<compile_context>
chip_gen: v7x
topology: tpu7x:2x2x1
jax: 0.10.0
libtpu: 0.0.40
codegen_flags: <defaults>
</compile_context>

<pallas_src>
import jax
import jax.numpy as jnp
from jax.experimental import pallas as pl
from jax.experimental.pallas import tpu as pltpu


# ----------------------------------------------------------------------------
# Fused kernel: conv1 -> pool1 -> conv2 -> pool2 -> linear -> fc  (one image)
# ----------------------------------------------------------------------------
def _dqn_kernel(xg_ref, w1_ref, b1_ref, w2_ref, b2_ref, w3_ref, b3_ref,
                w4_ref, b4_ref, out_ref,
                im1_ref, p1q_ref, im2_ref, act2_ref, fc_ref):
    # xg_ref : (1, 2, 50, 13, 128) bf16  input, parity/block-split (see _pack_input)
    # w1_ref : (1280, 128) bf16  conv1 block weights (1/255 folded in)
    # im1_ref: (48, 16, 1280) bf16 conv1 im2col slab scratch
    #   im1[oh, j4, ((u_hi*5+kh)*4+u_lo)*32 + wq*C + c]
    #     = x[c, 2*oh + kh, 8*(j4 + u_hi) + 2*u_lo + wq]
    # 10 lane-tile-aligned slab copies build the whole slab (2 per kernel row kh):
    for kh in range(5):
        qh, dh = kh % 2, kh // 2
        im1_ref[:, 0:12, kh * 128:(kh + 1) * 128] = \
            xg_ref[0, qh, dh:dh + 48, 0:12, :]
        im1_ref[:, 0:12, (5 + kh) * 128:(6 + kh) * 128] = \
            xg_ref[0, qh, dh:dh + 48, 1:13, :]
    # (Unwritten j4 in [12,16) rows only feed conv1 output columns >= 46, which
    #  are never consumed downstream; weight rows for the unused u=6,7 taps are 0.)

    # conv1 + bias + ReLU as ONE matmul: (768,1280) @ (1280,128), f32 accumulate.
    im1 = im1_ref[...].reshape(768, 1280)
    act1 = jnp.dot(im1, w1_ref[...], preferred_element_type=jnp.float32)
    act1 = jnp.maximum(act1 + b1_ref[...], 0.0)
    # act1[oh*16 + j4, n*32 + oc] = relu(conv1)[oh, 4*j4 + n, oc]   (lane-dense)

    # pool1 (2x2 stride 2), computed once:
    #   H pairs: split oh into (i, parity) on the leading dim (free reshape).
    #   W pairs: ow = 4*j4 + n -> pairs (n=0,1) and (n=2,3) are 32-lane slices.
    a4 = act1.reshape(24, 2, 16, 128)
    hpool = jnp.maximum(a4[:, 0], a4[:, 1]).reshape(12, 2, 16, 128)
    for e in range(2):
        he = hpool[:, e]                                           # (12, 16, 128)
        p1q_ref[e, :, :, 0:32] = jnp.maximum(
            he[:, :, 0:32], he[:, :, 32:64]).astype(jnp.bfloat16)
        p1q_ref[e, :, :, 32:64] = jnp.maximum(
            he[:, :, 64:96], he[:, :, 96:128]).astype(jnp.bfloat16)
    # p1q[e, i2, j4, jp*32 + c] = pool1[2*i2 + e, 2*j4 + jp, c]

    # conv2 im2col: 9 static-slice copies (pool1 is NOT recomputed per tap).
    for kh2 in range(3):
        for kw2 in range(3):
            tap = kh2 * 3 + kw2
            im2_ref[:, 0:11, tap * 32:(tap + 1) * 32] = p1q_ref[
                kh2 % 2,
                kh2 // 2:kh2 // 2 + 11,
                kw2 // 2:kw2 // 2 + 11,
                (kw2 % 2) * 32:(kw2 % 2) * 32 + 32]

    # conv2 + bias + ReLU as ONE matmul: (176,288) @ (288,64).
    act2 = jnp.dot(im2_ref[...].reshape(176, 288), w2_ref[...],
                   preferred_element_type=jnp.float32)
    act2 = jnp.maximum(act2 + b2_ref[...], 0.0)
    act2_ref[...] = act2.reshape(11, 16, 64)          # [oh2, ow2 (padded to 16), c]

    # pool2 (2x2 stride 2) + flatten into ONE (1, 1600) bf16 fc1 input row
    # (row order (p*5+q)*64 + c matches the pre-permuted fc1 weight rows).
    for p in range(5):
        hr = jnp.maximum(act2_ref[2 * p, :, :], act2_ref[2 * p + 1, :, :])  # (16,64)
        for q in range(5):
            v = jnp.maximum(hr[2 * q:2 * q + 1, :], hr[2 * q + 1:2 * q + 2, :])
            s = (p * 5 + q) * 64
            fc_ref[0:1, s:s + 64] = v.astype(jnp.bfloat16)

    # fc1 + ReLU + fc2: two matmuls (bf16 inputs, f32 accumulation).
    h = jnp.dot(fc_ref[...], w3_ref[...], preferred_element_type=jnp.float32)
    h = jnp.maximum(h + b3_ref[...], 0.0).astype(jnp.bfloat16)
    q_out = jnp.dot(h, w4_ref[...], preferred_element_type=jnp.float32) + b4_ref[...]
    out_ref[0] = q_out


# ----------------------------------------------------------------------------
# Glue: NCHW uint8 -> parity/block-split bf16 layout (one XLA transpose + pads)
# ----------------------------------------------------------------------------
def _pack_input(x_nchw):
    """xg[b, hq, hi, wi4, wu*32 + wq*C + c] = x[b, c, 2*hi + hq, 8*wi4 + 2*wu + wq]

    Shape (B, 2, 50, 13, 128) bf16; lanes [wu*32 + 2C, wu*32 + 32) and the
    hi/wi4 pad rows are zero.  Every conv1 im2col tap is then a contiguous,
    lane-tile-aligned static slice (no im2col ever materialized in HBM).
    """
    B, C, H, W = x_nchw.shape
    xb = x_nchw.astype(jnp.bfloat16)                      # uint8 -> bf16 is exact
    x7 = xb.reshape(B, C, 48, 2, 12, 4, 2)                # [b,c,hi,hq,wi4,wu,wq]
    x7 = jnp.transpose(x7, (0, 3, 2, 4, 5, 6, 1))         # [b,hq,hi,wi4,wu,wq,c]
    x7 = x7.reshape(B, 2, 48, 12, 4, 2 * C)
    x7 = jnp.pad(x7, ((0, 0),) * 5 + ((0, 32 - 2 * C),))  # pad (wq,c) slot to 32
    x7 = x7.reshape(B, 2, 48, 12, 128)
    x7 = jnp.pad(x7, ((0, 0), (0, 0), (0, 2), (0, 1), (0, 0)))   # hi->50, wi4->13
    return x7


# ----------------------------------------------------------------------------
# Forward pass (matches PyTorch DQN.forward semantics; bf16 MXU, f32 accumulate)
# ----------------------------------------------------------------------------
def dqn_forward(x_nchw, params):
    B, C, H, W = x_nchw.shape
    assert (H, W) == (96, 96), "CarRacing DQN expects 96x96 frames (1600-d flatten)"
    assert 2 * C <= 32

    xg = _pack_input(x_nchw)
    A = params["w4m"].shape[1]

    out = pl.pallas_call(
        _dqn_kernel,
        out_shape=jax.ShapeDtypeStruct((B, 1, A), jnp.float32),
        grid=(B,),
        in_specs=[
            pl.BlockSpec((1, 2, 50, 13, 128), lambda b: (b, 0, 0, 0, 0)),
            pl.BlockSpec((1280, 128), lambda b: (0, 0)),
            pl.BlockSpec((1, 128), lambda b: (0, 0)),
            pl.BlockSpec((288, 64), lambda b: (0, 0)),
            pl.BlockSpec((1, 64), lambda b: (0, 0)),
            pl.BlockSpec((1600, 256), lambda b: (0, 0)),
            pl.BlockSpec((1, 256), lambda b: (0, 0)),
            pl.BlockSpec((256, A), lambda b: (0, 0)),
            pl.BlockSpec((1, A), lambda b: (0, 0)),
        ],
        out_specs=pl.BlockSpec((1, 1, A), lambda b: (b, 0, 0)),
        scratch_shapes=[
            pltpu.VMEM((48, 16, 1280), jnp.bfloat16),   # conv1 im2col slab
            pltpu.VMEM((2, 12, 16, 64), jnp.bfloat16),  # pool1 (H-parity split)
            pltpu.VMEM((11, 16, 288), jnp.bfloat16),    # conv2 im2col
            pltpu.VMEM((11, 16, 64), jnp.float32),      # conv2 activation
            pltpu.VMEM((1, 1600), jnp.bfloat16),        # fc1 input row
        ],
        compiler_params=pltpu.CompilerParams(
            dimension_semantics=("parallel",),
            vmem_limit_bytes=32 * 1024 * 1024),
    )(xg, params["w1b"], params["b1"], params["w2m"], params["b2"],
      params["w3r"], params["b3"], params["w4m"], params["b4"])
    return out[:, 0, :]


# ----------------------------------------------------------------------------
# Parameters (deterministic, synthetic) pre-packed for the kernel
# ----------------------------------------------------------------------------
def init_params(key, n_frames, n_actions):
    ks = jax.random.split(key, 8)

    def rnd(k, shape, fan_in):
        bound = 1.0 / jnp.sqrt(fan_in)
        return jax.random.uniform(k, shape, jnp.float32, -bound, bound)

    C = n_frames
    w1 = rnd(ks[0], (32, C, 5, 5), C * 25)               # conv1 (OIHW)
    b1 = rnd(ks[1], (32,), C * 25)
    w2 = rnd(ks[2], (64, 32, 3, 3), 32 * 9)              # conv2 (OIHW)
    b2 = rnd(ks[3], (64,), 32 * 9)
    w3 = rnd(ks[4], (256, 1600), 1600)                   # linear
    b3 = rnd(ks[5], (256,), 1600)
    w4 = rnd(ks[6], (n_actions, 256), 256)               # fc
    b4 = rnd(ks[7], (n_actions,), 256)

    # conv1 block weights (1280, 128): row = ((u_hi*5+kh)*4+u_lo)*32 + wq*C + c,
    # col = n*32 + oc.  Each row group reads input column W = 8*j4 + 2u + wq and
    # each output column n corresponds to ow = 4*j4 + n, so kw = 2*(u-n) + wq.
    # Produces 4 adjacent output columns per matmul -> lane-dense conv1 output.
    # The 1/255 input scale is folded in here.
    w1s = jnp.transpose(w1, (2, 3, 1, 0)) / 255.0        # (5,5,C,32) [kh,kw,c,oc]
    blk = jnp.zeros((2, 5, 4, 32, 4, 32), jnp.float32)   # [u_hi,kh,u_lo,slot,n,oc]
    for u_hi in range(2):
        for u_lo in range(4):
            u = 4 * u_hi + u_lo
            if u > 5:
                continue
            for n in range(4):
                for wq in range(2):
                    kw = 2 * (u - n) + wq
                    if 0 <= kw <= 4:
                        blk = blk.at[u_hi, :, u_lo, wq * C:wq * C + C, n, :].set(
                            w1s[:, kw, :, :])
    w1b = blk.reshape(1280, 128).astype(jnp.bfloat16)

    # conv2: OIHW -> rows ordered (kh2*96 + kw2*32 + c_in), matching the im2col.
    w2m = jnp.transpose(w2, (2, 3, 1, 0)).reshape(288, 64).astype(jnp.bfloat16)

    # linear: rows reordered to ((p*5+q)*64 + c) so no runtime NHWC->NCHW
    # transpose is needed (PyTorch flatten index = c*25 + p*5 + q).
    w3r = jnp.transpose(w3.reshape(256, 64, 5, 5), (2, 3, 1, 0)).reshape(1600, 256)
    w3r = w3r.astype(jnp.bfloat16)

    return {
        "w1b": w1b, "b1": jnp.tile(b1, 4).reshape(1, 128),
        "w2m": w2m, "b2": b2.reshape(1, 64),
        "w3r": w3r, "b3": b3.reshape(1, 256),
        "w4m": w4.T.astype(jnp.bfloat16), "b4": b4.reshape(1, n_actions),
    }


# ----------------------------------------------------------------------------
if __name__ == "__main__":
    # Shapes implied by the module: linear expects 1600 = 64*5*5 -> 96x96 frames;
    # n_frames_to_stack = 10, n_actions = 5 (CarRacing-v2 discrete).
    B, FRAMES, H, W, N_ACTIONS = 2, 10, 96, 96, 5

    key = jax.random.PRNGKey(0)
    kx, kp = jax.random.split(key)
    x = jax.random.randint(kx, (B, FRAMES, H, W), 0, 256, dtype=jnp.int32)
    x = x.astype(jnp.uint8)

    params = init_params(kp, FRAMES, N_ACTIONS)

    fwd = jax.jit(dqn_forward)
    q_values = fwd(x, params)
    jax.block_until_ready(q_values)

    assert q_values.shape == (B, N_ACTIONS), q_values.shape
    assert q_values.dtype == jnp.float32
    assert bool(jnp.all(jnp.isfinite(q_values)))
    print("KERNEL_OK")
</pallas_src>

<mosaic_0001>
module attributes {stable_mosaic.version = 11 : i64} {
  func.func @_dqn_kernel(%arg0: i32, %arg1: memref<1x2x50x13x128xbf16, #tpu.memory_space<vmem>>, %arg2: memref<1280x128xbf16, #tpu.memory_space<vmem>>, %arg3: memref<1x128xf32, #tpu.memory_space<vmem>>, %arg4: memref<288x64xbf16, #tpu.memory_space<vmem>>, %arg5: memref<1x64xf32, #tpu.memory_space<vmem>>, %arg6: memref<1600x256xbf16, #tpu.memory_space<vmem>>, %arg7: memref<1x256xf32, #tpu.memory_space<vmem>>, %arg8: memref<256x5xbf16, #tpu.memory_space<vmem>>, %arg9: memref<1x5xf32, #tpu.memory_space<vmem>>, %arg10: memref<1x1x5xf32, #tpu.memory_space<vmem>>, %arg11: memref<48x16x1280xbf16, #tpu.memory_space<vmem>>, %arg12: memref<2x12x16x64xbf16, #tpu.memory_space<vmem>>, %arg13: memref<11x16x288xbf16, #tpu.memory_space<vmem>>, %arg14: memref<11x16x64xf32, #tpu.memory_space<vmem>>, %arg15: memref<1x1600xbf16, #tpu.memory_space<vmem>>) attributes {dimension_semantics = [#tpu.dimension_semantics<parallel>], iteration_bounds = array<i64: 2>, scalar_prefetch = 0 : i64, scratch_operands = 5 : i64, tpu.core_type = #tpu.core_type<tc>, window_params = [{transform_indices = @transform_0, window_bounds = array<i64: 1, 2, 50, 13, 128>}, {pipeline_mode = #tpu.pipeline_mode<synchronous>, transform_indices = @transform_1, window_bounds = array<i64: 1280, 128>}, {pipeline_mode = #tpu.pipeline_mode<synchronous>, transform_indices = @transform_2, window_bounds = array<i64: 1, 128>}, {pipeline_mode = #tpu.pipeline_mode<synchronous>, transform_indices = @transform_3, window_bounds = array<i64: 288, 64>}, {pipeline_mode = #tpu.pipeline_mode<synchronous>, transform_indices = @transform_4, window_bounds = array<i64: 1, 64>}, {pipeline_mode = #tpu.pipeline_mode<synchronous>, transform_indices = @transform_5, window_bounds = array<i64: 1600, 256>}, {pipeline_mode = #tpu.pipeline_mode<synchronous>, transform_indices = @transform_6, window_bounds = array<i64: 1, 256>}, {pipeline_mode = #tpu.pipeline_mode<synchronous>, transform_indices = @transform_7, window_bounds = array<i64: 256, 5>}, {pipeline_mode = #tpu.pipeline_mode<synchronous>, transform_indices = @transform_8, window_bounds = array<i64: 1, 5>}, {transform_indices = @transform_9, window_bounds = array<i64: 1, 1, 5>}]} {
    %c0 = arith.constant 0 : index
    %c0_0 = arith.constant 0 : index
    %c0_1 = arith.constant 0 : index
    %c0_2 = arith.constant 0 : index
    %c0_3 = arith.constant 0 : index
    %0 = vector.load %arg1[%c0, %c0_0, %c0_1, %c0_2, %c0_3] : memref<1x2x50x13x128xbf16, #tpu.memory_space<vmem>>, vector<1x1x48x12x128xbf16>
    %1 = vector.shape_cast %0 : vector<1x1x48x12x128xbf16> to vector<48x12x128xbf16>
    %c0_4 = arith.constant 0 : index
    %c0_5 = arith.constant 0 : index
    %c0_6 = arith.constant 0 : index
    %2 = vector.load %arg11[%c0_4, %c0_5, %c0_6] : memref<48x16x1280xbf16, #tpu.memory_space<vmem>>, vector<48x12x128xbf16>
    tpu.vector_store %arg11[%c0_4, %c0_5, %c0_6], %1 {strides = array<i32>} : memref<48x16x1280xbf16, #tpu.memory_space<vmem>>, vector<48x12x128xbf16>,
    %c0_7 = arith.constant 0 : index
    %c0_8 = arith.constant 0 : index
    %c0_9 = arith.constant 0 : index
    %c1 = arith.constant 1 : index
    %c0_10 = arith.constant 0 : index
    %3 = vector.load %arg1[%c0_7, %c0_8, %c0_9, %c1, %c0_10] : memref<1x2x50x13x128xbf16, #tpu.memory_space<vmem>>, vector<1x1x48x12x128xbf16>
    %4 = vector.shape_cast %3 : vector<1x1x48x12x128xbf16> to vector<48x12x128xbf16>
    %c0_11 = arith.constant 0 : index
    %c0_12 = arith.constant 0 : index
    %c640 = arith.constant 640 : index
    %5 = vector.load %arg11[%c0_11, %c0_12, %c640] : memref<48x16x1280xbf16, #tpu.memory_space<vmem>>, vector<48x12x128xbf16>
    tpu.vector_store %arg11[%c0_11, %c0_12, %c640], %4 {strides = array<i32>} : memref<48x16x1280xbf16, #tpu.memory_space<vmem>>, vector<48x12x128xbf16>,
    %c0_13 = arith.constant 0 : index
    %c1_14 = arith.constant 1 : index
    %c0_15 = arith.constant 0 : index
    %c0_16 = arith.constant 0 : index
    %c0_17 = arith.constant 0 : index
    %6 = vector.load %arg1[%c0_13, %c1_14, %c0_15, %c0_16, %c0_17] : memref<1x2x50x13x128xbf16, #tpu.memory_space<vmem>>, vector<1x1x48x12x128xbf16>
    %7 = vector.shape_cast %6 : vector<1x1x48x12x128xbf16> to vector<48x12x128xbf16>
    %c0_18 = arith.constant 0 : index
    %c0_19 = arith.constant 0 : index
    %c128 = arith.constant 128 : index
    %8 = vector.load %arg11[%c0_18, %c0_19, %c128] : memref<48x16x1280xbf16, #tpu.memory_space<vmem>>, vector<48x12x128xbf16>
    tpu.vector_store %arg11[%c0_18, %c0_19, %c128], %7 {strides = array<i32>} : memref<48x16x1280xbf16, #tpu.memory_space<vmem>>, vector<48x12x128xbf16>,
    %c0_20 = arith.constant 0 : index
    %c1_21 = arith.constant 1 : index
    %c0_22 = arith.constant 0 : index
    %c1_23 = arith.constant 1 : index
    %c0_24 = arith.constant 0 : index
    %9 = vector.load %arg1[%c0_20, %c1_21, %c0_22, %c1_23, %c0_24] : memref<1x2x50x13x128xbf16, #tpu.memory_space<vmem>>, vector<1x1x48x12x128xbf16>
    %10 = vector.shape_cast %9 : vector<1x1x48x12x128xbf16> to vector<48x12x128xbf16>
    %c0_25 = arith.constant 0 : index
    %c0_26 = arith.constant 0 : index
    %c768 = arith.constant 768 : index
    %11 = vector.load %arg11[%c0_25, %c0_26, %c768] : memref<48x16x1280xbf16, #tpu.memory_space<vmem>>, vector<48x12x128xbf16>
    tpu.vector_store %arg11[%c0_25, %c0_26, %c768], %10 {strides = array<i32>} : memref<48x16x1280xbf16, #tpu.memory_space<vmem>>, vector<48x12x128xbf16>,
    %c0_27 = arith.constant 0 : index
    %c0_28 = arith.constant 0 : index
    %c1_29 = arith.constant 1 : index
    %c0_30 = arith.constant 0 : index
    %c0_31 = arith.constant 0 : index
    %12 = vector.load %arg1[%c0_27, %c0_28, %c1_29, %c0_30, %c0_31] : memref<1x2x50x13x128xbf16, #tpu.memory_space<vmem>>, vector<1x1x48x12x128xbf16>
    %13 = vector.shape_cast %12 : vector<1x1x48x12x128xbf16> to vector<48x12x128xbf16>
    %c0_32 = arith.constant 0 : index
    %c0_33 = arith.constant 0 : index
    %c256 = arith.constant 256 : index
    %14 = vector.load %arg11[%c0_32, %c0_33, %c256] : memref<48x16x1280xbf16, #tpu.memory_space<vmem>>, vector<48x12x128xbf16>
    tpu.vector_store %arg11[%c0_32, %c0_33, %c256], %13 {strides = array<i32>} : memref<48x16x1280xbf16, #tpu.memory_space<vmem>>, vector<48x12x128xbf16>,
    %c0_34 = arith.constant 0 : index
    %c0_35 = arith.constant 0 : index
    %c1_36 = arith.constant 1 : index
    %c1_37 = arith.constant 1 : index
    %c0_38 = arith.constant 0 : index
    %15 = vector.load %arg1[%c0_34, %c0_35, %c1_36, %c1_37, %c0_38] : memref<1x2x50x13x128xbf16, #tpu.memory_space<vmem>>, vector<1x1x48x12x128xbf16>
    %16 = vector.shape_cast %15 : vector<1x1x48x12x128xbf16> to vector<48x12x128xbf16>
    %c0_39 = arith.constant 0 : index
    %c0_40 = arith.constant 0 : index
    %c896 = arith.constant 896 : index
    %17 = vector.load %arg11[%c0_39, %c0_40, %c896] : memref<48x16x1280xbf16, #tpu.memory_space<vmem>>, vector<48x12x128xbf16>
    tpu.vector_store %arg11[%c0_39, %c0_40, %c896], %16 {strides = array<i32>} : memref<48x16x1280xbf16, #tpu.memory_space<vmem>>, vector<48x12x128xbf16>,
    %c0_41 = arith.constant 0 : index
    %c1_42 = arith.constant 1 : index
    %c1_43 = arith.constant 1 : index
    %c0_44 = arith.constant 0 : index
    %c0_45 = arith.constant 0 : index
    %18 = vector.load %arg1[%c0_41, %c1_42, %c1_43, %c0_44, %c0_45] : memref<1x2x50x13x128xbf16, #tpu.memory_space<vmem>>, vector<1x1x48x12x128xbf16>
    %19 = vector.shape_cast %18 : vector<1x1x48x12x128xbf16> to vector<48x12x128xbf16>
    %c0_46 = arith.constant 0 : index
    %c0_47 = arith.constant 0 : index
    %c384 = arith.constant 384 : index
    %20 = vector.load %arg11[%c0_46, %c0_47, %c384] : memref<48x16x1280xbf16, #tpu.memory_space<vmem>>, vector<48x12x128xbf16>
    tpu.vector_store %arg11[%c0_46, %c0_47, %c384], %19 {strides = array<i32>} : memref<48x16x1280xbf16, #tpu.memory_space<vmem>>, vector<48x12x128xbf16>,
    %c0_48 = arith.constant 0 : index
    %c1_49 = arith.constant 1 : index
    %c1_50 = arith.constant 1 : index
    %c1_51 = arith.constant 1 : index
    %c0_52 = arith.constant 0 : index
    %21 = vector.load %arg1[%c0_48, %c1_49, %c1_50, %c1_51, %c0_52] : memref<1x2x50x13x128xbf16, #tpu.memory_space<vmem>>, vector<1x1x48x12x128xbf16>
    %22 = vector.shape_cast %21 : vector<1x1x48x12x128xbf16> to vector<48x12x128xbf16>
    %c0_53 = arith.constant 0 : index
    %c0_54 = arith.constant 0 : index
    %c1024 = arith.constant 1024 : index
    %23 = vector.load %arg11[%c0_53, %c0_54, %c1024] : memref<48x16x1280xbf16, #tpu.memory_space<vmem>>, vector<48x12x128xbf16>
    tpu.vector_store %arg11[%c0_53, %c0_54, %c1024], %22 {strides = array<i32>} : memref<48x16x1280xbf16, #tpu.memory_space<vmem>>, vector<48x12x128xbf16>,
    %c0_55 = arith.constant 0 : index
    %c0_56 = arith.constant 0 : index
    %c2 = arith.constant 2 : index
    %c0_57 = arith.constant 0 : index
    %c0_58 = arith.constant 0 : index
    %24 = vector.load %arg1[%c0_55, %c0_56, %c2, %c0_57, %c0_58] : memref<1x2x50x13x128xbf16, #tpu.memory_space<vmem>>, vector<1x1x48x12x128xbf16>
    %25 = vector.shape_cast %24 : vector<1x1x48x12x128xbf16> to vector<48x12x128xbf16>
    %c0_59 = arith.constant 0 : index
    %c0_60 = arith.constant 0 : index
    %c512 = arith.constant 512 : index
    %26 = vector.load %arg11[%c0_59, %c0_60, %c512] : memref<48x16x1280xbf16, #tpu.memory_space<vmem>>, vector<48x12x128xbf16>
    tpu.vector_store %arg11[%c0_59, %c0_60, %c512], %25 {strides = array<i32>} : memref<48x16x1280xbf16, #tpu.memory_space<vmem>>, vector<48x12x128xbf16>,
    %c0_61 = arith.constant 0 : index
    %c0_62 = arith.constant 0 : index
    %c2_63 = arith.constant 2 : index
    %c1_64 = arith.constant 1 : index
    %c0_65 = arith.constant 0 : index
    %27 = vector.load %arg1[%c0_61, %c0_62, %c2_63, %c1_64, %c0_65] : memref<1x2x50x13x128xbf16, #tpu.memory_space<vmem>>, vector<1x1x48x12x128xbf16>
    %28 = vector.shape_cast %27 : vector<1x1x48x12x128xbf16> to vector<48x12x128xbf16>
    %c0_66 = arith.constant 0 : index
    %c0_67 = arith.constant 0 : index
    %c1152 = arith.constant 1152 : index
    %29 = vector.load %arg11[%c0_66, %c0_67, %c1152] : memref<48x16x1280xbf16, #tpu.memory_space<vmem>>, vector<48x12x128xbf16>
    tpu.vector_store %arg11[%c0_66, %c0_67, %c1152], %28 {strides = array<i32>} : memref<48x16x1280xbf16, #tpu.memory_space<vmem>>, vector<48x12x128xbf16>,
    %c0_68 = arith.constant 0 : index
    %c0_69 = arith.constant 0 : index
    %c0_70 = arith.constant 0 : index
    %30 = vector.load %arg11[%c0_68, %c0_69, %c0_70] : memref<48x16x1280xbf16, #tpu.memory_space<vmem>>, vector<48x16x1280xbf16>
    %31 = vector.shape_cast %30 : vector<48x16x1280xbf16> to vector<768x1280xbf16>
    %c0_71 = arith.constant 0 : index
    %c0_72 = arith.constant 0 : index
    %32 = vector.load %arg2[%c0_71, %c0_72] : memref<1280x128xbf16, #tpu.memory_space<vmem>>, vector<1280x128xbf16>
    %cst = arith.constant dense<0.000000e+00> : vector<768x128xf32>
    %33 = tpu.matmul %31, %32, %cst {dimension_numbers = #tpu.dot_dimension_numbers<[1], [0], [0], [1], [0, 0, 1, 1], [], []>} : vector<768x1280xbf16>, vector<1280x128xbf16>, vector<768x128xf32> -> vector<768x128xf32>
    %c0_73 = arith.constant 0 : index
    %c0_74 = arith.constant 0 : index
    %34 = vector.load %arg3[%c0_73, %c0_74] : memref<1x128xf32, #tpu.memory_space<vmem>>, vector<1x128xf32>
    %35 = vector.broadcast %34 : vector<1x128xf32> to vector<768x128xf32>
    %36 = arith.addf %33, %35 : vector<768x128xf32>
    %cst_75 = arith.constant 0.000000e+00 : f32
    %37 = vector.broadcast %cst_75 : f32 to vector<768x128xf32>
    %38 = arith.maximumf %36, %37 : vector<768x128xf32>
    %39 = vector.shape_cast %38 : vector<768x128xf32> to vector<24x2x16x128xf32>
    %40 = vector.extract_strided_slice %39 {offsets = [0, 0, 0, 0], sizes = [24, 1, 16, 128], strides = [1, 1, 1, 1]} : vector<24x2x16x128xf32> to vector<24x1x16x128xf32>
    %41 = vector.shape_cast %40 : vector<24x1x16x128xf32> to vector<24x16x128xf32>
    %42 = vector.extract_strided_slice %39 {offsets = [0, 1, 0, 0], sizes = [24, 1, 16, 128], strides = [1, 1, 1, 1]} : vector<24x2x16x128xf32> to vector<24x1x16x128xf32>
    %43 = vector.shape_cast %42 : vector<24x1x16x128xf32> to vector<24x16x128xf32>
    %44 = arith.maximumf %41, %43 : vector<24x16x128xf32>
    %45 = vector.shape_cast %44 : vector<24x16x128xf32> to vector<12x2x16x128xf32>
    %46 = vector.extract_strided_slice %45 {offsets = [0, 0, 0, 0], sizes = [12, 1, 16, 128], strides = [1, 1, 1, 1]} : vector<12x2x16x128xf32> to vector<12x1x16x128xf32>
    %47 = vector.shape_cast %46 : vector<12x1x16x128xf32> to vector<12x16x128xf32>
    %48 = vector.extract_strided_slice %47 {offsets = [0, 0, 0], sizes = [12, 16, 32], strides = [1, 1, 1]} : vector<12x16x128xf32> to vector<12x16x32xf32>
    %49 = vector.extract_strided_slice %47 {offsets = [0, 0, 32], sizes = [12, 16, 32], strides = [1, 1, 1]} : vector<12x16x128xf32> to vector<12x16x32xf32>
    %50 = arith.maximumf %48, %49 : vector<12x16x32xf32>
    %51 = arith.truncf %50 : vector<12x16x32xf32> to vector<12x16x32xbf16>
    %c0_76 = arith.constant 0 : index
    %c0_77 = arith.constant 0 : index
    %c0_78 = arith.constant 0 : index
    %c0_79 = arith.constant 0 : index
    %52 = vector.load %arg12[%c0_76, %c0_77, %c0_78, %c0_79] : memref<2x12x16x64xbf16, #tpu.memory_space<vmem>>, vector<1x12x16x32xbf16>
    %53 = vector.shape_cast %52 : vector<1x12x16x32xbf16> to vector<12x16x32xbf16>
    %54 = vector.shape_cast %51 : vector<12x16x32xbf16> to vector<1x12x16x32xbf16>
    tpu.vector_store %arg12[%c0_76, %c0_77, %c0_78, %c0_79], %54 {strides = array<i32>} : memref<2x12x16x64xbf16, #tpu.memory_space<vmem>>, vector<1x12x16x32xbf16>,
    %55 = vector.extract_strided_slice %47 {offsets = [0, 0, 64], sizes = [12, 16, 32], strides = [1, 1, 1]} : vector<12x16x128xf32> to vector<12x16x32xf32>
    %56 = vector.extract_strided_slice %47 {offsets = [0, 0, 96], sizes = [12, 16, 32], strides = [1, 1, 1]} : vector<12x16x128xf32> to vector<12x16x32xf32>
    %57 = arith.maximumf %55, %56 : vector<12x16x32xf32>
    %58 = arith.truncf %57 : vector<12x16x32xf32> to vector<12x16x32xbf16>
    %c0_80 = arith.constant 0 : index
    %c0_81 = arith.constant 0 : index
    %c0_82 = arith.constant 0 : index
    %c32 = arith.constant 32 : index
    %59 = vector.load %arg12[%c0_80, %c0_81, %c0_82, %c32] : memref<2x12x16x64xbf16, #tpu.memory_space<vmem>>, vector<1x12x16x32xbf16>
    %60 = vector.shape_cast %59 : vector<1x12x16x32xbf16> to vector<12x16x32xbf16>
    %61 = vector.shape_cast %58 : vector<12x16x32xbf16> to vector<1x12x16x32xbf16>
    tpu.vector_store %arg12[%c0_80, %c0_81, %c0_82, %c32], %61 {strides = array<i32>} : memref<2x12x16x64xbf16, #tpu.memory_space<vmem>>, vector<1x12x16x32xbf16>,
    %62 = vector.extract_strided_slice %45 {offsets = [0, 1, 0, 0], sizes = [12, 1, 16, 128], strides = [1, 1, 1, 1]} : vector<12x2x16x128xf32> to vector<12x1x16x128xf32>
    %63 = vector.shape_cast %62 : vector<12x1x16x128xf32> to vector<12x16x128xf32>
    %64 = vector.extract_strided_slice %63 {offsets = [0, 0, 0], sizes = [12, 16, 32], strides = [1, 1, 1]} : vector<12x16x128xf32> to vector<12x16x32xf32>
    %65 = vector.extract_strided_slice %63 {offsets = [0, 0, 32], sizes = [12, 16, 32], strides = [1, 1, 1]} : vector<12x16x128xf32> to vector<12x16x32xf32>
    %66 = arith.maximumf %64, %65 : vector<12x16x32xf32>
    %67 = arith.truncf %66 : vector<12x16x32xf32> to vector<12x16x32xbf16>
    %c1_83 = arith.constant 1 : index
    %c0_84 = arith.constant 0 : index
    %c0_85 = arith.constant 0 : index
    %c0_86 = arith.constant 0 : index
    %68 = vector.load %arg12[%c1_83, %c0_84, %c0_85, %c0_86] : memref<2x12x16x64xbf16, #tpu.memory_space<vmem>>, vector<1x12x16x32xbf16>
    %69 = vector.shape_cast %68 : vector<1x12x16x32xbf16> to vector<12x16x32xbf16>
    %70 = vector.shape_cast %67 : vector<12x16x32xbf16> to vector<1x12x16x32xbf16>
    tpu.vector_store %arg12[%c1_83, %c0_84, %c0_85, %c0_86], %70 {strides = array<i32>} : memref<2x12x16x64xbf16, #tpu.memory_space<vmem>>, vector<1x12x16x32xbf16>,
    %71 = vector.extract_strided_slice %63 {offsets = [0, 0, 64], sizes = [12, 16, 32], strides = [1, 1, 1]} : vector<12x16x128xf32> to vector<12x16x32xf32>
    %72 = vector.extract_strided_slice %63 {offsets = [0, 0, 96], sizes = [12, 16, 32], strides = [1, 1, 1]} : vector<12x16x128xf32> to vector<12x16x32xf32>
    %73 = arith.maximumf %71, %72 : vector<12x16x32xf32>
    %74 = arith.truncf %73 : vector<12x16x32xf32> to vector<12x16x32xbf16>
    %c1_87 = arith.constant 1 : index
    %c0_88 = arith.constant 0 : index
    %c0_89 = arith.constant 0 : index
    %c32_90 = arith.constant 32 : index
    %75 = vector.load %arg12[%c1_87, %c0_88, %c0_89, %c32_90] : memref<2x12x16x64xbf16, #tpu.memory_space<vmem>>, vector<1x12x16x32xbf16>
    %76 = vector.shape_cast %75 : vector<1x12x16x32xbf16> to vector<12x16x32xbf16>
    %77 = vector.shape_cast %74 : vector<12x16x32xbf16> to vector<1x12x16x32xbf16>
    tpu.vector_store %arg12[%c1_87, %c0_88, %c0_89, %c32_90], %77 {strides = array<i32>} : memref<2x12x16x64xbf16, #tpu.memory_space<vmem>>, vector<1x12x16x32xbf16>,
    %c0_91 = arith.constant 0 : index
    %c0_92 = arith.constant 0 : index
    %c0_93 = arith.constant 0 : index
    %c0_94 = arith.constant 0 : index
    %78 = vector.load %arg12[%c0_91, %c0_92, %c0_93, %c0_94] : memref<2x12x16x64xbf16, #tpu.memory_space<vmem>>, vector<1x11x11x32xbf16>
    %79 = vector.shape_cast %78 : vector<1x11x11x32xbf16> to vector<11x11x32xbf16>
    %c0_95 = arith.constant 0 : index
    %c0_96 = arith.constant 0 : index
    %c0_97 = arith.constant 0 : index
    %80 = vector.load %arg13[%c0_95, %c0_96, %c0_97] : memref<11x16x288xbf16, #tpu.memory_space<vmem>>, vector<11x11x32xbf16>
    tpu.vector_store %arg13[%c0_95, %c0_96, %c0_97], %79 {strides = array<i32>} : memref<11x16x288xbf16, #tpu.memory_space<vmem>>, vector<11x11x32xbf16>,
    %c0_98 = arith.constant 0 : index
    %c0_99 = arith.constant 0 : index
    %c0_100 = arith.constant 0 : index
    %c32_101 = arith.constant 32 : index
    %81 = vector.load %arg12[%c0_98, %c0_99, %c0_100, %c32_101] : memref<2x12x16x64xbf16, #tpu.memory_space<vmem>>, vector<1x11x11x32xbf16>
    %82 = vector.shape_cast %81 : vector<1x11x11x32xbf16> to vector<11x11x32xbf16>
    %c0_102 = arith.constant 0 : index
    %c0_103 = arith.constant 0 : index
    %c32_104 = arith.constant 32 : index
    %83 = vector.load %arg13[%c0_102, %c0_103, %c32_104] : memref<11x16x288xbf16, #tpu.memory_space<vmem>>, vector<11x11x32xbf16>
    tpu.vector_store %arg13[%c0_102, %c0_103, %c32_104], %82 {strides = array<i32>} : memref<11x16x288xbf16, #tpu.memory_space<vmem>>, vector<11x11x32xbf16>,
    %c0_105 = arith.constant 0 : index
    %c0_106 = arith.constant 0 : index
    %c1_107 = arith.constant 1 : index
    %c0_108 = arith.constant 0 : index
    %84 = vector.load %arg12[%c0_105, %c0_106, %c1_107, %c0_108] : memref<2x12x16x64xbf16, #tpu.memory_space<vmem>>, vector<1x11x11x32xbf16>
    %85 = vector.shape_cast %84 : vector<1x11x11x32xbf16> to vector<11x11x32xbf16>
    %c0_109 = arith.constant 0 : index
    %c0_110 = arith.constant 0 : index
    %c64 = arith.constant 64 : index
    %86 = vector.load %arg13[%c0_109, %c0_110, %c64] : memref<11x16x288xbf16, #tpu.memory_space<vmem>>, vector<11x11x32xbf16>
    tpu.vector_store %arg13[%c0_109, %c0_110, %c64], %85 {strides = array<i32>} : memref<11x16x288xbf16, #tpu.memory_space<vmem>>, vector<11x11x32xbf16>,
    %c1_111 = arith.constant 1 : index
    %c0_112 = arith.constant 0 : index
    %c0_113 = arith.constant 0 : index
    %c0_114 = arith.constant 0 : index
    %87 = vector.load %arg12[%c1_111, %c0_112, %c0_113, %c0_114] : memref<2x12x16x64xbf16, #tpu.memory_space<vmem>>, vector<1x11x11x32xbf16>
    %88 = vector.shape_cast %87 : vector<1x11x11x32xbf16> to vector<11x11x32xbf16>
    %c0_115 = arith.constant 0 : index
    %c0_116 = arith.constant 0 : index
    %c96 = arith.constant 96 : index
    %89 = vector.load %arg13[%c0_115, %c0_116, %c96] : memref<11x16x288xbf16, #tpu.memory_space<vmem>>, vector<11x11x32xbf16>
    tpu.vector_store %arg13[%c0_115, %c0_116, %c96], %88 {strides = array<i32>} : memref<11x16x288xbf16, #tpu.memory_space<vmem>>, vector<11x11x32xbf16>,
    %c1_117 = arith.constant 1 : index
    %c0_118 = arith.constant 0 : index
    %c0_119 = arith.constant 0 : index
    %c32_120 = arith.constant 32 : index
    %90 = vector.load %arg12[%c1_117, %c0_118, %c0_119, %c32_120] : memref<2x12x16x64xbf16, #tpu.memory_space<vmem>>, vector<1x11x11x32xbf16>
    %91 = vector.shape_cast %90 : vector<1x11x11x32xbf16> to vector<11x11x32xbf16>
    %c0_121 = arith.constant 0 : index
    %c0_122 = arith.constant 0 : index
    %c128_123 = arith.constant 128 : index
    %92 = vector.load %arg13[%c0_121, %c0_122, %c128_123] : memref<11x16x288xbf16, #tpu.memory_space<vmem>>, vector<11x11x32xbf16>
    tpu.vector_store %arg13[%c0_121, %c0_122, %c128_123], %91 {strides = array<i32>} : memref<11x16x288xbf16, #tpu.memory_space<vmem>>, vector<11x11x32xbf16>,
    %c1_124 = arith.constant 1 : index
    %c0_125 = arith.constant 0 : index
    %c1_126 = arith.constant 1 : index
    %c0_127 = arith.constant 0 : index
    %93 = vector.load %arg12[%c1_124, %c0_125, %c1_126, %c0_127] : memref<2x12x16x64xbf16, #tpu.memory_space<vmem>>, vector<1x11x11x32xbf16>
    %94 = vector.shape_cast %93 : vector<1x11x11x32xbf16> to vector<11x11x32xbf16>
    %c0_128 = arith.constant 0 : index
    %c0_129 = arith.constant 0 : index
    %c160 = arith.constant 160 : index
    %95 = vector.load %arg13[%c0_128, %c0_129, %c160] : memref<11x16x288xbf16, #tpu.memory_space<vmem>>, vector<11x11x32xbf16>
    tpu.vector_store %arg13[%c0_128, %c0_129, %c160], %94 {strides = array<i32>} : memref<11x16x288xbf16, #tpu.memory_space<vmem>>, vector<11x11x32xbf16>,
    %c0_130 = arith.constant 0 : index
    %c1_131 = arith.constant 1 : index
    %c0_132 = arith.constant 0 : index
    %c0_133 = arith.constant 0 : index
    %96 = vector.load %arg12[%c0_130, %c1_131, %c0_132, %c0_133] : memref<2x12x16x64xbf16, #tpu.memory_space<vmem>>, vector<1x11x11x32xbf16>
    %97 = vector.shape_cast %96 : vector<1x11x11x32xbf16> to vector<11x11x32xbf16>
    %c0_134 = arith.constant 0 : index
    %c0_135 = arith.constant 0 : index
    %c192 = arith.constant 192 : index
    %98 = vector.load %arg13[%c0_134, %c0_135, %c192] : memref<11x16x288xbf16, #tpu.memory_space<vmem>>, vector<11x11x32xbf16>
    tpu.vector_store %arg13[%c0_134, %c0_135, %c192], %97 {strides = array<i32>} : memref<11x16x288xbf16, #tpu.memory_space<vmem>>, vector<11x11x32xbf16>,
    %c0_136 = arith.constant 0 : index
    %c1_137 = arith.constant 1 : index
    %c0_138 = arith.constant 0 : index
    %c32_139 = arith.constant 32 : index
    %99 = vector.load %arg12[%c0_136, %c1_137, %c0_138, %c32_139] : memref<2x12x16x64xbf16, #tpu.memory_space<vmem>>, vector<1x11x11x32xbf16>
    %100 = vector.shape_cast %99 : vector<1x11x11x32xbf16> to vector<11x11x32xbf16>
    %c0_140 = arith.constant 0 : index
    %c0_141 = arith.constant 0 : index
    %c224 = arith.constant 224 : index
    %101 = vector.load %arg13[%c0_140, %c0_141, %c224] : memref<11x16x288xbf16, #tpu.memory_space<vmem>>, vector<11x11x32xbf16>
    tpu.vector_store %arg13[%c0_140, %c0_141, %c224], %100 {strides = array<i32>} : memref<11x16x288xbf16, #tpu.memory_space<vmem>>, vector<11x11x32xbf16>,
    %c0_142 = arith.constant 0 : index
    %c1_143 = arith.constant 1 : index
    %c1_144 = arith.constant 1 : index
    %c0_145 = arith.constant 0 : index
    %102 = vector.load %arg12[%c0_142, %c1_143, %c1_144, %c0_145] : memref<2x12x16x64xbf16, #tpu.memory_space<vmem>>, vector<1x11x11x32xbf16>
    %103 = vector.shape_cast %102 : vector<1x11x11x32xbf16> to vector<11x11x32xbf16>
    %c0_146 = arith.constant 0 : index
    %c0_147 = arith.constant 0 : index
    %c256_148 = arith.constant 256 : index
    %104 = vector.load %arg13[%c0_146, %c0_147, %c256_148] : memref<11x16x288xbf16, #tpu.memory_space<vmem>>, vector<11x11x32xbf16>
    tpu.vector_store %arg13[%c0_146, %c0_147, %c256_148], %103 {strides = array<i32>} : memref<11x16x288xbf16, #tpu.memory_space<vmem>>, vector<11x11x32xbf16>,
    %c0_149 = arith.constant 0 : index
    %c0_150 = arith.constant 0 : index
    %c0_151 = arith.constant 0 : index
    %105 = vector.load %arg13[%c0_149, %c0_150, %c0_151] : memref<11x16x288xbf16, #tpu.memory_space<vmem>>, vector<11x16x288xbf16>
    %106 = vector.shape_cast %105 : vector<11x16x288xbf16> to vector<176x288xbf16>
    %c0_152 = arith.constant 0 : index
    %c0_153 = arith.constant 0 : index
    %107 = vector.load %arg4[%c0_152, %c0_153] : memref<288x64xbf16, #tpu.memory_space<vmem>>, vector<288x64xbf16>
    %cst_154 = arith.constant dense<0.000000e+00> : vector<176x64xf32>
    %108 = tpu.matmul %106, %107, %cst_154 {dimension_numbers = #tpu.dot_dimension_numbers<[1], [0], [0], [1], [0, 0, 1, 1], [], []>} : vector<176x288xbf16>, vector<288x64xbf16>, vector<176x64xf32> -> vector<176x64xf32>
    %c0_155 = arith.constant 0 : index
    %c0_156 = arith.constant 0 : index
    %109 = vector.load %arg5[%c0_155, %c0_156] : memref<1x64xf32, #tpu.memory_space<vmem>>, vector<1x64xf32>
    %110 = vector.broadcast %109 : vector<1x64xf32> to vector<176x64xf32>
    %111 = arith.addf %108, %110 : vector<176x64xf32>
    %cst_157 = arith.constant 0.000000e+00 : f32
    %112 = vector.broadcast %cst_157 : f32 to vector<176x64xf32>
    %113 = arith.maximumf %111, %112 : vector<176x64xf32>
    %114 = vector.shape_cast %113 : vector<176x64xf32> to vector<11x16x64xf32>
    %c0_158 = arith.constant 0 : index
    %c0_159 = arith.constant 0 : index
    %c0_160 = arith.constant 0 : index
    %115 = vector.load %arg14[%c0_158, %c0_159, %c0_160] : memref<11x16x64xf32, #tpu.memory_space<vmem>>, vector<11x16x64xf32>
    tpu.vector_store %arg14[%c0_158, %c0_159, %c0_160], %114 {strides = array<i32>} : memref<11x16x64xf32, #tpu.memory_space<vmem>>, vector<11x16x64xf32>,
    %c0_161 = arith.constant 0 : index
    %c0_162 = arith.constant 0 : index
    %c0_163 = arith.constant 0 : index
    %116 = vector.load %arg14[%c0_161, %c0_162, %c0_163] : memref<11x16x64xf32, #tpu.memory_space<vmem>>, vector<1x16x64xf32>
    %117 = vector.shape_cast %116 : vector<1x16x64xf32> to vector<16x64xf32>
    %c1_164 = arith.constant 1 : index
    %c0_165 = arith.constant 0 : index
    %c0_166 = arith.constant 0 : index
    %118 = vector.load %arg14[%c1_164, %c0_165, %c0_166] : memref<11x16x64xf32, #tpu.memory_space<vmem>>, vector<1x16x64xf32>
    %119 = vector.shape_cast %118 : vector<1x16x64xf32> to vector<16x64xf32>
    %120 = arith.maximumf %117, %119 : vector<16x64xf32>
    %121 = vector.extract_strided_slice %120 {offsets = [0, 0], sizes = [1, 64], strides = [1, 1]} : vector<16x64xf32> to vector<1x64xf32>
    %122 = vector.extract_strided_slice %120 {offsets = [1, 0], sizes = [1, 64], strides = [1, 1]} : vector<16x64xf32> to vector<1x64xf32>
    %123 = arith.maximumf %121, %122 : vector<1x64xf32>
    %124 = arith.truncf %123 : vector<1x64xf32> to vector<1x64xbf16>
    %c0_167 = arith.constant 0 : index
    %c0_168 = arith.constant 0 : index
    %125 = vector.load %arg15[%c0_167, %c0_168] : memref<1x1600xbf16, #tpu.memory_space<vmem>>, vector<1x64xbf16>
    tpu.vector_store %arg15[%c0_167, %c0_168], %124 {strides = array<i32>} : memref<1x1600xbf16, #tpu.memory_space<vmem>>, vector<1x64xbf16>,
    %126 = vector.extract_strided_slice %120 {offsets = [2, 0], sizes = [1, 64], strides = [1, 1]} : vector<16x64xf32> to vector<1x64xf32>
    %127 = vector.extract_strided_slice %120 {offsets = [3, 0], sizes = [1, 64], strides = [1, 1]} : vector<16x64xf32> to vector<1x64xf32>
    %128 = arith.maximumf %126, %127 : vector<1x64xf32>
    %129 = arith.truncf %128 : vector<1x64xf32> to vector<1x64xbf16>
    %c0_169 = arith.constant 0 : index
    %c64_170 = arith.constant 64 : index
    %130 = vector.load %arg15[%c0_169, %c64_170] : memref<1x1600xbf16, #tpu.memory_space<vmem>>, vector<1x64xbf16>
    tpu.vector_store %arg15[%c0_169, %c64_170], %129 {strides = array<i32>} : memref<1x1600xbf16, #tpu.memory_space<vmem>>, vector<1x64xbf16>,
    %131 = vector.extract_strided_slice %120 {offsets = [4, 0], sizes = [1, 64], strides = [1, 1]} : vector<16x64xf32> to vector<1x64xf32>
    %132 = vector.extract_strided_slice %120 {offsets = [5, 0], sizes = [1, 64], strides = [1, 1]} : vector<16x64xf32> to vector<1x64xf32>
    %133 = arith.maximumf %131, %132 : vector<1x64xf32>
    %134 = arith.truncf %133 : vector<1x64xf32> to vector<1x64xbf16>
    %c0_171 = arith.constant 0 : index
    %c128_172 = arith.constant 128 : index
    %135 = vector.load %arg15[%c0_171, %c128_172] : memref<1x1600xbf16, #tpu.memory_space<vmem>>, vector<1x64xbf16>
    tpu.vector_store %arg15[%c0_171, %c128_172], %134 {strides = array<i32>} : memref<1x1600xbf16, #tpu.memory_space<vmem>>, vector<1x64xbf16>,
    %136 = vector.extract_strided_slice %120 {offsets = [6, 0], sizes = [1, 64], strides = [1, 1]} : vector<16x64xf32> to vector<1x64xf32>
    %137 = vector.extract_strided_slice %120 {offsets = [7, 0], sizes = [1, 64], strides = [1, 1]} : vector<16x64xf32> to vector<1x64xf32>
    %138 = arith.maximumf %136, %137 : vector<1x64xf32>
    %139 = arith.truncf %138 : vector<1x64xf32> to vector<1x64xbf16>
    %c0_173 = arith.constant 0 : index
    %c192_174 = arith.constant 192 : index
    %140 = vector.load %arg15[%c0_173, %c192_174] : memref<1x1600xbf16, #tpu.memory_space<vmem>>, vector<1x64xbf16>
    tpu.vector_store %arg15[%c0_173, %c192_174], %139 {strides = array<i32>} : memref<1x1600xbf16, #tpu.memory_space<vmem>>, vector<1x64xbf16>,
    %141 = vector.extract_strided_slice %120 {offsets = [8, 0], sizes = [1, 64], strides = [1, 1]} : vector<16x64xf32> to vector<1x64xf32>
    %142 = vector.extract_strided_slice %120 {offsets = [9, 0], sizes = [1, 64], strides = [1, 1]} : vector<16x64xf32> to vector<1x64xf32>
    %143 = arith.maximumf %141, %142 : vector<1x64xf32>
    %144 = arith.truncf %143 : vector<1x64xf32> to vector<1x64xbf16>
    %c0_175 = arith.constant 0 : index
    %c256_176 = arith.constant 256 : index
    %145 = vector.load %arg15[%c0_175, %c256_176] : memref<1x1600xbf16, #tpu.memory_space<vmem>>, vector<1x64xbf16>
    tpu.vector_store %arg15[%c0_175, %c256_176], %144 {strides = array<i32>} : memref<1x1600xbf16, #tpu.memory_space<vmem>>, vector<1x64xbf16>,
    %c2_177 = arith.constant 2 : index
    %c0_178 = arith.constant 0 : index
    %c0_179 = arith.constant 0 : index
    %146 = vector.load %arg14[%c2_177, %c0_178, %c0_179] : memref<11x16x64xf32, #tpu.memory_space<vmem>>, vector<1x16x64xf32>
    %147 = vector.shape_cast %146 : vector<1x16x64xf32> to vector<16x64xf32>
    %c3 = arith.constant 3 : index
    %c0_180 = arith.constant 0 : index
    %c0_181 = arith.constant 0 : index
    %148 = vector.load %arg14[%c3, %c0_180, %c0_181] : memref<11x16x64xf32, #tpu.memory_space<vmem>>, vector<1x16x64xf32>
    %149 = vector.shape_cast %148 : vector<1x16x64xf32> to vector<16x64xf32>
    %150 = arith.maximumf %147, %149 : vector<16x64xf32>
    %151 = vector.extract_strided_slice %150 {offsets = [0, 0], sizes = [1, 64], strides = [1, 1]} : vector<16x64xf32> to vector<1x64xf32>
    %152 = vector.extract_strided_slice %150 {offsets = [1, 0], sizes = [1, 64], strides = [1, 1]} : vector<16x64xf32> to vector<1x64xf32>
    %153 = arith.maximumf %151, %152 : vector<1x64xf32>
    %154 = arith.truncf %153 : vector<1x64xf32> to vector<1x64xbf16>
    %c0_182 = arith.constant 0 : index
    %c320 = arith.constant 320 : index
    %155 = vector.load %arg15[%c0_182, %c320] : memref<1x1600xbf16, #tpu.memory_space<vmem>>, vector<1x64xbf16>
    tpu.vector_store %arg15[%c0_182, %c320], %154 {strides = array<i32>} : memref<1x1600xbf16, #tpu.memory_space<vmem>>, vector<1x64xbf16>,
    %156 = vector.extract_strided_slice %150 {offsets = [2, 0], sizes = [1, 64], strides = [1, 1]} : vector<16x64xf32> to vector<1x64xf32>
    %157 = vector.extract_strided_slice %150 {offsets = [3, 0], sizes = [1, 64], strides = [1, 1]} : vector<16x64xf32> to vector<1x64xf32>
    %158 = arith.maximumf %156, %157 : vector<1x64xf32>
    %159 = arith.truncf %158 : vector<1x64xf32> to vector<1x64xbf16>
    %c0_183 = arith.constant 0 : index
    %c384_184 = arith.constant 384 : index
    %160 = vector.load %arg15[%c0_183, %c384_184] : memref<1x1600xbf16, #tpu.memory_space<vmem>>, vector<1x64xbf16>
    tpu.vector_store %arg15[%c0_183, %c384_184], %159 {strides = array<i32>} : memref<1x1600xbf16, #tpu.memory_space<vmem>>, vector<1x64xbf16>,
    %161 = vector.extract_strided_slice %150 {offsets = [4, 0], sizes = [1, 64], strides = [1, 1]} : vector<16x64xf32> to vector<1x64xf32>
    %162 = vector.extract_strided_slice %150 {offsets = [5, 0], sizes = [1, 64], strides = [1, 1]} : vector<16x64xf32> to vector<1x64xf32>
    %163 = arith.maximumf %161, %162 : vector<1x64xf32>
    %164 = arith.truncf %163 : vector<1x64xf32> to vector<1x64xbf16>
    %c0_185 = arith.constant 0 : index
    %c448 = arith.constant 448 : index
    %165 = vector.load %arg15[%c0_185, %c448] : memref<1x1600xbf16, #tpu.memory_space<vmem>>, vector<1x64xbf16>
    tpu.vector_store %arg15[%c0_185, %c448], %164 {strides = array<i32>} : memref<1x1600xbf16, #tpu.memory_space<vmem>>, vector<1x64xbf16>,
    %166 = vector.extract_strided_slice %150 {offsets = [6, 0], sizes = [1, 64], strides = [1, 1]} : vector<16x64xf32> to vector<1x64xf32>
    %167 = vector.extract_strided_slice %150 {offsets = [7, 0], sizes = [1, 64], strides = [1, 1]} : vector<16x64xf32> to vector<1x64xf32>
    %168 = arith.maximumf %166, %167 : vector<1x64xf32>
    %169 = arith.truncf %168 : vector<1x64xf32> to vector<1x64xbf16>
    %c0_186 = arith.constant 0 : index
    %c512_187 = arith.constant 512 : index
    %170 = vector.load %arg15[%c0_186, %c512_187] : memref<1x1600xbf16, #tpu.memory_space<vmem>>, vector<1x64xbf16>
    tpu.vector_store %arg15[%c0_186, %c512_187], %169 {strides = array<i32>} : memref<1x1600xbf16, #tpu.memory_space<vmem>>, vector<1x64xbf16>,
    %171 = vector.extract_strided_slice %150 {offsets = [8, 0], sizes = [1, 64], strides = [1, 1]} : vector<16x64xf32> to vector<1x64xf32>
    %172 = vector.extract_strided_slice %150 {offsets = [9, 0], sizes = [1, 64], strides = [1, 1]} : vector<16x64xf32> to vector<1x64xf32>
    %173 = arith.maximumf %171, %172 : vector<1x64xf32>
    %174 = arith.truncf %173 : vector<1x64xf32> to vector<1x64xbf16>
    %c0_188 = arith.constant 0 : index
    %c576 = arith.constant 576 : index
    %175 = vector.load %arg15[%c0_188, %c576] : memref<1x1600xbf16, #tpu.memory_space<vmem>>, vector<1x64xbf16>
    tpu.vector_store %arg15[%c0_188, %c576], %174 {strides = array<i32>} : memref<1x1600xbf16, #tpu.memory_space<vmem>>, vector<1x64xbf16>,
    %c4 = arith.constant 4 : index
    %c0_189 = arith.constant 0 : index
    %c0_190 = arith.constant 0 : index
    %176 = vector.load %arg14[%c4, %c0_189, %c0_190] : memref<11x16x64xf32, #tpu.memory_space<vmem>>, vector<1x16x64xf32>
    %177 = vector.shape_cast %176 : vector<1x16x64xf32> to vector<16x64xf32>
    %c5 = arith.constant 5 : index
    %c0_191 = arith.constant 0 : index
    %c0_192 = arith.constant 0 : index
    %178 = vector.load %arg14[%c5, %c0_191, %c0_192] : memref<11x16x64xf32, #tpu.memory_space<vmem>>, vector<1x16x64xf32>
    %179 = vector.shape_cast %178 : vector<1x16x64xf32> to vector<16x64xf32>
    %180 = arith.maximumf %177, %179 : vector<16x64xf32>
    %181 = vector.extract_strided_slice %180 {offsets = [0, 0], sizes = [1, 64], strides = [1, 1]} : vector<16x64xf32> to vector<1x64xf32>
    %182 = vector.extract_strided_slice %180 {offsets = [1, 0], sizes = [1, 64], strides = [1, 1]} : vector<16x64xf32> to vector<1x64xf32>
    %183 = arith.maximumf %181, %182 : vector<1x64xf32>
    %184 = arith.truncf %183 : vector<1x64xf32> to vector<1x64xbf16>
    %c0_193 = arith.constant 0 : index
    %c640_194 = arith.constant 640 : index
    %185 = vector.load %arg15[%c0_193, %c640_194] : memref<1x1600xbf16, #tpu.memory_space<vmem>>, vector<1x64xbf16>
    tpu.vector_store %arg15[%c0_193, %c640_194], %184 {strides = array<i32>} : memref<1x1600xbf16, #tpu.memory_space<vmem>>, vector<1x64xbf16>,
    %186 = vector.extract_strided_slice %180 {offsets = [2, 0], sizes = [1, 64], strides = [1, 1]} : vector<16x64xf32> to vector<1x64xf32>
    %187 = vector.extract_strided_slice %180 {offsets = [3, 0], sizes = [1, 64], strides = [1, 1]} : vector<16x64xf32> to vector<1x64xf32>
    %188 = arith.maximumf %186, %187 : vector<1x64xf32>
    %189 = arith.truncf %188 : vector<1x64xf32> to vector<1x64xbf16>
    %c0_195 = arith.constant 0 : index
    %c704 = arith.constant 704 : index
    %190 = vector.load %arg15[%c0_195, %c704] : memref<1x1600xbf16, #tpu.memory_space<vmem>>, vector<1x64xbf16>
    tpu.vector_store %arg15[%c0_195, %c704], %189 {strides = array<i32>} : memref<1x1600xbf16, #tpu.memory_space<vmem>>, vector<1x64xbf16>,
    %191 = vector.extract_strided_slice %180 {offsets = [4, 0], sizes = [1, 64], strides = [1, 1]} : vector<16x64xf32> to vector<1x64xf32>
    %192 = vector.extract_strided_slice %180 {offsets = [5, 0], sizes = [1, 64], strides = [1, 1]} : vector<16x64xf32> to vector<1x64xf32>
    %193 = arith.maximumf %191, %192 : vector<1x64xf32>
    %194 = arith.truncf %193 : vector<1x64xf32> to vector<1x64xbf16>
    %c0_196 = arith.constant 0 : index
    %c768_197 = arith.constant 768 : index
    %195 = vector.load %arg15[%c0_196, %c768_197] : memref<1x1600xbf16, #tpu.memory_space<vmem>>, vector<1x64xbf16>
    tpu.vector_store %arg15[%c0_196, %c768_197], %194 {strides = array<i32>} : memref<1x1600xbf16, #tpu.memory_space<vmem>>, vector<1x64xbf16>,
    %196 = vector.extract_strided_slice %180 {offsets = [6, 0], sizes = [1, 64], strides = [1, 1]} : vector<16x64xf32> to vector<1x64xf32>
    %197 = vector.extract_strided_slice %180 {offsets = [7, 0], sizes = [1, 64], strides = [1, 1]} : vector<16x64xf32> to vector<1x64xf32>
    %198 = arith.maximumf %196, %197 : vector<1x64xf32>
    %199 = arith.truncf %198 : vector<1x64xf32> to vector<1x64xbf16>
    %c0_198 = arith.constant 0 : index
    %c832 = arith.constant 832 : index
    %200 = vector.load %arg15[%c0_198, %c832] : memref<1x1600xbf16, #tpu.memory_space<vmem>>, vector<1x64xbf16>
    tpu.vector_store %arg15[%c0_198, %c832], %199 {strides = array<i32>} : memref<1x1600xbf16, #tpu.memory_space<vmem>>, vector<1x64xbf16>,
    %201 = vector.extract_strided_slice %180 {offsets = [8, 0], sizes = [1, 64], strides = [1, 1]} : vector<16x64xf32> to vector<1x64xf32>
    %202 = vector.extract_strided_slice %180 {offsets = [9, 0], sizes = [1, 64], strides = [1, 1]} : vector<16x64xf32> to vector<1x64xf32>
    %203 = arith.maximumf %201, %202 : vector<1x64xf32>
    %204 = arith.truncf %203 : vector<1x64xf32> to vector<1x64xbf16>
    %c0_199 = arith.constant 0 : index
    %c896_200 = arith.constant 896 : index
    %205 = vector.load %arg15[%c0_199, %c896_200] : memref<1x1600xbf16, #tpu.memory_space<vmem>>, vector<1x64xbf16>
    tpu.vector_store %arg15[%c0_199, %c896_200], %204 {strides = array<i32>} : memref<1x1600xbf16, #tpu.memory_space<vmem>>, vector<1x64xbf16>,
    %c6 = arith.constant 6 : index
    %c0_201 = arith.constant 0 : index
    %c0_202 = arith.constant 0 : index
    %206 = vector.load %arg14[%c6, %c0_201, %c0_202] : memref<11x16x64xf32, #tpu.memory_space<vmem>>, vector<1x16x64xf32>
    %207 = vector.shape_cast %206 : vector<1x16x64xf32> to vector<16x64xf32>
    %c7 = arith.constant 7 : index
    %c0_203 = arith.constant 0 : index
    %c0_204 = arith.constant 0 : index
    %208 = vector.load %arg14[%c7, %c0_203, %c0_204] : memref<11x16x64xf32, #tpu.memory_space<vmem>>, vector<1x16x64xf32>
    %209 = vector.shape_cast %208 : vector<1x16x64xf32> to vector<16x64xf32>
    %210 = arith.maximumf %207, %209 : vector<16x64xf32>
    %211 = vector.extract_strided_slice %210 {offsets = [0, 0], sizes = [1, 64], strides = [1, 1]} : vector<16x64xf32> to vector<1x64xf32>
    %212 = vector.extract_strided_slice %210 {offsets = [1, 0], sizes = [1, 64], strides = [1, 1]} : vector<16x64xf32> to vector<1x64xf32>
    %213 = arith.maximumf %211, %212 : vector<1x64xf32>
    %214 = arith.truncf %213 : vector<1x64xf32> to vector<1x64xbf16>
    %c0_205 = arith.constant 0 : index
    %c960 = arith.constant 960 : index
    %215 = vector.load %arg15[%c0_205, %c960] : memref<1x1600xbf16, #tpu.memory_space<vmem>>, vector<1x64xbf16>
    tpu.vector_store %arg15[%c0_205, %c960], %214 {strides = array<i32>} : memref<1x1600xbf16, #tpu.memory_space<vmem>>, vector<1x64xbf16>,
    %216 = vector.extract_strided_slice %210 {offsets = [2, 0], sizes = [1, 64], strides = [1, 1]} : vector<16x64xf32> to vector<1x64xf32>
    %217 = vector.extract_strided_slice %210 {offsets = [3, 0], sizes = [1, 64], strides = [1, 1]} : vector<16x64xf32> to vector<1x64xf32>
    %218 = arith.maximumf %216, %217 : vector<1x64xf32>
    %219 = arith.truncf %218 : vector<1x64xf32> to vector<1x64xbf16>
    %c0_206 = arith.constant 0 : index
    %c1024_207 = arith.constant 1024 : index
    %220 = vector.load %arg15[%c0_206, %c1024_207] : memref<1x1600xbf16, #tpu.memory_space<vmem>>, vector<1x64xbf16>
    tpu.vector_store %arg15[%c0_206, %c1024_207], %219 {strides = array<i32>} : memref<1x1600xbf16, #tpu.memory_space<vmem>>, vector<1x64xbf16>,
    %221 = vector.extract_strided_slice %210 {offsets = [4, 0], sizes = [1, 64], strides = [1, 1]} : vector<16x64xf32> to vector<1x64xf32>
    %222 = vector.extract_strided_slice %210 {offsets = [5, 0], sizes = [1, 64], strides = [1, 1]} : vector<16x64xf32> to vector<1x64xf32>
    %223 = arith.maximumf %221, %222 : vector<1x64xf32>
    %224 = arith.truncf %223 : vector<1x64xf32> to vector<1x64xbf16>
    %c0_208 = arith.constant 0 : index
    %c1088 = arith.constant 1088 : index
    %225 = vector.load %arg15[%c0_208, %c1088] : memref<1x1600xbf16, #tpu.memory_space<vmem>>, vector<1x64xbf16>
    tpu.vector_store %arg15[%c0_208, %c1088], %224 {strides = array<i32>} : memref<1x1600xbf16, #tpu.memory_space<vmem>>, vector<1x64xbf16>,
    %226 = vector.extract_strided_slice %210 {offsets = [6, 0], sizes = [1, 64], strides = [1, 1]} : vector<16x64xf32> to vector<1x64xf32>
    %227 = vector.extract_strided_slice %210 {offsets = [7, 0], sizes = [1, 64], strides = [1, 1]} : vector<16x64xf32> to vector<1x64xf32>
    %228 = arith.maximumf %226, %227 : vector<1x64xf32>
    %229 = arith.truncf %228 : vector<1x64xf32> to vector<1x64xbf16>
    %c0_209 = arith.constant 0 : index
    %c1152_210 = arith.constant 1152 : index
    %230 = vector.load %arg15[%c0_209, %c1152_210] : memref<1x1600xbf16, #tpu.memory_space<vmem>>, vector<1x64xbf16>
    tpu.vector_store %arg15[%c0_209, %c1152_210], %229 {strides = array<i32>} : memref<1x1600xbf16, #tpu.memory_space<vmem>>, vector<1x64xbf16>,
    %231 = vector.extract_strided_slice %210 {offsets = [8, 0], sizes = [1, 64], strides = [1, 1]} : vector<16x64xf32> to vector<1x64xf32>
    %232 = vector.extract_strided_slice %210 {offsets = [9, 0], sizes = [1, 64], strides = [1, 1]} : vector<16x64xf32> to vector<1x64xf32>
    %233 = arith.maximumf %231, %232 : vector<1x64xf32>
    %234 = arith.truncf %233 : vector<1x64xf32> to vector<1x64xbf16>
    %c0_211 = arith.constant 0 : index
    %c1216 = arith.constant 1216 : index
    %235 = vector.load %arg15[%c0_211, %c1216] : memref<1x1600xbf16, #tpu.memory_space<vmem>>, vector<1x64xbf16>
    tpu.vector_store %arg15[%c0_211, %c1216], %234 {strides = array<i32>} : memref<1x1600xbf16, #tpu.memory_space<vmem>>, vector<1x64xbf16>,
    %c8 = arith.constant 8 : index
    %c0_212 = arith.constant 0 : index
    %c0_213 = arith.constant 0 : index
    %236 = vector.load %arg14[%c8, %c0_212, %c0_213] : memref<11x16x64xf32, #tpu.memory_space<vmem>>, vector<1x16x64xf32>
    %237 = vector.shape_cast %236 : vector<1x16x64xf32> to vector<16x64xf32>
    %c9 = arith.constant 9 : index
    %c0_214 = arith.constant 0 : index
    %c0_215 = arith.constant 0 : index
    %238 = vector.load %arg14[%c9, %c0_214, %c0_215] : memref<11x16x64xf32, #tpu.memory_space<vmem>>, vector<1x16x64xf32>
    %239 = vector.shape_cast %238 : vector<1x16x64xf32> to vector<16x64xf32>
    %240 = arith.maximumf %237, %239 : vector<16x64xf32>
    %241 = vector.extract_strided_slice %240 {offsets = [0, 0], sizes = [1, 64], strides = [1, 1]} : vector<16x64xf32> to vector<1x64xf32>
    %242 = vector.extract_strided_slice %240 {offsets = [1, 0], sizes = [1, 64], strides = [1, 1]} : vector<16x64xf32> to vector<1x64xf32>
    %243 = arith.maximumf %241, %242 : vector<1x64xf32>
    %244 = arith.truncf %243 : vector<1x64xf32> to vector<1x64xbf16>
    %c0_216 = arith.constant 0 : index
    %c1280 = arith.constant 1280 : index
    %245 = vector.load %arg15[%c0_216, %c1280] : memref<1x1600xbf16, #tpu.memory_space<vmem>>, vector<1x64xbf16>
    tpu.vector_store %arg15[%c0_216, %c1280], %244 {strides = array<i32>} : memref<1x1600xbf16, #tpu.memory_space<vmem>>, vector<1x64xbf16>,
    %246 = vector.extract_strided_slice %240 {offsets = [2, 0], sizes = [1, 64], strides = [1, 1]} : vector<16x64xf32> to vector<1x64xf32>
    %247 = vector.extract_strided_slice %240 {offsets = [3, 0], sizes = [1, 64], strides = [1, 1]} : vector<16x64xf32> to vector<1x64xf32>
    %248 = arith.maximumf %246, %247 : vector<1x64xf32>
    %249 = arith.truncf %248 : vector<1x64xf32> to vector<1x64xbf16>
    %c0_217 = arith.constant 0 : index
    %c1344 = arith.constant 1344 : index
    %250 = vector.load %arg15[%c0_217, %c1344] : memref<1x1600xbf16, #tpu.memory_space<vmem>>, vector<1x64xbf16>
    tpu.vector_store %arg15[%c0_217, %c1344], %249 {strides = array<i32>} : memref<1x1600xbf16, #tpu.memory_space<vmem>>, vector<1x64xbf16>,
    %251 = vector.extract_strided_slice %240 {offsets = [4, 0], sizes = [1, 64], strides = [1, 1]} : vector<16x64xf32> to vector<1x64xf32>
    %252 = vector.extract_strided_slice %240 {offsets = [5, 0], sizes = [1, 64], strides = [1, 1]} : vector<16x64xf32> to vector<1x64xf32>
    %253 = arith.maximumf %251, %252 : vector<1x64xf32>
    %254 = arith.truncf %253 : vector<1x64xf32> to vector<1x64xbf16>
    %c0_218 = arith.constant 0 : index
    %c1408 = arith.constant 1408 : index
    %255 = vector.load %arg15[%c0_218, %c1408] : memref<1x1600xbf16, #tpu.memory_space<vmem>>, vector<1x64xbf16>
    tpu.vector_store %arg15[%c0_218, %c1408], %254 {strides = array<i32>} : memref<1x1600xbf16, #tpu.memory_space<vmem>>, vector<1x64xbf16>,
    %256 = vector.extract_strided_slice %240 {offsets = [6, 0], sizes = [1, 64], strides = [1, 1]} : vector<16x64xf32> to vector<1x64xf32>
    %257 = vector.extract_strided_slice %240 {offsets = [7, 0], sizes = [1, 64], strides = [1, 1]} : vector<16x64xf32> to vector<1x64xf32>
    %258 = arith.maximumf %256, %257 : vector<1x64xf32>
    %259 = arith.truncf %258 : vector<1x64xf32> to vector<1x64xbf16>
    %c0_219 = arith.constant 0 : index
    %c1472 = arith.constant 1472 : index
    %260 = vector.load %arg15[%c0_219, %c1472] : memref<1x1600xbf16, #tpu.memory_space<vmem>>, vector<1x64xbf16>
    tpu.vector_store %arg15[%c0_219, %c1472], %259 {strides = array<i32>} : memref<1x1600xbf16, #tpu.memory_space<vmem>>, vector<1x64xbf16>,
    %261 = vector.extract_strided_slice %240 {offsets = [8, 0], sizes = [1, 64], strides = [1, 1]} : vector<16x64xf32> to vector<1x64xf32>
    %262 = vector.extract_strided_slice %240 {offsets = [9, 0], sizes = [1, 64], strides = [1, 1]} : vector<16x64xf32> to vector<1x64xf32>
    %263 = arith.maximumf %261, %262 : vector<1x64xf32>
    %264 = arith.truncf %263 : vector<1x64xf32> to vector<1x64xbf16>
    %c0_220 = arith.constant 0 : index
    %c1536 = arith.constant 1536 : index
    %265 = vector.load %arg15[%c0_220, %c1536] : memref<1x1600xbf16, #tpu.memory_space<vmem>>, vector<1x64xbf16>
    tpu.vector_store %arg15[%c0_220, %c1536], %264 {strides = array<i32>} : memref<1x1600xbf16, #tpu.memory_space<vmem>>, vector<1x64xbf16>,
    %c0_221 = arith.constant 0 : index
    %c0_222 = arith.constant 0 : index
    %266 = vector.load %arg15[%c0_221, %c0_222] : memref<1x1600xbf16, #tpu.memory_space<vmem>>, vector<1x1600xbf16>
    %c0_223 = arith.constant 0 : index
    %c0_224 = arith.constant 0 : index
    %267 = vector.load %arg6[%c0_223, %c0_224] : memref<1600x256xbf16, #tpu.memory_space<vmem>>, vector<1600x256xbf16>
    %cst_225 = arith.constant dense<0.000000e+00> : vector<1x256xf32>
    %268 = tpu.matmul %266, %267, %cst_225 {dimension_numbers = #tpu.dot_dimension_numbers<[1], [0], [0], [1], [0, 0, 1, 1], [], []>} : vector<1x1600xbf16>, vector<1600x256xbf16>, vector<1x256xf32> -> vector<1x256xf32>
    %c0_226 = arith.constant 0 : index
    %c0_227 = arith.constant 0 : index
    %269 = vector.load %arg7[%c0_226, %c0_227] : memref<1x256xf32, #tpu.memory_space<vmem>>, vector<1x256xf32>
    %270 = arith.addf %268, %269 : vector<1x256xf32>
    %cst_228 = arith.constant 0.000000e+00 : f32
    %271 = vector.broadcast %cst_228 : f32 to vector<1x256xf32>
    %272 = arith.maximumf %270, %271 : vector<1x256xf32>
    %273 = arith.truncf %272 : vector<1x256xf32> to vector<1x256xbf16>
    %c0_229 = arith.constant 0 : index
    %c0_230 = arith.constant 0 : index
    %274 = vector.load %arg8[%c0_229, %c0_230] : memref<256x5xbf16, #tpu.memory_space<vmem>>, vector<256x5xbf16>
    %cst_231 = arith.constant dense<0.000000e+00> : vector<1x5xf32>
    %275 = tpu.matmul %273, %274, %cst_231 {dimension_numbers = #tpu.dot_dimension_numbers<[1], [0], [0], [1], [0, 0, 1, 1], [], []>} : vector<1x256xbf16>, vector<256x5xbf16>, vector<1x5xf32> -> vector<1x5xf32>
    %c0_232 = arith.constant 0 : index
    %c0_233 = arith.constant 0 : index
    %276 = vector.load %arg9[%c0_232, %c0_233] : memref<1x5xf32, #tpu.memory_space<vmem>>, vector<1x5xf32>
    %277 = arith.addf %275, %276 : vector<1x5xf32>
    %c0_234 = arith.constant 0 : index
    %c0_235 = arith.constant 0 : index
    %c0_236 = arith.constant 0 : index
    %278 = vector.load %arg10[%c0_234, %c0_235, %c0_236] : memref<1x1x5xf32, #tpu.memory_space<vmem>>, vector<1x1x5xf32>
    %279 = vector.shape_cast %278 : vector<1x1x5xf32> to vector<1x5xf32>
    %280 = vector.shape_cast %277 : vector<1x5xf32> to vector<1x1x5xf32>
    tpu.vector_store %arg10[%c0_234, %c0_235, %c0_236], %280 {strides = array<i32>} : memref<1x1x5xf32, #tpu.memory_space<vmem>>, vector<1x1x5xf32>,
    return
  }
  func.func @transform_0(%arg0: i32) -> (i32, i32, i32, i32, i32) {
    %c0_i32 = arith.constant 0 : i32
    %c0_i32_0 = arith.constant 0 : i32
    %c0_i32_1 = arith.constant 0 : i32
    %c0_i32_2 = arith.constant 0 : i32
    %c0_i32_3 = arith.constant 0 : i32
    return %arg0, %c0_i32, %c0_i32_0, %c0_i32_1, %c0_i32_2 : i32, i32, i32, i32, i32
  }
  func.func @transform_1(%arg0: i32) -> (i32, i32) {
    %c0_i32 = arith.constant 0 : i32
    %c0_i32_0 = arith.constant 0 : i32
    %c0_i32_1 = arith.constant 0 : i32
    return %c0_i32, %c0_i32_0 : i32, i32
  }
  func.func @transform_2(%arg0: i32) -> (i32, i32) {
    %c0_i32 = arith.constant 0 : i32
    %c0_i32_0 = arith.constant 0 : i32
    %c0_i32_1 = arith.constant 0 : i32
    return %c0_i32, %c0_i32_0 : i32, i32
  }
  func.func @transform_3(%arg0: i32) -> (i32, i32) {
    %c0_i32 = arith.constant 0 : i32
    %c0_i32_0 = arith.constant 0 : i32
    %c0_i32_1 = arith.constant 0 : i32
    return %c0_i32, %c0_i32_0 : i32, i32
  }
  func.func @transform_4(%arg0: i32) -> (i32, i32) {
    %c0_i32 = arith.constant 0 : i32
    %c0_i32_0 = arith.constant 0 : i32
    %c0_i32_1 = arith.constant 0 : i32
    return %c0_i32, %c0_i32_0 : i32, i32
  }
  func.func @transform_5(%arg0: i32) -> (i32, i32) {
    %c0_i32 = arith.constant 0 : i32
    %c0_i32_0 = arith.constant 0 : i32
    %c0_i32_1 = arith.constant 0 : i32
    return %c0_i32, %c0_i32_0 : i32, i32
  }
  func.func @transform_6(%arg0: i32) -> (i32, i32) {
    %c0_i32 = arith.constant 0 : i32
    %c0_i32_0 = arith.constant 0 : i32
    %c0_i32_1 = arith.constant 0 : i32
    return %c0_i32, %c0_i32_0 : i32, i32
  }
  func.func @transform_7(%arg0: i32) -> (i32, i32) {
    %c0_i32 = arith.constant 0 : i32
    %c0_i32_0 = arith.constant 0 : i32
    %c0_i32_1 = arith.constant 0 : i32
    return %c0_i32, %c0_i32_0 : i32, i32
  }
  func.func @transform_8(%arg0: i32) -> (i32, i32) {
    %c0_i32 = arith.constant 0 : i32
    %c0_i32_0 = arith.constant 0 : i32
    %c0_i32_1 = arith.constant 0 : i32
    return %c0_i32, %c0_i32_0 : i32, i32
  }
  func.func @transform_9(%arg0: i32) -> (i32, i32, i32) {
    %c0_i32 = arith.constant 0 : i32
    %c0_i32_0 = arith.constant 0 : i32
    %c0_i32_1 = arith.constant 0 : i32
    return %arg0, %c0_i32, %c0_i32_0 : i32, i32, i32
  }
}

</mosaic_0001>

<bundles_post_ra>
// kernel: dqn_forward.1
= control target key start
LH: loop header
LB: loop body
LE: loop exit
PB: predicated region body
PF: predicated region fallthrough
CT: control target
= control target key end

     0   :  { %14 = vsyncpa [#allocation8], 0  ;;  %s20431_s0 = inlined_call_operand.vmem [shape: bf16[2,2,50,13,128], index: 0, kind: input, shape index: {}]   ;;  %s20432_s1 = inlined_call_operand.vmem [shape: bf16[1280,128], index: 1, kind: input, shape index: {}]   ;;  %s20433_s2 = inlined_call_operand.vmem [shape: f32[1,128], index: 2, kind: input, shape index: {}]   ;;  %s20434_s3 = inlined_call_operand.vmem [shape: bf16[288,64], index: 3, kind: input, shape index: {}]   ;;  %s20435_s4 = inlined_call_operand.vmem [shape: f32[1,64], index: 4, kind: input, shape index: {}]   ;;  %s20436_s5 = inlined_call_operand.vmem [shape: bf16[1600,256], index: 5, kind: input, shape index: {}]   ;;  %s20437_s6 = inlined_call_operand.vmem [shape: f32[1,256], index: 6, kind: input, shape index: {}]   ;;  %s20438_s7 = inlined_call_operand.vmem [shape: bf16[256,5], index: 7, kind: input, shape index: {}]   ;;  %s20439_s8 = inlined_call_operand.vmem [shape: f32[1,5], index: 8, kind: input, shape index: {}]   ;;  %s20440_s9 = inlined_call_operand.hbm [shape: f32[2,1,5], index: 9, kind: output, shape index: {}]  }
   0x1   :  { %16 = vsyncpa [#allocation8 + $0x1], 0  ;;  %s17488_s30 = smov 0   ;;  %s17490_s10 = smov 0  }
   0x2   :  { %s17492_s11 = smov 0   ;;  %s17494_s12 = smov 0  }
   0x3 LB: > { %s17509_s13 = sadd.s32 4294967295, %s17428_s12   ;;  %s13712_s14 = sadd.s32 4294967294, %s17428_s12   ;;  %s17428_s12 = sphi %s17494_s12, %s20568_s12   ;;  %s17424_s11 = sphi %s17492_s11, %s20567_s11   ;;  %s17420_s10 = sphi %s17490_s10, %s20566_s10   ;;  %s17416_s30 = sphi %s17488_s30, %s20565_s30  }
   0x4   : > { %s17513_s15 = sadd.s32 1, %s17428_s12   ;;  %s223_s16 = sadd.s32 1, %s17424_s11 }
   0x5   : > { %s220_s17 = ssub.s32 %s17428_s12, %s17513_s15  ;;  %p233_p0 = scmp.ne.s32.totalorder %s17424_s11, %s17420_s10 }
   0x6   : > { %p221_p1 = scmp.eq.s32.totalorder %s220_s17, 0  ;;  %p234_p2 = scmp.eq.s32.totalorder %s17509_s13, 1 }
   0x7   : > { %p239_p3 = scmp.ne.s32.totalorder %s17420_s10, %s17416_s30  ;;  %p240_p4 = scmp.eq.s32.totalorder %s13712_s14, 1 }
   0x8   : > { %s17524_s18 = scalar_select %p221_p1, %s17424_s11, %s223_s16  }
   0x9   : > { %p17526_p5 = por %p234_p2, %p233_p0  ;;  %p17530_p6 = por %p240_p4, %p239_p3 }
   0xa   : > { %p13715_p7 = scmp.ge.s32.totalorder %s17428_s12, 1  ;;  %p290_p8 = scmp.lt.s32.totalorder %s17428_s12, 3 }
   0xc   : > { %p291_p9 = pnand %p13715_p7, %p290_p8 }
   0xe   : > { %294 = sbr.rel (%p291_p9) target bundleno = 3124 (0xc34), region = 56 }
  0x15   : > { %v16454_v0 = vld [vmem:[%s20432_s1 + $0x80] sm:$0xff]   ;;  %v20441_v1 = vmov 0   ;;  %p325_p10 = scmp.lt.s32.totalorder %s17509_s13, 1  ;;  %v16455_v2 = vld [vmem:[%s20432_s1 + $0x88] sm:$0xff]   ;;  %v16456_v3 = vld [vmem:[%s20432_s1 + $0x90] sm:$0xff]   ;;  %s17431_s17 = smov 96  }
  0x16   : > { %7879 = vmatprep.subr.bf16.mxu0 %v20441_v1  ;;  %7462 = vmatprep.subr.bf16.mxu1 %v20441_v1  ;;  %v16457_v4 = vld [vmem:[%s20432_s1 + $0x98] sm:$0xff]   ;;  %v16458_v5 = vld [vmem:[%s20432_s1 + $0xa0] sm:$0xff]   ;;  %v16459_v8 = vld [vmem:[%s20432_s1 + $0xa8] sm:$0xff]   ;;  %vm9823_vm0 = vcmask 261120   ;;  %vm9884_vm1 = vcmask 523520   ;;  %vm10113_vm2 = vcmask 259072  }
  0x17   : > { %7880 = vmatpush1.bf16.msra.mxu0 %v16454_v0  ;;  %s326_s25 = scalar_select %p325_p10, %s17509_s13, 1  ;;  %v16460_v11 = vld [vmem:[%s20432_s1 + $0xb0] sm:$0xff]   ;;  %v16461_v15 = vld [vmem:[%s20432_s1 + $0xb8] sm:$0xff]   ;;  %v16462_v18 = vld [vmem:[%s20432_s1 + $0xc0] sm:$0xff]   ;;  %vm10114_vm3 = vsmask.f32 5376 }
  0x18   : > { %7881 = vmatprep.subr.bf16.mxu0 %v20441_v1  ;;  %v16463_v21 = vld [vmem:[%s20432_s1 + $0xc8] sm:$0xff]   ;;  %v16464_v24 = vld [vmem:[%s20432_s1 + $0xd0] sm:$0xff]   ;;  %v16465_v27 = vld [vmem:[%s20432_s1 + $0xd8] sm:$0xff]   ;;  %vm10160_vm5 = vcmask 521472   ;;  %s17432_s24 = smov 32   ;;  %s17433_s22 = smov 64  }
  0x19   : > { %s16287_s28 = smul.u32 800, %s326_s25  ;;  %v16466_v30 = vld [vmem:[%s20432_s1 + $0xe0] sm:$0xff]   ;;  %v16467_v32 = vld [vmem:[%s20432_s1 + $0xe8] sm:$0xff]   ;;  %v16468_v36 = vld [vmem:[%s20432_s1 + $0xf0] sm:$0xff]   ;;  %vm10316_vm7 = vcmask 783872   ;;  %vm10406_vm9 = vcmask 1046272  }
  0x1a   : > { %v16469_v37 = vld [vmem:[%s20432_s1 + $0xf8] sm:$0xff]   ;;  %v16472_v41 = vld [vmem:[%s20432_s1 + $0x100] sm:$0xff]   ;;  %v16474_v50 = vld [vmem:[%s20432_s1 + $0x108] sm:$0xff]   ;;  %vm17435_vm11 = vmmov 0   ;;  %vm11473_vm12 = vcmask 523264   ;;  %vm11508_vm13 = vcmask 516096  }
  0x1b   : > { %7882 = vmatpush1.bf16.msra.mxu0 %v16455_v2  ;;  %s17558_s21 = scalar_lea.vmem %s20431_s0, %s16287_s28  ;;  %v16476_v56 = vld [vmem:[%s20432_s1 + $0x110] sm:$0xff]   ;;  %vm18893_vm4 = vmand %vm10113_vm2, %vm10114_vm3  ;;  %vm11509_vm14 = vsmask.f32 256  ;;  %s323_s27 = sand.u32 1, %s17420_s10   ;;  %vm13642_vm2 = vcmask 32768  }
  0x1c   : > { %7883 = vmatprep.subr.bf16.mxu0 %v20441_v1  ;;  %v16470_v6 = vld [vmem:[%s17558_s21 + $0x198] sm:$0x3f]   ;;  %v16471_v7 = vld [vmem:[%s17558_s21 + $0x8] sm:$0x3f]   ;;  %v16473_v9 = vld [vmem:[%s17558_s21 + $0x1a0] sm:$0x3f]  }
  0x1d   : > { %4318 = vst [vmem:[#allocation2 + $0x18] sm:$0x3f] %v16470_v6  ;;  %3117 = vst [vmem:[#allocation2 + $0x10] sm:$0x3f] %v16471_v7  ;;  %v16475_v10 = vld [vmem:[%s17558_s21 + $0x10] sm:$0x3f]  }
  0x1e   : > { %4319 = vst [vmem:[#allocation2 + $0x68] sm:$0x3f] %v16473_v9  ;;  %3118 = vst [vmem:[#allocation2 + $0x60] sm:$0x3f] %v16475_v10  ;;  %v16477_v12 = vld [vmem:[%s17558_s21 + $0x1a8] sm:$0x3f]  }
  0x1f   : > { %7884 = vmatpush1.bf16.msra.mxu0 %v16456_v3  ;;  %v16478_v13 = vld [vmem:[%s17558_s21 + $0x18] sm:$0x3f]   ;;  %4320 = vst [vmem:[#allocation2 + $0xb8] sm:$0x3f] %v16477_v12  ;;  %v16480_v16 = vld [vmem:[%s17558_s21 + $0x1b0] sm:$0x3f]   ;;  %vm18910_vm6 = vmand %vm10160_vm5, %vm10114_vm3 }
  0x20   : > { %7885 = vmatprep.subr.bf16.mxu0 %v20441_v1  ;;  %3119 = vst [vmem:[#allocation2 + $0xb0] sm:$0x3f] %v16478_v13  ;;  %4321 = vst [vmem:[#allocation2 + $0x108] sm:$0x3f] %v16480_v16  ;;  %v16482_v17 = vld [vmem:[%s17558_s21 + $0x20] sm:$0x3f]  }
  0x21   : > { %3120 = vst [vmem:[#allocation2 + $0x100] sm:$0x3f] %v16482_v17  ;;  %v16484_v19 = vld [vmem:[%s17558_s21 + $0x1b8] sm:$0x3f]   ;;  %v16485_v20 = vld [vmem:[%s17558_s21 + $0x28] sm:$0x3f]   ;;  %vm19212_vm8 = vmand %vm10316_vm7, %vm10114_vm3 }
  0x22   : > { %4322 = vst [vmem:[#allocation2 + $0x158] sm:$0x3f] %v16484_v19  ;;  %3121 = vst [vmem:[#allocation2 + $0x150] sm:$0x3f] %v16485_v20  ;;  %v16487_v22 = vld [vmem:[%s17558_s21 + $0x1c0] sm:$0x3f]  }
  0x23   : > { %7886 = vmatpush1.bf16.msra.mxu0 %v16457_v4  ;;  %4323 = vst [vmem:[#allocation2 + $0x1a8] sm:$0x3f] %v16487_v22  ;;  %v16488_v23 = vld [vmem:[%s17558_s21 + $0x30] sm:$0x3f]   ;;  %v16491_v25 = vld [vmem:[%s17558_s21 + $0x1c8] sm:$0x3f]   ;;  %vm19239_vm10 = vmand %vm10406_vm9, %vm10114_vm3 }
  0x24   : > { %7887 = vmatprep.subr.bf16.mxu0 %v20441_v1  ;;  %v6338_v14 = vld [vmem:[#allocation2 + $0x18] sm:$0xff]  ;;  %3122 = vst [vmem:[#allocation2 + $0x1a0] sm:$0x3f] %v16488_v23  ;;  %4324 = vst [vmem:[#allocation2 + $0x1f8] sm:$0x3f] %v16491_v25  ;;  %v6337_v42 = vld [vmem:[#allocation2 + $0x10] sm:$0xff] }
  0x25   : > { %7911 = vmatprep.mubr.bf16.mxu0 %v6338_v14  ;;  %v16492_v26 = vld [vmem:[%s17558_s21 + $0x38] sm:$0x3f]   ;;  %v16494_v28 = vld [vmem:[%s17558_s21 + $0x1d0] sm:$0x3f]   ;;  %v16495_v29 = vld [vmem:[%s17558_s21 + $0x40] sm:$0x3f]  }
  0x26   : > { %3123 = vst [vmem:[#allocation2 + $0x1f0] sm:$0x3f] %v16492_v26  ;;  %4325 = vst [vmem:[#allocation2 + $0x248] sm:$0x3f] %v16494_v28  ;;  %v16498_v31 = vld [vmem:[%s17558_s21 + $0x1d8] sm:$0x3f]  }
  0x27   : > { %7888 = vmatpush1.bf16.msra.mxu0 %v16458_v5  ;;  %3124 = vst [vmem:[#allocation2 + $0x240] sm:$0x3f] %v16495_v29  ;;  %4326 = vst [vmem:[#allocation2 + $0x298] sm:$0x3f] %v16498_v31  ;;  %v16499_v33 = vld [vmem:[%s17558_s21 + $0x48] sm:$0x3f]  }
  0x28   : > { %7889 = vmatprep.subr.bf16.mxu0 %v20441_v1  ;;  %3125 = vst [vmem:[#allocation2 + $0x290] sm:$0x3f] %v16499_v33  ;;  %v16501_v34 = vld [vmem:[%s17558_s21 + $0x1e0] sm:$0x3f]   ;;  %v16502_v35 = vld [vmem:[%s17558_s21 + $0x50] sm:$0x3f]   ;;  %vm19572_vm15 = vmand %vm11508_vm13, %vm11509_vm14 }
  0x29   : > { %4327 = vst [vmem:[#allocation2 + $0x2e8] sm:$0x3f] %v16501_v34  ;;  %3126 = vst [vmem:[#allocation2 + $0x2e0] sm:$0x3f] %v16502_v35  ;;  %v16505_v38 = vld [vmem:[%s17558_s21 + $0x1e8] sm:$0x3f]  }
  0x2a   : > { %v16506_v39 = vld [vmem:[%s17558_s21 + $0x58] sm:$0x3f]   ;;  %4328 = vst [vmem:[#allocation2 + $0x338] sm:$0x3f] %v16505_v38  ;;  %v16508_v40 = vld [vmem:[%s17558_s21] sm:$0x7f]  }
  0x2b   : > { %7890 = vmatpush1.bf16.msra.mxu0 %v16459_v8  ;;  %3127 = vst [vmem:[#allocation2 + $0x330] sm:$0x3f] %v16506_v39  ;;  %v6348_v43 = vld [vmem:[#allocation2 + $0x68] sm:$0xff]  ;;  %v1100_v44 = vshrl.u32 %v16508_v40, 16  ;;  %v1102_v45 = vshll.u32 %v16508_v40, 16  ;;  %v6347_v55 = vld [vmem:[#allocation2 + $0x60] sm:$0xff] }
  0x2c   : > { %7891 = vmatprep.subr.bf16.mxu0 %v20441_v1  ;;  %v16509_v46 = vld [vmem:[%s17558_s21 + $0x10] sm:$0x3f]   ;;  %v16511_v48 = vld [vmem:[%s17558_s21 + $0x8] sm:$0x7f]   ;;  %v16512_v49 = vld [vmem:[%s17558_s21 + $0x18] sm:$0x3f]  }
  0x2d   : > { %v1104_v47 = vrot.slane %v1102_v45, 1  ;;  %5519 = vst [vmem:[#allocation2 + $0x20] sm:$0x3f] %v16509_v46  ;;  %v1107_v52 = vshrl.u32 %v16511_v48, 16  ;;  %v1109_v53 = vshll.u32 %v16511_v48, 16  ;;  %v6358_v63 = vld [vmem:[#allocation2 + $0xb8] sm:$0xff] }
  0x2e   : > { %5520 = vst [vmem:[#allocation2 + $0x70] sm:$0x3f] %v16512_v49  ;;  %v16513_v54 = vld [vmem:[%s17558_s21 + $0x10] sm:$0x7f]   ;;  %v16514_v60 = vld [vmem:[%s17558_s21 + $0x20] sm:$0x3f]  }
  0x2f   : > { %7892 = vmatpush1.bf16.msra.mxu0 %v16460_v11  ;;  %v1105_v51 = vor.u32 %v1104_v47, %v1100_v44  ;;  %v1111_v57 = vrot.slane %v1109_v53, 1  ;;  %v1114_v58 = vshrl.u32 %v16513_v54, 16  ;;  %v1116_v59 = vshll.u32 %v16513_v54, 16  ;;  %v16515_v62 = vld [vmem:[%s17558_s21 + $0x18] sm:$0x7f]   ;;  %v16481_v12 = vld [vmem:[%s20432_s1 + $0x120] sm:$0xff]  }
  0x30   : > { %7893 = vmatprep.subr.bf16.mxu0 %v20441_v1  ;;  %5521 = vst [vmem:[#allocation2 + $0xc0] sm:$0x3f] %v16514_v60  ;;  %v16516_v2 = vld [vmem:[%s17558_s21 + $0x28] sm:$0x3f]   ;;  %v1121_v3 = vshrl.u32 %v16515_v62, 16  ;;  %v1123_v4 = vshll.u32 %v16515_v62, 16 }
  0x31   : > { %1483 = vst [vmem:[#allocation2 + $0x28] sm:$0x3f] %v1105_v51  ;;  %v1112_v61 = vor.u32 %v1111_v57, %v1107_v52  ;;  %v1118_v0 = vrot.slane %v1116_v59, 1  ;;  %5522 = vst [vmem:[#allocation2 + $0x110] sm:$0x3f] %v16516_v2  ;;  %v16479_v7 = vld [vmem:[%s20432_s1 + $0x118] sm:$0xff]  }
  0x32   : > { %v16518_v6 = vld [vmem:[%s17558_s21 + $0x20] sm:$0x7f]   ;;  %v1125_v8 = vrot.slane %v1123_v4, 1  ;;  %v16519_v11 = vld [vmem:[%s17558_s21 + $0x30] sm:$0x3f]   ;;  %v6368_v20 = vld [vmem:[#allocation2 + $0x108] sm:$0xff] }
  0x33   : > { %7894 = vmatpush1.bf16.msra.mxu0 %v16461_v15  ;;  %1484 = vst [vmem:[#allocation2 + $0x78] sm:$0x3f] %v1112_v61  ;;  %v1119_v5 = vor.u32 %v1118_v0, %v1114_v58  ;;  %v1128_v9 = vshrl.u32 %v16518_v6, 16  ;;  %v1130_v10 = vshll.u32 %v16518_v6, 16  ;;  %v16520_v14 = vld [vmem:[%s17558_s21 + $0x28] sm:$0x7f]  }
  0x34   : > { %7895 = vmatprep.subr.bf16.mxu0 %v20441_v1  ;;  %v1126_v13 = vor.u32 %v1125_v8, %v1121_v3  ;;  %5523 = vst [vmem:[#allocation2 + $0x160] sm:$0x3f] %v16519_v11  ;;  %v6357_v16 = vld [vmem:[#allocation2 + $0xb0] sm:$0xff]  ;;  %v1135_v17 = vshrl.u32 %v16520_v14, 16  ;;  %v16521_v19 = vld [vmem:[%s17558_s21 + $0x38] sm:$0x3f]  }
  0x35   : > { %1485 = vst [vmem:[#allocation2 + $0xc8] sm:$0x3f] %v1119_v5  ;;  %v1132_v15 = vrot.slane %v1130_v10, 1  ;;  %5524 = vst [vmem:[#allocation2 + $0x1b0] sm:$0x3f] %v16521_v19  ;;  %v16483_v25 = vld [vmem:[%s20432_s1 + $0x128] sm:$0xff]  }
  0x36   : > { %1486 = vst [vmem:[#allocation2 + $0x118] sm:$0x3f] %v1126_v13  ;;  %v16522_v23 = vld [vmem:[%s17558_s21 + $0x30] sm:$0x7f]   ;;  %v16525_v29 = vld [vmem:[%s17558_s21 + $0x38] sm:$0x7f]  }
  0x37   : > { %7896 = vmatpush1.bf16.msra.mxu0 %v16462_v18  ;;  %v1137_v18 = vshll.u32 %v16520_v14, 16  ;;  %v1144_v28 = vshll.u32 %v16522_v23, 16  ;;  %v1149_v33 = vshrl.u32 %v16525_v29, 16  ;;  %v1151_v34 = vshll.u32 %v16525_v29, 16  ;;  %v16526_v35 = vld [vmem:[%s17558_s21 + $0x48] sm:$0x3f]  }
  0x38   : > { %7897 = vmatprep.subr.bf16.mxu0 %v20441_v1  ;;  %v6378_v38 = vld [vmem:[#allocation2 + $0x158] sm:$0xff]  ;;  %5526 = vst [vmem:[#allocation2 + $0x250] sm:$0x3f] %v16526_v35  ;;  %v16529_v44 = vld [vmem:[%s17558_s21 + $0x48] sm:$0x7f]   ;;  %v6377_v54 = vld [vmem:[#allocation2 + $0x150] sm:$0xff] }
  0x39   : > { %v1139_v22 = vrot.slane %v1137_v18, 1  ;;  %v1146_v31 = vrot.slane %v1144_v28, 1  ;;  %v1153_v39 = vrot.slane %v1151_v34, 1  ;;  %v16489_v45 = vld [vmem:[%s20432_s1 + $0x138] sm:$0xff]   ;;  %v1163_v47 = vshrl.u32 %v16529_v44, 16  ;;  %v16493_v62 = vld [vmem:[%s20432_s1 + $0x148] sm:$0xff]  }
  0x3a   : > { %v1165_v48 = vshll.u32 %v16529_v44, 16  ;;  %v16530_v49 = vld [vmem:[%s17558_s21 + $0x58] sm:$0x3f]   ;;  %v16532_v53 = vld [vmem:[%s17558_s21 + $0x50] sm:$0x7f]   ;;  %v6387_v2 = vld [vmem:[#allocation2 + $0x1a0] sm:$0xff] }
  0x3b   : > { %7898 = vmatpush1.bf16.msra.mxu0 %v16463_v21  ;;  %v1133_v21 = vor.u32 %v1132_v15, %v1128_v9  ;;  %v1140_v26 = vor.u32 %v1139_v22, %v1135_v17  ;;  %5528 = vst [vmem:[#allocation2 + $0x2f0] sm:$0x3f] %v16530_v49  ;;  %v1170_v57 = vshrl.u32 %v16532_v53, 16  ;;  %v1172_v58 = vshll.u32 %v16532_v53, 16  ;;  %v16533_v59 = vld [vmem:[%s17558_s21 + $0x60] sm:$0x3f]  }
  0x3c   : > { %7899 = vmatprep.subr.bf16.mxu0 %v20441_v1  ;;  %v1167_v52 = vrot.slane %v1165_v48, 1  ;;  %v16534_v60 = vld [vmem:[%s17558_s21 + $0x58] sm:$0x7f]   ;;  %5529 = vst [vmem:[#allocation2 + $0x340] sm:$0x3f] %v16533_v59  ;;  %v16496_v3 = vld [vmem:[%s20432_s1 + $0x150] sm:$0xff]  }
  0x3d   : > { %1487 = vst [vmem:[#allocation2 + $0x168] sm:$0x3f] %v1133_v21  ;;  %1488 = vst [vmem:[#allocation2 + $0x1b8] sm:$0x3f] %v1140_v26  ;;  %v1174_v61 = vrot.slane %v1172_v58, 1  ;;  %v1177_v4 = vshrl.u32 %v16534_v60, 16 }
  0x3e   : > { %v6398_v6 = vld [vmem:[#allocation2 + $0x1f8] sm:$0xff]  ;;  %v16535_v8 = vld [vmem:[%s17558_s21 + $0x68] sm:$0x3f]   ;;  %v16536_v10 = vld [vmem:[%s17558_s21 + $0x60] sm:$0x7f]   ;;  %s15293_s29 = sshll.u32 %s17509_s13, 4 }
  0x3f   : > { %7900 = vmatpush1.bf16.msra.mxu0 %v16464_v24  ;;  %v16523_v24 = vld [vmem:[%s17558_s21 + $0x40] sm:$0x3f]   ;;  %v1175_v0 = vor.u32 %v1174_v61, %v1170_v57  ;;  %v16497_v9 = vld [vmem:[%s20432_s1 + $0x158] sm:$0xff]   ;;  %5530 = vst [vmem:[#allocation2 + $0x390] sm:$0x3f] %v16535_v8  ;;  %v1186_v11 = vshll.u32 %v16536_v10, 16 }
  0x40   : > { %7901 = vmatprep.subr.bf16.mxu0 %v20441_v1  ;;  %5525 = vst [vmem:[#allocation2 + $0x200] sm:$0x3f] %v16523_v24  ;;  %v16500_v13 = vld [vmem:[%s20432_s1 + $0x160] sm:$0xff]   ;;  %v1184_v14 = vshrl.u32 %v16536_v10, 16  ;;  %v6408_v17 = vld [vmem:[#allocation2 + $0x248] sm:$0xff]  ;;  %v16545_v49 = vld [vmem:[%s20432_s1 + $0x10] sm:$0xff]  }
  0x41   : > { %1493 = vst [vmem:[#allocation2 + $0x348] sm:$0x3f] %v1175_v0  ;;  %v1188_v15 = vrot.slane %v1186_v11, 1  ;;  %v16537_v18 = vld [vmem:[%s17558_s21 + $0x70] sm:$0x3f]   ;;  %v16503_v19 = vld [vmem:[%s20432_s1 + $0x168] sm:$0xff]  }
  0x42   : > { %5531 = vst [vmem:[#allocation2 + $0x3e0] sm:$0x3f] %v16537_v18  ;;  %v6407_v22 = vld [vmem:[#allocation2 + $0x240] sm:$0xff]  ;;  %v16540_v28 = vld [vmem:[%s17558_s21 + $0x78] sm:$0x3f]   ;;  %v16554_v8 = vld [vmem:[%s20432_s1 + $0x30] sm:$0xff]  }
  0x43   : > { %7902 = vmatpush1.bf16.msra.mxu0 %v16465_v27  ;;  %v1142_v27 = vshrl.u32 %v16522_v23, 16  ;;  %v16504_v23 = vld [vmem:[%s20432_s1 + $0x170] sm:$0xff]   ;;  %5532 = vst [vmem:[#allocation2 + $0x430] sm:$0x3f] %v16540_v28  ;;  %v16551_v48 = vld [vmem:[%s17558_s21 + $0x80] sm:$0x7f]  }
  0x44   : > { %7903 = vmatprep.subr.bf16.mxu0 %v20441_v1  ;;  %v16542_v29 = vld [vmem:[%s17558_s21 + $0x70] sm:$0x7f]   ;;  %v16555_v58 = vld [vmem:[%s17558_s21 + $0x88] sm:$0x7f]   ;;  %v16550_v59 = vld [vmem:[%s20432_s1 + $0x20] sm:$0xff]   ;;  %s13645_s23 = scalar_lea.sflag [#allocation8], %s323_s27 }
  0x45   : > { %v16552_v57 = vld [vmem:[%s17558_s21 + $0x90] sm:$0x3f]   ;;  %v6339_v61 = vld [vmem:[#allocation2 + $0x20] sm:$0xff]  ;;  %v16531_v18 = vld [vmem:[%s20432_s1 + $0x198] sm:$0xff]   ;;  %s17437_s25 = smov [#allocation7]  }
  0x46   : > { %5535 = vst [vmem:[#allocation2 + $0x520] sm:$0x3f] %v16552_v57  ;;  %v6349_v10 = vld [vmem:[#allocation2 + $0x70] sm:$0xff]  ;;  %v16561_v28 = vld [vmem:[%s20432_s1 + $0x48] sm:$0xff]   ;;  %s17370_s26 = sshll.u32 %s17437_s25, 4  ;;  %s17371_s26 = int_to_ptr.vmem [resolvable:$false] %s17370_s26 }
  0x47   : > { %7904 = vmatpush1.bf16.msra.mxu0 %v16466_v30  ;;  %v16486_v30 = vld [vmem:[%s20432_s1 + $0x130] sm:$0xff]   ;;  %s17372_s28 = scalar_lea.vmem %s17371_s26, 32 }
  0x48   : > { %7905 = vmatprep.subr.bf16.mxu0 %v20441_v1  ;;  %v16524_v11 = vld [vmem:[%s20432_s1 + $0x190] sm:$0xff]  }
  0x49   : > { %v6389_v57 = vld [vmem:[#allocation2 + $0x1b0] sm:$0xff] }
  0x4b   : > { %7906 = vmatpush1.bf16.msra.mxu0 %v16467_v32  ;;  %v6367_v32 = vld [vmem:[#allocation2 + $0x100] sm:$0xff] }
  0x4c   : > { %7907 = vmatprep.subr.bf16.mxu0 %v20441_v1 }
  0x4f   : > { %7908 = vmatpush1.bf16.msra.mxu0 %v16468_v36  ;;  %v1147_v36 = vor.u32 %v1146_v31, %v1142_v27  ;;  %v6418_v27 = vld [vmem:[#allocation2 + $0x298] sm:$0xff]  ;;  %v1200_v31 = vshll.u32 %v16542_v29, 16 }
  0x50   : > { %7909 = vmatprep.subr.bf16.mxu0 %v20441_v1 }
  0x51   : > { %1489 = vst [vmem:[#allocation2 + $0x208] sm:$0x3f] %v1147_v36  ;;  %v1202_v34 = vrot.slane %v1200_v31, 1  ;;  %v6428_v36 = vld [vmem:[#allocation2 + $0x2e8] sm:$0xff] }
  0x52   : > { %v16549_v31 = vld [vmem:[%s20432_s1 + $0x1a8] sm:$0xff]  }
  0x53   : > { %7910 = vmatpush1.bf16.msra.mxu0 %v16469_v37  ;;  %v16527_v37 = vld [vmem:[%s17558_s21 + $0x40] sm:$0x7f]  }
  0x54   : > { %8296 = vmatprep.subr.bf16.mxu0 %v20441_v1  ;;  %v1156_v40 = vshrl.u32 %v16527_v37, 16 }
  0x56   : > { %7912 = vmatmul.mubr.bf16.vlgmr.msra.gmra.mrb[0].mxu0 %v6337_v42  ;;  %v16528_v42 = vld [vmem:[%s17558_s21 + $0x50] sm:$0x3f]  }
  0x57   : > { %8297 = vmatpush1.bf16.msra.mxu0 %v16472_v41  ;;  %7919 = vmatprep.mubr.bf16.mxu0 %v6348_v43  ;;  %v1158_v41 = vshll.u32 %v16527_v37, 16  ;;  %v1154_v43 = vor.u32 %v1153_v39, %v1149_v33  ;;  %5527 = vst [vmem:[#allocation2 + $0x2a0] sm:$0x3f] %v16528_v42  ;;  %v1198_v33 = vshrl.u32 %v16542_v29, 16  ;;  %v16543_v37 = vld [vmem:[%s17558_s21 + $0x80] sm:$0x3f]  }
  0x58   : > { %8298 = vmatprep.subr.bf16.mxu0 %v20441_v1  ;;  %v16541_v39 = vld [vmem:[%s20432_s1] sm:$0xff]   ;;  %5533 = vst [vmem:[#allocation2 + $0x480] sm:$0x3f] %v16543_v37  ;;  %v16565_v29 = vld [vmem:[%s17558_s21 + $0xa8] sm:$0x3f]  }
  0x59   : > { %v1160_v46 = vrot.slane %v1158_v41, 1  ;;  %1490 = vst [vmem:[#allocation2 + $0x258] sm:$0x3f] %v1154_v43  ;;  %v1203_v35 = vor.u32 %v1202_v34, %v1198_v33  ;;  %7463 = vmatpush1.bf16.msra.mxu1 %v16541_v39  ;;  %v6427_v41 = vld [vmem:[#allocation2 + $0x2e0] sm:$0xff]  ;;  %5538 = vst [vmem:[#allocation2 + $0x610] sm:$0x3f] %v16565_v29 }
  0x5a   : > { %7464 = vmatprep.subr.bf16.mxu1 %v20441_v1  ;;  %v6369_v34 = vld [vmem:[#allocation2 + $0x110] sm:$0xff]  ;;  %v6380_v39 = vld [vmem:[#allocation2 + $0x168] sm:$0xff] }
  0x5b   : > { %8299 = vmatpush1.bf16.msra.mxu0 %v16474_v50  ;;  %v16490_v50 = vld [vmem:[%s20432_s1 + $0x140] sm:$0xff]   ;;  %v1161_v51 = vor.u32 %v1160_v46, %v1156_v40  ;;  %1497 = vst [vmem:[#allocation2 + $0x488] sm:$0x3f] %v1203_v35  ;;  %v16544_v46 = vld [vmem:[%s20432_s1 + $0x8] sm:$0xff]   ;;  %v16562_v35 = vld [vmem:[%s20432_s1 + $0x1b0] sm:$0xff]  }
  0x5c   : > { %8300 = vmatprep.subr.bf16.mxu0 %v20441_v1  ;;  %v16591_v29 = vld [vmem:[%s17558_s21 + $0xc8] sm:$0x7f]  }
  0x5d   : > { %1491 = vst [vmem:[#allocation2 + $0x2a8] sm:$0x3f] %v1161_v51  ;;  %7465 = vmatpush1.bf16.msra.mxu1 %v16544_v46  ;;  %v6437_v51 = vld [vmem:[#allocation2 + $0x330] sm:$0xff] }
  0x5e   : > { %7920 = vmatmul.mubr.bf16.gmra.mrb[4].mxu0 %v6347_v55  ;;  %v6388_v55 = vld [vmem:[#allocation2 + $0x1a8] sm:$0xff]  ;;  %7466 = vmatprep.subr.bf16.mxu1 %v20441_v1 }
  0x5f   : > { %8301 = vmatpush1.bf16.msra.mxu0 %v16476_v56  ;;  %7927 = vmatprep.mubr.bf16.mxu0 %v6358_v63  ;;  %v1168_v56 = vor.u32 %v1167_v52, %v1163_v47  ;;  %v1179_v63 = vshll.u32 %v16534_v60, 16  ;;  %v16547_v47 = vld [vmem:[%s17558_s21 + $0x88] sm:$0x3f]   ;;  %v1212_v52 = vshrl.u32 %v16551_v48, 16  ;;  %v1221_v60 = vshll.u32 %v16555_v58, 16 }
  0x60   : > { %8302 = vmatprep.subr.bf16.mxu0 %v20441_v1  ;;  %5534 = vst [vmem:[#allocation2 + $0x4d0] sm:$0x3f] %v16547_v47 }
  0x61   : > { %1492 = vst [vmem:[#allocation2 + $0x2f8] sm:$0x3f] %v1168_v56  ;;  %v1181_v5 = vrot.slane %v1179_v63, 1  ;;  %7467 = vmatpush1.bf16.msra.mxu1 %v16545_v49  ;;  %v16548_v56 = vld [vmem:[%s20432_s1 + $0x18] sm:$0xff]   ;;  %v1219_v63 = vshrl.u32 %v16555_v58, 16  ;;  %v1223_v0 = vrot.slane %v1221_v60, 1 }
  0x62   : > { %7468 = vmatprep.subr.bf16.mxu1 %v20441_v1  ;;  %v6390_v49 = vld [vmem:[#allocation2 + $0x1b8] sm:$0xff] }
  0x63   : > { %8303 = vmatpush1.bf16.msra.mxu0 %v16479_v7  ;;  %v1182_v7 = vor.u32 %v1181_v5, %v1177_v4  ;;  %v16553_v4 = vld [vmem:[%s20432_s1 + $0x28] sm:$0xff]   ;;  %v16556_v5 = vld [vmem:[%s17558_s21 + $0x98] sm:$0x3f]  }
  0x64   : > { %8304 = vmatprep.subr.bf16.mxu0 %v20441_v1  ;;  %5536 = vst [vmem:[#allocation2 + $0x570] sm:$0x3f] %v16556_v5  ;;  %v16581_v5 = vld [vmem:[%s17558_s21 + $0x8] sm:$0x3f]  }
  0x65   : > { %1494 = vst [vmem:[#allocation2 + $0x398] sm:$0x3f] %v1182_v7  ;;  %7469 = vmatpush1.bf16.msra.mxu1 %v16548_v56  ;;  %v16559_v7 = vld [vmem:[%s17558_s21 + $0x90] sm:$0x7f]   ;;  %716 = vst [vmem:[#allocation2 + $0x50] sm:$0x3f] %v16581_v5 }
  0x66   : > { %7928 = vmatmul.mubr.bf16.gmra.mrb[8].mxu0 %v6357_v16  ;;  %v1189_v16 = vor.u32 %v1188_v15, %v1184_v14  ;;  %7470 = vmatprep.subr.bf16.mxu1 %v20441_v1  ;;  %v6360_v15 = vld [vmem:[#allocation2 + $0xc8] sm:$0xff]  ;;  %v17357_v5 = vld [vmem:[%s20432_s1 + $0xc0] sm:$0xff]  }
  0x67   : > { %7935 = vmatprep.mubr.bf16.mxu0 %v6368_v20  ;;  %8305 = vmatpush1.bf16.msra.mxu0 %v16481_v12  ;;  %v6397_v12 = vld [vmem:[#allocation2 + $0x1f0] sm:$0xff]  ;;  %v16539_v20 = vld [vmem:[%s17558_s21 + $0x68] sm:$0x7f]  }
  0x68   : > { %8306 = vmatprep.subr.bf16.mxu0 %v20441_v1  ;;  %1495 = vst [vmem:[#allocation2 + $0x3e8] sm:$0x3f] %v1189_v16  ;;  %v1193_v21 = vshll.u32 %v16539_v20, 16  ;;  %v1191_v24 = vshrl.u32 %v16539_v20, 16  ;;  %v16557_v16 = vld [vmem:[%s20432_s1 + $0x38] sm:$0xff]   ;;  %v16558_v20 = vld [vmem:[%s20432_s1 + $0x40] sm:$0xff]  }
  0x69   : > { %7471 = vmatpush1.bf16.msra.mxu1 %v16550_v59 }
  0x6a   : > { %7472 = vmatprep.subr.bf16.mxu1 %v20441_v1 }
  0x6b   : > { %8307 = vmatpush1.bf16.msra.mxu0 %v16483_v25  ;;  %v1195_v25 = vrot.slane %v1193_v21, 1 }
  0x6c   : > { %8308 = vmatprep.subr.bf16.mxu0 %v20441_v1 }
  0x6d   : > { %v1196_v26 = vor.u32 %v1195_v25, %v1191_v24  ;;  %7473 = vmatpush1.bf16.msra.mxu1 %v16553_v4 }
  0x6e   : > { %7936 = vmatmul.mubr.bf16.gmra.mrb[12].mxu0 %v6367_v32  ;;  %v6417_v32 = vld [vmem:[#allocation2 + $0x290] sm:$0xff]  ;;  %7474 = vmatprep.subr.bf16.mxu1 %v20441_v1 }
  0x6f   : > { %7943 = vmatprep.mubr.bf16.mxu0 %v6378_v38  ;;  %8309 = vmatpush1.bf16.msra.mxu0 %v16486_v30  ;;  %1496 = vst [vmem:[#allocation2 + $0x438] sm:$0x3f] %v1196_v26  ;;  %v16507_v30 = vld [vmem:[%s20432_s1 + $0x178] sm:$0xff]  }
  0x70   : > { %8310 = vmatprep.subr.bf16.mxu0 %v20441_v1  ;;  %v16546_v38 = vld [vmem:[%s17558_s21 + $0x78] sm:$0x7f]  }
  0x71   : > { %v1207_v40 = vshll.u32 %v16546_v38, 16  ;;  %v1205_v42 = vshrl.u32 %v16546_v38, 16  ;;  %7475 = vmatpush1.bf16.msra.mxu1 %v16554_v8  ;;  %v6399_v8 = vld [vmem:[#allocation2 + $0x200] sm:$0xff] }
  0x72   : > { %7476 = vmatprep.subr.bf16.mxu1 %v20441_v1 }
  0x73   : > { %8311 = vmatpush1.bf16.msra.mxu0 %v16489_v45  ;;  %v1209_v43 = vrot.slane %v1207_v40, 1  ;;  %v6438_v45 = vld [vmem:[#allocation2 + $0x338] sm:$0xff] }
  0x74   : > { %8312 = vmatprep.subr.bf16.mxu0 %v20441_v1  ;;  %v16566_v40 = vld [vmem:[%s20432_s1 + $0x58] sm:$0xff]  }
  0x75   : > { %v1210_v44 = vor.u32 %v1209_v43, %v1205_v42  ;;  %7477 = vmatpush1.bf16.msra.mxu1 %v16557_v16  ;;  %v16572_v42 = vld [vmem:[%s17558_s21 + $0xa8] sm:$0x7f]   ;;  %v16567_v43 = vld [vmem:[%s20432_s1 + $0x60] sm:$0xff]  }
  0x76   : > { %7944 = vmatmul.mubr.bf16.gmra.mrb[16].mxu0 %v6377_v54  ;;  %7478 = vmatprep.subr.bf16.mxu1 %v20441_v1  ;;  %v1247_v46 = vshrl.u32 %v16572_v42, 16  ;;  %v16584_v16 = vld [vmem:[%s17558_s21 + $0x1a0] sm:$0x3f]  }
  0x77   : > { %7951 = vmatprep.mubr.bf16.mxu0 %v6388_v55  ;;  %8313 = vmatpush1.bf16.msra.mxu0 %v16490_v50  ;;  %1498 = vst [vmem:[#allocation2 + $0x4d8] sm:$0x3f] %v1210_v44  ;;  %v1214_v50 = vshll.u32 %v16551_v48, 16  ;;  %v6340_v55 = vld [vmem:[#allocation2 + $0x28] sm:$0xff]  ;;  %v1249_v44 = vshll.u32 %v16572_v42, 16 }
  0x78   : > { %8314 = vmatprep.subr.bf16.mxu0 %v20441_v1  ;;  %1918 = vst [vmem:[#allocation2 + $0xa8] sm:$0x3f] %v16584_v16  ;;  %v16592_v42 = vld [vmem:[%s17558_s21 + $0xd8] sm:$0x3f]   ;;  %v6449_v16 = vld [vmem:[#allocation2 + $0x390] sm:$0xff] }
  0x79   : > { %v1216_v53 = vrot.slane %v1214_v50, 1  ;;  %7479 = vmatpush1.bf16.msra.mxu1 %v16558_v20  ;;  %v1251_v47 = vrot.slane %v1249_v44, 1  ;;  %v16570_v50 = vld [vmem:[%s20432_s1 + $0x68] sm:$0xff]   ;;  %v16588_v44 = vld [vmem:[%s20432_s1 + $0x1c0] sm:$0xff]   ;;  %5544 = vst [vmem:[#allocation2 + $0x7f0] sm:$0x3f] %v16592_v42 }
  0x7a   : > { %7480 = vmatprep.subr.bf16.mxu1 %v20441_v1  ;;  %v16611_v42 = vld [vmem:[%s17558_s21 + $0x40] sm:$0x3f]  }
  0x7b   : > { %8315 = vmatpush1.bf16.msra.mxu0 %v16493_v62  ;;  %v1217_v54 = vor.u32 %v1216_v53, %v1212_v52  ;;  %v16510_v62 = vld [vmem:[%s20432_s1 + $0x180] sm:$0xff]   ;;  %v1252_v48 = vor.u32 %v1251_v47, %v1247_v46  ;;  %v16578_v52 = vld [vmem:[%s17558_s21 + $0xb0] sm:$0x7f]   ;;  %v17354_v46 = vld [vmem:[%s20432_s1 + $0xa8] sm:$0xff]   ;;  %723 = vst [vmem:[#allocation2 + $0x280] sm:$0x3f] %v16611_v42 }
  0x7c   : > { %8316 = vmatprep.subr.bf16.mxu0 %v20441_v1  ;;  %v16571_v53 = vld [vmem:[%s20432_s1 + $0x70] sm:$0xff]   ;;  %v1256_v56 = vshll.u32 %v16578_v52, 16  ;;  %v1254_v58 = vshrl.u32 %v16578_v52, 16 }
  0x7d   : > { %1499 = vst [vmem:[#allocation2 + $0x528] sm:$0x3f] %v1217_v54  ;;  %7481 = vmatpush1.bf16.msra.mxu1 %v16561_v28  ;;  %1504 = vst [vmem:[#allocation2 + $0x6b8] sm:$0x3f] %v1252_v48  ;;  %v16576_v54 = vld [vmem:[%s17558_s21 + $0x190] sm:$0x3f]  }
  0x7e   : > { %7952 = vmatmul.mubr.bf16.gmra.mrb[20].mxu0 %v6387_v2  ;;  %v1224_v2 = vor.u32 %v1223_v0, %v1219_v63  ;;  %7482 = vmatprep.subr.bf16.mxu1 %v20441_v1  ;;  %1916 = vst [vmem:[#allocation2 + $0x8] sm:$0x3f] %v16576_v54  ;;  %v1258_v59 = vrot.slane %v1256_v56, 1  ;;  %v16579_v63 = vld [vmem:[%s17558_s21 + $0xc0] sm:$0x3f]   ;;  %v17355_v54 = vld [vmem:[%s20432_s1 + $0xb0] sm:$0xff]  }
  0x7f   : > { %7959 = vmatprep.mubr.bf16.mxu0 %v6398_v6  ;;  %8317 = vmatpush1.bf16.msra.mxu0 %v16496_v3  ;;  %v6350_v3 = vld [vmem:[#allocation2 + $0x78] sm:$0xff]  ;;  %v16517_v6 = vld [vmem:[%s20432_s1 + $0x188] sm:$0xff]   ;;  %5541 = vst [vmem:[#allocation2 + $0x700] sm:$0x3f] %v16579_v63  ;;  %v16587_v28 = vld [vmem:[%s17558_s21 + $0xd0] sm:$0x3f]  }
  0x80   : > { %8318 = vmatprep.subr.bf16.mxu0 %v20441_v1  ;;  %1500 = vst [vmem:[#allocation2 + $0x578] sm:$0x3f] %v1224_v2  ;;  %v1259_v60 = vor.u32 %v1258_v59, %v1254_v58  ;;  %v16582_v0 = vld [vmem:[%s17558_s21 + $0xb8] sm:$0x7f]   ;;  %5543 = vst [vmem:[#allocation2 + $0x7a0] sm:$0x3f] %v16587_v28 }
  0x81   : > { %v16575_v2 = vld [vmem:[%s20432_s1 + $0x1b8] sm:$0xff]   ;;  %v16594_v48 = vld [vmem:[%s17558_s21 + $0x20] sm:$0x3f]   ;;  %v6440_v56 = vld [vmem:[#allocation2 + $0x348] sm:$0xff] }
  0x82   : > { %1505 = vst [vmem:[#allocation2 + $0x708] sm:$0x3f] %v1259_v60  ;;  %719 = vst [vmem:[#allocation2 + $0x140] sm:$0x3f] %v16594_v48  ;;  %v16599_v58 = vld [vmem:[%s17558_s21 + $0xd8] sm:$0x7f]  }
  0x83   : > { %8319 = vmatpush1.bf16.msra.mxu0 %v16497_v9  ;;  %v1228_v9 = vshll.u32 %v16559_v7, 16  ;;  %v16597_v59 = vld [vmem:[%s17558_s21 + $0x1b8] sm:$0x3f]   ;;  %v1291_v63 = vshll.u32 %v16599_v58, 16  ;;  %v17363_v48 = vld [vmem:[%s20432_s1 + $0xf0] sm:$0xff]  }
  0x84   : > { %8320 = vmatprep.subr.bf16.mxu0 %v20441_v1  ;;  %v17356_v60 = vld [vmem:[%s20432_s1 + $0xb8] sm:$0xff]   ;;  %1921 = vst [vmem:[#allocation2 + $0x198] sm:$0x3f] %v16597_v59  ;;  %v6479_v59 = vld [vmem:[#allocation2 + $0x480] sm:$0xff] }
  0x85   : > { %v6336_v4 = vld [vmem:[#allocation2 + $0x8] sm:$0xff]  ;;  %v16607_v28 = vld [vmem:[%s17558_s21 + $0x38] sm:$0x3f]  }
  0x86   : > { %7960 = vmatmul.mubr.bf16.gmra.mrb[24].mxu0 %v6397_v12  ;;  %v1226_v12 = vshrl.u32 %v16559_v7, 16  ;;  %7494 = vmatprep.mubr.bf16.mxu1 %v6336_v4  ;;  %v1293_v4 = vrot.slane %v1291_v63, 1  ;;  %722 = vst [vmem:[#allocation2 + $0x230] sm:$0x3f] %v16607_v28  ;;  %v6490_v63 = vld [vmem:[#allocation2 + $0x4d8] sm:$0xff] }
  0x87   : > { %7967 = vmatprep.mubr.bf16.mxu0 %v6408_v17  ;;  %8321 = vmatpush1.bf16.msra.mxu0 %v16500_v13  ;;  %v1230_v13 = vrot.slane %v1228_v9, 1  ;;  %v16560_v17 = vld [vmem:[%s17558_s21 + $0xa0] sm:$0x3f]   ;;  %v1261_v9 = vshrl.u32 %v16582_v0, 16  ;;  %v16628_v28 = vld [vmem:[%s17558_s21 + $0x1f0] sm:$0x3f]  }
  0x88   : > { %8322 = vmatprep.subr.bf16.mxu0 %v20441_v1  ;;  %5537 = vst [vmem:[#allocation2 + $0x5c0] sm:$0x3f] %v16560_v17  ;;  %v17350_v17 = vld [vmem:[%s20432_s1 + $0x88] sm:$0xff]   ;;  %1928 = vst [vmem:[#allocation2 + $0x3c8] sm:$0x3f] %v16628_v28 }
  0x89   : > { %v1231_v14 = vor.u32 %v1230_v13, %v1226_v12  ;;  %v6410_v13 = vld [vmem:[#allocation2 + $0x258] sm:$0xff] }
  0x8b   : > { %8323 = vmatpush1.bf16.msra.mxu0 %v16503_v19  ;;  %1501 = vst [vmem:[#allocation2 + $0x5c8] sm:$0x3f] %v1231_v14  ;;  %v16564_v19 = vld [vmem:[%s17558_s21 + $0x98] sm:$0x7f]   ;;  %v16583_v14 = vld [vmem:[%s17558_s21 + $0xc8] sm:$0x3f]  }
  0x8c   : > { %8324 = vmatprep.subr.bf16.mxu0 %v20441_v1  ;;  %v1235_v21 = vshll.u32 %v16564_v19, 16  ;;  %v1233_v24 = vshrl.u32 %v16564_v19, 16  ;;  %5542 = vst [vmem:[#allocation2 + $0x750] sm:$0x3f] %v16583_v14  ;;  %v16585_v19 = vld [vmem:[%s17558_s21 + $0x10] sm:$0x3f]  }
  0x8d   : > { %717 = vst [vmem:[#allocation2 + $0xa0] sm:$0x3f] %v16585_v19  ;;  %v17359_v19 = vld [vmem:[%s20432_s1 + $0xd0] sm:$0xff]  }
  0x8e   : > { %7968 = vmatmul.mubr.bf16.gmra.mrb[28].mxu0 %v6407_v22  ;;  %v6359_v22 = vld [vmem:[#allocation2 + $0xc0] sm:$0xff]  ;;  %v1237_v25 = vrot.slane %v1235_v21, 1  ;;  %v6345_v21 = vld [vmem:[#allocation2 + $0x50] sm:$0xff] }
  0x8f   : > { %7975 = vmatprep.mubr.bf16.mxu0 %v6418_v27  ;;  %8325 = vmatpush1.bf16.msra.mxu0 %v16504_v23  ;;  %v16538_v23 = vld [vmem:[%s20432_s1 + $0x1a0] sm:$0xff]   ;;  %v6370_v27 = vld [vmem:[#allocation2 + $0x118] sm:$0xff]  ;;  %v6456_v42 = vld [vmem:[#allocation2 + $0x3c8] sm:$0xff] }
  0x90   : > { %8326 = vmatprep.subr.bf16.mxu0 %v20441_v1  ;;  %v1238_v26 = vor.u32 %v1237_v25, %v1233_v24  ;;  %v17351_v25 = vld [vmem:[%s20432_s1 + $0x90] sm:$0xff]  }
  0x92   : > { %1502 = vst [vmem:[#allocation2 + $0x618] sm:$0x3f] %v1238_v26 }
  0x93   : > { %8327 = vmatpush1.bf16.msra.mxu0 %v16507_v30  ;;  %v16568_v30 = vld [vmem:[%s17558_s21 + $0xa0] sm:$0x7f]  }
  0x94   : > { %8713 = vmatprep.subr.bf16.mxu0 %v20441_v1  ;;  %v1242_v33 = vshll.u32 %v16568_v30, 16 }
  0x96   : > { %7976 = vmatmul.mubr.bf16.gmra.mrb[32].mxu0 %v6417_v32  ;;  %v16563_v32 = vld [vmem:[%s20432_s1 + $0x50] sm:$0xff]   ;;  %v1244_v37 = vrot.slane %v1242_v33, 1  ;;  %v16590_v33 = vld [vmem:[%s17558_s21 + $0x18] sm:$0x3f]  }
  0x97   : > { %7983 = vmatprep.mubr.bf16.mxu0 %v6428_v36  ;;  %v1240_v36 = vshrl.u32 %v16568_v30, 16  ;;  %7483 = vmatpush1.bf16.msra.mxu1 %v16563_v32  ;;  %v16589_v30 = vld [vmem:[%s17558_s21 + $0x1a8] sm:$0x3f]   ;;  %718 = vst [vmem:[#allocation2 + $0xf0] sm:$0x3f] %v16590_v33 }
  0x98   : > { %7484 = vmatprep.subr.bf16.mxu1 %v20441_v1  ;;  %v6356_v32 = vld [vmem:[#allocation2 + $0xa8] sm:$0xff]  ;;  %1919 = vst [vmem:[#allocation2 + $0xf8] sm:$0x3f] %v16589_v30 }
  0x99   : > { %v1245_v38 = vor.u32 %v1244_v37, %v1240_v36  ;;  %v6419_v36 = vld [vmem:[#allocation2 + $0x2a0] sm:$0xff]  ;;  %v1275_v37 = vshrl.u32 %v16591_v29, 16 }
  0x9b   : > { %1503 = vst [vmem:[#allocation2 + $0x668] sm:$0x3f] %v1245_v38  ;;  %7485 = vmatpush1.bf16.msra.mxu1 %v16566_v40 }
  0x9c   : > { %7486 = vmatprep.subr.bf16.mxu1 %v20441_v1 }
  0x9e   : > { %7984 = vmatmul.mubr.bf16.gmra.mrb[36].mxu0 %v6427_v41  ;;  %v16569_v41 = vld [vmem:[%s17558_s21 + $0xb0] sm:$0x3f]  }
  0x9f   : > { %7991 = vmatprep.mubr.bf16.mxu0 %v6438_v45  ;;  %5539 = vst [vmem:[#allocation2 + $0x660] sm:$0x3f] %v16569_v41  ;;  %v6379_v45 = vld [vmem:[#allocation2 + $0x160] sm:$0xff]  ;;  %7487 = vmatpush1.bf16.msra.mxu1 %v16567_v43  ;;  %v6430_v41 = vld [vmem:[#allocation2 + $0x2f8] sm:$0xff]  ;;  %v16595_v43 = vld [vmem:[%s17558_s21 + $0xd0] sm:$0x7f]  }
  0xa0   : > { %7488 = vmatprep.subr.bf16.mxu1 %v20441_v1  ;;  %v6366_v47 = vld [vmem:[#allocation2 + $0xf8] sm:$0xff]  ;;  %v1282_v52 = vshrl.u32 %v16595_v43, 16 }
  0xa3   : > { %7489 = vmatpush1.bf16.msra.mxu1 %v16570_v50  ;;  %v6365_v50 = vld [vmem:[#allocation2 + $0xf0] sm:$0xff] }
  0xa4   : > { %7490 = vmatprep.subr.bf16.mxu1 %v20441_v1 }
  0xa6   : > { %7992 = vmatmul.mubr.bf16.gmra.mrb[40].mxu0 %v6437_v51  ;;  %v16573_v51 = vld [vmem:[%s17558_s21 + $0xb8] sm:$0x3f]  }
  0xa7   : > { %8328 = vmatprep.mubr.bf16.mxu0 %v6340_v55  ;;  %5540 = vst [vmem:[#allocation2 + $0x6b0] sm:$0x3f] %v16573_v51  ;;  %v16577_v55 = vld [vmem:[%s17558_s21] sm:$0x3f]   ;;  %7491 = vmatpush1.bf16.msra.mxu1 %v16571_v53  ;;  %v6429_v51 = vld [vmem:[#allocation2 + $0x2f0] sm:$0xff] }
  0xa8   : > { %715 = vst [vmem:[#allocation2] sm:$0x3f] %v16577_v55  ;;  %7492 = vmatprep.subr.bf16.mxu1 %v20441_v1 }
  0xae   : > { %8329 = vmatmul.mubr.bf16.vlgmr.msra.gmra.mrb[0].mxu0 %v6339_v61  ;;  %v6400_v61 = vld [vmem:[#allocation2 + $0x208] sm:$0xff] }
  0xaf   : > { %8714 = vmatpush1.bf16.msra.mxu0 %v16510_v62  ;;  %8336 = vmatprep.mubr.bf16.mxu0 %v6350_v3  ;;  %v16574_v62 = vld [vmem:[%s20432_s1 + $0x78] sm:$0xff]   ;;  %v6335_v7 = vld [vmem:[#allocation2] sm:$0xff] }
  0xb0   : > { %8715 = vmatprep.subr.bf16.mxu0 %v20441_v1  ;;  %7493 = vmatpush1.bf16.msra.mxu1 %v16574_v62  ;;  %v16580_v3 = vld [vmem:[%s17558_s21 + $0x198] sm:$0x3f]   ;;  %v16598_v62 = vld [vmem:[%s17558_s21 + $0x28] sm:$0x3f]  }
  0xb1   : > { %15461 = vmatprep.subr.bf16.mxu1 %v20441_v1  ;;  %1917 = vst [vmem:[#allocation2 + $0x58] sm:$0x3f] %v16580_v3  ;;  %720 = vst [vmem:[#allocation2 + $0x190] sm:$0x3f] %v16598_v62  ;;  %v1289_v3 = vshrl.u32 %v16599_v58, 16  ;;  %v6415_v58 = vld [vmem:[#allocation2 + $0x280] sm:$0xff] }
  0xb3   : > { %8716 = vmatpush1.bf16.msra.mxu0 %v16517_v6  ;;  %v1263_v6 = vshll.u32 %v16582_v0, 16  ;;  %7495 = vmatmul.mubr.bf16.vlgmr.msra.gmra.mrb[0].mxu1 %v6335_v7  ;;  %v6375_v0 = vld [vmem:[#allocation2 + $0x140] sm:$0xff]  ;;  %v6450_v7 = vld [vmem:[#allocation2 + $0x398] sm:$0xff] }
  0xb4   : > { %8717 = vmatprep.subr.bf16.mxu0 %v20441_v1 }
  0xb6   : > { %8337 = vmatmul.mubr.bf16.gmra.mrb[4].mxu0 %v6349_v10  ;;  %v1265_v10 = vrot.slane %v1263_v6, 1  ;;  %v1294_v6 = vor.u32 %v1293_v4, %v1289_v3  ;;  %v16614_v3 = vld [vmem:[%s20432_s1 + $0x1d0] sm:$0xff]   ;;  %v16619_v4 = vld [vmem:[%s17558_s21 + $0x1e0] sm:$0x3f]  }
  0xb7   : > { %8344 = vmatprep.mubr.bf16.mxu0 %v6360_v15  ;;  %8718 = vmatpush1.bf16.msra.mxu0 %v16524_v11  ;;  %v17349_v11 = vld [vmem:[%s20432_s1 + $0x80] sm:$0xff]   ;;  %1926 = vst [vmem:[#allocation2 + $0x328] sm:$0x3f] %v16619_v4  ;;  %v16642_v4 = vld [vmem:[%s17558_s21 + $0x78] sm:$0x3f]  }
  0xb8   : > { %8719 = vmatprep.subr.bf16.mxu0 %v20441_v1  ;;  %15477 = vmatpush1.bf16.msra.mxu1 %v17349_v11  ;;  %v1266_v12 = vor.u32 %v1265_v10, %v1261_v9  ;;  %v16586_v15 = vld [vmem:[%s17558_s21 + $0xc0] sm:$0x7f]   ;;  %1510 = vst [vmem:[#allocation2 + $0x898] sm:$0x3f] %v1294_v6  ;;  %v17358_v11 = vld [vmem:[%s20432_s1 + $0xc8] sm:$0xff]  }
  0xb9   : > { %15462 = vmatprep.subr.bf16.mxu1 %v20441_v1  ;;  %v1270_v20 = vshll.u32 %v16586_v15, 16  ;;  %v16604_v9 = vld [vmem:[%s17558_s21 + $0xe0] sm:$0x7f]   ;;  %v16620_v6 = vld [vmem:[%s17558_s21 + $0x50] sm:$0x3f]  }
  0xba   : > { %1506 = vst [vmem:[#allocation2 + $0x758] sm:$0x3f] %v1266_v12  ;;  %v16602_v10 = vld [vmem:[%s17558_s21 + $0x1c0] sm:$0x3f]   ;;  %v6386_v12 = vld [vmem:[#allocation2 + $0x198] sm:$0xff]  ;;  %v1298_v14 = vshll.u32 %v16604_v9, 16 }
  0xbb   : > { %8720 = vmatpush1.bf16.msra.mxu0 %v16531_v18  ;;  %v6346_v18 = vld [vmem:[#allocation2 + $0x58] sm:$0xff]  ;;  %v1272_v24 = vrot.slane %v1270_v20, 1  ;;  %1922 = vst [vmem:[#allocation2 + $0x1e8] sm:$0x3f] %v16602_v10  ;;  %725 = vst [vmem:[#allocation2 + $0x320] sm:$0x3f] %v16620_v6 }
  0xbc   : > { %8721 = vmatprep.subr.bf16.mxu0 %v20441_v1  ;;  %15478 = vmatpush1.bf16.msra.mxu1 %v17350_v17  ;;  %v1296_v17 = vshrl.u32 %v16604_v9, 16  ;;  %v6489_v9 = vld [vmem:[#allocation2 + $0x4d0] sm:$0xff]  ;;  %730 = vst [vmem:[#allocation2 + $0x4b0] sm:$0x3f] %v16642_v4 }
  0xbd   : > { %15463 = vmatprep.subr.bf16.mxu1 %v20441_v1  ;;  %7502 = vmatprep.mubr.bf16.mxu1 %v6346_v18  ;;  %v1300_v18 = vrot.slane %v1298_v14, 1  ;;  %v16622_v14 = vld [vmem:[%s17558_s21 + $0x110] sm:$0x3f]  }
  0xbe   : > { %8345 = vmatmul.mubr.bf16.gmra.mrb[8].mxu0 %v6359_v22  ;;  %v6409_v22 = vld [vmem:[#allocation2 + $0x250] sm:$0xff]  ;;  %7503 = vmatmul.mubr.bf16.gmra.mrb[4].mxu1 %v6345_v21  ;;  %v6460_v21 = vld [vmem:[#allocation2 + $0x3e8] sm:$0xff]  ;;  %5551 = vst [vmem:[#allocation2 + $0xa20] sm:$0x3f] %v16622_v14  ;;  %v16640_v14 = vld [vmem:[%s20432_s1 + $0x1e0] sm:$0xff]  }
  0xbf   : > { %8352 = vmatprep.mubr.bf16.mxu0 %v6370_v27  ;;  %8722 = vmatpush1.bf16.msra.mxu0 %v16538_v23  ;;  %v1268_v23 = vshrl.u32 %v16586_v15, 16  ;;  %v6420_v27 = vld [vmem:[#allocation2 + $0x2a8] sm:$0xff]  ;;  %v6385_v15 = vld [vmem:[#allocation2 + $0x190] sm:$0xff]  ;;  %v1301_v20 = vor.u32 %v1300_v18, %v1296_v17  ;;  %v16624_v18 = vld [vmem:[%s17558_s21 + $0x58] sm:$0x3f]  }
  0xc0   : > { %8723 = vmatprep.subr.bf16.mxu0 %v20441_v1  ;;  %15479 = vmatpush1.bf16.msra.mxu1 %v17351_v25  ;;  %v16606_v25 = vld [vmem:[%s17558_s21 + $0x1c8] sm:$0x3f]   ;;  %726 = vst [vmem:[#allocation2 + $0x370] sm:$0x3f] %v16624_v18 }
  0xc1   : > { %v1273_v26 = vor.u32 %v1272_v24, %v1268_v23  ;;  %15464 = vmatprep.subr.bf16.mxu1 %v20441_v1  ;;  %7510 = vmatprep.mubr.bf16.mxu1 %v6356_v32  ;;  %1511 = vst [vmem:[#allocation2 + $0x8e8] sm:$0x3f] %v1301_v20  ;;  %v16608_v23 = vld [vmem:[%s17558_s21 + $0xe8] sm:$0x7f]   ;;  %1923 = vst [vmem:[#allocation2 + $0x238] sm:$0x3f] %v16606_v25 }
  0xc2   : > { %v16601_v24 = vld [vmem:[%s20432_s1 + $0x1c8] sm:$0xff]   ;;  %v1303_v32 = vshrl.u32 %v16608_v23, 16  ;;  %v6435_v20 = vld [vmem:[#allocation2 + $0x320] sm:$0xff]  ;;  %v6510_v25 = vld [vmem:[#allocation2 + $0x578] sm:$0xff] }
  0xc3   : > { %8724 = vmatpush1.bf16.msra.mxu0 %v16549_v31  ;;  %1507 = vst [vmem:[#allocation2 + $0x7a8] sm:$0x3f] %v1273_v26  ;;  %v17352_v31 = vld [vmem:[%s20432_s1 + $0x98] sm:$0xff]   ;;  %v6436_v17 = vld [vmem:[#allocation2 + $0x328] sm:$0xff] }
  0xc4   : > { %8725 = vmatprep.subr.bf16.mxu0 %v20441_v1  ;;  %15480 = vmatpush1.bf16.msra.mxu1 %v17352_v31  ;;  %v17360_v26 = vld [vmem:[%s20432_s1 + $0xd8] sm:$0xff]   ;;  %v6459_v31 = vld [vmem:[#allocation2 + $0x3e0] sm:$0xff] }
  0xc5   : > { %15465 = vmatprep.subr.bf16.mxu1 %v20441_v1 }
  0xc6   : > { %8353 = vmatmul.mubr.bf16.gmra.mrb[12].mxu0 %v6369_v34  ;;  %v1277_v34 = vshll.u32 %v16591_v29, 16  ;;  %v1305_v29 = vshll.u32 %v16608_v23, 16 }
  0xc7   : > { %8360 = vmatprep.mubr.bf16.mxu0 %v6380_v39  ;;  %8726 = vmatpush1.bf16.msra.mxu0 %v16562_v35  ;;  %v6355_v35 = vld [vmem:[#allocation2 + $0xa0] sm:$0xff] }
  0xc8   : > { %8727 = vmatprep.subr.bf16.mxu0 %v20441_v1  ;;  %7511 = vmatmul.mubr.bf16.gmra.mrb[8].mxu1 %v6355_v35  ;;  %v1279_v38 = vrot.slane %v1277_v34, 1  ;;  %v17353_v39 = vld [vmem:[%s20432_s1 + $0xa0] sm:$0xff]   ;;  %v1307_v33 = vrot.slane %v1305_v29, 1 }
  0xc9   : > { %15481 = vmatpush1.bf16.msra.mxu1 %v17353_v39  ;;  %7518 = vmatprep.mubr.bf16.mxu1 %v6366_v47  ;;  %v17361_v34 = vld [vmem:[%s20432_s1 + $0xe0] sm:$0xff]   ;;  %v16610_v39 = vld [vmem:[%s17558_s21 + $0x1d0] sm:$0x3f]  }
  0xca   : > { %v1280_v40 = vor.u32 %v1279_v38, %v1275_v37  ;;  %15466 = vmatprep.subr.bf16.mxu1 %v20441_v1  ;;  %v1308_v35 = vor.u32 %v1307_v33, %v1303_v32  ;;  %v16609_v37 = vld [vmem:[%s17558_s21 + $0xf8] sm:$0x3f]   ;;  %v16612_v38 = vld [vmem:[%s17558_s21 + $0xf0] sm:$0x7f]   ;;  %1924 = vst [vmem:[#allocation2 + $0x288] sm:$0x3f] %v16610_v39 }
  0xcb   : > { %8728 = vmatpush1.bf16.msra.mxu0 %v16575_v2  ;;  %v6439_v2 = vld [vmem:[#allocation2 + $0x340] sm:$0xff]  ;;  %5548 = vst [vmem:[#allocation2 + $0x930] sm:$0x3f] %v16609_v37  ;;  %v6445_v32 = vld [vmem:[#allocation2 + $0x370] sm:$0xff]  ;;  %v6520_v37 = vld [vmem:[#allocation2 + $0x5c8] sm:$0xff] }
  0xcc   : > { %8729 = vmatprep.subr.bf16.mxu0 %v20441_v1  ;;  %1508 = vst [vmem:[#allocation2 + $0x7f8] sm:$0x3f] %v1280_v40  ;;  %1512 = vst [vmem:[#allocation2 + $0x938] sm:$0x3f] %v1308_v35  ;;  %v17362_v40 = vld [vmem:[%s20432_s1 + $0xe8] sm:$0xff]   ;;  %v6509_v33 = vld [vmem:[#allocation2 + $0x570] sm:$0xff] }
  0xcd   : > { %15482 = vmatpush1.bf16.msra.mxu1 %v17354_v46  ;;  %v1310_v46 = vshrl.u32 %v16612_v38, 16  ;;  %v16634_v39 = vld [vmem:[%s17558_s21 + $0x118] sm:$0x7f]  }
  0xce   : > { %8361 = vmatmul.mubr.bf16.gmra.mrb[16].mxu0 %v6379_v45  ;;  %v16593_v45 = vld [vmem:[%s17558_s21 + $0x1b0] sm:$0x3f]   ;;  %15467 = vmatprep.subr.bf16.mxu1 %v20441_v1 }
  0xcf   : > { %8368 = vmatprep.mubr.bf16.mxu0 %v6390_v49  ;;  %v1284_v49 = vshll.u32 %v16595_v43, 16  ;;  %8730 = vmatpush1.bf16.msra.mxu0 %v16588_v44  ;;  %1920 = vst [vmem:[#allocation2 + $0x148] sm:$0x3f] %v16593_v45  ;;  %v1312_v43 = vshll.u32 %v16612_v38, 16  ;;  %v6405_v44 = vld [vmem:[#allocation2 + $0x230] sm:$0xff] }
  0xd0   : > { %7519 = vmatmul.mubr.bf16.gmra.mrb[12].mxu1 %v6365_v50  ;;  %8731 = vmatprep.subr.bf16.mxu0 %v20441_v1  ;;  %v6469_v45 = vld [vmem:[#allocation2 + $0x430] sm:$0xff]  ;;  %v6480_v50 = vld [vmem:[#allocation2 + $0x488] sm:$0xff]  ;;  %v16631_v38 = vld [vmem:[%s17558_s21 + $0x120] sm:$0x3f]  }
  0xd1   : > { %v1286_v53 = vrot.slane %v1284_v49, 1  ;;  %15483 = vmatpush1.bf16.msra.mxu1 %v17355_v54  ;;  %v1314_v47 = vrot.slane %v1312_v43, 1  ;;  %v17364_v54 = vld [vmem:[%s20432_s1 + $0xf8] sm:$0xff]   ;;  %5553 = vst [vmem:[#allocation2 + $0xac0] sm:$0x3f] %v16631_v38 }
  0xd2   : > { %15468 = vmatprep.subr.bf16.mxu1 %v20441_v1  ;;  %v16633_v43 = vld [vmem:[%s17558_s21 + $0x68] sm:$0x3f]   ;;  %v16656_v38 = vld [vmem:[%s17558_s21 + $0x140] sm:$0x7f]  }
  0xd3   : > { %v1287_v55 = vor.u32 %v1286_v53, %v1282_v52  ;;  %8732 = vmatpush1.bf16.msra.mxu0 %v16601_v24  ;;  %v1315_v49 = vor.u32 %v1314_v47, %v1310_v46  ;;  %v16617_v52 = vld [vmem:[%s17558_s21 + $0xf8] sm:$0x7f]   ;;  %v6519_v46 = vld [vmem:[#allocation2 + $0x5c0] sm:$0xff]  ;;  %728 = vst [vmem:[#allocation2 + $0x410] sm:$0x3f] %v16633_v43  ;;  %v1345_v47 = vshrl.u32 %v16634_v39, 16 }
  0xd4   : > { %8733 = vmatprep.subr.bf16.mxu0 %v20441_v1  ;;  %v16615_v53 = vld [vmem:[%s17558_s21 + $0x1d8] sm:$0x3f]  }
  0xd5   : > { %1509 = vst [vmem:[#allocation2 + $0x848] sm:$0x3f] %v1287_v55  ;;  %15484 = vmatpush1.bf16.msra.mxu1 %v17356_v60  ;;  %1513 = vst [vmem:[#allocation2 + $0x988] sm:$0x3f] %v1315_v49  ;;  %v6416_v55 = vld [vmem:[#allocation2 + $0x288] sm:$0xff]  ;;  %v1317_v60 = vshrl.u32 %v16617_v52, 16 }
  0xd6   : > { %8369 = vmatmul.mubr.bf16.gmra.mrb[20].mxu0 %v6389_v57  ;;  %v16596_v57 = vld [vmem:[%s17558_s21 + $0xe0] sm:$0x3f]   ;;  %15469 = vmatprep.subr.bf16.mxu1 %v20441_v1  ;;  %1925 = vst [vmem:[#allocation2 + $0x2d8] sm:$0x3f] %v16615_v53 }
  0xd7   : > { %8376 = vmatprep.mubr.bf16.mxu0 %v6400_v61  ;;  %5545 = vst [vmem:[#allocation2 + $0x840] sm:$0x3f] %v16596_v57  ;;  %v6376_v61 = vld [vmem:[#allocation2 + $0x148] sm:$0xff]  ;;  %v1319_v57 = vshll.u32 %v16617_v52, 16  ;;  %8734 = vmatpush1.bf16.msra.mxu0 %v16614_v3  ;;  %v16638_v52 = vld [vmem:[%s17558_s21 + $0x120] sm:$0x7f]  }
  0xd8   : > { %7526 = vmatprep.mubr.bf16.mxu1 %v6376_v61  ;;  %8735 = vmatprep.subr.bf16.mxu0 %v20441_v1  ;;  %v16636_v53 = vld [vmem:[%s17558_s21 + $0x200] sm:$0x3f]  }
  0xd9   : > { %7527 = vmatmul.mubr.bf16.gmra.mrb[16].mxu1 %v6375_v0  ;;  %v1321_v61 = vrot.slane %v1319_v57, 1  ;;  %v16618_v0 = vld [vmem:[%s17558_s21 + $0x108] sm:$0x3f]   ;;  %1930 = vst [vmem:[#allocation2 + $0x468] sm:$0x3f] %v16636_v53 }
  0xda   : > { %15485 = vmatpush1.bf16.msra.mxu1 %v17357_v5  ;;  %7534 = vmatprep.mubr.bf16.mxu1 %v6386_v12  ;;  %5550 = vst [vmem:[#allocation2 + $0x9d0] sm:$0x3f] %v16618_v0  ;;  %v6465_v57 = vld [vmem:[#allocation2 + $0x410] sm:$0xff]  ;;  %v16643_v0 = vld [vmem:[%s17558_s21 + $0x128] sm:$0x7f]  }
  0xdb   : > { %15470 = vmatprep.subr.bf16.mxu1 %v20441_v1  ;;  %v1322_v62 = vor.u32 %v1321_v61, %v1317_v60 }
  0xdd   : > { %1514 = vst [vmem:[#allocation2 + $0x9d8] sm:$0x3f] %v1322_v62  ;;  %v6426_v5 = vld [vmem:[#allocation2 + $0x2d8] sm:$0xff]  ;;  %v6540_v62 = vld [vmem:[#allocation2 + $0x668] sm:$0xff] }
  0xde   : > { %8377 = vmatmul.mubr.bf16.gmra.mrb[24].mxu0 %v6399_v8  ;;  %v16600_v8 = vld [vmem:[%s17558_s21 + $0xe8] sm:$0x3f]   ;;  %15486 = vmatpush1.bf16.msra.mxu1 %v17358_v11 }
  0xdf   : > { %8384 = vmatprep.mubr.bf16.mxu0 %v6410_v13  ;;  %5546 = vst [vmem:[#allocation2 + $0x890] sm:$0x3f] %v16600_v8  ;;  %v16603_v13 = vld [vmem:[%s17558_s21 + $0x30] sm:$0x3f]   ;;  %15471 = vmatprep.subr.bf16.mxu1 %v20441_v1 }
  0xe0   : > { %721 = vst [vmem:[#allocation2 + $0x1e0] sm:$0x3f] %v16603_v13  ;;  %v6500_v13 = vld [vmem:[#allocation2 + $0x528] sm:$0xff] }
  0xe1   : > { %7535 = vmatmul.mubr.bf16.gmra.mrb[20].mxu1 %v6385_v15  ;;  %v16625_v15 = vld [vmem:[%s17558_s21 + $0x108] sm:$0x7f]  }
  0xe2   : > { %15487 = vmatpush1.bf16.msra.mxu1 %v17359_v19  ;;  %v1333_v19 = vshll.u32 %v16625_v15, 16  ;;  %v6476_v3 = vld [vmem:[#allocation2 + $0x468] sm:$0xff] }
  0xe3   : > { %15472 = vmatprep.subr.bf16.mxu1 %v20441_v1 }
  0xe4   : > { %v1335_v23 = vrot.slane %v1333_v19, 1  ;;  %v6485_v19 = vld [vmem:[#allocation2 + $0x4b0] sm:$0xff] }
  0xe6   : > { %8385 = vmatmul.mubr.bf16.gmra.mrb[28].mxu0 %v6409_v22  ;;  %v16605_v22 = vld [vmem:[%s17558_s21 + $0xf0] sm:$0x3f]   ;;  %15488 = vmatpush1.bf16.msra.mxu1 %v17360_v26  ;;  %v16626_v26 = vld [vmem:[%s17558_s21 + $0x118] sm:$0x3f]  }
  0xe7   : > { %8392 = vmatprep.mubr.bf16.mxu0 %v6420_v27  ;;  %5547 = vst [vmem:[#allocation2 + $0x8e0] sm:$0x3f] %v16605_v22  ;;  %v6396_v27 = vld [vmem:[#allocation2 + $0x1e8] sm:$0xff]  ;;  %15473 = vmatprep.subr.bf16.mxu1 %v20441_v1  ;;  %v6395_v30 = vld [vmem:[#allocation2 + $0x1e0] sm:$0xff]  ;;  %v1331_v22 = vshrl.u32 %v16625_v15, 16 }
  0xe8   : > { %7542 = vmatprep.mubr.bf16.mxu1 %v6396_v27  ;;  %v16630_v27 = vld [vmem:[%s17558_s21 + $0x110] sm:$0x7f]   ;;  %5552 = vst [vmem:[#allocation2 + $0xa70] sm:$0x3f] %v16626_v26  ;;  %v16651_v26 = vld [vmem:[%s17558_s21 + $0x138] sm:$0x7f]  }
  0xe9   : > { %7543 = vmatmul.mubr.bf16.gmra.mrb[24].mxu1 %v6395_v30  ;;  %v1336_v24 = vor.u32 %v1335_v23, %v1331_v22  ;;  %v16629_v30 = vld [vmem:[%s17558_s21 + $0x60] sm:$0x3f]   ;;  %v16645_v15 = vld [vmem:[%s17558_s21 + $0x210] sm:$0x3f]  }
  0xea   : > { %15489 = vmatpush1.bf16.msra.mxu1 %v17361_v34  ;;  %727 = vst [vmem:[#allocation2 + $0x3c0] sm:$0x3f] %v16629_v30  ;;  %v1338_v34 = vshrl.u32 %v16630_v27, 16  ;;  %1932 = vst [vmem:[#allocation2 + $0x508] sm:$0x3f] %v16645_v15  ;;  %v1375_v30 = vshll.u32 %v16651_v26, 16 }
  0xeb   : > { %15474 = vmatprep.subr.bf16.mxu1 %v20441_v1  ;;  %1516 = vst [vmem:[#allocation2 + $0xa78] sm:$0x3f] %v1336_v24  ;;  %v6560_v24 = vld [vmem:[#allocation2 + $0x708] sm:$0xff] }
  0xec   : > { %v16668_v15 = vld [vmem:[%s17558_s21 + $0xa8] sm:$0x3f]  }
  0xed   : > { %736 = vst [vmem:[#allocation2 + $0x690] sm:$0x3f] %v16668_v15  ;;  %v16689_v15 = vld [vmem:[%s17558_s21 + $0xd0] sm:$0x3f]  }
  0xee   : > { %8393 = vmatmul.mubr.bf16.gmra.mrb[32].mxu0 %v6419_v36  ;;  %v6470_v36 = vld [vmem:[#allocation2 + $0x438] sm:$0xff]  ;;  %15490 = vmatpush1.bf16.msra.mxu1 %v17362_v40  ;;  %741 = vst [vmem:[#allocation2 + $0x820] sm:$0x3f] %v16689_v15 }
  0xef   : > { %8400 = vmatprep.mubr.bf16.mxu0 %v6430_v41  ;;  %v6406_v41 = vld [vmem:[#allocation2 + $0x238] sm:$0xff]  ;;  %15475 = vmatprep.subr.bf16.mxu1 %v20441_v1 }
  0xf0   : > { %7550 = vmatprep.mubr.bf16.mxu1 %v6406_v41  ;;  %v16627_v40 = vld [vmem:[%s20432_s1 + $0x1d8] sm:$0xff]  }
  0xf1   : > { %7551 = vmatmul.mubr.bf16.gmra.mrb[28].mxu1 %v6405_v44  ;;  %v16632_v41 = vld [vmem:[%s17558_s21 + $0x1f8] sm:$0x3f]   ;;  %v1347_v44 = vshll.u32 %v16634_v39, 16  ;;  %8736 = vmatpush1.bf16.msra.mxu0 %v16627_v40  ;;  %v6496_v28 = vld [vmem:[#allocation2 + $0x508] sm:$0xff]  ;;  %v16654_v39 = vld [vmem:[%s17558_s21 + $0x220] sm:$0x3f]  }
  0xf2   : > { %15491 = vmatpush1.bf16.msra.mxu1 %v17363_v48  ;;  %7558 = vmatprep.mubr.bf16.mxu1 %v6416_v55  ;;  %1929 = vst [vmem:[#allocation2 + $0x418] sm:$0x3f] %v16632_v41  ;;  %v16637_v55 = vld [vmem:[%s17558_s21 + $0x70] sm:$0x3f]   ;;  %1934 = vst [vmem:[#allocation2 + $0x5a8] sm:$0x3f] %v16654_v39 }
  0xf3   : > { %15476 = vmatprep.subr.bf16.mxu1 %v20441_v1  ;;  %v1349_v48 = vrot.slane %v1347_v44, 1  ;;  %8737 = vmatprep.subr.bf16.mxu0 %v20441_v1  ;;  %729 = vst [vmem:[#allocation2 + $0x460] sm:$0x3f] %v16637_v55  ;;  %v16655_v41 = vld [vmem:[%s17558_s21 + $0x90] sm:$0x3f]  }
  0xf4   : > { %v6569_v44 = vld [vmem:[#allocation2 + $0x750] sm:$0xff]  ;;  %733 = vst [vmem:[#allocation2 + $0x5a0] sm:$0x3f] %v16655_v41 }
  0xf5   : > { %v1350_v49 = vor.u32 %v1349_v48, %v1345_v47  ;;  %8738 = vmatpush1.bf16.msra.mxu0 %v16640_v14  ;;  %v6580_v48 = vld [vmem:[#allocation2 + $0x7a8] sm:$0xff] }
  0xf6   : > { %8401 = vmatmul.mubr.bf16.gmra.mrb[36].mxu0 %v6429_v51  ;;  %v16613_v51 = vld [vmem:[%s17558_s21 + $0x100] sm:$0x3f]   ;;  %15492 = vmatpush1.bf16.msra.mxu1 %v17364_v54 }
  0xf7   : > { %8408 = vmatprep.mubr.bf16.mxu0 %v6440_v56  ;;  %5549 = vst [vmem:[#allocation2 + $0x980] sm:$0x3f] %v16613_v51  ;;  %v16616_v56 = vld [vmem:[%s17558_s21 + $0x48] sm:$0x3f]   ;;  %1518 = vst [vmem:[#allocation2 + $0xb18] sm:$0x3f] %v1350_v49  ;;  %8739 = vmatprep.subr.bf16.mxu0 %v20441_v1 }
  0xf8   : > { %724 = vst [vmem:[#allocation2 + $0x2d0] sm:$0x3f] %v16616_v56  ;;  %v16635_v51 = vld [vmem:[%s17558_s21 + $0x128] sm:$0x3f]   ;;  %v1354_v56 = vshll.u32 %v16638_v52, 16 }
  0xf9   : > { %7559 = vmatmul.mubr.bf16.gmra.mrb[32].mxu1 %v6415_v58  ;;  %5554 = vst [vmem:[#allocation2 + $0xb10] sm:$0x3f] %v16635_v51  ;;  %v6466_v54 = vld [vmem:[#allocation2 + $0x418] sm:$0xff]  ;;  %v6529_v58 = vld [vmem:[#allocation2 + $0x610] sm:$0xff]  ;;  %v16653_v51 = vld [vmem:[%s20432_s1 + $0x1e8] sm:$0xff]  }
  0xfa   : > { %7566 = vmatprep.mubr.bf16.mxu1 %v6426_v5  ;;  %v1356_v60 = vrot.slane %v1354_v56, 1  ;;  %v1361_v5 = vshll.u32 %v16643_v0, 16  ;;  %v6475_v6 = vld [vmem:[#allocation2 + $0x460] sm:$0xff]  ;;  %v16657_v49 = vld [vmem:[%s17558_s21 + $0x150] sm:$0x3f]   ;;  %v6516_v53 = vld [vmem:[#allocation2 + $0x5a8] sm:$0xff]  ;;  %8740 = vmatpush1.bf16.msra.mxu0 %v16653_v51 }
  0xfb   : > { %5559 = vst [vmem:[#allocation2 + $0xca0] sm:$0x3f] %v16657_v49  ;;  %v6515_v56 = vld [vmem:[#allocation2 + $0x5a0] sm:$0xff]  ;;  %8741 = vmatprep.subr.bf16.mxu0 %v20441_v1  ;;  %v16682_v49 = vld [vmem:[%s17558_s21 + $0x170] sm:$0x7f]  }
  0xfe   : > { %8409 = vmatmul.mubr.bf16.gmra.mrb[40].mxu0 %v6439_v2  ;;  %v16621_v2 = vld [vmem:[%s17558_s21 + $0x100] sm:$0x7f]  }
  0xff   : > { %8416 = vmatprep.mubr.bf16.mxu0 %v6450_v7  ;;  %v1326_v7 = vshll.u32 %v16621_v2, 16  ;;  %v6425_v8 = vld [vmem:[#allocation2 + $0x2d0] sm:$0xff]  ;;  %v1324_v10 = vshrl.u32 %v16621_v2, 16  ;;  %v16641_v2 = vld [vmem:[%s17558_s21 + $0x208] sm:$0x3f]  }
 0x100   : > { %1931 = vst [vmem:[#allocation2 + $0x4b8] sm:$0x3f] %v16641_v2 }
 0x101   : > { %7567 = vmatmul.mubr.bf16.gmra.mrb[36].mxu1 %v6425_v8  ;;  %v1328_v11 = vrot.slane %v1326_v7, 1  ;;  %v6539_v7 = vld [vmem:[#allocation2 + $0x660] sm:$0xff]  ;;  %v1359_v8 = vshrl.u32 %v16643_v0, 16  ;;  %v16662_v0 = vld [vmem:[%s17558_s21 + $0x230] sm:$0x3f]  }
 0x102   : > { %7574 = vmatprep.mubr.bf16.mxu1 %v6436_v17  ;;  %v16646_v17 = vld [vmem:[%s17558_s21 + $0x80] sm:$0x3f]   ;;  %1936 = vst [vmem:[#allocation2 + $0x648] sm:$0x3f] %v16662_v0 }
 0x103   : > { %v1329_v12 = vor.u32 %v1328_v11, %v1324_v10  ;;  %v6550_v11 = vld [vmem:[#allocation2 + $0x6b8] sm:$0xff]  ;;  %731 = vst [vmem:[#allocation2 + $0x500] sm:$0x3f] %v16646_v17 }
 0x105   : > { %1515 = vst [vmem:[#allocation2 + $0xa28] sm:$0x3f] %v1329_v12  ;;  %v16644_v12 = vld [vmem:[%s17558_s21 + $0x138] sm:$0x3f]  }
 0x106   : > { %8417 = vmatmul.mubr.bf16.gmra.mrb[44].mxu0 %v6449_v16  ;;  %v16623_v16 = vld [vmem:[%s17558_s21 + $0x1e8] sm:$0x3f]   ;;  %5556 = vst [vmem:[#allocation2 + $0xbb0] sm:$0x3f] %v16644_v12  ;;  %v16669_v12 = vld [vmem:[%s17558_s21 + $0x158] sm:$0x7f]  }
 0x107   : > { %8424 = vmatprep.mubr.bf16.mxu0 %v6460_v21  ;;  %1927 = vst [vmem:[#allocation2 + $0x378] sm:$0x3f] %v16623_v16  ;;  %v6499_v21 = vld [vmem:[#allocation2 + $0x520] sm:$0xff]  ;;  %v6486_v16 = vld [vmem:[#allocation2 + $0x4b8] sm:$0xff] }
 0x109   : > { %7575 = vmatmul.mubr.bf16.gmra.mrb[40].mxu1 %v6435_v20  ;;  %v6549_v20 = vld [vmem:[#allocation2 + $0x6b0] sm:$0xff]  ;;  %v6536_v14 = vld [vmem:[#allocation2 + $0x648] sm:$0xff] }
 0x10e   : > { %8425 = vmatmul.mubr.bf16.gmra.mrb[48].mxu0 %v6459_v31  ;;  %v6446_v29 = vld [vmem:[#allocation2 + $0x378] sm:$0xff]  ;;  %v1340_v31 = vshll.u32 %v16630_v27, 16 }
 0x10f   : > { %8432 = vmatprep.mubr.bf16.mxu0 %v6470_v36  ;;  %7582 = vmatprep.mubr.bf16.mxu1 %v6446_v29  ;;  %v16649_v27 = vld [vmem:[%s17558_s21 + $0x218] sm:$0x3f]   ;;  %v16650_v29 = vld [vmem:[%s17558_s21 + $0x88] sm:$0x3f]  }
 0x110   : > { %v1342_v35 = vrot.slane %v1340_v31, 1  ;;  %v6495_v31 = vld [vmem:[#allocation2 + $0x500] sm:$0xff]  ;;  %1933 = vst [vmem:[#allocation2 + $0x558] sm:$0x3f] %v16649_v27  ;;  %732 = vst [vmem:[#allocation2 + $0x550] sm:$0x3f] %v16650_v29 }
 0x111   : > { %7583 = vmatmul.mubr.bf16.gmra.mrb[44].mxu1 %v6445_v32  ;;  %v6559_v32 = vld [vmem:[#allocation2 + $0x700] sm:$0xff] }
 0x112   : > { %v1343_v36 = vor.u32 %v1342_v35, %v1338_v34  ;;  %7590 = vmatprep.mubr.bf16.mxu1 %v6456_v42  ;;  %v1377_v34 = vrot.slane %v1375_v30, 1  ;;  %v1382_v42 = vshll.u32 %v16656_v38, 16  ;;  %v6545_v30 = vld [vmem:[#allocation2 + $0x690] sm:$0xff] }
 0x114   : > { %1517 = vst [vmem:[#allocation2 + $0xac8] sm:$0x3f] %v1343_v36  ;;  %v6570_v36 = vld [vmem:[#allocation2 + $0x758] sm:$0xff] }
 0x116   : > { %8433 = vmatmul.mubr.bf16.gmra.mrb[52].mxu0 %v6469_v45  ;;  %v6455_v45 = vld [vmem:[#allocation2 + $0x3c0] sm:$0xff] }
 0x117   : > { %8440 = vmatprep.mubr.bf16.mxu0 %v6480_v50  ;;  %v6530_v50 = vld [vmem:[#allocation2 + $0x618] sm:$0xff]  ;;  %v6505_v43 = vld [vmem:[#allocation2 + $0x550] sm:$0xff] }
 0x118   : > { %v6506_v40 = vld [vmem:[#allocation2 + $0x558] sm:$0xff] }
 0x119   : > { %7591 = vmatmul.mubr.bf16.gmra.mrb[48].mxu1 %v6455_v45  ;;  %v1380_v45 = vshrl.u32 %v16656_v38, 16  ;;  %v16675_v38 = vld [vmem:[%s17558_s21 + $0x248] sm:$0x3f]  }
 0x11a   : > { %7598 = vmatprep.mubr.bf16.mxu1 %v6466_v54  ;;  %v16659_v54 = vld [vmem:[%s17558_s21 + $0x98] sm:$0x3f]   ;;  %1939 = vst [vmem:[#allocation2 + $0x738] sm:$0x3f] %v16675_v38 }
 0x11b   : > { %734 = vst [vmem:[#allocation2 + $0x5f0] sm:$0x3f] %v16659_v54 }
 0x11e   : > { %8441 = vmatmul.mubr.bf16.gmra.mrb[56].mxu0 %v6479_v59  ;;  %v1352_v59 = vshrl.u32 %v16638_v52, 16  ;;  %v16658_v52 = vld [vmem:[%s17558_s21 + $0x228] sm:$0x3f]  }
 0x11f   : > { %8448 = vmatprep.mubr.bf16.mxu0 %v6490_v63  ;;  %v16639_v63 = vld [vmem:[%s17558_s21 + $0x130] sm:$0x3f]   ;;  %1935 = vst [vmem:[#allocation2 + $0x5f8] sm:$0x3f] %v16658_v52  ;;  %v16681_v52 = vld [vmem:[%s17558_s21 + $0xc0] sm:$0x3f]  }
 0x120   : > { %v1357_v61 = vor.u32 %v1356_v60, %v1352_v59  ;;  %5555 = vst [vmem:[#allocation2 + $0xb60] sm:$0x3f] %v16639_v63  ;;  %v16664_v63 = vld [vmem:[%s17558_s21 + $0x150] sm:$0x7f]   ;;  %739 = vst [vmem:[#allocation2 + $0x780] sm:$0x3f] %v16681_v52 }
 0x121   : > { %7599 = vmatmul.mubr.bf16.gmra.mrb[52].mxu1 %v6465_v57  ;;  %v6579_v57 = vld [vmem:[#allocation2 + $0x7a0] sm:$0xff]  ;;  %v1396_v4 = vshll.u32 %v16664_v63, 16  ;;  %v6566_v51 = vld [vmem:[#allocation2 + $0x738] sm:$0xff] }
 0x122   : > { %1519 = vst [vmem:[#allocation2 + $0xb68] sm:$0x3f] %v1357_v61  ;;  %7606 = vmatprep.mubr.bf16.mxu1 %v6476_v3  ;;  %v6590_v61 = vld [vmem:[#allocation2 + $0x7f8] sm:$0xff]  ;;  %v16663_v3 = vld [vmem:[%s17558_s21 + $0xa0] sm:$0x3f]  }
 0x123   : > { %735 = vst [vmem:[#allocation2 + $0x640] sm:$0x3f] %v16663_v3 }
 0x126   : > { %8449 = vmatmul.mubr.bf16.gmra.mrb[60].mxu0 %v6489_v9  ;;  %v1363_v9 = vrot.slane %v1361_v5, 1  ;;  %v6526_v2 = vld [vmem:[#allocation2 + $0x5f8] sm:$0xff]  ;;  %v6525_v5 = vld [vmem:[#allocation2 + $0x5f0] sm:$0xff] }
 0x127   : > { %8456 = vmatprep.mubr.bf16.mxu0 %v6500_v13  ;;  %v16647_v13 = vld [vmem:[%s17558_s21 + $0x130] sm:$0x7f]  }
 0x128   : > { %v1364_v10 = vor.u32 %v1363_v9, %v1359_v8  ;;  %v1368_v18 = vshll.u32 %v16647_v13, 16  ;;  %v1398_v8 = vrot.slane %v1396_v4, 1  ;;  %v6575_v4 = vld [vmem:[#allocation2 + $0x780] sm:$0xff] }
 0x129   : > { %7607 = vmatmul.mubr.bf16.gmra.mrb[56].mxu1 %v6475_v6  ;;  %v6589_v6 = vld [vmem:[#allocation2 + $0x7f0] sm:$0xff] }
 0x12a   : > { %1520 = vst [vmem:[#allocation2 + $0xbb8] sm:$0x3f] %v1364_v10  ;;  %7614 = vmatprep.mubr.bf16.mxu1 %v6486_v16  ;;  %v1370_v22 = vrot.slane %v1368_v18, 1  ;;  %v6600_v10 = vld [vmem:[#allocation2 + $0x848] sm:$0xff]  ;;  %v1403_v16 = vshll.u32 %v16669_v12, 16  ;;  %v6535_v17 = vld [vmem:[#allocation2 + $0x640] sm:$0xff] }
 0x12b   : > { %v6599_v18 = vld [vmem:[#allocation2 + $0x840] sm:$0xff] }
 0x12e   : > { %8457 = vmatmul.mubr.bf16.gmra.mrb[64].mxu0 %v6499_v21  ;;  %v1366_v21 = vshrl.u32 %v16647_v13, 16  ;;  %v16667_v13 = vld [vmem:[%s17558_s21 + $0x238] sm:$0x3f]  }
 0x12f   : > { %8464 = vmatprep.mubr.bf16.mxu0 %v6510_v25  ;;  %v16648_v25 = vld [vmem:[%s17558_s21 + $0x140] sm:$0x3f]   ;;  %1937 = vst [vmem:[#allocation2 + $0x698] sm:$0x3f] %v16667_v13  ;;  %v16691_v13 = vld [vmem:[%s17558_s21 + $0x190] sm:$0x7f]  }
 0x130   : > { %v1371_v23 = vor.u32 %v1370_v22, %v1366_v21  ;;  %5557 = vst [vmem:[#allocation2 + $0xc00] sm:$0x3f] %v16648_v25  ;;  %v6610_v22 = vld [vmem:[#allocation2 + $0x898] sm:$0xff]  ;;  %v16666_v25 = vld [vmem:[%s20432_s1 + $0x1f0] sm:$0xff]  }
 0x131   : > { %7615 = vmatmul.mubr.bf16.gmra.mrb[60].mxu1 %v6485_v19  ;;  %v1401_v19 = vshrl.u32 %v16669_v12, 16  ;;  %8742 = vmatpush1.bf16.msra.mxu0 %v16666_v25  ;;  %v16688_v12 = vld [vmem:[%s17558_s21 + $0x260] sm:$0x3f]   ;;  %v6660_v25 = vld [vmem:[#allocation2 + $0xa28] sm:$0xff] }
 0x132   : > { %1521 = vst [vmem:[#allocation2 + $0xc08] sm:$0x3f] %v1371_v23  ;;  %7622 = vmatprep.mubr.bf16.mxu1 %v6496_v28  ;;  %v16670_v23 = vld [vmem:[%s17558_s21 + $0x168] sm:$0x3f]   ;;  %v16672_v28 = vld [vmem:[%s17558_s21 + $0xb0] sm:$0x3f]   ;;  %8743 = vmatprep.subr.bf16.mxu0 %v20441_v1 }
 0x133   : > { %5562 = vst [vmem:[#allocation2 + $0xd90] sm:$0x3f] %v16670_v23  ;;  %737 = vst [vmem:[#allocation2 + $0x6e0] sm:$0x3f] %v16672_v28  ;;  %v16693_v28 = vld [vmem:[%s17558_s21 + $0x268] sm:$0x3f]  }
 0x134   : > { %1942 = vst [vmem:[#allocation2 + $0x828] sm:$0x3f] %v16688_v12  ;;  %1943 = vst [vmem:[#allocation2 + $0x878] sm:$0x3f] %v16693_v28  ;;  %v16708_v12 = vld [vmem:[%s17558_s21 + $0x28] sm:$0x7f]  }
 0x135   : > { %v16712_v28 = vld [vmem:[%s17558_s21 + $0x30] sm:$0x7f]  }
 0x136   : > { %8465 = vmatmul.mubr.bf16.gmra.mrb[68].mxu0 %v6509_v33  ;;  %v1373_v33 = vshrl.u32 %v16651_v26, 16  ;;  %v16671_v26 = vld [vmem:[%s17558_s21 + $0x240] sm:$0x3f]   ;;  %v6546_v27 = vld [vmem:[#allocation2 + $0x698] sm:$0xff] }
 0x137   : > { %8472 = vmatprep.mubr.bf16.mxu0 %v6520_v37  ;;  %v16652_v37 = vld [vmem:[%s17558_s21 + $0x148] sm:$0x3f]   ;;  %1938 = vst [vmem:[#allocation2 + $0x6e8] sm:$0x3f] %v16671_v26 }
 0x138   : > { %v1378_v35 = vor.u32 %v1377_v34, %v1373_v33  ;;  %5558 = vst [vmem:[#allocation2 + $0xc50] sm:$0x3f] %v16652_v37  ;;  %v16677_v37 = vld [vmem:[%s17558_s21 + $0x168] sm:$0x7f]  }
 0x139   : > { %7623 = vmatmul.mubr.bf16.gmra.mrb[64].mxu1 %v6495_v31  ;;  %v6609_v31 = vld [vmem:[#allocation2 + $0x890] sm:$0xff]  ;;  %v1417_v41 = vshll.u32 %v16677_v37, 16 }
 0x13a   : > { %1522 = vst [vmem:[#allocation2 + $0xc58] sm:$0x3f] %v1378_v35  ;;  %7630 = vmatprep.mubr.bf16.mxu1 %v6506_v40  ;;  %v6620_v35 = vld [vmem:[#allocation2 + $0x8e8] sm:$0xff]  ;;  %v16676_v40 = vld [vmem:[%s17558_s21 + $0xb8] sm:$0x3f]  }
 0x13b   : > { %738 = vst [vmem:[#allocation2 + $0x730] sm:$0x3f] %v16676_v40 }
 0x13e   : > { %8473 = vmatmul.mubr.bf16.gmra.mrb[72].mxu0 %v6519_v46  ;;  %v1384_v46 = vrot.slane %v1382_v42, 1  ;;  %v6556_v39 = vld [vmem:[#allocation2 + $0x6e8] sm:$0xff]  ;;  %v6555_v42 = vld [vmem:[#allocation2 + $0x6e0] sm:$0xff] }
 0x13f   : > { %8480 = vmatprep.mubr.bf16.mxu0 %v6530_v50  ;;  %v16660_v50 = vld [vmem:[%s17558_s21 + $0x148] sm:$0x7f]  }
 0x140   : > { %v1385_v47 = vor.u32 %v1384_v46, %v1380_v45  ;;  %v1389_v55 = vshll.u32 %v16660_v50, 16  ;;  %v1419_v45 = vrot.slane %v1417_v41, 1  ;;  %v6670_v41 = vld [vmem:[#allocation2 + $0xa78] sm:$0xff] }
 0x141   : > { %7631 = vmatmul.mubr.bf16.gmra.mrb[68].mxu1 %v6505_v43  ;;  %v6619_v43 = vld [vmem:[#allocation2 + $0x8e0] sm:$0xff] }
 0x142   : > { %1523 = vst [vmem:[#allocation2 + $0xca8] sm:$0x3f] %v1385_v47  ;;  %7638 = vmatprep.mubr.bf16.mxu1 %v6516_v53  ;;  %v1391_v59 = vrot.slane %v1389_v55, 1  ;;  %v6630_v47 = vld [vmem:[#allocation2 + $0x938] sm:$0xff]  ;;  %v1424_v53 = vshll.u32 %v16682_v49, 16  ;;  %v6565_v54 = vld [vmem:[#allocation2 + $0x730] sm:$0xff] }
 0x143   : > { %v6629_v55 = vld [vmem:[#allocation2 + $0x930] sm:$0xff] }
 0x146   : > { %8481 = vmatmul.mubr.bf16.gmra.mrb[76].mxu0 %v6529_v58  ;;  %v1387_v58 = vshrl.u32 %v16660_v50, 16  ;;  %v16680_v50 = vld [vmem:[%s17558_s21 + $0x250] sm:$0x3f]  }
 0x147   : > { %8488 = vmatprep.mubr.bf16.mxu0 %v6540_v62  ;;  %v16661_v62 = vld [vmem:[%s17558_s21 + $0x158] sm:$0x3f]   ;;  %1940 = vst [vmem:[#allocation2 + $0x788] sm:$0x3f] %v16680_v50 }
 0x148   : > { %v1392_v60 = vor.u32 %v1391_v59, %v1387_v58  ;;  %5560 = vst [vmem:[#allocation2 + $0xcf0] sm:$0x3f] %v16661_v62  ;;  %v6640_v59 = vld [vmem:[#allocation2 + $0x988] sm:$0xff]  ;;  %v16679_v62 = vld [vmem:[%s20432_s1 + $0x1f8] sm:$0xff]  }
 0x149   : > { %7639 = vmatmul.mubr.bf16.gmra.mrb[72].mxu1 %v6515_v56  ;;  %v1422_v56 = vshrl.u32 %v16682_v49, 16  ;;  %8744 = vmatpush1.bf16.msra.mxu0 %v16679_v62 }
 0x14a   : > { %1524 = vst [vmem:[#allocation2 + $0xcf8] sm:$0x3f] %v1392_v60  ;;  %7646 = vmatprep.mubr.bf16.mxu1 %v6526_v2  ;;  %v16683_v60 = vld [vmem:[%s17558_s21 + $0x180] sm:$0x3f]   ;;  %v16685_v2 = vld [vmem:[%s17558_s21 + $0xc8] sm:$0x3f]   ;;  %9130 = vmatprep.subr.bf16.mxu0 %v20441_v1 }
 0x14b   : > { %5565 = vst [vmem:[#allocation2 + $0xe80] sm:$0x3f] %v16683_v60  ;;  %740 = vst [vmem:[#allocation2 + $0x7d0] sm:$0x3f] %v16685_v2  ;;  %v16701_v60 = vld [vmem:[%s17558_s21 + $0x278] sm:$0x3f]  }
 0x14c   : > { %1945 = vst [vmem:[#allocation2 + $0x918] sm:$0x3f] %v16701_v60  ;;  %v16721_v60 = vld [vmem:[%s17558_s21 + $0x40] sm:$0x7f]  }
 0x14e   : > { %8489 = vmatmul.mubr.bf16.gmra.mrb[80].mxu0 %v6539_v7  ;;  %v1394_v7 = vshrl.u32 %v16664_v63, 16  ;;  %v16684_v63 = vld [vmem:[%s17558_s21 + $0x258] sm:$0x3f]   ;;  %v6576_v0 = vld [vmem:[#allocation2 + $0x788] sm:$0xff] }
 0x14f   : > { %8496 = vmatprep.mubr.bf16.mxu0 %v6550_v11  ;;  %v16665_v11 = vld [vmem:[%s17558_s21 + $0x160] sm:$0x3f]   ;;  %1941 = vst [vmem:[#allocation2 + $0x7d8] sm:$0x3f] %v16684_v63  ;;  %v16702_v63 = vld [vmem:[%s17558_s21 + $0xe8] sm:$0x3f]  }
 0x150   : > { %v1399_v9 = vor.u32 %v1398_v8, %v1394_v7  ;;  %5561 = vst [vmem:[#allocation2 + $0xd40] sm:$0x3f] %v16665_v11  ;;  %v16690_v11 = vld [vmem:[%s17558_s21 + $0x8] sm:$0x7f]   ;;  %744 = vst [vmem:[#allocation2 + $0x910] sm:$0x3f] %v16702_v63 }
 0x151   : > { %7647 = vmatmul.mubr.bf16.gmra.mrb[76].mxu1 %v6525_v5  ;;  %v6639_v5 = vld [vmem:[#allocation2 + $0x980] sm:$0xff] }
 0x152   : > { %1525 = vst [vmem:[#allocation2 + $0xd48] sm:$0x3f] %v1399_v9  ;;  %7654 = vmatprep.mubr.bf16.mxu1 %v6536_v14  ;;  %v6650_v9 = vld [vmem:[#allocation2 + $0x9d8] sm:$0xff] }
 0x153   : > { %v6626_v15 = vld [vmem:[#allocation2 + $0x918] sm:$0xff] }
 0x156   : > { %8497 = vmatmul.mubr.bf16.gmra.mrb[84].mxu0 %v6549_v20  ;;  %v1405_v20 = vrot.slane %v1403_v16, 1  ;;  %v6586_v14 = vld [vmem:[#allocation2 + $0x7d8] sm:$0xff]  ;;  %v3504_v16 = vshll.u32 %v16690_v11, 16 }
 0x157   : > { %8504 = vmatprep.mubr.bf16.mxu0 %v6560_v24  ;;  %v16673_v24 = vld [vmem:[%s17558_s21 + $0x160] sm:$0x7f]  }
 0x158   : > { %v1406_v21 = vor.u32 %v1405_v20, %v1401_v19  ;;  %v1410_v29 = vshll.u32 %v16673_v24, 16  ;;  %v6649_v19 = vld [vmem:[#allocation2 + $0x9d0] sm:$0xff]  ;;  %v3502_v20 = vshrl.u32 %v16690_v11, 16 }
 0x159   : > { %7655 = vmatmul.mubr.bf16.gmra.mrb[80].mxu1 %v6535_v17  ;;  %v6585_v17 = vld [vmem:[#allocation2 + $0x7d0] sm:$0xff] }
 0x15a   : > { %1526 = vst [vmem:[#allocation2 + $0xd98] sm:$0x3f] %v1406_v21  ;;  %7662 = vmatprep.mubr.bf16.mxu1 %v6546_v27  ;;  %v1412_v33 = vrot.slane %v1410_v29, 1  ;;  %v3506_v21 = vrot.slane %v3504_v16, 1  ;;  %v16695_v27 = vld [vmem:[%s17558_s21 + $0x10] sm:$0x7f]  }
 0x15b   : > { %v16696_v29 = vld [vmem:[%s17558_s21 + $0x198] sm:$0x7f]   ;;  %v16707_v16 = vld [vmem:[%s17558_s21 + $0xf0] sm:$0x3f]  }
 0x15c   : > { %v2308_v38 = vshrl.u32 %v16696_v29, 16  ;;  %745 = vst [vmem:[#allocation2 + $0x960] sm:$0x3f] %v16707_v16 }
 0x15e   : > { %8505 = vmatmul.mubr.bf16.gmra.mrb[88].mxu0 %v6559_v32  ;;  %v1408_v32 = vshrl.u32 %v16673_v24, 16  ;;  %v3507_v24 = vor.u32 %v3506_v21, %v3502_v20  ;;  %v6689_v20 = vld [vmem:[#allocation2 + $0xb10] sm:$0xff]  ;;  %v3530_v21 = vshrl.u32 %v16708_v12, 16 }
 0x15f   : > { %8512 = vmatprep.mubr.bf16.mxu0 %v6570_v36  ;;  %v16674_v36 = vld [vmem:[%s17558_s21 + $0x170] sm:$0x3f]  }
 0x160   : > { %v1413_v34 = vor.u32 %v1412_v33, %v1408_v32  ;;  %5563 = vst [vmem:[#allocation2 + $0xde0] sm:$0x3f] %v16674_v36  ;;  %3885 = vst [vmem:[#allocation2 + $0x38] sm:$0x3f] %v3507_v24  ;;  %v3511_v32 = vshll.u32 %v16695_v27, 16  ;;  %v6595_v33 = vld [vmem:[#allocation2 + $0x820] sm:$0xff] }
 0x161   : > { %7663 = vmatmul.mubr.bf16.gmra.mrb[84].mxu1 %v6545_v30  ;;  %v6596_v30 = vld [vmem:[#allocation2 + $0x828] sm:$0xff]  ;;  %v3509_v36 = vshrl.u32 %v16695_v27, 16 }
 0x162   : > { %1527 = vst [vmem:[#allocation2 + $0xde8] sm:$0x3f] %v1413_v34  ;;  %7670 = vmatprep.mubr.bf16.mxu1 %v6556_v39  ;;  %v2310_v34 = vshll.u32 %v16696_v29, 16  ;;  %v16710_v29 = vld [vmem:[%s17558_s21 + $0x288] sm:$0x3f]  }
 0x163   : > { %1947 = vst [vmem:[#allocation2 + $0x9b8] sm:$0x3f] %v16710_v29  ;;  %v16729_v29 = vld [vmem:[%s17558_s21 + $0x50] sm:$0x7f]  }
 0x164   : > { %v2312_v39 = vrot.slane %v2310_v34, 1  ;;  %v6635_v34 = vld [vmem:[#allocation2 + $0x960] sm:$0xff] }
 0x166   : > { %8513 = vmatmul.mubr.bf16.gmra.mrb[92].mxu0 %v6569_v44  ;;  %v1415_v44 = vshrl.u32 %v16677_v37, 16  ;;  %v3513_v37 = vrot.slane %v3511_v32, 1  ;;  %v16711_v32 = vld [vmem:[%s17558_s21 + $0xf8] sm:$0x3f]  }
 0x167   : > { %8520 = vmatprep.mubr.bf16.mxu0 %v6580_v48  ;;  %v16678_v48 = vld [vmem:[%s17558_s21 + $0x178] sm:$0x3f]   ;;  %746 = vst [vmem:[#allocation2 + $0x9b0] sm:$0x3f] %v16711_v32 }
 0x168   : > { %v1420_v46 = vor.u32 %v1419_v45, %v1415_v44  ;;  %5564 = vst [vmem:[#allocation2 + $0xe30] sm:$0x3f] %v16678_v48  ;;  %v3514_v40 = vor.u32 %v3513_v37, %v3509_v36  ;;  %v16697_v44 = vld [vmem:[%s17558_s21 + $0x270] sm:$0x3f]   ;;  %v16700_v45 = vld [vmem:[%s17558_s21 + $0x1a0] sm:$0x7f]  }
 0x169   : > { %7671 = vmatmul.mubr.bf16.gmra.mrb[88].mxu1 %v6555_v42  ;;  %v2313_v42 = vor.u32 %v2312_v39, %v2308_v38  ;;  %1944 = vst [vmem:[#allocation2 + $0x8c8] sm:$0x3f] %v16697_v44  ;;  %v2317_v50 = vshll.u32 %v16700_v45, 16  ;;  %v6699_v36 = vld [vmem:[#allocation2 + $0xb60] sm:$0xff]  ;;  %v3537_v37 = vshrl.u32 %v16712_v28, 16 }
 0x16a   : > { %1528 = vst [vmem:[#allocation2 + $0xe38] sm:$0x3f] %v1420_v46  ;;  %7678 = vmatprep.mubr.bf16.mxu1 %v6566_v51  ;;  %3886 = vst [vmem:[#allocation2 + $0x88] sm:$0x3f] %v3514_v40  ;;  %v6606_v46 = vld [vmem:[#allocation2 + $0x878] sm:$0xff]  ;;  %v6669_v51 = vld [vmem:[#allocation2 + $0xa70] sm:$0xff] }
 0x16b   : > { %2685 = vst [vmem:[#allocation2 + $0x80] sm:$0x3f] %v2313_v42  ;;  %v6710_v42 = vld [vmem:[#allocation2 + $0xbb8] sm:$0xff] }
 0x16c   : > { %v16716_v44 = vld [vmem:[%s17558_s21 + $0x38] sm:$0x7f]  }
 0x16e   : > { %8521 = vmatmul.mubr.bf16.gmra.mrb[96].mxu0 %v6579_v57  ;;  %v1426_v57 = vrot.slane %v1424_v53, 1 }
 0x16f   : > { %8528 = vmatprep.mubr.bf16.mxu0 %v6590_v61  ;;  %v16686_v61 = vld [vmem:[%s17558_s21 + $0x178] sm:$0x7f]  }
 0x170   : > { %v1427_v58 = vor.u32 %v1426_v57, %v1422_v56  ;;  %v1431_v3 = vshll.u32 %v16686_v61, 16  ;;  %v6680_v57 = vld [vmem:[#allocation2 + $0xac8] sm:$0xff] }
 0x171   : > { %7679 = vmatmul.mubr.bf16.gmra.mrb[92].mxu1 %v6565_v54  ;;  %v2315_v54 = vshrl.u32 %v16700_v45, 16  ;;  %v6616_v62 = vld [vmem:[#allocation2 + $0x8c8] sm:$0xff]  ;;  %v16714_v45 = vld [vmem:[%s17558_s21 + $0x290] sm:$0x3f]  }
 0x172   : > { %1529 = vst [vmem:[#allocation2 + $0xe88] sm:$0x3f] %v1427_v58  ;;  %7686 = vmatprep.mubr.bf16.mxu1 %v6576_v0  ;;  %v1433_v7 = vrot.slane %v1431_v3, 1  ;;  %1948 = vst [vmem:[#allocation2 + $0xa08] sm:$0x3f] %v16714_v45 }
 0x173   : > { %v16734_v45 = vld [vmem:[%s17558_s21 + $0x58] sm:$0x7f]  }
 0x176   : > { %8529 = vmatmul.mubr.bf16.gmra.mrb[100].mxu0 %v6589_v6  ;;  %v1429_v6 = vshrl.u32 %v16686_v61, 16  ;;  %v16704_v61 = vld [vmem:[%s17558_s21 + $0x1a8] sm:$0x7f]  }
 0x177   : > { %8536 = vmatprep.mubr.bf16.mxu0 %v6600_v10  ;;  %v16687_v10 = vld [vmem:[%s17558_s21 + $0x188] sm:$0x3f]   ;;  %v2324_v3 = vshll.u32 %v16704_v61, 16 }
 0x178   : > { %v1434_v8 = vor.u32 %v1433_v7, %v1429_v6  ;;  %5566 = vst [vmem:[#allocation2 + $0xed0] sm:$0x3f] %v16687_v10  ;;  %v2322_v7 = vshrl.u32 %v16704_v61, 16  ;;  %v6690_v10 = vld [vmem:[#allocation2 + $0xb18] sm:$0xff] }
 0x179   : > { %7687 = vmatmul.mubr.bf16.gmra.mrb[96].mxu1 %v6575_v4  ;;  %v6679_v4 = vld [vmem:[#allocation2 + $0xac0] sm:$0xff]  ;;  %v16719_v61 = vld [vmem:[%s17558_s21 + $0x298] sm:$0x3f]   ;;  %v6656_v63 = vld [vmem:[#allocation2 + $0xa08] sm:$0xff] }
 0x17a   : > { %1530 = vst [vmem:[#allocation2 + $0xed8] sm:$0x3f] %v1434_v8  ;;  %7694 = vmatprep.mubr.bf16.mxu1 %v6586_v14  ;;  %v2326_v8 = vrot.slane %v2324_v3, 1  ;;  %v16709_v14 = vld [vmem:[%s17558_s21 + $0x1b0] sm:$0x7f]  }
 0x17b   : > { %1949 = vst [vmem:[#allocation2 + $0xa58] sm:$0x3f] %v16719_v61  ;;  %v16738_v61 = vld [vmem:[%s17558_s21 + $0x60] sm:$0x7f]  }
 0x17c   : > { %v2327_v11 = vor.u32 %v2326_v8, %v2322_v7 }
 0x17e   : > { %8537 = vmatmul.mubr.bf16.gmra.mrb[104].mxu0 %v6599_v18  ;;  %v2303_v18 = vshll.u32 %v16691_v13, 16  ;;  %2687 = vst [vmem:[#allocation2 + $0x120] sm:$0x3f] %v2327_v11  ;;  %v6730_v11 = vld [vmem:[#allocation2 + $0xc58] sm:$0xff] }
 0x17f   : > { %8544 = vmatprep.mubr.bf16.mxu0 %v6610_v22  ;;  %v2301_v22 = vshrl.u32 %v16691_v13, 16  ;;  %v16706_v13 = vld [vmem:[%s17558_s21 + $0x280] sm:$0x3f]  }
 0x180   : > { %v2305_v23 = vrot.slane %v2303_v18, 1  ;;  %v6625_v18 = vld [vmem:[#allocation2 + $0x910] sm:$0xff]  ;;  %1946 = vst [vmem:[#allocation2 + $0x968] sm:$0x3f] %v16706_v13  ;;  %v16725_v13 = vld [vmem:[%s17558_s21 + $0x48] sm:$0x7f]  }
 0x181   : > { %7695 = vmatmul.mubr.bf16.gmra.mrb[100].mxu1 %v6585_v17  ;;  %v3532_v17 = vshll.u32 %v16708_v12, 16 }
 0x182   : > { %v2306_v26 = vor.u32 %v2305_v23, %v2301_v22  ;;  %7702 = vmatprep.mubr.bf16.mxu1 %v6596_v30  ;;  %v2329_v23 = vshrl.u32 %v16709_v14, 16  ;;  %v16713_v30 = vld [vmem:[%s17558_s21 + $0x1b8] sm:$0x7f]  }
 0x183   : > { %v3534_v22 = vrot.slane %v3532_v17, 1  ;;  %v2336_v39 = vshrl.u32 %v16713_v30, 16  ;;  %v6666_v16 = vld [vmem:[#allocation2 + $0xa58] sm:$0xff]  ;;  %v16724_v17 = vld [vmem:[%s17558_s21 + $0x110] sm:$0x3f]  }
 0x184   : > { %2684 = vst [vmem:[#allocation2 + $0x30] sm:$0x3f] %v2306_v26  ;;  %v6700_v26 = vld [vmem:[#allocation2 + $0xb68] sm:$0xff]  ;;  %749 = vst [vmem:[#allocation2 + $0xaa0] sm:$0x3f] %v16724_v17 }
 0x186   : > { %8545 = vmatmul.mubr.bf16.gmra.mrb[108].mxu0 %v6609_v31  ;;  %v16694_v31 = vld [vmem:[%s17558_s21 + $0xd8] sm:$0x3f]  }
 0x187   : > { %8552 = vmatprep.mubr.bf16.mxu0 %v6620_v35  ;;  %v6659_v35 = vld [vmem:[#allocation2 + $0xa20] sm:$0xff]  ;;  %742 = vst [vmem:[#allocation2 + $0x870] sm:$0x3f] %v16694_v31  ;;  %v6636_v31 = vld [vmem:[#allocation2 + $0x968] sm:$0xff] }
 0x189   : > { %7703 = vmatmul.mubr.bf16.gmra.mrb[104].mxu1 %v6595_v33  ;;  %v3539_v33 = vshll.u32 %v16712_v28, 16 }
 0x18a   : > { %7710 = vmatprep.mubr.bf16.mxu1 %v6606_v46  ;;  %v16717_v46 = vld [vmem:[%s17558_s21 + $0x1c0] sm:$0x7f]  }
 0x18b   : > { %v3541_v38 = vrot.slane %v3539_v33, 1  ;;  %v16728_v33 = vld [vmem:[%s17558_s21 + $0x118] sm:$0x3f]  }
 0x18c   : > { %750 = vst [vmem:[#allocation2 + $0xaf0] sm:$0x3f] %v16728_v33 }
 0x18e   : > { %8553 = vmatmul.mubr.bf16.gmra.mrb[112].mxu0 %v6619_v43  ;;  %v16699_v43 = vld [vmem:[%s17558_s21 + $0x18] sm:$0x7f]   ;;  %v6605_v49 = vld [vmem:[#allocation2 + $0x870] sm:$0xff] }
 0x18f   : > { %8560 = vmatprep.mubr.bf16.mxu0 %v6630_v47  ;;  %v16698_v47 = vld [vmem:[%s17558_s21 + $0xe0] sm:$0x3f]   ;;  %v3518_v48 = vshll.u32 %v16699_v43, 16  ;;  %v3516_v52 = vshrl.u32 %v16699_v43, 16 }
 0x190   : > { %743 = vst [vmem:[#allocation2 + $0x8c0] sm:$0x3f] %v16698_v47  ;;  %v6646_v47 = vld [vmem:[#allocation2 + $0x9b8] sm:$0xff] }
 0x191   : > { %7711 = vmatmul.mubr.bf16.gmra.mrb[108].mxu1 %v6605_v49  ;;  %v3520_v53 = vrot.slane %v3518_v48, 1  ;;  %v16715_v48 = vld [vmem:[%s17558_s21 + $0x100] sm:$0x3f]   ;;  %v3546_v49 = vshll.u32 %v16716_v44, 16 }
 0x192   : > { %7718 = vmatprep.mubr.bf16.mxu1 %v6616_v62  ;;  %747 = vst [vmem:[#allocation2 + $0xa00] sm:$0x3f] %v16715_v48  ;;  %v16722_v62 = vld [vmem:[%s17558_s21 + $0x1c8] sm:$0x7f]  }
 0x193   : > { %v3521_v56 = vor.u32 %v3520_v53, %v3516_v52  ;;  %v6709_v52 = vld [vmem:[#allocation2 + $0xbb0] sm:$0xff]  ;;  %v3544_v53 = vshrl.u32 %v16716_v44, 16  ;;  %v2350_v8 = vshrl.u32 %v16722_v62, 16 }
 0x195   : > { %3887 = vst [vmem:[#allocation2 + $0xd8] sm:$0x3f] %v3521_v56 }
 0x196   : > { %8561 = vmatmul.mubr.bf16.gmra.mrb[116].mxu0 %v6629_v55  ;;  %v2319_v55 = vrot.slane %v2317_v50, 1  ;;  %v6645_v50 = vld [vmem:[#allocation2 + $0x9b0] sm:$0xff] }
 0x197   : > { %8568 = vmatprep.mubr.bf16.mxu0 %v6640_v59  ;;  %v16703_v59 = vld [vmem:[%s17558_s21 + $0x20] sm:$0x7f]  }
 0x198   : > { %v2320_v58 = vor.u32 %v2319_v55, %v2315_v54  ;;  %v3525_v0 = vshll.u32 %v16703_v59, 16  ;;  %v6615_v2 = vld [vmem:[#allocation2 + $0x8c0] sm:$0xff]  ;;  %v3548_v54 = vrot.slane %v3546_v49, 1  ;;  %v2343_v55 = vshrl.u32 %v16717_v46, 16 }
 0x199   : > { %7719 = vmatmul.mubr.bf16.gmra.mrb[112].mxu1 %v6615_v2  ;;  %v3553_v2 = vshll.u32 %v16721_v60, 16  ;;  %v6655_v3 = vld [vmem:[#allocation2 + $0xa00] sm:$0xff] }
 0x19a   : > { %2686 = vst [vmem:[#allocation2 + $0xd0] sm:$0x3f] %v2320_v58  ;;  %v3527_v6 = vrot.slane %v3525_v0, 1  ;;  %7726 = vmatprep.mubr.bf16.mxu1 %v6626_v15  ;;  %v6720_v58 = vld [vmem:[#allocation2 + $0xc08] sm:$0xff]  ;;  %v16726_v15 = vld [vmem:[%s17558_s21 + $0x1d0] sm:$0x7f]  }
 0x19b   : > { %v16720_v0 = vld [vmem:[%s17558_s21 + $0x108] sm:$0x3f]   ;;  %v3555_v7 = vrot.slane %v3553_v2, 1  ;;  %v16733_v49 = vld [vmem:[%s17558_s21 + $0x120] sm:$0x3f]  }
 0x19c   : > { %748 = vst [vmem:[#allocation2 + $0xa50] sm:$0x3f] %v16720_v0  ;;  %751 = vst [vmem:[#allocation2 + $0xb40] sm:$0x3f] %v16733_v49  ;;  %v16737_v2 = vld [vmem:[%s17558_s21 + $0x128] sm:$0x3f]  }
 0x19d   : > { %752 = vst [vmem:[#allocation2 + $0xb90] sm:$0x3f] %v16737_v2 }
 0x19e   : > { %8569 = vmatmul.mubr.bf16.gmra.mrb[120].mxu0 %v6639_v5  ;;  %v3523_v5 = vshrl.u32 %v16703_v59, 16 }
 0x19f   : > { %8576 = vmatprep.mubr.bf16.mxu0 %v6650_v9 }
 0x1a0   : > { %v3528_v9 = vor.u32 %v3527_v6, %v3523_v5  ;;  %v6719_v5 = vld [vmem:[#allocation2 + $0xc00] sm:$0xff]  ;;  %v3551_v6 = vshrl.u32 %v16721_v60, 16 }
 0x1a1   : > { %7727 = vmatmul.mubr.bf16.gmra.mrb[116].mxu1 %v6625_v18  ;;  %v3560_v18 = vshll.u32 %v16725_v13, 16 }
 0x1a2   : > { %3888 = vst [vmem:[#allocation2 + $0x128] sm:$0x3f] %v3528_v9  ;;  %7734 = vmatprep.mubr.bf16.mxu1 %v6636_v31  ;;  %v16730_v31 = vld [vmem:[%s17558_s21 + $0x1d8] sm:$0x7f]  }
 0x1a6   : > { %8577 = vmatmul.mubr.bf16.gmra.mrb[124].mxu0 %v6649_v19  ;;  %v2331_v19 = vshll.u32 %v16709_v14, 16  ;;  %v16723_v14 = vld [vmem:[%s17558_s21 + $0x2a0] sm:$0x3f]  }
 0x1a7   : > { %8584 = vmatprep.mubr.bf16.mxu0 %v6660_v25  ;;  %v3535_v25 = vor.u32 %v3534_v22, %v3530_v21  ;;  %1950 = vst [vmem:[#allocation2 + $0xaa8] sm:$0x3f] %v16723_v14  ;;  %v6729_v21 = vld [vmem:[#allocation2 + $0xc50] sm:$0xff]  ;;  %v3558_v22 = vshrl.u32 %v16725_v13, 16  ;;  %v16742_v14 = vld [vmem:[%s17558_s21 + $0x68] sm:$0x7f]  }
 0x1a8   : > { %v2333_v24 = vrot.slane %v2331_v19, 1  ;;  %v6665_v19 = vld [vmem:[#allocation2 + $0xa50] sm:$0xff] }
 0x1a9   : > { %3889 = vst [vmem:[#allocation2 + $0x178] sm:$0x3f] %v3535_v25  ;;  %7735 = vmatmul.mubr.bf16.gmra.mrb[120].mxu1 %v6635_v34  ;;  %v3567_v34 = vshll.u32 %v16729_v29, 16 }
 0x1aa   : > { %v2334_v27 = vor.u32 %v2333_v24, %v2329_v23  ;;  %7742 = vmatprep.mubr.bf16.mxu1 %v6646_v47  ;;  %v3562_v23 = vrot.slane %v3560_v18, 1  ;;  %v2357_v24 = vshrl.u32 %v16726_v15, 16  ;;  %v16735_v47 = vld [vmem:[%s17558_s21 + $0x1e0] sm:$0x7f]   ;;  %v16741_v18 = vld [vmem:[%s17558_s21 + $0x130] sm:$0x3f]  }
 0x1ab   : > { %753 = vst [vmem:[#allocation2 + $0xbe0] sm:$0x3f] %v16741_v18 }
 0x1ac   : > { %2688 = vst [vmem:[#allocation2 + $0x170] sm:$0x3f] %v2334_v27  ;;  %v6740_v27 = vld [vmem:[#allocation2 + $0xca8] sm:$0xff] }
 0x1ae   : > { %8585 = vmatmul.mubr.bf16.gmra.mrb[128].mxu0 %v6659_v35  ;;  %v2338_v35 = vshll.u32 %v16713_v30, 16  ;;  %v16727_v30 = vld [vmem:[%s17558_s21 + $0x2a8] sm:$0x3f]  }
 0x1af   : > { %8592 = vmatprep.mubr.bf16.mxu0 %v6670_v41  ;;  %v3542_v41 = vor.u32 %v3541_v38, %v3537_v37  ;;  %v6676_v32 = vld [vmem:[#allocation2 + $0xaa8] sm:$0xff]  ;;  %1951 = vst [vmem:[#allocation2 + $0xaf8] sm:$0x3f] %v16727_v30  ;;  %v6739_v37 = vld [vmem:[#allocation2 + $0xca0] sm:$0xff]  ;;  %v3565_v38 = vshrl.u32 %v16729_v29, 16 }
 0x1b0   : > { %v2340_v40 = vrot.slane %v2338_v35, 1  ;;  %v6675_v35 = vld [vmem:[#allocation2 + $0xaa0] sm:$0xff]  ;;  %v16747_v30 = vld [vmem:[%s17558_s21 + $0x70] sm:$0x7f]  }
 0x1b1   : > { %3890 = vst [vmem:[#allocation2 + $0x1c8] sm:$0x3f] %v3542_v41  ;;  %7743 = vmatmul.mubr.bf16.gmra.mrb[124].mxu1 %v6645_v50  ;;  %v3574_v50 = vshll.u32 %v16734_v45, 16 }
 0x1b2   : > { %v2341_v43 = vor.u32 %v2340_v40, %v2336_v39  ;;  %7750 = vmatprep.mubr.bf16.mxu1 %v6656_v63  ;;  %v3569_v39 = vrot.slane %v3567_v34, 1  ;;  %v2364_v40 = vshrl.u32 %v16730_v31, 16  ;;  %v16739_v63 = vld [vmem:[%s17558_s21 + $0x1e8] sm:$0x7f]   ;;  %v16746_v34 = vld [vmem:[%s17558_s21 + $0x138] sm:$0x3f]  }
 0x1b3   : > { %754 = vst [vmem:[#allocation2 + $0xc30] sm:$0x3f] %v16746_v34 }
 0x1b4   : > { %2689 = vst [vmem:[#allocation2 + $0x1c0] sm:$0x3f] %v2341_v43  ;;  %v6750_v43 = vld [vmem:[#allocation2 + $0xcf8] sm:$0xff] }
 0x1b6   : > { %8593 = vmatmul.mubr.bf16.gmra.mrb[132].mxu0 %v6669_v51  ;;  %v2345_v51 = vshll.u32 %v16717_v46, 16  ;;  %v16732_v46 = vld [vmem:[%s17558_s21 + $0x2b0] sm:$0x3f]   ;;  %v6686_v48 = vld [vmem:[#allocation2 + $0xaf8] sm:$0xff] }
 0x1b7   : > { %8600 = vmatprep.mubr.bf16.mxu0 %v6680_v57  ;;  %v3549_v57 = vor.u32 %v3548_v54, %v3544_v53  ;;  %1952 = vst [vmem:[#allocation2 + $0xb48] sm:$0x3f] %v16732_v46  ;;  %v6749_v53 = vld [vmem:[#allocation2 + $0xcf0] sm:$0xff]  ;;  %v3572_v54 = vshrl.u32 %v16734_v45, 16  ;;  %v16751_v46 = vld [vmem:[%s17558_s21 + $0x78] sm:$0x7f]  }
 0x1b8   : > { %v2347_v56 = vrot.slane %v2345_v51, 1  ;;  %v6685_v51 = vld [vmem:[#allocation2 + $0xaf0] sm:$0xff] }
 0x1b9   : > { %3891 = vst [vmem:[#allocation2 + $0x218] sm:$0x3f] %v3549_v57  ;;  %7751 = vmatmul.mubr.bf16.gmra.mrb[128].mxu1 %v6655_v3  ;;  %v3581_v3 = vshll.u32 %v16738_v61, 16 }
 0x1ba   : > { %v2348_v59 = vor.u32 %v2347_v56, %v2343_v55  ;;  %7758 = vmatprep.mubr.bf16.mxu1 %v6666_v16  ;;  %v3576_v55 = vrot.slane %v3574_v50, 1  ;;  %v2371_v56 = vshrl.u32 %v16735_v47, 16  ;;  %v16743_v16 = vld [vmem:[%s17558_s21 + $0x1f0] sm:$0x7f]   ;;  %v16750_v50 = vld [vmem:[%s17558_s21 + $0x140] sm:$0x3f]  }
 0x1bb   : > { %755 = vst [vmem:[#allocation2 + $0xc80] sm:$0x3f] %v16750_v50  ;;  %v16766_v50 = vld [vmem:[%s17558_s21 + $0x2f0] sm:$0x3f]  }
 0x1bc   : > { %2690 = vst [vmem:[#allocation2 + $0x210] sm:$0x3f] %v2348_v59  ;;  %v6760_v59 = vld [vmem:[#allocation2 + $0xd48] sm:$0xff]  ;;  %1960 = vst [vmem:[#allocation2 + $0xdc8] sm:$0x3f] %v16766_v50 }
 0x1be   : > { %8601 = vmatmul.mubr.bf16.gmra.mrb[136].mxu0 %v6679_v4  ;;  %v2352_v4 = vshll.u32 %v16722_v62, 16  ;;  %v16736_v62 = vld [vmem:[%s17558_s21 + $0x2b8] sm:$0x3f]   ;;  %v6696_v0 = vld [vmem:[#allocation2 + $0xb48] sm:$0xff] }
 0x1bf   : > { %8608 = vmatprep.mubr.bf16.mxu0 %v6690_v10  ;;  %v3556_v10 = vor.u32 %v3555_v7, %v3551_v6  ;;  %1953 = vst [vmem:[#allocation2 + $0xb98] sm:$0x3f] %v16736_v62  ;;  %v6759_v6 = vld [vmem:[#allocation2 + $0xd40] sm:$0xff]  ;;  %v3579_v7 = vshrl.u32 %v16738_v61, 16 }
 0x1c0   : > { %v2354_v9 = vrot.slane %v2352_v4, 1  ;;  %v6695_v4 = vld [vmem:[#allocation2 + $0xb40] sm:$0xff] }
 0x1c1   : > { %3892 = vst [vmem:[#allocation2 + $0x268] sm:$0x3f] %v3556_v10  ;;  %7759 = vmatmul.mubr.bf16.gmra.mrb[132].mxu1 %v6665_v19  ;;  %v3588_v19 = vshll.u32 %v16742_v14, 16  ;;  %v16755_v62 = vld [vmem:[%s17558_s21 + $0x80] sm:$0x7f]  }
 0x1c2   : > { %v2355_v12 = vor.u32 %v2354_v9, %v2350_v8  ;;  %7766 = vmatprep.mubr.bf16.mxu1 %v6676_v32  ;;  %v3583_v8 = vrot.slane %v3581_v3, 1  ;;  %v2378_v9 = vshrl.u32 %v16739_v63, 16  ;;  %v16748_v32 = vld [vmem:[%s17558_s21 + $0x1f8] sm:$0x7f]   ;;  %v16754_v3 = vld [vmem:[%s17558_s21 + $0x148] sm:$0x3f]  }
 0x1c3   : > { %756 = vst [vmem:[#allocation2 + $0xcd0] sm:$0x3f] %v16754_v3  ;;  %v16731_v3 = vld [vmem:[%s20432_s1 + $0x218] sm:$0xff]  }
 0x1c4   : > { %2691 = vst [vmem:[#allocation2 + $0x260] sm:$0x3f] %v2355_v12  ;;  %v6770_v12 = vld [vmem:[#allocation2 + $0xd98] sm:$0xff] }
 0x1c6   : > { %8609 = vmatmul.mubr.bf16.gmra.mrb[140].mxu0 %v6689_v20  ;;  %v2359_v20 = vshll.u32 %v16726_v15, 16  ;;  %v16740_v15 = vld [vmem:[%s17558_s21 + $0x2c0] sm:$0x3f]   ;;  %v6706_v17 = vld [vmem:[#allocation2 + $0xb98] sm:$0xff] }
 0x1c7   : > { %8616 = vmatprep.mubr.bf16.mxu0 %v6700_v26  ;;  %v3563_v26 = vor.u32 %v3562_v23, %v3558_v22  ;;  %1954 = vst [vmem:[#allocation2 + $0xbe8] sm:$0x3f] %v16740_v15  ;;  %v6769_v22 = vld [vmem:[#allocation2 + $0xd90] sm:$0xff]  ;;  %v3586_v23 = vshrl.u32 %v16742_v14, 16  ;;  %v16760_v15 = vld [vmem:[%s17558_s21 + $0x88] sm:$0x7f]  }
 0x1c8   : > { %v2361_v25 = vrot.slane %v2359_v20, 1  ;;  %v6705_v20 = vld [vmem:[#allocation2 + $0xb90] sm:$0xff] }
 0x1c9   : > { %3893 = vst [vmem:[#allocation2 + $0x2b8] sm:$0x3f] %v3563_v26  ;;  %7767 = vmatmul.mubr.bf16.gmra.mrb[136].mxu1 %v6675_v35  ;;  %v3595_v35 = vshll.u32 %v16747_v30, 16 }
 0x1ca   : > { %v2362_v28 = vor.u32 %v2361_v25, %v2357_v24  ;;  %7774 = vmatprep.mubr.bf16.mxu1 %v6686_v48  ;;  %v3590_v24 = vrot.slane %v3588_v19, 1  ;;  %v2385_v25 = vshrl.u32 %v16743_v16, 16  ;;  %v16752_v48 = vld [vmem:[%s17558_s21 + $0x200] sm:$0x7f]   ;;  %v16759_v19 = vld [vmem:[%s17558_s21 + $0x150] sm:$0x3f]  }
 0x1cb   : > { %757 = vst [vmem:[#allocation2 + $0xd20] sm:$0x3f] %v16759_v19  ;;  %v6372_v19 = vld [vmem:[#allocation2 + $0x128] sm:$0xff] }
 0x1cc   : > { %2692 = vst [vmem:[#allocation2 + $0x2b0] sm:$0x3f] %v2362_v28  ;;  %v6780_v28 = vld [vmem:[#allocation2 + $0xde8] sm:$0xff] }
 0x1ce   : > { %8617 = vmatmul.mubr.bf16.gmra.mrb[144].mxu0 %v6699_v36  ;;  %v2366_v36 = vshll.u32 %v16730_v31, 16  ;;  %v16745_v31 = vld [vmem:[%s17558_s21 + $0x2c8] sm:$0x3f]  }
 0x1cf   : > { %8624 = vmatprep.mubr.bf16.mxu0 %v6710_v42  ;;  %v3570_v42 = vor.u32 %v3569_v39, %v3565_v38  ;;  %v6716_v33 = vld [vmem:[#allocation2 + $0xbe8] sm:$0xff]  ;;  %1955 = vst [vmem:[#allocation2 + $0xc38] sm:$0x3f] %v16745_v31  ;;  %v6779_v38 = vld [vmem:[#allocation2 + $0xde0] sm:$0xff]  ;;  %v3593_v39 = vshrl.u32 %v16747_v30, 16 }
 0x1d0   : > { %v2368_v41 = vrot.slane %v2366_v36, 1  ;;  %v6715_v36 = vld [vmem:[#allocation2 + $0xbe0] sm:$0xff]  ;;  %v16764_v31 = vld [vmem:[%s17558_s21 + $0x90] sm:$0x7f]  }
 0x1d1   : > { %3894 = vst [vmem:[#allocation2 + $0x308] sm:$0x3f] %v3570_v42  ;;  %7775 = vmatmul.mubr.bf16.gmra.mrb[140].mxu1 %v6685_v51  ;;  %v3602_v51 = vshll.u32 %v16751_v46, 16 }
 0x1d2   : > { %v2369_v44 = vor.u32 %v2368_v41, %v2364_v40  ;;  %7782 = vmatprep.mubr.bf16.mxu1 %v6696_v0  ;;  %v3597_v40 = vrot.slane %v3595_v35, 1  ;;  %v2392_v41 = vshrl.u32 %v16748_v32, 16  ;;  %v16756_v0 = vld [vmem:[%s17558_s21 + $0x208] sm:$0x7f]   ;;  %v16763_v35 = vld [vmem:[%s17558_s21 + $0x158] sm:$0x3f]  }
 0x1d3   : > { %758 = vst [vmem:[#allocation2 + $0xd70] sm:$0x3f] %v16763_v35 }
 0x1d4   : > { %2693 = vst [vmem:[#allocation2 + $0x300] sm:$0x3f] %v2369_v44  ;;  %v6790_v44 = vld [vmem:[#allocation2 + $0xe38] sm:$0xff] }
 0x1d6   : > { %8625 = vmatmul.mubr.bf16.gmra.mrb[148].mxu0 %v6709_v52  ;;  %v2373_v52 = vshll.u32 %v16735_v47, 16  ;;  %v16749_v47 = vld [vmem:[%s17558_s21 + $0x2d0] sm:$0x3f]   ;;  %v6726_v49 = vld [vmem:[#allocation2 + $0xc38] sm:$0xff] }
 0x1d7   : > { %8632 = vmatprep.mubr.bf16.mxu0 %v6720_v58  ;;  %v3577_v58 = vor.u32 %v3576_v55, %v3572_v54  ;;  %1956 = vst [vmem:[#allocation2 + $0xc88] sm:$0x3f] %v16749_v47  ;;  %v6789_v54 = vld [vmem:[#allocation2 + $0xe30] sm:$0xff]  ;;  %v3600_v55 = vshrl.u32 %v16751_v46, 16  ;;  %v6352_v46 = vld [vmem:[#allocation2 + $0x88] sm:$0xff] }
 0x1d8   : > { %v2375_v57 = vrot.slane %v2373_v52, 1  ;;  %v6725_v52 = vld [vmem:[#allocation2 + $0xc30] sm:$0xff] }
 0x1d9   : > { %3895 = vst [vmem:[#allocation2 + $0x358] sm:$0x3f] %v3577_v58  ;;  %7783 = vmatmul.mubr.bf16.gmra.mrb[144].mxu1 %v6695_v4  ;;  %v3609_v4 = vshll.u32 %v16755_v62, 16 }
 0x1da   : > { %v2376_v60 = vor.u32 %v2375_v57, %v2371_v56  ;;  %7790 = vmatprep.mubr.bf16.mxu1 %v6706_v17  ;;  %v3604_v56 = vrot.slane %v3602_v51, 1  ;;  %v2399_v57 = vshrl.u32 %v16752_v48, 16  ;;  %v16761_v17 = vld [vmem:[%s17558_s21 + $0x210] sm:$0x7f]   ;;  %v16769_v51 = vld [vmem:[%s17558_s21 + $0x220] sm:$0x7f]  }
 0x1dc   : > { %2694 = vst [vmem:[#allocation2 + $0x350] sm:$0x3f] %v2376_v60  ;;  %v6800_v60 = vld [vmem:[#allocation2 + $0xe88] sm:$0xff] }
 0x1de   : > { %8633 = vmatmul.mubr.bf16.gmra.mrb[152].mxu0 %v6719_v5  ;;  %v2380_v5 = vshll.u32 %v16739_v63, 16  ;;  %v16753_v63 = vld [vmem:[%s17558_s21 + $0x2d8] sm:$0x3f]   ;;  %v6736_v2 = vld [vmem:[#allocation2 + $0xc88] sm:$0xff] }
 0x1df   : > { %8640 = vmatprep.mubr.bf16.mxu0 %v6730_v11  ;;  %v3584_v11 = vor.u32 %v3583_v8, %v3579_v7  ;;  %1957 = vst [vmem:[#allocation2 + $0xcd8] sm:$0x3f] %v16753_v63  ;;  %v6799_v7 = vld [vmem:[#allocation2 + $0xe80] sm:$0xff]  ;;  %v3607_v8 = vshrl.u32 %v16755_v62, 16 }
 0x1e0   : > { %v2382_v10 = vrot.slane %v2380_v5, 1  ;;  %v6735_v5 = vld [vmem:[#allocation2 + $0xc80] sm:$0xff] }
 0x1e1   : > { %3896 = vst [vmem:[#allocation2 + $0x3a8] sm:$0x3f] %v3584_v11  ;;  %7791 = vmatmul.mubr.bf16.gmra.mrb[148].mxu1 %v6705_v20  ;;  %v3616_v20 = vshll.u32 %v16760_v15, 16 }
 0x1e2   : > { %v2383_v13 = vor.u32 %v2382_v10, %v2378_v9  ;;  %7798 = vmatprep.mubr.bf16.mxu1 %v6716_v33  ;;  %v3611_v9 = vrot.slane %v3609_v4, 1  ;;  %v2406_v10 = vshrl.u32 %v16756_v0, 16  ;;  %v16765_v33 = vld [vmem:[%s17558_s21 + $0x218] sm:$0x7f]   ;;  %v16773_v4 = vld [vmem:[%s17558_s21 + $0xa0] sm:$0x7f]  }
 0x1e4   : > { %2695 = vst [vmem:[#allocation2 + $0x3a0] sm:$0x3f] %v2383_v13  ;;  %v6810_v13 = vld [vmem:[#allocation2 + $0xed8] sm:$0xff] }
 0x1e6   : > { %8641 = vmatmul.mubr.bf16.gmra.mrb[156].mxu0 %v6729_v21  ;;  %v2387_v21 = vshll.u32 %v16743_v16, 16  ;;  %v16758_v16 = vld [vmem:[%s17558_s21 + $0x2e0] sm:$0x3f]   ;;  %v6746_v18 = vld [vmem:[#allocation2 + $0xcd8] sm:$0xff] }
 0x1e7   : > { %8648 = vmatprep.mubr.bf16.mxu0 %v6740_v27  ;;  %v3591_v27 = vor.u32 %v3590_v24, %v3586_v23  ;;  %1958 = vst [vmem:[#allocation2 + $0xd28] sm:$0x3f] %v16758_v16  ;;  %v6809_v23 = vld [vmem:[#allocation2 + $0xed0] sm:$0xff]  ;;  %v3614_v24 = vshrl.u32 %v16760_v15, 16 }
 0x1e8   : > { %v2389_v26 = vrot.slane %v2387_v21, 1  ;;  %v6745_v21 = vld [vmem:[#allocation2 + $0xcd0] sm:$0xff] }
 0x1e9   : > { %3897 = vst [vmem:[#allocation2 + $0x3f8] sm:$0x3f] %v3591_v27  ;;  %7799 = vmatmul.mubr.bf16.gmra.mrb[152].mxu1 %v6715_v36  ;;  %v3623_v36 = vshll.u32 %v16764_v31, 16 }
 0x1ea   : > { %v2390_v29 = vor.u32 %v2389_v26, %v2385_v25  ;;  %7806 = vmatprep.mubr.bf16.mxu1 %v6726_v49  ;;  %v3618_v25 = vrot.slane %v3616_v20, 1  ;;  %v2413_v26 = vshrl.u32 %v16761_v17, 16  ;;  %v16768_v49 = vld [vmem:[%s17558_s21 + $0x98] sm:$0x7f]  }
 0x1ec   : > { %2696 = vst [vmem:[#allocation2 + $0x3f0] sm:$0x3f] %v2390_v29  ;;  %v6342_v29 = vld [vmem:[#allocation2 + $0x38] sm:$0xff] }
 0x1ee   : > { %8649 = vmatmul.mubr.bf16.gmra.mrb[160].mxu0 %v6739_v37  ;;  %v2394_v37 = vshll.u32 %v16748_v32, 16  ;;  %v16762_v32 = vld [vmem:[%s17558_s21 + $0x2e8] sm:$0x3f]  }
 0x1ef   : > { %8656 = vmatprep.mubr.bf16.mxu0 %v6750_v43  ;;  %v3598_v43 = vor.u32 %v3597_v40, %v3593_v39  ;;  %v6756_v34 = vld [vmem:[#allocation2 + $0xd28] sm:$0xff]  ;;  %1959 = vst [vmem:[#allocation2 + $0xd78] sm:$0x3f] %v16762_v32  ;;  %v6341_v39 = vld [vmem:[#allocation2 + $0x30] sm:$0xff]  ;;  %v16692_v40 = vld [vmem:[%s20432_s1 + $0x200] sm:$0xff]  }
 0x1f0   : > { %v2396_v42 = vrot.slane %v2394_v37, 1  ;;  %v6755_v37 = vld [vmem:[#allocation2 + $0xd20] sm:$0xff] }
 0x1f1   : > { %3898 = vst [vmem:[#allocation2 + $0x448] sm:$0x3f] %v3598_v43  ;;  %7807 = vmatmul.mubr.bf16.gmra.mrb[156].mxu1 %v6725_v52  ;;  %v2420_v43 = vshrl.u32 %v16765_v33, 16 }
 0x1f2   : > { %v2397_v45 = vor.u32 %v2396_v42, %v2392_v41  ;;  %7814 = vmatprep.mubr.bf16.mxu1 %v6736_v2  ;;  %v3621_v41 = vshrl.u32 %v16764_v31, 16  ;;  %v3625_v42 = vrot.slane %v3623_v36, 1  ;;  %v16770_v31 = vld [vmem:[%s20432_s1 + $0x230] sm:$0xff]  }
 0x1f4   : > { %2697 = vst [vmem:[#allocation2 + $0x440] sm:$0x3f] %v2397_v45  ;;  %v3626_v45 = vor.u32 %v3625_v42, %v3621_v41  ;;  %v16782_v41 = vld [vmem:[%s17558_s21 + $0x238] sm:$0x7f]  }
 0x1f5   : > { %v2448_v50 = vshrl.u32 %v16782_v41, 16 }
 0x1f6   : > { %8657 = vmatmul.mubr.bf16.gmra.mrb[164].mxu0 %v6749_v53  ;;  %v2401_v53 = vshll.u32 %v16752_v48, 16  ;;  %v16705_v48 = vld [vmem:[%s20432_s1 + $0x208] sm:$0xff]   ;;  %3902 = vst [vmem:[#allocation2 + $0x588] sm:$0x3f] %v3626_v45  ;;  %v6766_v52 = vld [vmem:[#allocation2 + $0xd78] sm:$0xff] }
 0x1f7   : > { %8664 = vmatprep.mubr.bf16.mxu0 %v6760_v59  ;;  %v3605_v59 = vor.u32 %v3604_v56, %v3600_v55  ;;  %v6765_v55 = vld [vmem:[#allocation2 + $0xd70] sm:$0xff]  ;;  %v2429_v56 = vshll.u32 %v16769_v51, 16 }
 0x1f8   : > { %v2403_v58 = vrot.slane %v2401_v53, 1  ;;  %v16767_v53 = vld [vmem:[%s17558_s21 + $0x160] sm:$0x3f]  }
 0x1f9   : > { %3899 = vst [vmem:[#allocation2 + $0x498] sm:$0x3f] %v3605_v59  ;;  %7815 = vmatmul.mubr.bf16.gmra.mrb[160].mxu1 %v6735_v5  ;;  %759 = vst [vmem:[#allocation2 + $0xdc0] sm:$0x3f] %v16767_v53  ;;  %v3628_v59 = vshrl.u32 %v16768_v49, 16  ;;  %v2431_v62 = vrot.slane %v2429_v56, 1 }
 0x1fa   : > { %v2404_v61 = vor.u32 %v2403_v58, %v2399_v57  ;;  %7822 = vmatprep.mubr.bf16.mxu1 %v6746_v18  ;;  %v6351_v57 = vld [vmem:[#allocation2 + $0x80] sm:$0xff]  ;;  %v16718_v58 = vld [vmem:[%s20432_s1 + $0x210] sm:$0xff]   ;;  %v16771_v5 = vld [vmem:[%s17558_s21 + $0x2f8] sm:$0x3f]  }
 0x1fb   : > { %1961 = vst [vmem:[#allocation2 + $0xe18] sm:$0x3f] %v16771_v5  ;;  %v6392_v53 = vld [vmem:[#allocation2 + $0x1c8] sm:$0xff]  ;;  %v16784_v56 = vld [vmem:[%s17558_s21 + $0x1f0] sm:$0x3f]  }
 0x1fc   : > { %2698 = vst [vmem:[#allocation2 + $0x490] sm:$0x3f] %v2404_v61  ;;  %v2427_v61 = vshrl.u32 %v16769_v51, 16  ;;  %4329 = vst [vmem:[#allocation2 + $0x388] sm:$0x3f] %v16784_v56 }
 0x1fe   : > { %8665 = vmatmul.mubr.bf16.gmra.mrb[168].mxu0 %v6759_v6  ;;  %v2408_v6 = vshll.u32 %v16756_v0, 16  ;;  %v6362_v0 = vld [vmem:[#allocation2 + $0xd8] sm:$0xff]  ;;  %v2432_v2 = vor.u32 %v2431_v62, %v2427_v61 }
 0x1ff   : > { %8672 = vmatprep.mubr.bf16.mxu0 %v6770_v12  ;;  %v3612_v12 = vor.u32 %v3611_v9, %v3607_v8  ;;  %v16772_v8 = vld [vmem:[%s17558_s21 + $0x168] sm:$0x3f]   ;;  %v3637_v9 = vshll.u32 %v16773_v4, 16 }
 0x200   : > { %v2410_v11 = vrot.slane %v2408_v6, 1  ;;  %2702 = vst [vmem:[#allocation2 + $0x5d0] sm:$0x3f] %v2432_v2  ;;  %v16774_v6 = vld [vmem:[%s17558_s21 + $0x228] sm:$0x7f]  }
 0x201   : > { %3900 = vst [vmem:[#allocation2 + $0x4e8] sm:$0x3f] %v3612_v12  ;;  %7823 = vmatmul.mubr.bf16.gmra.mrb[164].mxu1 %v6745_v21  ;;  %v6361_v12 = vld [vmem:[#allocation2 + $0xd0] sm:$0xff]  ;;  %760 = vst [vmem:[#allocation2 + $0xe10] sm:$0x3f] %v16772_v8  ;;  %v3639_v15 = vrot.slane %v3637_v9, 1 }
 0x202   : > { %v2411_v14 = vor.u32 %v2410_v11, %v2406_v10  ;;  %7830 = vmatprep.mubr.bf16.mxu1 %v6756_v34  ;;  %v6775_v10 = vld [vmem:[#allocation2 + $0xdc0] sm:$0xff]  ;;  %v2436_v11 = vshll.u32 %v16774_v6, 16  ;;  %v2434_v16 = vshrl.u32 %v16774_v6, 16  ;;  %v16777_v21 = vld [vmem:[%s17558_s21 + $0xa8] sm:$0x7f]   ;;  %v6402_v6 = vld [vmem:[#allocation2 + $0x218] sm:$0xff] }
 0x203   : > { %v3642_v32 = vshrl.u32 %v16777_v21, 16  ;;  %v16790_v8 = vld [vmem:[%s17558_s21 + $0xc0] sm:$0x7f]   ;;  %v16783_v9 = vld [vmem:[%s20432_s1 + $0x238] sm:$0xff]  }
 0x204   : > { %2699 = vst [vmem:[#allocation2 + $0x4e0] sm:$0x3f] %v2411_v14  ;;  %v3635_v14 = vshrl.u32 %v16773_v4, 16 }
 0x206   : > { %8673 = vmatmul.mubr.bf16.gmra.mrb[172].mxu0 %v6769_v22  ;;  %v2415_v22 = vshll.u32 %v16761_v17, 16  ;;  %v2438_v17 = vrot.slane %v2436_v11, 1  ;;  %v3640_v18 = vor.u32 %v3639_v15, %v3635_v14  ;;  %v16791_v11 = vld [vmem:[%s17558_s21 + $0x248] sm:$0x7f]   ;;  %v3665_v14 = vshll.u32 %v16790_v8, 16 }
 0x207   : > { %8680 = vmatprep.mubr.bf16.mxu0 %v6780_v28  ;;  %v3619_v28 = vor.u32 %v3618_v25, %v3614_v24  ;;  %v16778_v24 = vld [vmem:[%s17558_s21 + $0x230] sm:$0x7f]   ;;  %v6786_v25 = vld [vmem:[#allocation2 + $0xe18] sm:$0xff] }
 0x208   : > { %v2417_v27 = vrot.slane %v2415_v22, 1  ;;  %v2439_v20 = vor.u32 %v2438_v17, %v2434_v16  ;;  %3904 = vst [vmem:[#allocation2 + $0x628] sm:$0x3f] %v3640_v18  ;;  %v16757_v22 = vld [vmem:[%s20432_s1 + $0x228] sm:$0xff]   ;;  %v2441_v34 = vshrl.u32 %v16778_v24, 16  ;;  %v2464_v16 = vshll.u32 %v16791_v11, 16 }
 0x209   : > { %3901 = vst [vmem:[#allocation2 + $0x538] sm:$0x3f] %v3619_v28  ;;  %7831 = vmatmul.mubr.bf16.gmra.mrb[168].mxu1 %v6755_v37  ;;  %v6785_v28 = vld [vmem:[#allocation2 + $0xe10] sm:$0xff]  ;;  %v6382_v37 = vld [vmem:[#allocation2 + $0x178] sm:$0xff]  ;;  %v3663_v18 = vshrl.u32 %v16790_v8, 16 }
 0x20a   : > { %v2418_v30 = vor.u32 %v2417_v27, %v2413_v26  ;;  %7838 = vmatprep.mubr.bf16.mxu1 %v6766_v52  ;;  %2703 = vst [vmem:[#allocation2 + $0x620] sm:$0x3f] %v2439_v20  ;;  %v16776_v26 = vld [vmem:[%s17558_s21 + $0x170] sm:$0x3f]   ;;  %v3644_v27 = vshll.u32 %v16777_v21, 16  ;;  %v2462_v20 = vshrl.u32 %v16791_v11, 16 }
 0x20b   : > { %761 = vst [vmem:[#allocation2 + $0xe60] sm:$0x3f] %v16776_v26  ;;  %v6401_v17 = vld [vmem:[#allocation2 + $0x210] sm:$0xff]  ;;  %v2466_v21 = vrot.slane %v2464_v16, 1  ;;  %v16792_v26 = vld [vmem:[%s17558_s21 + $0x200] sm:$0x3f]  }
 0x20c   : > { %2700 = vst [vmem:[#allocation2 + $0x530] sm:$0x3f] %v2418_v30  ;;  %v6371_v30 = vld [vmem:[#allocation2 + $0x120] sm:$0xff]  ;;  %4331 = vst [vmem:[#allocation2 + $0x428] sm:$0x3f] %v16792_v26 }
 0x20d   : > { %v16807_v11 = vld [vmem:[%s17558_s21 + $0xe0] sm:$0x7f]  }
 0x20e   : > { %8681 = vmatmul.mubr.bf16.gmra.mrb[176].mxu0 %v6779_v38  ;;  %v2422_v38 = vshll.u32 %v16765_v33, 16  ;;  %v3646_v33 = vrot.slane %v3644_v27, 1  ;;  %v16795_v27 = vld [vmem:[%s17558_s21 + $0x250] sm:$0x7f]   ;;  %v3693_v16 = vshll.u32 %v16807_v11, 16 }
 0x20f   : > { %8688 = vmatprep.mubr.bf16.mxu0 %v6790_v44 }
 0x210   : > { %v2424_v44 = vrot.slane %v2422_v38, 1  ;;  %v3647_v36 = vor.u32 %v3646_v33, %v3642_v32  ;;  %v2471_v32 = vshll.u32 %v16795_v27, 16  ;;  %v6411_v33 = vld [vmem:[#allocation2 + $0x260] sm:$0xff] }
 0x211   : > { %7839 = vmatmul.mubr.bf16.gmra.mrb[172].mxu1 %v6765_v55  ;;  %v16786_v55 = vld [vmem:[%s17558_s21 + $0xb8] sm:$0x7f]  }
 0x212   : > { %v2425_v47 = vor.u32 %v2424_v44, %v2420_v43  ;;  %3905 = vst [vmem:[#allocation2 + $0x678] sm:$0x3f] %v3647_v36  ;;  %v16780_v43 = vld [vmem:[%s17558_s21 + $0x178] sm:$0x3f]   ;;  %v6795_v45 = vld [vmem:[#allocation2 + $0xe60] sm:$0xff]  ;;  %v2469_v36 = vshrl.u32 %v16795_v27, 16 }
 0x213   : > { %762 = vst [vmem:[#allocation2 + $0xeb0] sm:$0x3f] %v16780_v43  ;;  %v16800_v43 = vld [vmem:[%s17558_s21 + $0x258] sm:$0x7f]   ;;  %v16812_v27 = vld [vmem:[%s17558_s21 + $0xe8] sm:$0x7f]  }
 0x214   : > { %2701 = vst [vmem:[#allocation2 + $0x580] sm:$0x3f] %v2425_v47  ;;  %v6381_v47 = vld [vmem:[#allocation2 + $0x170] sm:$0xff] }
 0x216   : > { %8689 = vmatmul.mubr.bf16.gmra.mrb[180].mxu0 %v6789_v54  ;;  %v3630_v54 = vshll.u32 %v16768_v49, 16 }
 0x217   : > { %8696 = vmatprep.mubr.bf16.mxu0 %v6800_v60 }
 0x218   : > { %v3632_v60 = vrot.slane %v3630_v54, 1 }
 0x21a   : > { %v3633_v63 = vor.u32 %v3632_v60, %v3628_v59  ;;  %v16785_v59 = vld [vmem:[%s17558_s21 + $0x60] sm:$0x3f]   ;;  %v3658_v60 = vshll.u32 %v16786_v55, 16  ;;  %v6805_v61 = vld [vmem:[#allocation2 + $0xeb0] sm:$0xff] }
 0x21b   : > { %3128 = vst [vmem:[#allocation2 + $0x380] sm:$0x3f] %v16785_v59  ;;  %v16801_v59 = vld [vmem:[%s17558_s21 + $0x210] sm:$0x3f]  }
 0x21c   : > { %3903 = vst [vmem:[#allocation2 + $0x5d8] sm:$0x3f] %v3633_v63  ;;  %v6391_v63 = vld [vmem:[#allocation2 + $0x1c0] sm:$0xff]  ;;  %v3660_v2 = vrot.slane %v3658_v60, 1  ;;  %4333 = vst [vmem:[#allocation2 + $0x4c8] sm:$0x3f] %v16801_v59 }
 0x21d   : > { %v16804_v60 = vld [vmem:[%s17558_s21 + $0x260] sm:$0x7f]  }
 0x21e   : > { %8697 = vmatmul.mubr.bf16.gmra.mrb[184].mxu0 %v6799_v7  ;;  %v6776_v7 = vld [vmem:[#allocation2 + $0xdc8] sm:$0xff] }
 0x21f   : > { %8704 = vmatprep.mubr.bf16.mxu0 %v6810_v13  ;;  %7846 = vmatprep.mubr.bf16.mxu1 %v6776_v7  ;;  %v16744_v13 = vld [vmem:[%s20432_s1 + $0x220] sm:$0xff]  }
 0x220   : > { %7847 = vmatmul.mubr.bf16.gmra.mrb[176].mxu1 %v6775_v10  ;;  %v16788_v10 = vld [vmem:[%s17558_s21 + $0x1f8] sm:$0x3f]  }
 0x221   : > { %7854 = vmatprep.mubr.bf16.mxu1 %v6786_v25  ;;  %4330 = vst [vmem:[#allocation2 + $0x3d8] sm:$0x3f] %v16788_v10  ;;  %v16794_v25 = vld [vmem:[%s17558_s21 + $0xc8] sm:$0x7f]  }
 0x222   : > { %v6447_v15 = vld [vmem:[#allocation2 + $0x380] sm:$0xff] }
 0x226   : > { %8705 = vmatmul.mubr.bf16.gmra.mrb[188].mxu0 %v6809_v23  ;;  %v16775_v23 = vld [vmem:[%s17558_s21 + $0x300] sm:$0x3f]  }
 0x227   : > { %8745 = vmatprep.mubr.bf16.mxu0 %v6342_v29  ;;  %1962 = vst [vmem:[#allocation2 + $0xe68] sm:$0x3f] %v16775_v23  ;;  %v2443_v29 = vshll.u32 %v16778_v24, 16  ;;  %v6412_v23 = vld [vmem:[#allocation2 + $0x268] sm:$0xff]  ;;  %v2467_v24 = vor.u32 %v2466_v21, %v2462_v20  ;;  %v3691_v20 = vshrl.u32 %v16807_v11, 16  ;;  %v3695_v21 = vrot.slane %v3693_v16, 1 }
 0x228   : > { %7855 = vmatmul.mubr.bf16.gmra.mrb[180].mxu1 %v6785_v28  ;;  %v6458_v28 = vld [vmem:[#allocation2 + $0x3d8] sm:$0xff] }
 0x229   : > { %v2445_v35 = vrot.slane %v2443_v29, 1  ;;  %2707 = vst [vmem:[#allocation2 + $0x760] sm:$0x3f] %v2467_v24  ;;  %v16793_v29 = vld [vmem:[%s17558_s21 + $0x70] sm:$0x3f]   ;;  %v3696_v24 = vor.u32 %v3695_v21, %v3691_v20  ;;  %v6482_v11 = vld [vmem:[#allocation2 + $0x498] sm:$0xff] }
 0x22a   : > { %3130 = vst [vmem:[#allocation2 + $0x420] sm:$0x3f] %v16793_v29  ;;  %v16813_v29 = vld [vmem:[%s17558_s21 + $0x270] sm:$0x7f]  }
 0x22b   : > { %v2446_v38 = vor.u32 %v2445_v35, %v2441_v34  ;;  %v3670_v34 = vshrl.u32 %v16794_v25, 16  ;;  %3912 = vst [vmem:[#allocation2 + $0x8a8] sm:$0x3f] %v3696_v24  ;;  %v6481_v21 = vld [vmem:[#allocation2 + $0x490] sm:$0xff] }
 0x22d   : > { %2704 = vst [vmem:[#allocation2 + $0x670] sm:$0x3f] %v2446_v38 }
 0x22e   : > { %8746 = vmatmul.mubr.bf16.vlgmr.msra.gmra.mrb[0].mxu0 %v6341_v39  ;;  %v16781_v39 = vld [vmem:[%s17558_s21 + $0xb0] sm:$0x7f]   ;;  %v6796_v42 = vld [vmem:[#allocation2 + $0xe68] sm:$0xff] }
 0x22f   : > { %9131 = vmatpush1.bf16.msra.mxu0 %v16692_v40  ;;  %8753 = vmatprep.mubr.bf16.mxu0 %v6352_v46  ;;  %v16779_v40 = vld [vmem:[%s17558_s21 + $0x308] sm:$0x3f]   ;;  %v3651_v44 = vshll.u32 %v16781_v39, 16  ;;  %v2450_v46 = vshll.u32 %v16782_v41, 16  ;;  %v16799_v41 = vld [vmem:[%s17558_s21 + $0xd0] sm:$0x7f]  }
 0x230   : > { %9132 = vmatprep.subr.bf16.mxu0 %v20441_v1  ;;  %7862 = vmatprep.mubr.bf16.mxu1 %v6796_v42  ;;  %1963 = vst [vmem:[#allocation2 + $0xeb8] sm:$0x3f] %v16779_v40  ;;  %v16797_v42 = vld [vmem:[%s17558_s21 + $0x208] sm:$0x3f]  }
 0x231   : > { %7863 = vmatmul.mubr.bf16.gmra.mrb[184].mxu1 %v6795_v45  ;;  %v3653_v49 = vrot.slane %v3651_v44, 1  ;;  %v2452_v51 = vrot.slane %v2450_v46, 1  ;;  %v6468_v44 = vld [vmem:[#allocation2 + $0x428] sm:$0xff]  ;;  %v16798_v45 = vld [vmem:[%s17558_s21 + $0x78] sm:$0x3f]   ;;  %v3679_v46 = vshll.u32 %v16799_v41, 16 }
 0x232   : > { %4332 = vst [vmem:[#allocation2 + $0x478] sm:$0x3f] %v16797_v42  ;;  %3131 = vst [vmem:[#allocation2 + $0x470] sm:$0x3f] %v16798_v45  ;;  %v16814_v45 = vld [vmem:[%s17558_s21 + $0x228] sm:$0x3f]  }
 0x233   : > { %9133 = vmatpush1.bf16.msra.mxu0 %v16705_v48  ;;  %v3649_v48 = vshrl.u32 %v16781_v39, 16  ;;  %v2453_v54 = vor.u32 %v2452_v51, %v2448_v50  ;;  %v6422_v39 = vld [vmem:[#allocation2 + $0x2b8] sm:$0xff]  ;;  %v3677_v50 = vshrl.u32 %v16799_v41, 16  ;;  %v3681_v51 = vrot.slane %v3679_v46, 1  ;;  %4336 = vst [vmem:[#allocation2 + $0x5b8] sm:$0x3f] %v16814_v45 }
 0x234   : > { %9134 = vmatprep.subr.bf16.mxu0 %v20441_v1  ;;  %v6462_v41 = vld [vmem:[#allocation2 + $0x3f8] sm:$0xff] }
 0x235   : > { %v3654_v52 = vor.u32 %v3653_v49, %v3649_v48  ;;  %2705 = vst [vmem:[#allocation2 + $0x6c0] sm:$0x3f] %v2453_v54  ;;  %v2478_v48 = vshll.u32 %v16800_v43, 16  ;;  %v6421_v49 = vld [vmem:[#allocation2 + $0x2b0] sm:$0xff]  ;;  %v3682_v54 = vor.u32 %v3681_v51, %v3677_v50  ;;  %v16817_v46 = vld [vmem:[%s17558_s21 + $0x278] sm:$0x7f]  }
 0x236   : > { %8754 = vmatmul.mubr.bf16.gmra.mrb[4].mxu0 %v6351_v57  ;;  %v16787_v57 = vld [vmem:[%s17558_s21 + $0x240] sm:$0x7f]   ;;  %v2506_v51 = vshll.u32 %v16817_v46, 16 }
 0x237   : > { %8761 = vmatprep.mubr.bf16.mxu0 %v6362_v0  ;;  %9135 = vmatpush1.bf16.msra.mxu0 %v16718_v58  ;;  %3906 = vst [vmem:[#allocation2 + $0x6c8] sm:$0x3f] %v3654_v52  ;;  %v6806_v58 = vld [vmem:[#allocation2 + $0xeb8] sm:$0xff]  ;;  %v2457_v62 = vshll.u32 %v16787_v57, 16  ;;  %v3656_v0 = vshrl.u32 %v16786_v55, 16  ;;  %v2476_v52 = vshrl.u32 %v16800_v43, 16 }
 0x238   : > { %9136 = vmatprep.subr.bf16.mxu0 %v20441_v1  ;;  %7870 = vmatprep.mubr.bf16.mxu1 %v6806_v58  ;;  %v6432_v55 = vld [vmem:[#allocation2 + $0x308] sm:$0xff]  ;;  %3910 = vst [vmem:[#allocation2 + $0x808] sm:$0x3f] %v3682_v54  ;;  %v16796_v58 = vld [vmem:[%s20432_s1 + $0x240] sm:$0xff]   ;;  %v16816_v43 = vld [vmem:[%s17558_s21 + $0xf0] sm:$0x7f]  }
 0x239   : > { %7871 = vmatmul.mubr.bf16.gmra.mrb[188].mxu1 %v6805_v61  ;;  %v2459_v4 = vrot.slane %v2457_v62, 1  ;;  %v3661_v5 = vor.u32 %v3660_v2, %v3656_v0  ;;  %v6478_v61 = vld [vmem:[#allocation2 + $0x478] sm:$0xff]  ;;  %v16802_v62 = vld [vmem:[%s17558_s21 + $0x80] sm:$0x3f]   ;;  %v6477_v0 = vld [vmem:[#allocation2 + $0x470] sm:$0xff]  ;;  %v2485_v2 = vshll.u32 %v16804_v60, 16 }
 0x23a   : > { %3132 = vst [vmem:[#allocation2 + $0x4c0] sm:$0x3f] %v16802_v62  ;;  %v16821_v62 = vld [vmem:[%s17558_s21 + $0x280] sm:$0x7f]  }
 0x23b   : > { %9137 = vmatpush1.bf16.msra.mxu0 %v16731_v3  ;;  %v2455_v3 = vshrl.u32 %v16787_v57, 16  ;;  %3907 = vst [vmem:[#allocation2 + $0x718] sm:$0x3f] %v3661_v5  ;;  %v16803_v57 = vld [vmem:[%s17558_s21 + $0xd8] sm:$0x7f]  }
 0x23c   : > { %9138 = vmatprep.subr.bf16.mxu0 %v20441_v1 }
 0x23d   : > { %v2460_v7 = vor.u32 %v2459_v4, %v2455_v3  ;;  %v6431_v3 = vld [vmem:[#allocation2 + $0x300] sm:$0xff]  ;;  %v3684_v4 = vshrl.u32 %v16803_v57, 16 }
 0x23e   : > { %8762 = vmatmul.mubr.bf16.gmra.mrb[8].mxu0 %v6361_v12  ;;  %v6448_v12 = vld [vmem:[#allocation2 + $0x388] sm:$0xff] }
 0x23f   : > { %8769 = vmatprep.mubr.bf16.mxu0 %v6372_v19  ;;  %9139 = vmatpush1.bf16.msra.mxu0 %v16744_v13  ;;  %2706 = vst [vmem:[#allocation2 + $0x710] sm:$0x3f] %v2460_v7  ;;  %v16789_v13 = vld [vmem:[%s17558_s21 + $0x68] sm:$0x3f]   ;;  %v3667_v19 = vrot.slane %v3665_v14, 1  ;;  %v2487_v7 = vrot.slane %v2485_v2, 1 }
 0x240   : > { %9140 = vmatprep.subr.bf16.mxu0 %v20441_v1  ;;  %7999 = vmatprep.mubr.bf16.mxu1 %v6448_v12  ;;  %3129 = vst [vmem:[#allocation2 + $0x3d0] sm:$0x3f] %v16789_v13  ;;  %v16805_v12 = vld [vmem:[%s17558_s21 + $0x218] sm:$0x3f]   ;;  %v16808_v13 = vld [vmem:[%s17558_s21 + $0x268] sm:$0x7f]  }
 0x241   : > { %8000 = vmatmul.mubr.bf16.vlgmr.msra.gmra.mrb[44].mxu1 %v6447_v15  ;;  %v6488_v14 = vld [vmem:[#allocation2 + $0x4c8] sm:$0xff]  ;;  %4334 = vst [vmem:[#allocation2 + $0x518] sm:$0x3f] %v16805_v12 }
 0x242   : > { %8007 = vmatprep.mubr.bf16.mxu1 %v6458_v28  ;;  %v16806_v15 = vld [vmem:[%s17558_s21 + $0x88] sm:$0x3f]   ;;  %v16810_v28 = vld [vmem:[%s17558_s21 + $0x220] sm:$0x3f]  }
 0x243   : > { %9141 = vmatpush1.bf16.msra.mxu0 %v16757_v22  ;;  %v3668_v22 = vor.u32 %v3667_v19, %v3663_v18  ;;  %v2492_v18 = vshll.u32 %v16808_v13, 16  ;;  %v6441_v19 = vld [vmem:[#allocation2 + $0x350] sm:$0xff]  ;;  %3133 = vst [vmem:[#allocation2 + $0x510] sm:$0x3f] %v16806_v15  ;;  %4335 = vst [vmem:[#allocation2 + $0x568] sm:$0x3f] %v16810_v28 }
 0x244   : > { %9142 = vmatprep.subr.bf16.mxu0 %v20441_v1  ;;  %v16826_v15 = vld [vmem:[%s17558_s21 + $0x288] sm:$0x7f]  }
 0x245   : > { %3908 = vst [vmem:[#allocation2 + $0x768] sm:$0x3f] %v3668_v22  ;;  %v2490_v22 = vshrl.u32 %v16808_v13, 16  ;;  %v16825_v13 = vld [vmem:[%s17558_s21 + $0x100] sm:$0x7f]   ;;  %v2520_v20 = vshll.u32 %v16826_v15, 16 }
 0x246   : > { %8770 = vmatmul.mubr.bf16.gmra.mrb[12].mxu0 %v6371_v30  ;;  %v3672_v30 = vshll.u32 %v16794_v25, 16  ;;  %v6452_v25 = vld [vmem:[#allocation2 + $0x3a8] sm:$0xff]  ;;  %v2518_v24 = vshrl.u32 %v16826_v15, 16  ;;  %v16842_v15 = vld [vmem:[%s17558_s21 + $0x120] sm:$0x7f]  }
 0x247   : > { %8777 = vmatprep.mubr.bf16.mxu0 %v6382_v37  ;;  %9143 = vmatpush1.bf16.msra.mxu0 %v16770_v31  ;;  %v6457_v31 = vld [vmem:[#allocation2 + $0x3d0] sm:$0xff]  ;;  %v2473_v37 = vrot.slane %v2471_v32, 1  ;;  %v3700_v32 = vshll.u32 %v16812_v27, 16 }
 0x248   : > { %9144 = vmatprep.subr.bf16.mxu0 %v20441_v1  ;;  %v3674_v35 = vrot.slane %v3672_v30, 1  ;;  %v6498_v30 = vld [vmem:[#allocation2 + $0x518] sm:$0xff] }
 0x249   : > { %8008 = vmatmul.mubr.bf16.gmra.mrb[48].mxu1 %v6457_v31  ;;  %v2474_v40 = vor.u32 %v2473_v37, %v2469_v36  ;;  %v16811_v31 = vld [vmem:[%s17558_s21 + $0x90] sm:$0x3f]   ;;  %v3698_v36 = vshrl.u32 %v16812_v27, 16  ;;  %v3702_v37 = vrot.slane %v3700_v32, 1  ;;  %v6492_v27 = vld [vmem:[#allocation2 + $0x4e8] sm:$0xff] }
 0x24a   : > { %v3675_v38 = vor.u32 %v3674_v35, %v3670_v34  ;;  %8015 = vmatprep.mubr.bf16.mxu1 %v6468_v44  ;;  %v2499_v34 = vshll.u32 %v16813_v29, 16  ;;  %v6451_v35 = vld [vmem:[#allocation2 + $0x3a0] sm:$0xff]  ;;  %3134 = vst [vmem:[#allocation2 + $0x560] sm:$0x3f] %v16811_v31  ;;  %v16809_v44 = vld [vmem:[%s20432_s1 + $0x248] sm:$0xff]  }
 0x24b   : > { %9145 = vmatpush1.bf16.msra.mxu0 %v16783_v9  ;;  %2708 = vst [vmem:[#allocation2 + $0x7b0] sm:$0x3f] %v2474_v40  ;;  %v6442_v9 = vld [vmem:[#allocation2 + $0x358] sm:$0xff]  ;;  %v3703_v40 = vor.u32 %v3702_v37, %v3698_v36  ;;  %v16827_v31 = vld [vmem:[%s17558_s21 + $0x240] sm:$0x3f]  }
 0x24c   : > { %9146 = vmatprep.subr.bf16.mxu0 %v20441_v1  ;;  %3909 = vst [vmem:[#allocation2 + $0x7b8] sm:$0x3f] %v3675_v38  ;;  %v2497_v38 = vshrl.u32 %v16813_v29, 16  ;;  %v16829_v29 = vld [vmem:[%s17558_s21 + $0x108] sm:$0x7f]  }
 0x24d   : > { %3913 = vst [vmem:[#allocation2 + $0x8f8] sm:$0x3f] %v3703_v40  ;;  %v16830_v32 = vld [vmem:[%s17558_s21 + $0x290] sm:$0x7f]   ;;  %4339 = vst [vmem:[#allocation2 + $0x6a8] sm:$0x3f] %v16827_v31 }
 0x24e   : > { %8778 = vmatmul.mubr.bf16.gmra.mrb[16].mxu0 %v6381_v47  ;;  %v6467_v47 = vld [vmem:[#allocation2 + $0x420] sm:$0xff]  ;;  %v2527_v37 = vshll.u32 %v16830_v32, 16 }
 0x24f   : > { %8785 = vmatprep.mubr.bf16.mxu0 %v6392_v53  ;;  %v2480_v53 = vrot.slane %v2478_v48, 1  ;;  %9147 = vmatpush1.bf16.msra.mxu0 %v16796_v58  ;;  %v16815_v48 = vld [vmem:[%s17558_s21 + $0x98] sm:$0x3f]   ;;  %v6472_v58 = vld [vmem:[#allocation2 + $0x448] sm:$0xff] }
 0x250   : > { %9148 = vmatprep.subr.bf16.mxu0 %v20441_v1  ;;  %3135 = vst [vmem:[#allocation2 + $0x5b0] sm:$0x3f] %v16815_v48  ;;  %v16834_v48 = vld [vmem:[%s17558_s21 + $0x298] sm:$0x7f]  }
 0x251   : > { %8016 = vmatmul.mubr.bf16.gmra.mrb[52].mxu1 %v6467_v47  ;;  %v2481_v56 = vor.u32 %v2480_v53, %v2476_v52  ;;  %v6508_v47 = vld [vmem:[#allocation2 + $0x568] sm:$0xff]  ;;  %v6507_v50 = vld [vmem:[#allocation2 + $0x560] sm:$0xff]  ;;  %v6461_v52 = vld [vmem:[#allocation2 + $0x3f0] sm:$0xff]  ;;  %v3705_v53 = vshrl.u32 %v16816_v43, 16 }
 0x252   : > { %8023 = vmatprep.mubr.bf16.mxu1 %v6478_v61  ;;  %v16818_v61 = vld [vmem:[%s17558_s21 + $0x230] sm:$0x3f]  }
 0x253   : > { %2709 = vst [vmem:[#allocation2 + $0x800] sm:$0x3f] %v2481_v56  ;;  %9149 = vmatpush1.bf16.msra.mxu0 %v16809_v44  ;;  %v2508_v56 = vrot.slane %v2506_v51, 1  ;;  %4337 = vst [vmem:[#allocation2 + $0x608] sm:$0x3f] %v16818_v61  ;;  %v6502_v44 = vld [vmem:[#allocation2 + $0x538] sm:$0xff] }
 0x254   : > { %9150 = vmatprep.subr.bf16.mxu0 %v20441_v1 }
 0x256   : > { %8786 = vmatmul.mubr.bf16.gmra.mrb[20].mxu0 %v6391_v63  ;;  %v3686_v63 = vshll.u32 %v16803_v57, 16 }
 0x257   : > { %8793 = vmatprep.mubr.bf16.mxu0 %v6402_v6  ;;  %v2483_v6 = vshrl.u32 %v16804_v60, 16  ;;  %v16820_v60 = vld [vmem:[%s17558_s21 + $0xf8] sm:$0x7f]  }
 0x258   : > { %v3688_v5 = vrot.slane %v3686_v63, 1  ;;  %v6518_v63 = vld [vmem:[#allocation2 + $0x5b8] sm:$0xff]  ;;  %v3714_v2 = vshll.u32 %v16820_v60, 16 }
 0x259   : > { %8024 = vmatmul.mubr.bf16.gmra.mrb[56].mxu1 %v6477_v0  ;;  %v2488_v10 = vor.u32 %v2487_v7, %v2483_v6  ;;  %v16819_v0 = vld [vmem:[%s17558_s21 + $0xa0] sm:$0x3f]   ;;  %v3712_v6 = vshrl.u32 %v16820_v60, 16  ;;  %v6512_v60 = vld [vmem:[#allocation2 + $0x588] sm:$0xff] }
 0x25a   : > { %v3689_v8 = vor.u32 %v3688_v5, %v3684_v4  ;;  %8031 = vmatprep.mubr.bf16.mxu1 %v6488_v14  ;;  %v2513_v4 = vshll.u32 %v16821_v62, 16  ;;  %v6471_v5 = vld [vmem:[#allocation2 + $0x440] sm:$0xff]  ;;  %3136 = vst [vmem:[#allocation2 + $0x600] sm:$0x3f] %v16819_v0  ;;  %v3716_v7 = vrot.slane %v3714_v2, 1  ;;  %v6528_v16 = vld [vmem:[#allocation2 + $0x608] sm:$0xff] }
 0x25b   : > { %2710 = vst [vmem:[#allocation2 + $0x850] sm:$0x3f] %v2488_v10  ;;  %v16823_v14 = vld [vmem:[%s17558_s21 + $0x238] sm:$0x3f]   ;;  %v16839_v0 = vld [vmem:[%s17558_s21 + $0x2a0] sm:$0x7f]  }
 0x25c   : > { %3911 = vst [vmem:[#allocation2 + $0x858] sm:$0x3f] %v3689_v8  ;;  %v2511_v8 = vshrl.u32 %v16821_v62, 16  ;;  %v3717_v10 = vor.u32 %v3716_v7, %v3712_v6  ;;  %4338 = vst [vmem:[#allocation2 + $0x658] sm:$0x3f] %v16823_v14  ;;  %v2541_v6 = vshll.u32 %v16839_v0, 16 }
 0x25d   : > { %v16838_v62 = vld [vmem:[%s17558_s21 + $0x118] sm:$0x7f]   ;;  %v6511_v7 = vld [vmem:[#allocation2 + $0x580] sm:$0xff] }
 0x25e   : > { %8794 = vmatmul.mubr.bf16.gmra.mrb[24].mxu0 %v6401_v17  ;;  %v6487_v17 = vld [vmem:[#allocation2 + $0x4c0] sm:$0xff]  ;;  %3915 = vst [vmem:[#allocation2 + $0x998] sm:$0x3f] %v3717_v10  ;;  %v2539_v10 = vshrl.u32 %v16839_v0, 16  ;;  %v16855_v0 = vld [vmem:[%s17558_s21 + $0x138] sm:$0x7f]  }
 0x25f   : > { %8801 = vmatprep.mubr.bf16.mxu0 %v6412_v23  ;;  %v2494_v23 = vrot.slane %v2492_v18, 1  ;;  %v3721_v18 = vshll.u32 %v16825_v13, 16 }
 0x261   : > { %8032 = vmatmul.mubr.bf16.gmra.mrb[60].mxu1 %v6487_v17  ;;  %v2495_v26 = vor.u32 %v2494_v23, %v2490_v22  ;;  %v16824_v17 = vld [vmem:[%s17558_s21 + $0xa8] sm:$0x3f]   ;;  %v3719_v22 = vshrl.u32 %v16825_v13, 16  ;;  %v3723_v23 = vrot.slane %v3721_v18, 1  ;;  %v6522_v13 = vld [vmem:[#allocation2 + $0x5d8] sm:$0xff] }
 0x262   : > { %8039 = vmatprep.mubr.bf16.mxu1 %v6498_v30  ;;  %3137 = vst [vmem:[#allocation2 + $0x650] sm:$0x3f] %v16824_v17  ;;  %v16822_v30 = vld [vmem:[%s20432_s1 + $0x250] sm:$0xff]   ;;  %v16840_v17 = vld [vmem:[%s17558_s21 + $0x258] sm:$0x3f]  }
 0x263   : > { %2711 = vst [vmem:[#allocation2 + $0x8a0] sm:$0x3f] %v2495_v26  ;;  %v3724_v26 = vor.u32 %v3723_v23, %v3719_v22  ;;  %9151 = vmatpush1.bf16.msra.mxu0 %v16822_v30  ;;  %v16843_v18 = vld [vmem:[%s17558_s21 + $0x2a8] sm:$0x7f]   ;;  %4342 = vst [vmem:[#allocation2 + $0x798] sm:$0x3f] %v16840_v17 }
 0x264   : > { %9152 = vmatprep.subr.bf16.mxu0 %v20441_v1  ;;  %v2548_v23 = vshll.u32 %v16843_v18, 16  ;;  %v6532_v30 = vld [vmem:[#allocation2 + $0x628] sm:$0xff] }
 0x265   : > { %3916 = vst [vmem:[#allocation2 + $0x9e8] sm:$0x3f] %v3724_v26 }
 0x266   : > { %8802 = vmatmul.mubr.bf16.gmra.mrb[28].mxu0 %v6411_v33  ;;  %v6497_v33 = vld [vmem:[#allocation2 + $0x510] sm:$0xff] }
 0x267   : > { %8809 = vmatprep.mubr.bf16.mxu0 %v6422_v39  ;;  %v2501_v39 = vrot.slane %v2499_v34, 1  ;;  %v16828_v34 = vld [vmem:[%s17558_s21 + $0xb0] sm:$0x3f]  }
 0x268   : > { %3138 = vst [vmem:[#allocation2 + $0x6a0] sm:$0x3f] %v16828_v34  ;;  %v16847_v34 = vld [vmem:[%s17558_s21 + $0x2b0] sm:$0x7f]  }
 0x269   : > { %8040 = vmatmul.mubr.bf16.gmra.mrb[64].mxu1 %v6497_v33  ;;  %v2502_v42 = vor.u32 %v2501_v39, %v2497_v38  ;;  %v6538_v33 = vld [vmem:[#allocation2 + $0x658] sm:$0xff]  ;;  %v6537_v36 = vld [vmem:[#allocation2 + $0x650] sm:$0xff]  ;;  %v6491_v38 = vld [vmem:[#allocation2 + $0x4e0] sm:$0xff]  ;;  %v3726_v39 = vshrl.u32 %v16829_v29, 16 }
 0x26a   : > { %8047 = vmatprep.mubr.bf16.mxu1 %v6508_v47  ;;  %v16831_v47 = vld [vmem:[%s17558_s21 + $0x248] sm:$0x3f]  }
 0x26b   : > { %2712 = vst [vmem:[#allocation2 + $0x8f0] sm:$0x3f] %v2502_v42  ;;  %v2529_v42 = vrot.slane %v2527_v37, 1  ;;  %4340 = vst [vmem:[#allocation2 + $0x6f8] sm:$0x3f] %v16831_v47 }
 0x26e   : > { %8810 = vmatmul.mubr.bf16.gmra.mrb[32].mxu0 %v6421_v49  ;;  %v3707_v49 = vshll.u32 %v16816_v43, 16 }
 0x26f   : > { %8817 = vmatprep.mubr.bf16.mxu0 %v6432_v55  ;;  %v2504_v55 = vshrl.u32 %v16817_v46, 16  ;;  %v16833_v46 = vld [vmem:[%s17558_s21 + $0x110] sm:$0x7f]  }
 0x270   : > { %v3709_v54 = vrot.slane %v3707_v49, 1  ;;  %v6548_v49 = vld [vmem:[#allocation2 + $0x6a8] sm:$0xff]  ;;  %v3735_v51 = vshll.u32 %v16833_v46, 16 }
 0x271   : > { %8048 = vmatmul.mubr.bf16.gmra.mrb[68].mxu1 %v6507_v50  ;;  %v2509_v59 = vor.u32 %v2508_v56, %v2504_v55  ;;  %v16832_v50 = vld [vmem:[%s17558_s21 + $0xb8] sm:$0x3f]   ;;  %v3733_v55 = vshrl.u32 %v16833_v46, 16 }
 0x272   : > { %v3710_v57 = vor.u32 %v3709_v54, %v3705_v53  ;;  %8055 = vmatprep.mubr.bf16.mxu1 %v6518_v63  ;;  %v2534_v53 = vshll.u32 %v16834_v48, 16  ;;  %v6501_v54 = vld [vmem:[#allocation2 + $0x530] sm:$0xff]  ;;  %3139 = vst [vmem:[#allocation2 + $0x6f0] sm:$0x3f] %v16832_v50  ;;  %v3737_v56 = vrot.slane %v3735_v51, 1  ;;  %v6558_v2 = vld [vmem:[#allocation2 + $0x6f8] sm:$0xff] }
 0x273   : > { %2713 = vst [vmem:[#allocation2 + $0x940] sm:$0x3f] %v2509_v59  ;;  %v16836_v63 = vld [vmem:[%s17558_s21 + $0x250] sm:$0x3f]   ;;  %v6542_v46 = vld [vmem:[#allocation2 + $0x678] sm:$0xff] }
 0x274   : > { %3914 = vst [vmem:[#allocation2 + $0x948] sm:$0x3f] %v3710_v57  ;;  %v2532_v57 = vshrl.u32 %v16834_v48, 16  ;;  %v3738_v59 = vor.u32 %v3737_v56, %v3733_v55  ;;  %4341 = vst [vmem:[#allocation2 + $0x748] sm:$0x3f] %v16836_v63  ;;  %v6541_v56 = vld [vmem:[#allocation2 + $0x670] sm:$0xff] }
 0x275   : > { %v16851_v48 = vld [vmem:[%s17558_s21 + $0x130] sm:$0x7f]   ;;  %v16852_v50 = vld [vmem:[%s17558_s21 + $0x2b8] sm:$0x7f]  }
 0x276   : > { %8818 = vmatmul.mubr.bf16.gmra.mrb[36].mxu0 %v6431_v3  ;;  %v6517_v3 = vld [vmem:[#allocation2 + $0x5b0] sm:$0xff]  ;;  %3918 = vst [vmem:[#allocation2 + $0xa88] sm:$0x3f] %v3738_v59  ;;  %v2562_v55 = vshll.u32 %v16852_v50, 16  ;;  %v2560_v59 = vshrl.u32 %v16852_v50, 16 }
 0x277   : > { %8825 = vmatprep.mubr.bf16.mxu0 %v6442_v9  ;;  %v2515_v9 = vrot.slane %v2513_v4, 1  ;;  %v3742_v4 = vshll.u32 %v16838_v62, 16 }
 0x279   : > { %8056 = vmatmul.mubr.bf16.gmra.mrb[72].mxu1 %v6517_v3  ;;  %v2516_v12 = vor.u32 %v2515_v9, %v2511_v8  ;;  %v16837_v3 = vld [vmem:[%s17558_s21 + $0xc0] sm:$0x3f]   ;;  %v3740_v8 = vshrl.u32 %v16838_v62, 16  ;;  %v3744_v9 = vrot.slane %v3742_v4, 1  ;;  %v6552_v62 = vld [vmem:[#allocation2 + $0x6c8] sm:$0xff] }
 0x27a   : > { %8063 = vmatprep.mubr.bf16.mxu1 %v6528_v16  ;;  %3140 = vst [vmem:[#allocation2 + $0x740] sm:$0x3f] %v16837_v3  ;;  %v16835_v16 = vld [vmem:[%s20432_s1 + $0x258] sm:$0xff]   ;;  %v18238_v3 = vpop.f32.mrb[0].mxu1  ;;  %v16853_v4 = vld [vmem:[%s17558_s21 + $0x270] sm:$0x3f]  }
 0x27b   : > { %2714 = vst [vmem:[#allocation2 + $0x990] sm:$0x3f] %v2516_v12  ;;  %v3745_v12 = vor.u32 %v3744_v9, %v3740_v8  ;;  %9153 = vmatpush1.bf16.msra.mxu0 %v16835_v16  ;;  %v16854_v8 = vld [vmem:[%s17558_s21 + $0xe0] sm:$0x3f]   ;;  %v3770_v9 = vshll.u32 %v16855_v0, 16 }
 0x27c   : > { %9154 = vmatprep.subr.bf16.mxu0 %v20441_v1  ;;  %4345 = vst [vmem:[#allocation2 + $0x888] sm:$0x3f] %v16853_v4  ;;  %3144 = vst [vmem:[#allocation2 + $0x880] sm:$0x3f] %v16854_v8 }
 0x27d   : > { %3919 = vst [vmem:[#allocation2 + $0xad8] sm:$0x3f] %v3745_v12  ;;  %v6551_v12 = vld [vmem:[#allocation2 + $0x6c0] sm:$0xff] }
 0x27e   : > { %8826 = vmatmul.mubr.bf16.gmra.mrb[40].mxu0 %v6441_v19  ;;  %v6527_v19 = vld [vmem:[#allocation2 + $0x600] sm:$0xff] }
 0x27f   : > { %8833 = vmatprep.mubr.bf16.mxu0 %v6452_v25  ;;  %v2522_v25 = vrot.slane %v2520_v20, 1  ;;  %v16841_v20 = vld [vmem:[%s17558_s21 + $0xc8] sm:$0x3f]  }
 0x280   : > { %3141 = vst [vmem:[#allocation2 + $0x790] sm:$0x3f] %v16841_v20  ;;  %v16859_v20 = vld [vmem:[%s17558_s21 + $0x140] sm:$0x7f]  }
 0x281   : > { %8064 = vmatmul.mubr.bf16.gmra.mrb[76].mxu1 %v6527_v19  ;;  %v2523_v28 = vor.u32 %v2522_v25, %v2518_v24  ;;  %v6568_v19 = vld [vmem:[#allocation2 + $0x748] sm:$0xff]  ;;  %v6567_v22 = vld [vmem:[#allocation2 + $0x740] sm:$0xff]  ;;  %v6521_v24 = vld [vmem:[#allocation2 + $0x5d0] sm:$0xff]  ;;  %v3747_v25 = vshrl.u32 %v16842_v15, 16 }
 0x282   : > { %8071 = vmatprep.mubr.bf16.mxu1 %v6538_v33  ;;  %v16844_v33 = vld [vmem:[%s17558_s21 + $0x260] sm:$0x3f]  }
 0x283   : > { %2715 = vst [vmem:[#allocation2 + $0x9e0] sm:$0x3f] %v2523_v28  ;;  %v2550_v28 = vrot.slane %v2548_v23, 1  ;;  %4343 = vst [vmem:[#allocation2 + $0x7e8] sm:$0x3f] %v16844_v33  ;;  %v3775_v33 = vshrl.u32 %v16859_v20, 16 }
 0x284   : > { %v16860_v23 = vld [vmem:[%s17558_s21 + $0x2c8] sm:$0x7f]  }
 0x286   : > { %8834 = vmatmul.mubr.bf16.gmra.mrb[44].mxu0 %v6451_v35  ;;  %v3728_v35 = vshll.u32 %v16829_v29, 16 }
 0x287   : > { %8841 = vmatprep.mubr.bf16.mxu0 %v6462_v41  ;;  %v2525_v41 = vshrl.u32 %v16830_v32, 16  ;;  %v16846_v32 = vld [vmem:[%s17558_s21 + $0x128] sm:$0x7f]  }
 0x288   : > { %v3730_v40 = vrot.slane %v3728_v35, 1  ;;  %v6578_v35 = vld [vmem:[#allocation2 + $0x798] sm:$0xff]  ;;  %v3756_v37 = vshll.u32 %v16846_v32, 16 }
 0x289   : > { %8072 = vmatmul.mubr.bf16.gmra.mrb[80].mxu1 %v6537_v36  ;;  %v2530_v45 = vor.u32 %v2529_v42, %v2525_v41  ;;  %v16845_v36 = vld [vmem:[%s17558_s21 + $0xd0] sm:$0x3f]   ;;  %v3754_v41 = vshrl.u32 %v16846_v32, 16 }
 0x28a   : > { %v3731_v43 = vor.u32 %v3730_v40, %v3726_v39  ;;  %8079 = vmatprep.mubr.bf16.mxu1 %v6548_v49  ;;  %v2555_v39 = vshll.u32 %v16847_v34, 16  ;;  %v6531_v40 = vld [vmem:[#allocation2 + $0x620] sm:$0xff]  ;;  %3142 = vst [vmem:[#allocation2 + $0x7e0] sm:$0x3f] %v16845_v36  ;;  %v3758_v42 = vrot.slane %v3756_v37, 1  ;;  %v6588_v51 = vld [vmem:[#allocation2 + $0x7e8] sm:$0xff] }
 0x28b   : > { %2716 = vst [vmem:[#allocation2 + $0xa30] sm:$0x3f] %v2530_v45  ;;  %v16849_v49 = vld [vmem:[%s17558_s21 + $0x268] sm:$0x3f]  }
 0x28c   : > { %3917 = vst [vmem:[#allocation2 + $0xa38] sm:$0x3f] %v3731_v43  ;;  %v2553_v43 = vshrl.u32 %v16847_v34, 16  ;;  %v3759_v45 = vor.u32 %v3758_v42, %v3754_v41  ;;  %4344 = vst [vmem:[#allocation2 + $0x838] sm:$0x3f] %v16849_v49 }
 0x28d   : > { %v16862_v42 = vld [vmem:[%s17558_s21 + $0x280] sm:$0x3f]  }
 0x28e   : > { %8842 = vmatmul.mubr.bf16.gmra.mrb[48].mxu0 %v6461_v52  ;;  %v6547_v52 = vld [vmem:[#allocation2 + $0x6a0] sm:$0xff]  ;;  %3921 = vst [vmem:[#allocation2 + $0xb78] sm:$0x3f] %v3759_v45  ;;  %4347 = vst [vmem:[#allocation2 + $0x928] sm:$0x3f] %v16862_v42 }
 0x28f   : > { %8849 = vmatprep.mubr.bf16.mxu0 %v6472_v58  ;;  %v2536_v58 = vrot.slane %v2534_v53, 1  ;;  %v3763_v53 = vshll.u32 %v16851_v48, 16  ;;  %v16877_v42 = vld [vmem:[%s17558_s21 + $0x160] sm:$0x7f]  }
 0x291   : > { %8080 = vmatmul.mubr.bf16.gmra.mrb[84].mxu1 %v6547_v52  ;;  %v2537_v61 = vor.u32 %v2536_v58, %v2532_v57  ;;  %v16850_v52 = vld [vmem:[%s17558_s21 + $0xd8] sm:$0x3f]   ;;  %v3761_v57 = vshrl.u32 %v16851_v48, 16  ;;  %v3765_v58 = vrot.slane %v3763_v53, 1 }
 0x292   : > { %8087 = vmatprep.mubr.bf16.mxu1 %v6558_v2  ;;  %3143 = vst [vmem:[#allocation2 + $0x830] sm:$0x3f] %v16850_v52  ;;  %v16848_v2 = vld [vmem:[%s20432_s1 + $0x260] sm:$0xff]  }
 0x293   : > { %2717 = vst [vmem:[#allocation2 + $0xa80] sm:$0x3f] %v2537_v61  ;;  %v3766_v61 = vor.u32 %v3765_v58, %v3761_v57  ;;  %9155 = vmatpush1.bf16.msra.mxu0 %v16848_v2  ;;  %v6582_v58 = vld [vmem:[#allocation2 + $0x7b8] sm:$0xff] }
 0x294   : > { %9156 = vmatprep.subr.bf16.mxu0 %v20441_v1 }
 0x295   : > { %3922 = vst [vmem:[#allocation2 + $0xbc8] sm:$0x3f] %v3766_v61  ;;  %v6628_v4 = vld [vmem:[#allocation2 + $0x928] sm:$0xff] }
 0x296   : > { %8850 = vmatmul.mubr.bf16.gmra.mrb[52].mxu0 %v6471_v5  ;;  %v6557_v5 = vld [vmem:[#allocation2 + $0x6f0] sm:$0xff] }
 0x297   : > { %8857 = vmatprep.mubr.bf16.mxu0 %v6482_v11  ;;  %v2543_v11 = vrot.slane %v2541_v6, 1  ;;  %v6598_v6 = vld [vmem:[#allocation2 + $0x838] sm:$0xff] }
 0x299   : > { %8088 = vmatmul.mubr.bf16.gmra.mrb[88].mxu1 %v6557_v5  ;;  %v2544_v14 = vor.u32 %v2543_v11, %v2539_v10  ;;  %v16856_v5 = vld [vmem:[%s17558_s21 + $0x2c0] sm:$0x7f]   ;;  %v6597_v10 = vld [vmem:[#allocation2 + $0x830] sm:$0xff] }
 0x29a   : > { %8095 = vmatprep.mubr.bf16.mxu1 %v6568_v19  ;;  %v2569_v11 = vshll.u32 %v16856_v5, 16 }
 0x29b   : > { %2718 = vst [vmem:[#allocation2 + $0xad0] sm:$0x3f] %v2544_v14  ;;  %v3772_v14 = vrot.slane %v3770_v9, 1 }
 0x29c   : > { %v2571_v16 = vrot.slane %v2569_v11, 1 }
 0x29e   : > { %8858 = vmatmul.mubr.bf16.gmra.mrb[56].mxu0 %v6481_v21  ;;  %v3749_v21 = vshll.u32 %v16842_v15, 16  ;;  %v2567_v15 = vshrl.u32 %v16856_v5, 16  ;;  %v16867_v5 = vld [vmem:[%s17558_s21 + $0xf8] sm:$0x3f]  }
 0x29f   : > { %8865 = vmatprep.mubr.bf16.mxu0 %v6492_v27  ;;  %v2546_v27 = vshrl.u32 %v16843_v18, 16  ;;  %v6562_v18 = vld [vmem:[#allocation2 + $0x718] sm:$0xff]  ;;  %3147 = vst [vmem:[#allocation2 + $0x970] sm:$0x3f] %v16867_v5  ;;  %v16879_v5 = vld [vmem:[%s17558_s21 + $0x2a0] sm:$0x3f]  }
 0x2a0   : > { %v3751_v26 = vrot.slane %v3749_v21, 1  ;;  %v2572_v19 = vor.u32 %v2571_v16, %v2567_v15  ;;  %4351 = vst [vmem:[#allocation2 + $0xa68] sm:$0x3f] %v16879_v5 }
 0x2a1   : > { %8096 = vmatmul.mubr.bf16.gmra.mrb[92].mxu1 %v6567_v22  ;;  %v2551_v31 = vor.u32 %v2550_v28, %v2546_v27  ;;  %v16857_v22 = vld [vmem:[%s17558_s21 + $0x278] sm:$0x3f]   ;;  %v3777_v27 = vshll.u32 %v16859_v20, 16  ;;  %v6607_v28 = vld [vmem:[#allocation2 + $0x880] sm:$0xff] }
 0x2a2   : > { %v3752_v29 = vor.u32 %v3751_v26, %v3747_v25  ;;  %8103 = vmatprep.mubr.bf16.mxu1 %v6578_v35  ;;  %2722 = vst [vmem:[#allocation2 + $0xc10] sm:$0x3f] %v2572_v19  ;;  %v6608_v25 = vld [vmem:[#allocation2 + $0x888] sm:$0xff]  ;;  %4346 = vst [vmem:[#allocation2 + $0x8d8] sm:$0x3f] %v16857_v22  ;;  %v2574_v35 = vshrl.u32 %v16860_v23, 16 }
 0x2a3   : > { %2719 = vst [vmem:[#allocation2 + $0xb20] sm:$0x3f] %v2551_v31  ;;  %v16858_v26 = vld [vmem:[%s17558_s21 + $0xe8] sm:$0x3f]   ;;  %v6561_v31 = vld [vmem:[#allocation2 + $0x710] sm:$0xff]  ;;  %v3779_v34 = vrot.slane %v3777_v27, 1 }
 0x2a4   : > { %3920 = vst [vmem:[#allocation2 + $0xb28] sm:$0x3f] %v3752_v29  ;;  %3145 = vst [vmem:[#allocation2 + $0x8d0] sm:$0x3f] %v16858_v26  ;;  %v16872_v19 = vld [vmem:[%s17558_s21 + $0x158] sm:$0x7f]  }
 0x2a5   : > { %v3780_v37 = vor.u32 %v3779_v34, %v3775_v33  ;;  %v16870_v22 = vld [vmem:[%s17558_s21 + $0x290] sm:$0x3f]   ;;  %v16871_v26 = vld [vmem:[%s17558_s21 + $0x100] sm:$0x3f]   ;;  %v3798_v27 = vshll.u32 %v16872_v19, 16  ;;  %v3796_v34 = vshrl.u32 %v16872_v19, 16 }
 0x2a6   : > { %8866 = vmatmul.mubr.bf16.gmra.mrb[60].mxu0 %v6491_v38  ;;  %v6577_v38 = vld [vmem:[#allocation2 + $0x790] sm:$0xff]  ;;  %4349 = vst [vmem:[#allocation2 + $0x9c8] sm:$0x3f] %v16870_v22  ;;  %3148 = vst [vmem:[#allocation2 + $0x9c0] sm:$0x3f] %v16871_v26 }
 0x2a7   : > { %8873 = vmatprep.mubr.bf16.mxu0 %v6502_v44  ;;  %v2557_v44 = vrot.slane %v2555_v39, 1  ;;  %3924 = vst [vmem:[#allocation2 + $0xc68] sm:$0x3f] %v3780_v37  ;;  %v16885_v26 = vld [vmem:[%s17558_s21 + $0x170] sm:$0x7f]  }
 0x2a9   : > { %8104 = vmatmul.mubr.bf16.gmra.mrb[96].mxu1 %v6577_v38  ;;  %v2558_v47 = vor.u32 %v2557_v44, %v2553_v43  ;;  %v6572_v38 = vld [vmem:[#allocation2 + $0x768] sm:$0xff]  ;;  %v16865_v43 = vld [vmem:[%s17558_s21 + $0x2d0] sm:$0x7f]   ;;  %v6618_v45 = vld [vmem:[#allocation2 + $0x8d8] sm:$0xff] }
 0x2aa   : > { %8111 = vmatprep.mubr.bf16.mxu1 %v6588_v51  ;;  %v2583_v50 = vshll.u32 %v16865_v43, 16  ;;  %v6571_v51 = vld [vmem:[#allocation2 + $0x760] sm:$0xff] }
 0x2ab   : > { %2720 = vst [vmem:[#allocation2 + $0xb70] sm:$0x3f] %v2558_v47  ;;  %v6617_v48 = vld [vmem:[#allocation2 + $0x8d0] sm:$0xff] }
 0x2ae   : > { %8874 = vmatmul.mubr.bf16.gmra.mrb[64].mxu0 %v6501_v54  ;;  %v6587_v54 = vld [vmem:[#allocation2 + $0x7e0] sm:$0xff] }
 0x2af   : > { %8881 = vmatprep.mubr.bf16.mxu0 %v6512_v60  ;;  %v2564_v60 = vrot.slane %v2562_v55, 1  ;;  %v2581_v55 = vshrl.u32 %v16865_v43, 16 }
 0x2b1   : > { %8112 = vmatmul.mubr.bf16.gmra.mrb[100].mxu1 %v6587_v54  ;;  %v2565_v63 = vor.u32 %v2564_v60, %v2560_v59  ;;  %v16868_v60 = vld [vmem:[%s17558_s21 + $0x150] sm:$0x7f]  }
 0x2b2   : > { %8119 = vmatprep.mubr.bf16.mxu1 %v6598_v6  ;;  %v3791_v6 = vshll.u32 %v16868_v60, 16 }
 0x2b3   : > { %2721 = vst [vmem:[#allocation2 + $0xbc0] sm:$0x3f] %v2565_v63  ;;  %v16866_v63 = vld [vmem:[%s17558_s21 + $0x288] sm:$0x3f]  }
 0x2b4   : > { %4348 = vst [vmem:[#allocation2 + $0x978] sm:$0x3f] %v16866_v63 }
 0x2b6   : > { %8882 = vmatmul.mubr.bf16.gmra.mrb[68].mxu0 %v6511_v7  ;;  %v7498_v7 = vpop.f32.mrb[1].mxu1 }
 0x2b7   : > { %8889 = vmatprep.mubr.bf16.mxu0 %v6522_v13  ;;  %v3768_v13 = vshrl.u32 %v16855_v0, 16  ;;  %v18245_v21 = vpop.f32.mrb[2].mxu1  ;;  %v16869_v0 = vld [vmem:[%s17558_s21 + $0x2d8] sm:$0x7f]  }
 0x2b8   : > { %v2590_v9 = vshll.u32 %v16869_v0, 16 }
 0x2b9   : > { %8120 = vmatmul.mubr.bf16.gmra.mrb[104].mxu1 %v6597_v10  ;;  %v3773_v17 = vor.u32 %v3772_v14, %v3768_v13  ;;  %v6581_v10 = vld [vmem:[#allocation2 + $0x7b0] sm:$0xff]  ;;  %v3793_v13 = vrot.slane %v3791_v6, 1  ;;  %v2588_v14 = vshrl.u32 %v16869_v0, 16  ;;  %v16881_v0 = vld [vmem:[%s17558_s21 + $0x168] sm:$0x7f]  }
 0x2ba   : > { %8127 = vmatprep.mubr.bf16.mxu1 %v6608_v25  ;;  %v2592_v15 = vrot.slane %v2590_v9, 1  ;;  %v16882_v6 = vld [vmem:[%s17558_s21 + $0x2f0] sm:$0x7f]  }
 0x2bb   : > { %3923 = vst [vmem:[#allocation2 + $0xc18] sm:$0x3f] %v3773_v17  ;;  %v6592_v17 = vld [vmem:[#allocation2 + $0x808] sm:$0xff]  ;;  %v6638_v25 = vld [vmem:[#allocation2 + $0x978] sm:$0xff]  ;;  %v2609_v19 = vshrl.u32 %v16882_v6, 16 }
 0x2be   : > { %8890 = vmatmul.mubr.bf16.gmra.mrb[72].mxu0 %v6521_v24  ;;  %v7501_v24 = vpop.f32.mrb[3].mxu1 }
 0x2bf   : > { %8897 = vmatprep.mubr.bf16.mxu0 %v6532_v30  ;;  %v18250_v29 = vpop.f32.mrb[4].mxu1  ;;  %v2576_v30 = vshll.u32 %v16860_v23, 16  ;;  %v16873_v23 = vld [vmem:[%s17558_s21 + $0x2e0] sm:$0x7f]  }
 0x2c0   : > { %v7506_v32 = vpop.f32.mrb[5].mxu1 }
 0x2c1   : > { %8128 = vmatmul.mubr.bf16.gmra.mrb[108].mxu1 %v6607_v28  ;;  %v2578_v36 = vrot.slane %v2576_v30, 1  ;;  %v18253_v41 = vpop.f32.mrb[6].mxu1  ;;  %v6637_v28 = vld [vmem:[#allocation2 + $0x970] sm:$0xff]  ;;  %v6591_v32 = vld [vmem:[#allocation2 + $0x800] sm:$0xff] }
 0x2c2   : > { %v7509_v44 = vpop.f32.mrb[7].mxu1  ;;  %8135 = vmatprep.mubr.bf16.mxu1 %v6618_v45  ;;  %v16878_v45 = vld [vmem:[%s17558_s21 + $0x2e8] sm:$0x7f]  }
 0x2c3   : > { %v2579_v39 = vor.u32 %v2578_v36, %v2574_v35  ;;  %v18258_v49 = vpop.f32.mrb[8].mxu1  ;;  %v3800_v35 = vrot.slane %v3798_v27, 1  ;;  %v2595_v36 = vshrl.u32 %v16873_v23, 16  ;;  %v16875_v44 = vld [vmem:[%s17558_s21 + $0x298] sm:$0x3f]  }
 0x2c4   : > { %v7514_v52 = vpop.f32.mrb[9].mxu1  ;;  %4350 = vst [vmem:[#allocation2 + $0xa18] sm:$0x3f] %v16875_v44 }
 0x2c5   : > { %2723 = vst [vmem:[#allocation2 + $0xc60] sm:$0x3f] %v2579_v39  ;;  %v18261_v61 = vpop.f32.mrb[10].mxu1  ;;  %v6602_v39 = vld [vmem:[#allocation2 + $0x858] sm:$0xff] }
 0x2c6   : > { %8898 = vmatmul.mubr.bf16.gmra.mrb[76].mxu0 %v6531_v40  ;;  %v16864_v40 = vld [vmem:[%s17558_s21 + $0x148] sm:$0x7f]   ;;  %v7517_v2 = vpop.f32.mrb[11].mxu1 }
 0x2c7   : > { %8905 = vmatprep.mubr.bf16.mxu0 %v6542_v46  ;;  %v16863_v46 = vld [vmem:[%s17558_s21 + $0xf0] sm:$0x3f]   ;;  %v3784_v47 = vshll.u32 %v16864_v40, 16  ;;  %v3782_v53 = vshrl.u32 %v16864_v40, 16  ;;  %v18269_v8 = vpop.f32.mrb[12].mxu1 }
 0x2c8   : > { %3146 = vst [vmem:[#allocation2 + $0x920] sm:$0x3f] %v16863_v46  ;;  %v7522_v11 = vpop.f32.mrb[13].mxu1 }
 0x2c9   : > { %8136 = vmatmul.mubr.bf16.gmra.mrb[112].mxu1 %v6617_v48  ;;  %v3786_v54 = vrot.slane %v3784_v47, 1  ;;  %v18273_v20 = vpop.f32.mrb[14].mxu1  ;;  %v6648_v47 = vld [vmem:[#allocation2 + $0x9c8] sm:$0xff]  ;;  %v3812_v11 = vshll.u32 %v16881_v0, 16 }
 0x2ca   : > { %8143 = vmatprep.mubr.bf16.mxu1 %v6628_v4  ;;  %v7525_v24 = vpop.f32.mrb[15].mxu1  ;;  %v16876_v48 = vld [vmem:[%s17558_s21 + $0x108] sm:$0x3f]   ;;  %v16874_v4 = vld [vmem:[%s20432_s1 + $0x270] sm:$0xff]  }
 0x2cb   : > { %v3787_v57 = vor.u32 %v3786_v54, %v3782_v53  ;;  %v18278_v30 = vpop.f32.mrb[16].mxu1  ;;  %v2604_v53 = vshll.u32 %v16878_v45, 16  ;;  %v6601_v54 = vld [vmem:[#allocation2 + $0x850] sm:$0xff]  ;;  %3149 = vst [vmem:[#allocation2 + $0xa10] sm:$0x3f] %v16876_v48  ;;  %v6658_v9 = vld [vmem:[#allocation2 + $0xa18] sm:$0xff] }
 0x2cc   : > { %v7530_v33 = vpop.f32.mrb[17].mxu1  ;;  %v6622_v24 = vld [vmem:[#allocation2 + $0x8f8] sm:$0xff]  ;;  %v6632_v48 = vld [vmem:[#allocation2 + $0x948] sm:$0xff] }
 0x2cd   : > { %3925 = vst [vmem:[#allocation2 + $0xcb8] sm:$0x3f] %v3787_v57  ;;  %v18281_v43 = vpop.f32.mrb[18].mxu1  ;;  %v6668_v33 = vld [vmem:[#allocation2 + $0xa68] sm:$0xff] }
 0x2ce   : > { %8906 = vmatmul.mubr.bf16.gmra.mrb[80].mxu0 %v6541_v56  ;;  %v2585_v56 = vrot.slane %v2583_v50, 1  ;;  %v7533_v46 = vpop.f32.mrb[19].mxu1  ;;  %v3805_v50 = vshll.u32 %v16877_v42, 16 }
 0x2cf   : > { %8913 = vmatprep.mubr.bf16.mxu0 %v6552_v62  ;;  %v16861_v62 = vld [vmem:[%s20432_s1 + $0x268] sm:$0xff]   ;;  %v6627_v7 = vld [vmem:[#allocation2 + $0x920] sm:$0xff]  ;;  %v18286_v52 = vpop.f32.mrb[20].mxu1 }
 0x2d0   : > { %v2586_v59 = vor.u32 %v2585_v56, %v2581_v55  ;;  %9157 = vmatpush1.bf16.msra.mxu0 %v16861_v62  ;;  %v7538_v55 = vpop.f32.mrb[21].mxu1  ;;  %v3803_v56 = vshrl.u32 %v16877_v42, 16  ;;  %v3807_v57 = vrot.slane %v3805_v50, 1  ;;  %v6612_v62 = vld [vmem:[#allocation2 + $0x8a8] sm:$0xff]  ;;  %v3817_v42 = vshrl.u32 %v16885_v26, 16 }
 0x2d1   : > { %8144 = vmatmul.mubr.bf16.gmra.mrb[116].mxu1 %v6627_v7  ;;  %9158 = vmatprep.subr.bf16.mxu0 %v20441_v1  ;;  %v18289_v2 = vpop.f32.mrb[22].mxu1  ;;  %v16891_v55 = vld [vmem:[%s17558_s21 + $0x300] sm:$0x7f]  }
 0x2d2   : > { %2724 = vst [vmem:[#allocation2 + $0xcb0] sm:$0x3f] %v2586_v59  ;;  %8151 = vmatprep.mubr.bf16.mxu1 %v6638_v25  ;;  %v2606_v59 = vrot.slane %v2604_v53, 1  ;;  %v7541_v7 = vpop.f32.mrb[23].mxu1 }
 0x2d4   : > { %9159 = vmatpush1.bf16.msra.mxu0 %v16874_v4 }
 0x2d5   : > { %9160 = vmatprep.subr.bf16.mxu0 %v20441_v1 }
 0x2d6   : > { %8914 = vmatmul.mubr.bf16.gmra.mrb[84].mxu0 %v6551_v12  ;;  %v3789_v12 = vshrl.u32 %v16868_v60, 16  ;;  %v3808_v60 = vor.u32 %v3807_v57, %v3803_v56 }
 0x2d7   : > { %8921 = vmatprep.mubr.bf16.mxu0 %v6562_v18  ;;  %v2593_v18 = vor.u32 %v2592_v15, %v2588_v14  ;;  %v2611_v14 = vshll.u32 %v16882_v6, 16  ;;  %v6611_v15 = vld [vmem:[#allocation2 + $0x8a0] sm:$0xff]  ;;  %v2623_v6 = vshrl.u32 %v16891_v55, 16 }
 0x2d8   : > { %v3794_v16 = vor.u32 %v3793_v13, %v3789_v12  ;;  %3928 = vst [vmem:[#allocation2 + $0xda8] sm:$0x3f] %v3808_v60  ;;  %v6657_v12 = vld [vmem:[#allocation2 + $0xa10] sm:$0xff]  ;;  %v18297_v13 = vpop.f32.mrb[24].mxu1 }
 0x2d9   : > { %2725 = vst [vmem:[#allocation2 + $0xd00] sm:$0x3f] %v2593_v18  ;;  %8152 = vmatmul.mubr.bf16.gmra.mrb[120].mxu1 %v6637_v28  ;;  %v3814_v18 = vrot.slane %v3812_v11, 1  ;;  %v2613_v22 = vrot.slane %v2611_v14, 1  ;;  %v16883_v28 = vld [vmem:[%s17558_s21 + $0x2a8] sm:$0x3f]  }
 0x2da   : > { %3926 = vst [vmem:[#allocation2 + $0xd08] sm:$0x3f] %v3794_v16  ;;  %8159 = vmatprep.mubr.bf16.mxu1 %v6648_v47  ;;  %v7546_v16 = vpop.f32.mrb[25].mxu1  ;;  %4352 = vst [vmem:[#allocation2 + $0xab8] sm:$0x3f] %v16883_v28  ;;  %v6642_v11 = vld [vmem:[#allocation2 + $0x998] sm:$0xff] }
 0x2db   : > { %v2614_v25 = vor.u32 %v2613_v22, %v2609_v19  ;;  %v18301_v27 = vpop.f32.mrb[26].mxu1  ;;  %v16894_v14 = vld [vmem:[%s17558_s21 + $0x180] sm:$0x7f]   ;;  %v16887_v16 = vld [vmem:[%s20432_s1 + $0x278] sm:$0xff]  }
 0x2dc   : > { %9161 = vmatpush1.bf16.msra.mxu0 %v16887_v16  ;;  %v16901_v16 = vld [vmem:[%s17558_s21 + $0x138] sm:$0x3f]  }
 0x2dd   : > { %2728 = vst [vmem:[#allocation2 + $0xdf0] sm:$0x3f] %v2614_v25  ;;  %3155 = vst [vmem:[#allocation2 + $0xbf0] sm:$0x3f] %v16901_v16 }
 0x2de   : > { %8922 = vmatmul.mubr.bf16.gmra.mrb[88].mxu0 %v6561_v31  ;;  %v2597_v31 = vshll.u32 %v16873_v23, 16 }
 0x2df   : > { %8929 = vmatprep.mubr.bf16.mxu0 %v6572_v38  ;;  %v3801_v38 = vor.u32 %v3800_v35, %v3796_v34  ;;  %v16884_v34 = vld [vmem:[%s17558_s21 + $0x118] sm:$0x3f]   ;;  %v3819_v35 = vshll.u32 %v16885_v26, 16 }
 0x2e0   : > { %v2599_v37 = vrot.slane %v2597_v31, 1  ;;  %v16886_v31 = vld [vmem:[%s17558_s21 + $0x2f8] sm:$0x7f]   ;;  %3151 = vst [vmem:[#allocation2 + $0xab0] sm:$0x3f] %v16884_v34 }
 0x2e1   : > { %3927 = vst [vmem:[#allocation2 + $0xd58] sm:$0x3f] %v3801_v38  ;;  %v2618_v38 = vshll.u32 %v16886_v31, 16  ;;  %v3821_v44 = vrot.slane %v3819_v35, 1  ;;  %v6678_v57 = vld [vmem:[#allocation2 + $0xab8] sm:$0xff] }
 0x2e2   : > { %v2600_v40 = vor.u32 %v2599_v37, %v2595_v36 }
 0x2e3   : > { %v2620_v46 = vrot.slane %v2618_v38, 1  ;;  %v3822_v47 = vor.u32 %v3821_v44, %v3817_v42  ;;  %v16898_v42 = vld [vmem:[%s17558_s21 + $0x10] sm:$0x7f]  }
 0x2e4   : > { %2726 = vst [vmem:[#allocation2 + $0xd50] sm:$0x3f] %v2600_v40 }
 0x2e5   : > { %3930 = vst [vmem:[#allocation2 + $0xe48] sm:$0x3f] %v3822_v47 }
 0x2e6   : > { %8930 = vmatmul.mubr.bf16.gmra.mrb[92].mxu0 %v6571_v51  ;;  %v6647_v51 = vld [vmem:[#allocation2 + $0x9c0] sm:$0xff] }
 0x2e7   : > { %8937 = vmatprep.mubr.bf16.mxu0 %v6582_v58  ;;  %8160 = vmatmul.mubr.bf16.gmra.mrb[124].mxu1 %v6647_v51  ;;  %v2602_v58 = vshrl.u32 %v16878_v45, 16  ;;  %v2616_v45 = vshrl.u32 %v16886_v31, 16  ;;  %v16890_v51 = vld [vmem:[%s17558_s21 + $0x178] sm:$0x7f]   ;;  %v6677_v60 = vld [vmem:[#allocation2 + $0xab0] sm:$0xff] }
 0x2e8   : > { %8167 = vmatprep.mubr.bf16.mxu1 %v6658_v9  ;;  %v3824_v4 = vshrl.u32 %v16890_v51, 16  ;;  %v6631_v9 = vld [vmem:[#allocation2 + $0x940] sm:$0xff] }
 0x2e9   : > { %v2607_v63 = vor.u32 %v2606_v59, %v2602_v58  ;;  %v2621_v50 = vor.u32 %v2620_v46, %v2616_v45  ;;  %v16889_v58 = vld [vmem:[%s17558_s21 + $0x120] sm:$0x3f]   ;;  %v3826_v59 = vshll.u32 %v16890_v51, 16  ;;  %v16899_v46 = vld [vmem:[%s17558_s21 + $0x198] sm:$0x7f]   ;;  %v5906_v51 = vshll.u32 %v16898_v42, 16 }
 0x2ea   : > { %3152 = vst [vmem:[#allocation2 + $0xb00] sm:$0x3f] %v16889_v58  ;;  %v16896_v45 = vld [vmem:[%s17558_s21 + $0x2c0] sm:$0x3f]   ;;  %v5904_v58 = vshrl.u32 %v16898_v42, 16 }
 0x2eb   : > { %2727 = vst [vmem:[#allocation2 + $0xda0] sm:$0x3f] %v2607_v63  ;;  %2729 = vst [vmem:[#allocation2 + $0xe40] sm:$0x3f] %v2621_v50  ;;  %v2625_v63 = vshll.u32 %v16891_v55, 16  ;;  %v3828_v5 = vrot.slane %v3826_v59, 1 }
 0x2ec   : > { %v16897_v50 = vld [vmem:[%s17558_s21 + $0x130] sm:$0x3f]   ;;  %4355 = vst [vmem:[#allocation2 + $0xba8] sm:$0x3f] %v16896_v45  ;;  %v5908_v59 = vrot.slane %v5906_v51, 1 }
 0x2ed   : > { %v2627_v7 = vrot.slane %v2625_v63, 1  ;;  %3154 = vst [vmem:[#allocation2 + $0xba0] sm:$0x3f] %v16897_v50 }
 0x2ee   : > { %8938 = vmatmul.mubr.bf16.gmra.mrb[96].mxu0 %v6581_v10  ;;  %v16880_v10 = vld [vmem:[%s17558_s21 + $0x110] sm:$0x3f]  }
 0x2ef   : > { %8945 = vmatprep.mubr.bf16.mxu0 %v6592_v17  ;;  %8168 = vmatmul.mubr.bf16.gmra.mrb[128].mxu1 %v6657_v12  ;;  %3150 = vst [vmem:[#allocation2 + $0xa60] sm:$0x3f] %v16880_v10  ;;  %v3810_v17 = vshrl.u32 %v16881_v0, 16  ;;  %v3829_v10 = vor.u32 %v3828_v5, %v3824_v4  ;;  %v2628_v12 = vor.u32 %v2627_v7, %v2623_v6  ;;  %v6662_v5 = vld [vmem:[#allocation2 + $0xa38] sm:$0xff] }
 0x2f0   : > { %8175 = vmatprep.mubr.bf16.mxu1 %v6668_v33  ;;  %v5909_v4 = vor.u32 %v5908_v59, %v5904_v58  ;;  %v16902_v7 = vld [vmem:[%s17558_s21 + $0x18] sm:$0x7f]   ;;  %v6671_v58 = vld [vmem:[#allocation2 + $0xa80] sm:$0xff] }
 0x2f1   : > { %v3815_v23 = vor.u32 %v3814_v18, %v3810_v17  ;;  %3931 = vst [vmem:[#allocation2 + $0xe98] sm:$0x3f] %v3829_v10  ;;  %2730 = vst [vmem:[#allocation2 + $0xe90] sm:$0x3f] %v2628_v12  ;;  %v16892_v17 = vld [vmem:[%s17558_s21 + $0x2b8] sm:$0x3f]  }
 0x2f2   : > { %v16895_v18 = vld [vmem:[%s17558_s21 + $0x308] sm:$0x7f]   ;;  %v6687_v25 = vld [vmem:[#allocation2 + $0xb00] sm:$0xff]  ;;  %4354 = vst [vmem:[#allocation2 + $0xb58] sm:$0x3f] %v16892_v17  ;;  %v5913_v17 = vshll.u32 %v16902_v7, 16 }
 0x2f3   : > { %3929 = vst [vmem:[#allocation2 + $0xdf8] sm:$0x3f] %v3815_v23  ;;  %v16893_v23 = vld [vmem:[%s17558_s21 + $0x128] sm:$0x3f]   ;;  %v2632_v28 = vshll.u32 %v16895_v18, 16  ;;  %v2630_v34 = vshrl.u32 %v16895_v18, 16 }
 0x2f4   : > { %3153 = vst [vmem:[#allocation2 + $0xb50] sm:$0x3f] %v16893_v23  ;;  %6287 = vst [vmem:[#allocation2 + $0x48] sm:$0x3f] %v5909_v4  ;;  %v16900_v10 = vld [vmem:[%s17558_s21 + $0x2c8] sm:$0x3f]  }
 0x2f5   : > { %v2634_v35 = vrot.slane %v2632_v28, 1  ;;  %v6707_v18 = vld [vmem:[#allocation2 + $0xba0] sm:$0xff]  ;;  %4356 = vst [vmem:[#allocation2 + $0xbf8] sm:$0x3f] %v16900_v10  ;;  %v5915_v23 = vrot.slane %v5913_v17, 1  ;;  %v6661_v28 = vld [vmem:[#allocation2 + $0xa30] sm:$0xff] }
 0x2f6   : > { %8946 = vmatmul.mubr.bf16.gmra.mrb[100].mxu0 %v6591_v32  ;;  %v7549_v32 = vpop.f32.mrb[27].mxu1  ;;  %v6667_v36 = vld [vmem:[#allocation2 + $0xa60] sm:$0xff]  ;;  %v16911_v10 = vld [vmem:[%s17558_s21 + $0x1b0] sm:$0x7f]  }
 0x2f7   : > { %8953 = vmatprep.mubr.bf16.mxu0 %v6602_v39  ;;  %v18306_v37 = vpop.f32.mrb[28].mxu1  ;;  %v6621_v39 = vld [vmem:[#allocation2 + $0x8f0] sm:$0xff]  ;;  %8176 = vmatmul.mubr.bf16.gmra.mrb[132].mxu1 %v6667_v36  ;;  %v3831_v32 = vshrl.u32 %v16894_v14, 16 }
 0x2f8   : > { %v7554_v40 = vpop.f32.mrb[29].mxu1  ;;  %8183 = vmatprep.mubr.bf16.mxu1 %v6678_v57  ;;  %v6641_v36 = vld [vmem:[#allocation2 + $0x990] sm:$0xff] }
 0x2f9   : > { %v18309_v53 = vpop.f32.mrb[30].mxu1  ;;  %v2635_v40 = vor.u32 %v2634_v35, %v2630_v34 }
 0x2fa   : > { %v7557_v56 = vpop.f32.mrb[31].mxu1 }
 0x2fb   : > { %2731 = vst [vmem:[#allocation2 + $0xee0] sm:$0x3f] %v2635_v40  ;;  %v4705_v56 = vshll.u32 %v16899_v46, 16  ;;  %v16907_v40 = vld [vmem:[%s17558_s21 + $0x1a8] sm:$0x7f]  }
 0x2fc   : > { %v6718_v45 = vld [vmem:[#allocation2 + $0xbf8] sm:$0xff]  ;;  %v4719_v50 = vshll.u32 %v16907_v40, 16 }
 0x2fd   : > { %v4707_v63 = vrot.slane %v4705_v56, 1  ;;  %v4717_v56 = vshrl.u32 %v16907_v40, 16  ;;  %v16912_v40 = vld [vmem:[%s17558_s21 + $0x2e0] sm:$0x3f]  }
 0x2fe   : > { %8954 = vmatmul.mubr.bf16.gmra.mrb[104].mxu0 %v6601_v54  ;;  %v16888_v54 = vld [vmem:[%s17558_s21 + $0x2b0] sm:$0x3f]   ;;  %4359 = vst [vmem:[#allocation2 + $0xce8] sm:$0x3f] %v16912_v40 }
 0x2ff   : > { %8961 = vmatprep.mubr.bf16.mxu0 %v6612_v62  ;;  %v18314_v62 = vpop.f32.mrb[32].mxu1  ;;  %4353 = vst [vmem:[#allocation2 + $0xb08] sm:$0x3f] %v16888_v54  ;;  %8184 = vmatmul.mubr.bf16.gmra.mrb[136].mxu1 %v6677_v60  ;;  %v6697_v54 = vld [vmem:[#allocation2 + $0xb50] sm:$0xff]  ;;  %v4703_v60 = vshrl.u32 %v16899_v46, 16 }
 0x300   : > { %v7562_v0 = vpop.f32.mrb[33].mxu1  ;;  %v16905_v46 = vld [vmem:[%s17558_s21 + $0x140] sm:$0x3f]  }
 0x301   : > { %v6651_v0 = vld [vmem:[#allocation2 + $0x9e0] sm:$0xff]  ;;  %v4708_v6 = vor.u32 %v4707_v63, %v4703_v60  ;;  %3156 = vst [vmem:[#allocation2 + $0xc40] sm:$0x3f] %v16905_v46  ;;  %v6682_v60 = vld [vmem:[#allocation2 + $0xad8] sm:$0xff] }
 0x303   : > { %5086 = vst [vmem:[#allocation2 + $0x40] sm:$0x3f] %v4708_v6 }
 0x306   : > { %8962 = vmatmul.mubr.bf16.gmra.mrb[108].mxu0 %v6611_v15  ;;  %v18317_v15 = vpop.f32.mrb[34].mxu1  ;;  %v6688_v22 = vld [vmem:[#allocation2 + $0xb08] sm:$0xff] }
 0x307   : > { %8969 = vmatprep.mubr.bf16.mxu0 %v6622_v24  ;;  %v7565_v19 = vpop.f32.mrb[35].mxu1  ;;  %v3833_v24 = vshll.u32 %v16894_v14, 16  ;;  %8191 = vmatprep.mubr.bf16.mxu1 %v6688_v22  ;;  %v6708_v14 = vld [vmem:[#allocation2 + $0xba8] sm:$0xff]  ;;  %v5911_v22 = vshrl.u32 %v16902_v7, 16  ;;  %v16908_v7 = vld [vmem:[%s17558_s21 + $0x2d8] sm:$0x3f]  }
 0x308   : > { %v18325_v26 = vpop.f32.mrb[36].mxu1  ;;  %8192 = vmatmul.mubr.bf16.gmra.mrb[140].mxu1 %v6687_v25  ;;  %v6727_v17 = vld [vmem:[#allocation2 + $0xc40] sm:$0xff]  ;;  %4358 = vst [vmem:[#allocation2 + $0xc98] sm:$0x3f] %v16908_v7 }
 0x309   : > { %v7570_v31 = vpop.f32.mrb[37].mxu1  ;;  %v3835_v33 = vrot.slane %v3833_v24, 1 }
 0x30a   : > { %v18328_v44 = vpop.f32.mrb[38].mxu1  ;;  %v5916_v31 = vor.u32 %v5915_v23, %v5911_v22  ;;  %v4724_v23 = vshrl.u32 %v16911_v10, 16 }
 0x30b   : > { %v3836_v38 = vor.u32 %v3835_v33, %v3831_v32  ;;  %v7573_v47 = vpop.f32.mrb[39].mxu1  ;;  %v6672_v32 = vld [vmem:[#allocation2 + $0xa88] sm:$0xff] }
 0x30c   : > { %v18333_v55 = vpop.f32.mrb[40].mxu1  ;;  %6288 = vst [vmem:[#allocation2 + $0x98] sm:$0x3f] %v5916_v31  ;;  %v6692_v31 = vld [vmem:[#allocation2 + $0xb28] sm:$0xff] }
 0x30d   : > { %3932 = vst [vmem:[#allocation2 + $0xee8] sm:$0x3f] %v3836_v38  ;;  %v7578_v57 = vpop.f32.mrb[41].mxu1 }
 0x30e   : > { %8970 = vmatmul.mubr.bf16.gmra.mrb[112].mxu0 %v6621_v39  ;;  %v6652_v39 = vld [vmem:[#allocation2 + $0x9e8] sm:$0xff]  ;;  %v4721_v57 = vrot.slane %v4719_v50, 1 }
 0x30f   : > { %8977 = vmatprep.mubr.bf16.mxu0 %v6632_v48  ;;  %v6698_v48 = vld [vmem:[#allocation2 + $0xb58] sm:$0xff] }
 0x310   : > { %8199 = vmatprep.mubr.bf16.mxu1 %v6698_v48  ;;  %v6717_v48 = vld [vmem:[#allocation2 + $0xbf0] sm:$0xff]  ;;  %v6738_v46 = vld [vmem:[#allocation2 + $0xc98] sm:$0xff] }
 0x311   : > { %8200 = vmatmul.mubr.bf16.gmra.mrb[144].mxu1 %v6697_v54 }
 0x312   : > { %8207 = vmatprep.mubr.bf16.mxu1 %v6708_v14  ;;  %v16909_v14 = vld [vmem:[%s17558_s21 + $0x148] sm:$0x3f]  }
 0x313   : > { %3157 = vst [vmem:[#allocation2 + $0xc90] sm:$0x3f] %v16909_v14  ;;  %v16919_v14 = vld [vmem:[%s17558_s21 + $0x1c0] sm:$0x7f]  }
 0x316   : > { %8978 = vmatmul.mubr.bf16.gmra.mrb[116].mxu0 %v6631_v9  ;;  %v18336_v9 = vpop.f32.mrb[42].mxu1 }
 0x317   : > { %8985 = vmatprep.mubr.bf16.mxu0 %v6642_v11  ;;  %v16903_v11 = vld [vmem:[%s17558_s21 + $0x1a0] sm:$0x7f]   ;;  %v7581_v12 = vpop.f32.mrb[43].mxu1 }
 0x318   : > { %v4712_v19 = vshll.u32 %v16903_v11, 16  ;;  %v4710_v24 = vshrl.u32 %v16903_v11, 16  ;;  %v18341_v33 = vpop.f32.mrb[44].mxu1 }
 0x319   : > { %8208 = vmatmul.mubr.bf16.gmra.mrb[148].mxu1 %v6707_v18  ;;  %v8003_v35 = vpop.f32.mrb[45].mxu1  ;;  %v4726_v18 = vshll.u32 %v16911_v10, 16  ;;  %v16918_v10 = vld [vmem:[%s17558_s21 + $0x38] sm:$0x7f]  }
 0x31a   : > { %v4714_v25 = vrot.slane %v4712_v19, 1  ;;  %v18344_v38 = vpop.f32.mrb[46].mxu1  ;;  %8215 = vmatprep.mubr.bf16.mxu1 %v6718_v45  ;;  %v6737_v50 = vld [vmem:[#allocation2 + $0xc90] sm:$0xff] }
 0x31b   : > { %v8006_v42 = vpop.f32.mrb[47].mxu1 }
 0x31c   : > { %v4715_v34 = vor.u32 %v4714_v25, %v4710_v24  ;;  %v18349_v63 = vpop.f32.mrb[48].mxu1  ;;  %v4728_v24 = vrot.slane %v4726_v18, 1  ;;  %v6681_v25 = vld [vmem:[#allocation2 + $0xad0] sm:$0xff]  ;;  %v16915_v42 = vld [vmem:[%s17558_s21 + $0x1b8] sm:$0x7f]  }
 0x31d   : > { %v8011_v4 = vpop.f32.mrb[49].mxu1  ;;  %v16917_v18 = vld [vmem:[%s17558_s21 + $0x158] sm:$0x3f]  }
 0x31e   : > { %8986 = vmatmul.mubr.bf16.gmra.mrb[120].mxu0 %v6641_v36  ;;  %v16906_v36 = vld [vmem:[%s17558_s21 + $0x20] sm:$0x7f]   ;;  %5087 = vst [vmem:[#allocation2 + $0x90] sm:$0x3f] %v4715_v34  ;;  %v18352_v6 = vpop.f32.mrb[50].mxu1  ;;  %v4729_v34 = vor.u32 %v4728_v24, %v4724_v23  ;;  %v4740_v23 = vshll.u32 %v16919_v14, 16 }
 0x31f   : > { %8993 = vmatprep.mubr.bf16.mxu0 %v6652_v39  ;;  %v16904_v39 = vld [vmem:[%s17558_s21 + $0x2d0] sm:$0x3f]   ;;  %v5920_v47 = vshll.u32 %v16906_v36, 16  ;;  %v5918_v51 = vshrl.u32 %v16906_v36, 16  ;;  %v8014_v11 = vpop.f32.mrb[51].mxu1  ;;  %v5939_v24 = vshrl.u32 %v16918_v10, 16 }
 0x320   : > { %4357 = vst [vmem:[#allocation2 + $0xc48] sm:$0x3f] %v16904_v39  ;;  %v16914_v36 = vld [vmem:[%s17558_s21 + $0x30] sm:$0x7f]   ;;  %5089 = vst [vmem:[#allocation2 + $0x130] sm:$0x3f] %v4729_v34 }
 0x321   : > { %8216 = vmatmul.mubr.bf16.gmra.mrb[152].mxu1 %v6717_v48  ;;  %v5922_v54 = vrot.slane %v5920_v47, 1  ;;  %v16913_v47 = vld [vmem:[%s17558_s21 + $0x150] sm:$0x3f]   ;;  %v5934_v48 = vshll.u32 %v16914_v36, 16  ;;  %3159 = vst [vmem:[#allocation2 + $0xd30] sm:$0x3f] %v16917_v18 }
 0x322   : > { %3158 = vst [vmem:[#allocation2 + $0xce0] sm:$0x3f] %v16913_v47  ;;  %v6701_v34 = vld [vmem:[#allocation2 + $0xb70] sm:$0xff] }
 0x323   : > { %v5923_v59 = vor.u32 %v5922_v54, %v5918_v51  ;;  %v4733_v51 = vshll.u32 %v16915_v42, 16  ;;  %v5932_v54 = vshrl.u32 %v16914_v36, 16  ;;  %v6712_v36 = vld [vmem:[#allocation2 + $0xbc8] sm:$0xff] }
 0x325   : > { %6289 = vst [vmem:[#allocation2 + $0xe8] sm:$0x3f] %v5923_v59  ;;  %v6691_v59 = vld [vmem:[#allocation2 + $0xb20] sm:$0xff] }
 0x326   : > { %8994 = vmatmul.mubr.bf16.gmra.mrb[124].mxu0 %v6651_v0  ;;  %v4722_v0 = vor.u32 %v4721_v57, %v4717_v56  ;;  %v5936_v56 = vrot.slane %v5934_v48, 1  ;;  %v4731_v57 = vshrl.u32 %v16915_v42, 16  ;;  %v16920_v48 = vld [vmem:[%s17558_s21 + $0x2f0] sm:$0x3f]  }
 0x327   : > { %9001 = vmatprep.mubr.bf16.mxu0 %v6662_v5  ;;  %v16910_v5 = vld [vmem:[%s17558_s21 + $0x28] sm:$0x7f]   ;;  %4361 = vst [vmem:[#allocation2 + $0xd88] sm:$0x3f] %v16920_v48 }
 0x328   : > { %5088 = vst [vmem:[#allocation2 + $0xe0] sm:$0x3f] %v4722_v0  ;;  %v6728_v12 = vld [vmem:[#allocation2 + $0xc48] sm:$0xff]  ;;  %v5927_v16 = vshll.u32 %v16910_v5, 16  ;;  %v5925_v19 = vshrl.u32 %v16910_v5, 16  ;;  %v6702_v0 = vld [vmem:[#allocation2 + $0xb78] sm:$0xff] }
 0x329   : > { %8223 = vmatprep.mubr.bf16.mxu1 %v6728_v12  ;;  %v16916_v12 = vld [vmem:[%s17558_s21 + $0x2e8] sm:$0x3f]  }
 0x32a   : > { %8224 = vmatmul.mubr.bf16.gmra.mrb[156].mxu1 %v6727_v17  ;;  %v5929_v22 = vrot.slane %v5927_v16, 1  ;;  %v6748_v17 = vld [vmem:[#allocation2 + $0xce8] sm:$0xff]  ;;  %4360 = vst [vmem:[#allocation2 + $0xd38] sm:$0x3f] %v16916_v12 }
 0x32b   : > { %8231 = vmatprep.mubr.bf16.mxu1 %v6738_v46  ;;  %v16922_v46 = vld [vmem:[%s17558_s21 + $0x40] sm:$0x7f]  }
 0x32e   : > { %9002 = vmatmul.mubr.bf16.gmra.mrb[128].mxu0 %v6661_v28  ;;  %v5930_v28 = vor.u32 %v5929_v22, %v5925_v19  ;;  %v5941_v19 = vshll.u32 %v16918_v10, 16  ;;  %v6747_v22 = vld [vmem:[#allocation2 + $0xce0] sm:$0xff] }
 0x32f   : > { %9009 = vmatprep.mubr.bf16.mxu0 %v6672_v32  ;;  %v18357_v32 = vpop.f32.mrb[52].mxu1  ;;  %v6711_v10 = vld [vmem:[#allocation2 + $0xbc0] sm:$0xff] }
 0x330   : > { %v8019_v35 = vpop.f32.mrb[53].mxu1  ;;  %6290 = vst [vmem:[#allocation2 + $0x138] sm:$0x3f] %v5930_v28  ;;  %v4738_v28 = vshrl.u32 %v16919_v14, 16  ;;  %v6722_v14 = vld [vmem:[#allocation2 + $0xc18] sm:$0xff] }
 0x331   : > { %v18360_v39 = vpop.f32.mrb[54].mxu1 }
 0x332   : > { %v8022_v45 = vpop.f32.mrb[55].mxu1  ;;  %8232 = vmatmul.mubr.bf16.gmra.mrb[160].mxu1 %v6737_v50  ;;  %v16923_v50 = vld [vmem:[%s17558_s21 + $0x1c8] sm:$0x7f]  }
 0x333   : > { %v18365_v4 = vpop.f32.mrb[56].mxu1  ;;  %8239 = vmatprep.mubr.bf16.mxu1 %v6748_v17 }
 0x334   : > { %v8027_v7 = vpop.f32.mrb[57].mxu1 }
 0x335   : > { %v18368_v11 = vpop.f32.mrb[58].mxu1 }
 0x336   : > { %9010 = vmatmul.mubr.bf16.gmra.mrb[132].mxu0 %v6671_v58  ;;  %v4735_v58 = vrot.slane %v4733_v51, 1  ;;  %v8030_v16 = vpop.f32.mrb[59].mxu1 }
 0x337   : > { %9017 = vmatprep.mubr.bf16.mxu0 %v6682_v60  ;;  %v5937_v60 = vor.u32 %v5936_v56, %v5932_v54  ;;  %v18373_v40 = vpop.f32.mrb[60].mxu1  ;;  %v6758_v54 = vld [vmem:[#allocation2 + $0xd38] sm:$0xff]  ;;  %v16921_v56 = vld [vmem:[%s17558_s21 + $0x160] sm:$0x3f]  }
 0x338   : > { %v4736_v5 = vor.u32 %v4735_v58, %v4731_v57  ;;  %v8035_v45 = vpop.f32.mrb[61].mxu1  ;;  %v5948_v57 = vshll.u32 %v16922_v46, 16  ;;  %v6757_v58 = vld [vmem:[#allocation2 + $0xd30] sm:$0xff]  ;;  %3160 = vst [vmem:[#allocation2 + $0xd80] sm:$0x3f] %v16921_v56 }
 0x339   : > { %6291 = vst [vmem:[#allocation2 + $0x188] sm:$0x3f] %v5937_v60  ;;  %v18376_v47 = vpop.f32.mrb[62].mxu1  ;;  %v5946_v60 = vshrl.u32 %v16922_v46, 16 }
 0x33a   : > { %5090 = vst [vmem:[#allocation2 + $0x180] sm:$0x3f] %v4736_v5  ;;  %8240 = vmatmul.mubr.bf16.gmra.mrb[164].mxu1 %v6747_v22  ;;  %v8038_v51 = vpop.f32.mrb[63].mxu1  ;;  %v4745_v5 = vshrl.u32 %v16923_v50, 16 }
 0x33b   : > { %8247 = vmatprep.mubr.bf16.mxu1 %v6758_v54  ;;  %v6732_v54 = vld [vmem:[#allocation2 + $0xc68] sm:$0xff] }
 0x33c   : > { %v18381_v16 = vpop.f32.mrb[64].mxu1 }
 0x33d   : > { %v8043_v18 = vpop.f32.mrb[65].mxu1 }
 0x33e   : > { %9018 = vmatmul.mubr.bf16.gmra.mrb[136].mxu0 %v6681_v25  ;;  %v5943_v25 = vrot.slane %v5941_v19, 1  ;;  %v16926_v19 = vld [vmem:[%s17558_s21 + $0x48] sm:$0x7f]   ;;  %v18384_v22 = vpop.f32.mrb[66].mxu1 }
 0x33f   : > { %9025 = vmatprep.mubr.bf16.mxu0 %v6692_v31  ;;  %v4742_v31 = vrot.slane %v4740_v23, 1  ;;  %v16924_v23 = vld [vmem:[%s17558_s21 + $0x2f8] sm:$0x3f]  }
 0x340   : > { %v5944_v35 = vor.u32 %v5943_v25, %v5939_v24  ;;  %v16927_v24 = vld [vmem:[%s17558_s21 + $0x1d0] sm:$0x7f]   ;;  %v8046_v25 = vpop.f32.mrb[67].mxu1  ;;  %4362 = vst [vmem:[#allocation2 + $0xdd8] sm:$0x3f] %v16924_v23 }
 0x341   : > { %v4743_v42 = vor.u32 %v4742_v31, %v4738_v28  ;;  %v6768_v28 = vld [vmem:[#allocation2 + $0xd88] sm:$0xff]  ;;  %v4752_v46 = vshrl.u32 %v16927_v24, 16 }
 0x342   : > { %6292 = vst [vmem:[#allocation2 + $0x1d8] sm:$0x3f] %v5944_v35  ;;  %8248 = vmatmul.mubr.bf16.gmra.mrb[168].mxu1 %v6757_v58  ;;  %v16925_v31 = vld [vmem:[%s17558_s21 + $0x168] sm:$0x3f]   ;;  %v6767_v35 = vld [vmem:[#allocation2 + $0xd80] sm:$0xff] }
 0x343   : > { %5091 = vst [vmem:[#allocation2 + $0x1d0] sm:$0x3f] %v4743_v42  ;;  %8255 = vmatprep.mubr.bf16.mxu1 %v6768_v28  ;;  %3161 = vst [vmem:[#allocation2 + $0xdd0] sm:$0x3f] %v16925_v31  ;;  %v5953_v42 = vshrl.u32 %v16926_v19, 16  ;;  %v6731_v28 = vld [vmem:[#allocation2 + $0xc60] sm:$0xff] }
 0x344   : > { %v18389_v56 = vpop.f32.mrb[68].mxu1 }
 0x345   : > { %v8051_v58 = vpop.f32.mrb[69].mxu1 }
 0x346   : > { %9026 = vmatmul.mubr.bf16.gmra.mrb[140].mxu0 %v6691_v59  ;;  %v4747_v59 = vshll.u32 %v16923_v50, 16  ;;  %v6721_v50 = vld [vmem:[#allocation2 + $0xc10] sm:$0xff] }
 0x347   : > { %9033 = vmatprep.mubr.bf16.mxu0 %v6702_v0  ;;  %v5950_v0 = vrot.slane %v5948_v57, 1 }
 0x348   : > { %v4749_v7 = vrot.slane %v4747_v59, 1  ;;  %v16930_v59 = vld [vmem:[%s17558_s21 + $0x50] sm:$0x7f]  }
 0x349   : > { %v5951_v12 = vor.u32 %v5950_v0, %v5946_v60  ;;  %v18392_v60 = vpop.f32.mrb[70].mxu1  ;;  %v16928_v0 = vld [vmem:[%s17558_s21 + $0x300] sm:$0x3f]  }
 0x34a   : > { %v4750_v17 = vor.u32 %v4749_v7, %v4745_v5  ;;  %8256 = vmatmul.mubr.bf16.gmra.mrb[172].mxu1 %v6767_v35  ;;  %v16931_v5 = vld [vmem:[%s17558_s21 + $0x1d8] sm:$0x7f]   ;;  %v8054_v7 = vpop.f32.mrb[71].mxu1  ;;  %4363 = vst [vmem:[#allocation2 + $0xe28] sm:$0x3f] %v16928_v0 }
 0x34b   : > { %6293 = vst [vmem:[#allocation2 + $0x228] sm:$0x3f] %v5951_v12  ;;  %v16929_v12 = vld [vmem:[%s17558_s21 + $0x170] sm:$0x3f]   ;;  %v4761_v18 = vshll.u32 %v16931_v5, 16 }
 0x34c   : > { %5092 = vst [vmem:[#allocation2 + $0x220] sm:$0x3f] %v4750_v17  ;;  %v6777_v17 = vld [vmem:[#allocation2 + $0xdd0] sm:$0xff]  ;;  %3162 = vst [vmem:[#allocation2 + $0xe20] sm:$0x3f] %v16929_v12  ;;  %v18397_v35 = vpop.f32.mrb[72].mxu1 }
 0x34d   : > { %v4763_v25 = vrot.slane %v4761_v18, 1  ;;  %v6752_v18 = vld [vmem:[#allocation2 + $0xd08] sm:$0xff] }
 0x34e   : > { %9034 = vmatmul.mubr.bf16.gmra.mrb[144].mxu0 %v6701_v34  ;;  %v5955_v34 = vshll.u32 %v16926_v19, 16  ;;  %v5960_v19 = vshrl.u32 %v16930_v59, 16 }
 0x34f   : > { %9041 = vmatprep.mubr.bf16.mxu0 %v6712_v36  ;;  %v4754_v36 = vshll.u32 %v16927_v24, 16  ;;  %v4759_v24 = vshrl.u32 %v16931_v5, 16 }
 0x350   : > { %v5957_v45 = vrot.slane %v5955_v34, 1  ;;  %v6742_v34 = vld [vmem:[#allocation2 + $0xcb8] sm:$0xff] }
 0x351   : > { %v4756_v48 = vrot.slane %v4754_v36, 1  ;;  %v4764_v36 = vor.u32 %v4763_v25, %v4759_v24  ;;  %v16938_v25 = vld [vmem:[%s17558_s21 + $0x60] sm:$0x7f]  }
 0x352   : > { %v5958_v51 = vor.u32 %v5957_v45, %v5953_v42  ;;  %v8059_v42 = vpop.f32.mrb[73].mxu1  ;;  %v16934_v45 = vld [vmem:[%s17558_s21 + $0x58] sm:$0x7f]  }
 0x353   : > { %v4757_v57 = vor.u32 %v4756_v48, %v4752_v46  ;;  %v18400_v46 = vpop.f32.mrb[74].mxu1  ;;  %5094 = vst [vmem:[#allocation2 + $0x2c0] sm:$0x3f] %v4764_v36  ;;  %v16932_v48 = vld [vmem:[%s17558_s21 + $0x308] sm:$0x3f]   ;;  %v5969_v58 = vshll.u32 %v16934_v45, 16 }
 0x354   : > { %6294 = vst [vmem:[#allocation2 + $0x278] sm:$0x3f] %v5958_v51  ;;  %v8062_v51 = vpop.f32.mrb[75].mxu1  ;;  %4364 = vst [vmem:[#allocation2 + $0xe78] sm:$0x3f] %v16932_v48  ;;  %v5967_v5 = vshrl.u32 %v16934_v45, 16 }
 0x355   : > { %5093 = vst [vmem:[#allocation2 + $0x270] sm:$0x3f] %v4757_v57  ;;  %v16933_v57 = vld [vmem:[%s17558_s21 + $0x178] sm:$0x3f]   ;;  %v5971_v7 = vrot.slane %v5969_v58, 1  ;;  %v5976_v48 = vshll.u32 %v16938_v25, 16 }
 0x356   : > { %9042 = vmatmul.mubr.bf16.gmra.mrb[148].mxu0 %v6711_v10  ;;  %v6778_v10 = vld [vmem:[#allocation2 + $0xdd8] sm:$0xff]  ;;  %3163 = vst [vmem:[#allocation2 + $0xe70] sm:$0x3f] %v16933_v57  ;;  %v16937_v45 = vld [vmem:[%s17558_s21 + $0x180] sm:$0x3f]  }
 0x357   : > { %9049 = vmatprep.mubr.bf16.mxu0 %v6722_v14  ;;  %v5962_v14 = vshll.u32 %v16930_v59, 16  ;;  %8263 = vmatprep.mubr.bf16.mxu1 %v6778_v10  ;;  %v6787_v59 = vld [vmem:[#allocation2 + $0xe20] sm:$0xff]  ;;  %3164 = vst [vmem:[#allocation2 + $0xec0] sm:$0x3f] %v16937_v45  ;;  %v5978_v57 = vrot.slane %v5976_v48, 1 }
 0x358   : > { %8264 = vmatmul.mubr.bf16.gmra.mrb[176].mxu1 %v6777_v17  ;;  %v5972_v17 = vor.u32 %v5971_v7, %v5967_v5  ;;  %v6762_v7 = vld [vmem:[#allocation2 + $0xd58] sm:$0xff] }
 0x359   : > { %v5964_v23 = vrot.slane %v5962_v14, 1  ;;  %v6741_v14 = vld [vmem:[#allocation2 + $0xcb0] sm:$0xff] }
 0x35a   : > { %6296 = vst [vmem:[#allocation2 + $0x318] sm:$0x3f] %v5972_v17  ;;  %v16940_v17 = vld [vmem:[%s17558_s21 + $0x68] sm:$0x7f]  }
 0x35b   : > { %v5965_v31 = vor.u32 %v5964_v23, %v5960_v19  ;;  %v18405_v19 = vpop.f32.mrb[76].mxu1  ;;  %v6798_v42 = vld [vmem:[#allocation2 + $0xe78] sm:$0xff] }
 0x35c   : > { %v8067_v24 = vpop.f32.mrb[77].mxu1 }
 0x35d   : > { %6295 = vst [vmem:[#allocation2 + $0x2c8] sm:$0x3f] %v5965_v31  ;;  %v16936_v31 = vld [vmem:[%s17558_s21 + $0x310] sm:$0x3f]  }
 0x35e   : > { %9050 = vmatmul.mubr.bf16.gmra.mrb[152].mxu0 %v6721_v50  ;;  %v16935_v50 = vld [vmem:[%s17558_s21 + $0x1e0] sm:$0x7f]   ;;  %4365 = vst [vmem:[#allocation2 + $0xec8] sm:$0x3f] %v16936_v31  ;;  %v5983_v31 = vshll.u32 %v16940_v17, 16 }
 0x35f   : > { %9057 = vmatprep.mubr.bf16.mxu0 %v6732_v54  ;;  %v6788_v54 = vld [vmem:[#allocation2 + $0xe28] sm:$0xff]  ;;  %v4768_v0 = vshll.u32 %v16935_v50, 16  ;;  %v4766_v10 = vshrl.u32 %v16935_v50, 16  ;;  %v6797_v50 = vld [vmem:[#allocation2 + $0xe70] sm:$0xff] }
 0x360   : > { %8271 = vmatprep.mubr.bf16.mxu1 %v6788_v54  ;;  %v5974_v54 = vshrl.u32 %v16938_v25, 16  ;;  %v5985_v45 = vrot.slane %v5983_v31, 1 }
 0x361   : > { %8272 = vmatmul.mubr.bf16.gmra.mrb[180].mxu1 %v6787_v59  ;;  %v4770_v12 = vrot.slane %v4768_v0, 1  ;;  %v6751_v0 = vld [vmem:[#allocation2 + $0xd00] sm:$0xff] }
 0x362   : > { %8279 = vmatprep.mubr.bf16.mxu1 %v6798_v42  ;;  %v5979_v5 = vor.u32 %v5978_v57, %v5974_v54  ;;  %v5981_v42 = vshrl.u32 %v16940_v17, 16  ;;  %v6772_v57 = vld [vmem:[#allocation2 + $0xda8] sm:$0xff] }
 0x363   : > { %v4771_v23 = vor.u32 %v4770_v12, %v4766_v10 }
 0x364   : > { %6297 = vst [vmem:[#allocation2 + $0x368] sm:$0x3f] %v5979_v5  ;;  %v5986_v54 = vor.u32 %v5985_v45, %v5981_v42  ;;  %v16942_v5 = vld [vmem:[%s17558_s21 + $0x70] sm:$0x7f]   ;;  %v6782_v45 = vld [vmem:[#allocation2 + $0xdf8] sm:$0xff] }
 0x365   : > { %5095 = vst [vmem:[#allocation2 + $0x310] sm:$0x3f] %v4771_v23  ;;  %v16941_v23 = vld [vmem:[%s17558_s21 + $0x1f0] sm:$0x7f]   ;;  %v6808_v25 = vld [vmem:[#allocation2 + $0xec8] sm:$0xff]  ;;  %v5990_v17 = vshll.u32 %v16942_v5, 16 }
 0x366   : > { %9058 = vmatmul.mubr.bf16.gmra.mrb[156].mxu0 %v6731_v28  ;;  %v18408_v28 = vpop.f32.mrb[78].mxu1  ;;  %v4780_v48 = vshrl.u32 %v16941_v23, 16  ;;  %6298 = vst [vmem:[#allocation2 + $0x3b8] sm:$0x3f] %v5986_v54  ;;  %v16944_v54 = vld [vmem:[%s17558_s21 + $0x78] sm:$0x7f]  }
 0x367   : > { %9065 = vmatprep.mubr.bf16.mxu0 %v6742_v34  ;;  %v16939_v34 = vld [vmem:[%s17558_s21 + $0x1e8] sm:$0x7f]   ;;  %v8070_v36 = vpop.f32.mrb[79].mxu1 }
 0x368   : > { %v4775_v51 = vshll.u32 %v16939_v34, 16  ;;  %v4773_v58 = vshrl.u32 %v16939_v34, 16  ;;  %v18413_v10 = vpop.f32.mrb[80].mxu1  ;;  %v6807_v34 = vld [vmem:[#allocation2 + $0xec0] sm:$0xff]  ;;  %v4782_v36 = vshll.u32 %v16941_v23, 16 }
 0x369   : > { %8280 = vmatmul.mubr.bf16.gmra.mrb[184].mxu1 %v6797_v50 }
 0x36a   : > { %v4777_v59 = vrot.slane %v4775_v51, 1  ;;  %8287 = vmatprep.mubr.bf16.mxu1 %v6808_v25  ;;  %v4784_v50 = vrot.slane %v4782_v36, 1  ;;  %v6761_v51 = vld [vmem:[#allocation2 + $0xd50] sm:$0xff]  ;;  %v5992_v25 = vrot.slane %v5990_v17, 1  ;;  %v6771_v36 = vld [vmem:[#allocation2 + $0xda0] sm:$0xff] }
 0x36c   : > { %v4778_v12 = vor.u32 %v4777_v59, %v4773_v58  ;;  %v4785_v59 = vor.u32 %v4784_v50, %v4780_v48 }
 0x36e   : > { %9066 = vmatmul.mubr.bf16.gmra.mrb[160].mxu0 %v6741_v14  ;;  %v8075_v14 = vpop.f32.mrb[81].mxu1  ;;  %5096 = vst [vmem:[#allocation2 + $0x360] sm:$0x3f] %v4778_v12  ;;  %5097 = vst [vmem:[#allocation2 + $0x3b0] sm:$0x3f] %v4785_v59 }
 0x36f   : > { %9073 = vmatprep.mubr.bf16.mxu0 %v6752_v18  ;;  %v18416_v18 = vpop.f32.mrb[82].mxu1  ;;  %v16943_v12 = vld [vmem:[%s17558_s21 + $0x1f8] sm:$0x7f]  }
 0x370   : > { %v8078_v24 = vpop.f32.mrb[83].mxu1  ;;  %v4789_v23 = vshll.u32 %v16943_v12, 16  ;;  %v4787_v31 = vshrl.u32 %v16943_v12, 16 }
 0x371   : > { %8288 = vmatmul.mubr.bf16.gmra.mrb[188].mxu1 %v6807_v34  ;;  %v18419_v58 = vpop.f32.mrb[84].mxu1  ;;  %v5988_v24 = vshrl.u32 %v16942_v5, 16  ;;  %v5997_v5 = vshll.u32 %v16944_v54, 16 }
 0x372   : > { %20444 = vst [vmem:[#allocation10_spill] sm:$0xff] %v18419_v58  ;;  %v4791_v34 = vrot.slane %v4789_v23, 1 }
 0x373   : > { %v5993_v42 = vor.u32 %v5992_v25, %v5988_v24  ;;  %v5999_v17 = vrot.slane %v5997_v5, 1  ;;  %v6781_v25 = vld [vmem:[#allocation2 + $0xdf0] sm:$0xff] }
 0x374   : > { %v4792_v50 = vor.u32 %v4791_v34, %v4787_v31  ;;  %v6792_v34 = vld [vmem:[#allocation2 + $0xe48] sm:$0xff] }
 0x375   : > { %6299 = vst [vmem:[#allocation2 + $0x408] sm:$0x3f] %v5993_v42 }
 0x376   : > { %9074 = vmatmul.mubr.bf16.gmra.mrb[164].mxu0 %v6751_v0  ;;  %v8083_v0 = vpop.f32.mrb[85].mxu1  ;;  %5098 = vst [vmem:[#allocation2 + $0x400] sm:$0x3f] %v4792_v50  ;;  %v16946_v50 = vld [vmem:[%s17558_s21 + $0x80] sm:$0x7f]  }
 0x377   : > { %9081 = vmatprep.mubr.bf16.mxu0 %v6762_v7  ;;  %v18422_v7 = vpop.f32.mrb[86].mxu1  ;;  %v6002_v5 = vshrl.u32 %v16946_v50, 16 }
 0x378   : > { %20445 = vst [vmem:[#allocation11_spill] sm:$0xff] %v18422_v7  ;;  %v8086_v14 = vpop.f32.mrb[87].mxu1  ;;  %v17008_v7 = vld [vmem:[%s17558_s21 + $0x178] sm:$0x7f]  }
 0x379   : > { %v18425_v48 = vpop.f32.mrb[88].mxu1  ;;  %v5995_v14 = vshrl.u32 %v16944_v54, 16 }
 0x37a   : > { %20446 = vst [vmem:[#allocation12_spill] sm:$0xff] %v18425_v48 }
 0x37b   : > { %v6000_v31 = vor.u32 %v5999_v17, %v5995_v14 }
 0x37d   : > { %6300 = vst [vmem:[#allocation2 + $0x458] sm:$0x3f] %v6000_v31 }
 0x37e   : > { %9082 = vmatmul.mubr.bf16.gmra.mrb[168].mxu0 %v6761_v51  ;;  %v8091_v51 = vpop.f32.mrb[89].mxu1 }
 0x37f   : > { %9089 = vmatprep.mubr.bf16.mxu0 %v6772_v57  ;;  %v18428_v59 = vpop.f32.mrb[90].mxu1  ;;  %v16945_v57 = vld [vmem:[%s17558_s21 + $0x200] sm:$0x7f]  }
 0x380   : > { %20447 = vst [vmem:[#allocation13_spill] sm:$0xff] %v18428_v59  ;;  %v8094_v0 = vpop.f32.mrb[91].mxu1  ;;  %v4796_v12 = vshll.u32 %v16945_v57, 16  ;;  %v4794_v23 = vshrl.u32 %v16945_v57, 16 }
 0x381   : > { %v18431_v42 = vpop.f32.mrb[92].mxu1  ;;  %v6004_v0 = vshll.u32 %v16946_v50, 16 }
 0x382   : > { %v4798_v24 = vrot.slane %v4796_v12, 1  ;;  %20448 = vst [vmem:[#allocation14_spill] sm:$0xff] %v18431_v42  ;;  %v8099_v51 = vpop.f32.mrb[93].mxu1  ;;  %v6791_v42 = vld [vmem:[#allocation2 + $0xe40] sm:$0xff] }
 0x383   : > { %v18434_v1 = vpop.f32.mrb[94].mxu1  ;;  %v6006_v12 = vrot.slane %v6004_v0, 1 }
 0x384   : > { %20449 = vst [vmem:[#allocation15_spill] sm:$0xff] %v18434_v1  ;;  %v8102_v54 = vpop.f32.mrb[95].mxu1 }
 0x385   : > { %v18437_v31 = vpop.f32.mrb[96].mxu1 }
 0x386   : > { %9090 = vmatmul.mubr.bf16.gmra.mrb[172].mxu0 %v6771_v36  ;;  %v4799_v36 = vor.u32 %v4798_v24, %v4794_v23  ;;  %v6007_v23 = vor.u32 %v6006_v12, %v6002_v5  ;;  %v6802_v24 = vld [vmem:[#allocation2 + $0xe98] sm:$0xff]  ;;  %20450 = vst [vmem:[#allocation16_spill] sm:$0xff] %v18437_v31  ;;  %v8107_v51 = vpop.f32.mrb[97].mxu1  ;;  %v6801_v31 = vld [vmem:[#allocation2 + $0xe90] sm:$0xff] }
 0x387   : > { %9097 = vmatprep.mubr.bf16.mxu0 %v6782_v45  ;;  %v16947_v45 = vld [vmem:[%s17558_s21 + $0x208] sm:$0x7f]   ;;  %v18440_v1 = vpop.f32.mrb[98].mxu1 }
 0x388   : > { %5099 = vst [vmem:[#allocation2 + $0x450] sm:$0x3f] %v4799_v36  ;;  %v4803_v57 = vshll.u32 %v16947_v45, 16  ;;  %v4801_v14 = vshrl.u32 %v16947_v45, 16  ;;  %6301 = vst [vmem:[#allocation2 + $0x4a8] sm:$0x3f] %v6007_v23 }
 0x389   : > { %v16948_v36 = vld [vmem:[%s17558_s21 + $0x88] sm:$0x7f]   ;;  %20451 = vst [vmem:[#allocation17_spill] sm:$0xff] %v18440_v1  ;;  %v8110_v50 = vpop.f32.mrb[99].mxu1 }
 0x38a   : > { %v4805_v17 = vrot.slane %v4803_v57, 1  ;;  %v6011_v54 = vshll.u32 %v16948_v36, 16  ;;  %v6009_v0 = vshrl.u32 %v16948_v36, 16  ;;  %v18443_v23 = vpop.f32.mrb[100].mxu1 }
 0x38b   : > { %20452 = vst [vmem:[#allocation18_spill] sm:$0xff] %v18443_v23  ;;  %v8115_v51 = vpop.f32.mrb[101].mxu1  ;;  %v6811_v23 = vld [vmem:[#allocation2 + $0xee0] sm:$0xff] }
 0x38c   : > { %v6013_v57 = vrot.slane %v6011_v54, 1  ;;  %v18446_v1 = vpop.f32.mrb[102].mxu1 }
 0x38d   : > { %20453 = vst [vmem:[#allocation19_spill] sm:$0xff] %v18446_v1  ;;  %v8118_v36 = vpop.f32.mrb[103].mxu1 }
 0x38e   : > { %9098 = vmatmul.mubr.bf16.gmra.mrb[176].mxu0 %v6781_v25  ;;  %v4806_v25 = vor.u32 %v4805_v17, %v4801_v14  ;;  %v6014_v14 = vor.u32 %v6013_v57, %v6009_v0  ;;  %v6812_v17 = vld [vmem:[#allocation2 + $0xee8] sm:$0xff] }
 0x38f   : > { %9105 = vmatprep.mubr.bf16.mxu0 %v6792_v34  ;;  %v16949_v34 = vld [vmem:[%s17558_s21 + $0x210] sm:$0x7f]  }
 0x390   : > { %5100 = vst [vmem:[#allocation2 + $0x4a0] sm:$0x3f] %v4806_v25  ;;  %v4810_v45 = vshll.u32 %v16949_v34, 16  ;;  %v4808_v5 = vshrl.u32 %v16949_v34, 16  ;;  %6302 = vst [vmem:[#allocation2 + $0x4f8] sm:$0x3f] %v6014_v14 }
 0x391   : > { %v16950_v25 = vld [vmem:[%s17558_s21 + $0x90] sm:$0x7f]   ;;  %v18449_v14 = vpop.f32.mrb[104].mxu1 }
 0x392   : > { %v4812_v12 = vrot.slane %v4810_v45, 1  ;;  %v6018_v50 = vshll.u32 %v16950_v25, 16  ;;  %v6016_v54 = vshrl.u32 %v16950_v25, 16  ;;  %20454 = vst [vmem:[#allocation20_spill] sm:$0xff] %v18449_v14  ;;  %v8123_v51 = vpop.f32.mrb[105].mxu1  ;;  %v6343_v14 = vld [vmem:[#allocation2 + $0x40] sm:$0xff] }
 0x393   : > { %v18452_v1 = vpop.f32.mrb[106].mxu1 }
 0x394   : > { %v6020_v45 = vrot.slane %v6018_v50, 1  ;;  %20455 = vst [vmem:[#allocation21_spill] sm:$0xff] %v18452_v1  ;;  %v8126_v25 = vpop.f32.mrb[107].mxu1 }
 0x396   : > { %9106 = vmatmul.mubr.bf16.gmra.mrb[180].mxu0 %v6791_v42  ;;  %v4813_v42 = vor.u32 %v4812_v12, %v4808_v5  ;;  %v6021_v5 = vor.u32 %v6020_v45, %v6016_v54  ;;  %v6344_v12 = vld [vmem:[#allocation2 + $0x48] sm:$0xff] }
 0x397   : > { %9113 = vmatprep.mubr.bf16.mxu0 %v6802_v24  ;;  %v16951_v24 = vld [vmem:[%s17558_s21 + $0x218] sm:$0x7f]  }
 0x398   : > { %5101 = vst [vmem:[#allocation2 + $0x4f0] sm:$0x3f] %v4813_v42  ;;  %v4817_v34 = vshll.u32 %v16951_v24, 16  ;;  %v4815_v0 = vshrl.u32 %v16951_v24, 16  ;;  %6303 = vst [vmem:[#allocation2 + $0x548] sm:$0x3f] %v6021_v5 }
 0x399   : > { %v16952_v42 = vld [vmem:[%s17558_s21 + $0x98] sm:$0x7f]   ;;  %v18455_v5 = vpop.f32.mrb[108].mxu1 }
 0x39a   : > { %v4819_v57 = vrot.slane %v4817_v34, 1  ;;  %v6025_v36 = vshll.u32 %v16952_v42, 16  ;;  %v6023_v50 = vshrl.u32 %v16952_v42, 16  ;;  %20456 = vst [vmem:[#allocation22_spill] sm:$0xff] %v18455_v5  ;;  %v8131_v51 = vpop.f32.mrb[109].mxu1  ;;  %v6353_v5 = vld [vmem:[#allocation2 + $0x90] sm:$0xff] }
 0x39b   : > { %v18458_v1 = vpop.f32.mrb[110].mxu1 }
 0x39c   : > { %v6027_v34 = vrot.slane %v6025_v36, 1  ;;  %20457 = vst [vmem:[#allocation23_spill] sm:$0xff] %v18458_v1  ;;  %v8134_v42 = vpop.f32.mrb[111].mxu1 }
 0x39e   : > { %9114 = vmatmul.mubr.bf16.gmra.mrb[184].mxu0 %v6801_v31  ;;  %v4820_v31 = vor.u32 %v4819_v57, %v4815_v0  ;;  %v6028_v0 = vor.u32 %v6027_v34, %v6023_v50  ;;  %v6354_v57 = vld [vmem:[#allocation2 + $0x98] sm:$0xff] }
 0x39f   : > { %9121 = vmatprep.mubr.bf16.mxu0 %v6812_v17  ;;  %v16953_v17 = vld [vmem:[%s17558_s21 + $0x220] sm:$0x7f]  }
 0x3a0   : > { %5102 = vst [vmem:[#allocation2 + $0x540] sm:$0x3f] %v4820_v31  ;;  %v4824_v24 = vshll.u32 %v16953_v17, 16  ;;  %v4822_v54 = vshrl.u32 %v16953_v17, 16  ;;  %6304 = vst [vmem:[#allocation2 + $0x598] sm:$0x3f] %v6028_v0 }
 0x3a1   : > { %v16954_v31 = vld [vmem:[%s17558_s21 + $0xa0] sm:$0x7f]   ;;  %v18461_v0 = vpop.f32.mrb[112].mxu1 }
 0x3a2   : > { %v4826_v45 = vrot.slane %v4824_v24, 1  ;;  %v6032_v25 = vshll.u32 %v16954_v31, 16  ;;  %v6030_v36 = vshrl.u32 %v16954_v31, 16  ;;  %20458 = vst [vmem:[#allocation24_spill] sm:$0xff] %v18461_v0  ;;  %v8139_v51 = vpop.f32.mrb[113].mxu1  ;;  %v6363_v0 = vld [vmem:[#allocation2 + $0xe0] sm:$0xff] }
 0x3a3   : > { %v18464_v1 = vpop.f32.mrb[114].mxu1 }
 0x3a4   : > { %v6034_v24 = vrot.slane %v6032_v25, 1  ;;  %20459 = vst [vmem:[#allocation25_spill] sm:$0xff] %v18464_v1  ;;  %v8142_v31 = vpop.f32.mrb[115].mxu1 }
 0x3a6   : > { %9122 = vmatmul.mubr.bf16.gmra.mrb[188].mxu0 %v6811_v23  ;;  %v4827_v23 = vor.u32 %v4826_v45, %v4822_v54  ;;  %v6035_v54 = vor.u32 %v6034_v24, %v6030_v36  ;;  %v6364_v45 = vld [vmem:[#allocation2 + $0xe8] sm:$0xff] }
 0x3a7   : > { %9162 = vmatprep.mubr.bf16.mxu0 %v6344_v12  ;;  %v16955_v12 = vld [vmem:[%s17558_s21 + $0x228] sm:$0x7f]  }
 0x3a8   : > { %5103 = vst [vmem:[#allocation2 + $0x590] sm:$0x3f] %v4827_v23  ;;  %v4831_v17 = vshll.u32 %v16955_v12, 16  ;;  %v4829_v50 = vshrl.u32 %v16955_v12, 16  ;;  %6305 = vst [vmem:[#allocation2 + $0x5e8] sm:$0x3f] %v6035_v54 }
 0x3a9   : > { %v16956_v23 = vld [vmem:[%s17558_s21 + $0xa8] sm:$0x7f]   ;;  %v18467_v54 = vpop.f32.mrb[116].mxu1 }
 0x3aa   : > { %v4833_v34 = vrot.slane %v4831_v17, 1  ;;  %v6039_v42 = vshll.u32 %v16956_v23, 16  ;;  %v6037_v25 = vshrl.u32 %v16956_v23, 16  ;;  %20460 = vst [vmem:[#allocation26_spill] sm:$0xff] %v18467_v54  ;;  %v8147_v51 = vpop.f32.mrb[117].mxu1  ;;  %v6373_v54 = vld [vmem:[#allocation2 + $0x130] sm:$0xff] }
 0x3ab   : > { %v18470_v1 = vpop.f32.mrb[118].mxu1 }
 0x3ac   : > { %v6041_v17 = vrot.slane %v6039_v42, 1  ;;  %20461 = vst [vmem:[#allocation27_spill] sm:$0xff] %v18470_v1  ;;  %v8150_v23 = vpop.f32.mrb[119].mxu1 }
 0x3ae   : > { %9163 = vmatmul.mubr.bf16.vlgmr.msra.gmra.mrb[0].mxu0 %v6343_v14  ;;  %v4834_v14 = vor.u32 %v4833_v34, %v4829_v50  ;;  %v6042_v50 = vor.u32 %v6041_v17, %v6037_v25  ;;  %v6374_v34 = vld [vmem:[#allocation2 + $0x138] sm:$0xff] }
 0x3af   : > { %9170 = vmatprep.mubr.bf16.mxu0 %v6354_v57  ;;  %v16957_v57 = vld [vmem:[%s17558_s21 + $0x230] sm:$0x7f]  }
 0x3b0   : > { %5104 = vst [vmem:[#allocation2 + $0x5e0] sm:$0x3f] %v4834_v14  ;;  %v4838_v12 = vshll.u32 %v16957_v57, 16  ;;  %v4836_v36 = vshrl.u32 %v16957_v57, 16  ;;  %6306 = vst [vmem:[#allocation2 + $0x638] sm:$0x3f] %v6042_v50 }
 0x3b1   : > { %v16958_v14 = vld [vmem:[%s17558_s21 + $0xb0] sm:$0x7f]   ;;  %v18473_v50 = vpop.f32.mrb[120].mxu1 }
 0x3b2   : > { %v4840_v24 = vrot.slane %v4838_v12, 1  ;;  %v6046_v31 = vshll.u32 %v16958_v14, 16  ;;  %v6044_v42 = vshrl.u32 %v16958_v14, 16  ;;  %20462 = vst [vmem:[#allocation28_spill] sm:$0xff] %v18473_v50  ;;  %v8155_v51 = vpop.f32.mrb[121].mxu1  ;;  %v6383_v50 = vld [vmem:[#allocation2 + $0x180] sm:$0xff] }
 0x3b3   : > { %v18476_v1 = vpop.f32.mrb[122].mxu1 }
 0x3b4   : > { %v6048_v12 = vrot.slane %v6046_v31, 1  ;;  %20463 = vst [vmem:[#allocation29_spill] sm:$0xff] %v18476_v1  ;;  %v8158_v14 = vpop.f32.mrb[123].mxu1 }
 0x3b6   : > { %9171 = vmatmul.mubr.bf16.gmra.mrb[4].mxu0 %v6353_v5  ;;  %v4841_v5 = vor.u32 %v4840_v24, %v4836_v36  ;;  %v6049_v36 = vor.u32 %v6048_v12, %v6044_v42  ;;  %v6384_v24 = vld [vmem:[#allocation2 + $0x188] sm:$0xff] }
 0x3b7   : > { %9178 = vmatprep.mubr.bf16.mxu0 %v6364_v45  ;;  %v16959_v45 = vld [vmem:[%s17558_s21 + $0x238] sm:$0x7f]  }
 0x3b8   : > { %5105 = vst [vmem:[#allocation2 + $0x630] sm:$0x3f] %v4841_v5  ;;  %v4845_v57 = vshll.u32 %v16959_v45, 16  ;;  %v4843_v25 = vshrl.u32 %v16959_v45, 16  ;;  %6307 = vst [vmem:[#allocation2 + $0x688] sm:$0x3f] %v6049_v36 }
 0x3b9   : > { %v16960_v5 = vld [vmem:[%s17558_s21 + $0xb8] sm:$0x7f]  }
 0x3ba   : > { %v4847_v17 = vrot.slane %v4845_v57, 1  ;;  %v6053_v23 = vshll.u32 %v16960_v5, 16  ;;  %v6051_v31 = vshrl.u32 %v16960_v5, 16  ;;  %v18479_v36 = vpop.f32.mrb[124].mxu1 }
 0x3bb   : > { %20464 = vst [vmem:[#allocation30_spill] sm:$0xff] %v18479_v36  ;;  %v8163_v51 = vpop.f32.mrb[125].mxu1  ;;  %v6393_v36 = vld [vmem:[#allocation2 + $0x1d0] sm:$0xff] }
 0x3bc   : > { %v6055_v57 = vrot.slane %v6053_v23, 1  ;;  %v18482_v1 = vpop.f32.mrb[126].mxu1 }
 0x3bd   : > { %20465 = vst [vmem:[#allocation31_spill] sm:$0xff] %v18482_v1  ;;  %v8166_v5 = vpop.f32.mrb[127].mxu1 }
 0x3be   : > { %9179 = vmatmul.mubr.bf16.gmra.mrb[8].mxu0 %v6363_v0  ;;  %v4848_v0 = vor.u32 %v4847_v17, %v4843_v25  ;;  %v6056_v25 = vor.u32 %v6055_v57, %v6051_v31  ;;  %v6394_v17 = vld [vmem:[#allocation2 + $0x1d8] sm:$0xff] }
 0x3bf   : > { %9186 = vmatprep.mubr.bf16.mxu0 %v6374_v34  ;;  %v16961_v34 = vld [vmem:[%s17558_s21 + $0x240] sm:$0x7f]  }
 0x3c0   : > { %5106 = vst [vmem:[#allocation2 + $0x680] sm:$0x3f] %v4848_v0  ;;  %v4852_v45 = vshll.u32 %v16961_v34, 16  ;;  %v4850_v42 = vshrl.u32 %v16961_v34, 16  ;;  %6308 = vst [vmem:[#allocation2 + $0x6d8] sm:$0x3f] %v6056_v25 }
 0x3c1   : > { %v16962_v0 = vld [vmem:[%s17558_s21 + $0xc0] sm:$0x7f]  }
 0x3c2   : > { %v4854_v12 = vrot.slane %v4852_v45, 1  ;;  %v6060_v14 = vshll.u32 %v16962_v0, 16  ;;  %v6058_v23 = vshrl.u32 %v16962_v0, 16  ;;  %v18485_v25 = vpop.f32.mrb[128].mxu1 }
 0x3c3   : > { %20466 = vst [vmem:[#allocation32_spill] sm:$0xff] %v18485_v25  ;;  %v8171_v51 = vpop.f32.mrb[129].mxu1  ;;  %v6403_v25 = vld [vmem:[#allocation2 + $0x220] sm:$0xff] }
 0x3c4   : > { %v6062_v45 = vrot.slane %v6060_v14, 1  ;;  %v18488_v1 = vpop.f32.mrb[130].mxu1 }
 0x3c5   : > { %20467 = vst [vmem:[#allocation33_spill] sm:$0xff] %v18488_v1  ;;  %v8174_v0 = vpop.f32.mrb[131].mxu1 }
 0x3c6   : > { %9187 = vmatmul.mubr.bf16.gmra.mrb[12].mxu0 %v6373_v54  ;;  %v4855_v54 = vor.u32 %v4854_v12, %v4850_v42  ;;  %v6063_v42 = vor.u32 %v6062_v45, %v6058_v23  ;;  %v6404_v12 = vld [vmem:[#allocation2 + $0x228] sm:$0xff] }
 0x3c7   : > { %9194 = vmatprep.mubr.bf16.mxu0 %v6384_v24  ;;  %v16963_v24 = vld [vmem:[%s17558_s21 + $0x248] sm:$0x7f]  }
 0x3c8   : > { %5107 = vst [vmem:[#allocation2 + $0x6d0] sm:$0x3f] %v4855_v54  ;;  %v4859_v34 = vshll.u32 %v16963_v24, 16  ;;  %v4857_v31 = vshrl.u32 %v16963_v24, 16  ;;  %6309 = vst [vmem:[#allocation2 + $0x728] sm:$0x3f] %v6063_v42 }
 0x3c9   : > { %v16964_v54 = vld [vmem:[%s17558_s21 + $0xc8] sm:$0x7f]  }
 0x3ca   : > { %v4861_v57 = vrot.slane %v4859_v34, 1  ;;  %v6067_v5 = vshll.u32 %v16964_v54, 16  ;;  %v6065_v14 = vshrl.u32 %v16964_v54, 16  ;;  %v18491_v42 = vpop.f32.mrb[132].mxu1 }
 0x3cb   : > { %20468 = vst [vmem:[#allocation34_spill] sm:$0xff] %v18491_v42  ;;  %v8179_v51 = vpop.f32.mrb[133].mxu1  ;;  %v6413_v42 = vld [vmem:[#allocation2 + $0x270] sm:$0xff] }
 0x3cc   : > { %v6069_v34 = vrot.slane %v6067_v5, 1  ;;  %v18494_v1 = vpop.f32.mrb[134].mxu1 }
 0x3cd   : > { %20469 = vst [vmem:[#allocation35_spill] sm:$0xff] %v18494_v1  ;;  %v8182_v54 = vpop.f32.mrb[135].mxu1 }
 0x3ce   : > { %9195 = vmatmul.mubr.bf16.gmra.mrb[16].mxu0 %v6383_v50  ;;  %v4862_v50 = vor.u32 %v4861_v57, %v4857_v31  ;;  %v6070_v31 = vor.u32 %v6069_v34, %v6065_v14  ;;  %v6414_v57 = vld [vmem:[#allocation2 + $0x278] sm:$0xff] }
 0x3cf   : > { %9202 = vmatprep.mubr.bf16.mxu0 %v6394_v17  ;;  %v16965_v17 = vld [vmem:[%s17558_s21 + $0x250] sm:$0x7f]  }
 0x3d0   : > { %5108 = vst [vmem:[#allocation2 + $0x720] sm:$0x3f] %v4862_v50  ;;  %v4866_v24 = vshll.u32 %v16965_v17, 16  ;;  %v4864_v23 = vshrl.u32 %v16965_v17, 16  ;;  %6310 = vst [vmem:[#allocation2 + $0x778] sm:$0x3f] %v6070_v31 }
 0x3d1   : > { %v16966_v50 = vld [vmem:[%s17558_s21 + $0xd0] sm:$0x7f]  }
 0x3d2   : > { %v4868_v45 = vrot.slane %v4866_v24, 1  ;;  %v6074_v0 = vshll.u32 %v16966_v50, 16  ;;  %v6072_v5 = vshrl.u32 %v16966_v50, 16  ;;  %v18497_v31 = vpop.f32.mrb[136].mxu1 }
 0x3d3   : > { %20470 = vst [vmem:[#allocation36_spill] sm:$0xff] %v18497_v31  ;;  %v8187_v51 = vpop.f32.mrb[137].mxu1  ;;  %v6423_v31 = vld [vmem:[#allocation2 + $0x2c0] sm:$0xff] }
 0x3d4   : > { %v6076_v24 = vrot.slane %v6074_v0, 1  ;;  %v18500_v1 = vpop.f32.mrb[138].mxu1 }
 0x3d5   : > { %20471 = vst [vmem:[#allocation37_spill] sm:$0xff] %v18500_v1  ;;  %v8190_v50 = vpop.f32.mrb[139].mxu1 }
 0x3d6   : > { %9203 = vmatmul.mubr.bf16.gmra.mrb[20].mxu0 %v6393_v36  ;;  %v4869_v36 = vor.u32 %v4868_v45, %v4864_v23  ;;  %v6077_v23 = vor.u32 %v6076_v24, %v6072_v5  ;;  %v6424_v45 = vld [vmem:[#allocation2 + $0x2c8] sm:$0xff] }
 0x3d7   : > { %9210 = vmatprep.mubr.bf16.mxu0 %v6404_v12  ;;  %v16967_v12 = vld [vmem:[%s17558_s21 + $0x258] sm:$0x7f]  }
 0x3d8   : > { %5109 = vst [vmem:[#allocation2 + $0x770] sm:$0x3f] %v4869_v36  ;;  %v4873_v17 = vshll.u32 %v16967_v12, 16  ;;  %v4871_v14 = vshrl.u32 %v16967_v12, 16  ;;  %6311 = vst [vmem:[#allocation2 + $0x7c8] sm:$0x3f] %v6077_v23 }
 0x3d9   : > { %v16968_v36 = vld [vmem:[%s17558_s21 + $0xd8] sm:$0x7f]  }
 0x3da   : > { %v4875_v34 = vrot.slane %v4873_v17, 1  ;;  %v6081_v54 = vshll.u32 %v16968_v36, 16  ;;  %v6079_v0 = vshrl.u32 %v16968_v36, 16  ;;  %v6574_v59 = vld [vmem:[#allocation2 + $0x778] sm:$0xff] }
 0x3db   : > { %v18503_v23 = vpop.f32.mrb[140].mxu1 }
 0x3dc   : > { %v6083_v17 = vrot.slane %v6081_v54, 1  ;;  %20472 = vst [vmem:[#allocation38_spill] sm:$0xff] %v18503_v23  ;;  %v8195_v51 = vpop.f32.mrb[141].mxu1  ;;  %v6433_v23 = vld [vmem:[#allocation2 + $0x310] sm:$0xff] }
 0x3dd   : > { %v18506_v1 = vpop.f32.mrb[142].mxu1 }
 0x3de   : > { %9211 = vmatmul.mubr.bf16.gmra.mrb[24].mxu0 %v6403_v25  ;;  %v4876_v25 = vor.u32 %v4875_v34, %v4871_v14  ;;  %v6084_v14 = vor.u32 %v6083_v17, %v6079_v0  ;;  %v6434_v34 = vld [vmem:[#allocation2 + $0x318] sm:$0xff]  ;;  %20473 = vst [vmem:[#allocation39_spill] sm:$0xff] %v18506_v1  ;;  %v8198_v36 = vpop.f32.mrb[143].mxu1 }
 0x3df   : > { %9218 = vmatprep.mubr.bf16.mxu0 %v6414_v57  ;;  %v16969_v57 = vld [vmem:[%s17558_s21 + $0x260] sm:$0x7f]  }
 0x3e0   : > { %5110 = vst [vmem:[#allocation2 + $0x7c0] sm:$0x3f] %v4876_v25  ;;  %v4880_v12 = vshll.u32 %v16969_v57, 16  ;;  %v4878_v5 = vshrl.u32 %v16969_v57, 16  ;;  %6312 = vst [vmem:[#allocation2 + $0x818] sm:$0x3f] %v6084_v14 }
 0x3e1   : > { %v16970_v25 = vld [vmem:[%s17558_s21 + $0xe0] sm:$0x7f]  }
 0x3e2   : > { %v4882_v24 = vrot.slane %v4880_v12, 1  ;;  %v6088_v50 = vshll.u32 %v16970_v25, 16  ;;  %v6086_v54 = vshrl.u32 %v16970_v25, 16 }
 0x3e4   : > { %v6090_v12 = vrot.slane %v6088_v50, 1  ;;  %v18509_v14 = vpop.f32.mrb[144].mxu1 }
 0x3e5   : > { %20474 = vst [vmem:[#allocation40_spill] sm:$0xff] %v18509_v14  ;;  %v8203_v51 = vpop.f32.mrb[145].mxu1  ;;  %v6443_v14 = vld [vmem:[#allocation2 + $0x360] sm:$0xff] }
 0x3e6   : > { %9219 = vmatmul.mubr.bf16.gmra.mrb[28].mxu0 %v6413_v42  ;;  %v4883_v42 = vor.u32 %v4882_v24, %v4878_v5  ;;  %v6091_v5 = vor.u32 %v6090_v12, %v6086_v54  ;;  %v6444_v24 = vld [vmem:[#allocation2 + $0x368] sm:$0xff]  ;;  %v18512_v1 = vpop.f32.mrb[146].mxu1 }
 0x3e7   : > { %9226 = vmatprep.mubr.bf16.mxu0 %v6424_v45  ;;  %v16971_v45 = vld [vmem:[%s17558_s21 + $0x268] sm:$0x7f]   ;;  %20475 = vst [vmem:[#allocation41_spill] sm:$0xff] %v18512_v1  ;;  %v8206_v25 = vpop.f32.mrb[147].mxu1 }
 0x3e8   : > { %5111 = vst [vmem:[#allocation2 + $0x810] sm:$0x3f] %v4883_v42  ;;  %v4887_v57 = vshll.u32 %v16971_v45, 16  ;;  %v4885_v0 = vshrl.u32 %v16971_v45, 16  ;;  %6313 = vst [vmem:[#allocation2 + $0x868] sm:$0x3f] %v6091_v5 }
 0x3e9   : > { %v16972_v42 = vld [vmem:[%s17558_s21 + $0xe8] sm:$0x7f]  }
 0x3ea   : > { %v4889_v17 = vrot.slane %v4887_v57, 1  ;;  %v6095_v36 = vshll.u32 %v16972_v42, 16  ;;  %v6093_v50 = vshrl.u32 %v16972_v42, 16 }
 0x3ec   : > { %v6097_v57 = vrot.slane %v6095_v36, 1  ;;  %v18515_v5 = vpop.f32.mrb[148].mxu1 }
 0x3ed   : > { %20476 = vst [vmem:[#allocation42_spill] sm:$0xff] %v18515_v5  ;;  %v8211_v51 = vpop.f32.mrb[149].mxu1  ;;  %v6453_v5 = vld [vmem:[#allocation2 + $0x3b0] sm:$0xff] }
 0x3ee   : > { %9227 = vmatmul.mubr.bf16.gmra.mrb[32].mxu0 %v6423_v31  ;;  %v4890_v31 = vor.u32 %v4889_v17, %v4885_v0  ;;  %v6098_v0 = vor.u32 %v6097_v57, %v6093_v50  ;;  %v6454_v17 = vld [vmem:[#allocation2 + $0x3b8] sm:$0xff]  ;;  %v18518_v1 = vpop.f32.mrb[150].mxu1 }
 0x3ef   : > { %9234 = vmatprep.mubr.bf16.mxu0 %v6434_v34  ;;  %v16973_v34 = vld [vmem:[%s17558_s21 + $0x270] sm:$0x7f]   ;;  %20477 = vst [vmem:[#allocation43_spill] sm:$0xff] %v18518_v1  ;;  %v8214_v42 = vpop.f32.mrb[151].mxu1 }
 0x3f0   : > { %5112 = vst [vmem:[#allocation2 + $0x860] sm:$0x3f] %v4890_v31  ;;  %v4894_v45 = vshll.u32 %v16973_v34, 16  ;;  %v4892_v54 = vshrl.u32 %v16973_v34, 16  ;;  %6314 = vst [vmem:[#allocation2 + $0x8b8] sm:$0x3f] %v6098_v0 }
 0x3f1   : > { %v16974_v31 = vld [vmem:[%s17558_s21 + $0xf0] sm:$0x7f]  }
 0x3f2   : > { %v4896_v12 = vrot.slane %v4894_v45, 1  ;;  %v6102_v25 = vshll.u32 %v16974_v31, 16  ;;  %v6100_v36 = vshrl.u32 %v16974_v31, 16 }
 0x3f4   : > { %v6104_v45 = vrot.slane %v6102_v25, 1  ;;  %v18521_v0 = vpop.f32.mrb[152].mxu1 }
 0x3f5   : > { %20478 = vst [vmem:[#allocation44_spill] sm:$0xff] %v18521_v0  ;;  %v8219_v51 = vpop.f32.mrb[153].mxu1  ;;  %v6463_v0 = vld [vmem:[#allocation2 + $0x400] sm:$0xff] }
 0x3f6   : > { %9235 = vmatmul.mubr.bf16.gmra.mrb[36].mxu0 %v6433_v23  ;;  %v4897_v23 = vor.u32 %v4896_v12, %v4892_v54  ;;  %v6105_v54 = vor.u32 %v6104_v45, %v6100_v36  ;;  %v6464_v12 = vld [vmem:[#allocation2 + $0x408] sm:$0xff]  ;;  %v18524_v1 = vpop.f32.mrb[154].mxu1 }
 0x3f7   : > { %9242 = vmatprep.mubr.bf16.mxu0 %v6444_v24  ;;  %v16975_v24 = vld [vmem:[%s17558_s21 + $0x278] sm:$0x7f]   ;;  %20479 = vst [vmem:[#allocation45_spill] sm:$0xff] %v18524_v1  ;;  %v8222_v31 = vpop.f32.mrb[155].mxu1 }
 0x3f8   : > { %5113 = vst [vmem:[#allocation2 + $0x8b0] sm:$0x3f] %v4897_v23  ;;  %v4901_v34 = vshll.u32 %v16975_v24, 16  ;;  %v4899_v50 = vshrl.u32 %v16975_v24, 16  ;;  %6315 = vst [vmem:[#allocation2 + $0x908] sm:$0x3f] %v6105_v54 }
 0x3f9   : > { %v16976_v23 = vld [vmem:[%s17558_s21 + $0xf8] sm:$0x7f]  }
 0x3fa   : > { %v4903_v57 = vrot.slane %v4901_v34, 1  ;;  %v6109_v42 = vshll.u32 %v16976_v23, 16  ;;  %v6107_v25 = vshrl.u32 %v16976_v23, 16 }
 0x3fc   : > { %v6111_v34 = vrot.slane %v6109_v42, 1 }
 0x3fd   : > { %v18527_v54 = vpop.f32.mrb[156].mxu1 }
 0x3fe   : > { %9243 = vmatmul.mubr.bf16.gmra.mrb[40].mxu0 %v6443_v14  ;;  %v4904_v14 = vor.u32 %v4903_v57, %v4899_v50  ;;  %v6112_v50 = vor.u32 %v6111_v34, %v6107_v25  ;;  %v6474_v57 = vld [vmem:[#allocation2 + $0x458] sm:$0xff]  ;;  %20480 = vst [vmem:[#allocation46_spill] sm:$0xff] %v18527_v54  ;;  %v8227_v51 = vpop.f32.mrb[157].mxu1  ;;  %v6473_v54 = vld [vmem:[#allocation2 + $0x450] sm:$0xff] }
 0x3ff   : > { %9250 = vmatprep.mubr.bf16.mxu0 %v6454_v17  ;;  %v16977_v17 = vld [vmem:[%s17558_s21 + $0x280] sm:$0x7f]   ;;  %v18530_v1 = vpop.f32.mrb[158].mxu1  ;;  %v6624_v48 = vld [vmem:[#allocation2 + $0x908] sm:$0xff] }
 0x400   : > { %5114 = vst [vmem:[#allocation2 + $0x900] sm:$0x3f] %v4904_v14  ;;  %v4908_v24 = vshll.u32 %v16977_v17, 16  ;;  %v4906_v36 = vshrl.u32 %v16977_v17, 16  ;;  %6316 = vst [vmem:[#allocation2 + $0x958] sm:$0x3f] %v6112_v50 }
 0x401   : > { %v16978_v14 = vld [vmem:[%s17558_s21 + $0x100] sm:$0x7f]   ;;  %20481 = vst [vmem:[#allocation47_spill] sm:$0xff] %v18530_v1  ;;  %v8230_v23 = vpop.f32.mrb[159].mxu1 }
 0x402   : > { %v4910_v45 = vrot.slane %v4908_v24, 1  ;;  %v6116_v31 = vshll.u32 %v16978_v14, 16  ;;  %v6114_v42 = vshrl.u32 %v16978_v14, 16 }
 0x404   : > { %v6118_v24 = vrot.slane %v6116_v31, 1 }
 0x405   : > { %v18533_v50 = vpop.f32.mrb[160].mxu1 }
 0x406   : > { %9251 = vmatmul.mubr.bf16.gmra.mrb[44].mxu0 %v6453_v5  ;;  %v4911_v5 = vor.u32 %v4910_v45, %v4906_v36  ;;  %v6119_v36 = vor.u32 %v6118_v24, %v6114_v42  ;;  %v6484_v45 = vld [vmem:[#allocation2 + $0x4a8] sm:$0xff]  ;;  %20482 = vst [vmem:[#allocation48_spill] sm:$0xff] %v18533_v50  ;;  %v8235_v51 = vpop.f32.mrb[161].mxu1  ;;  %v6483_v50 = vld [vmem:[#allocation2 + $0x4a0] sm:$0xff] }
 0x407   : > { %9258 = vmatprep.mubr.bf16.mxu0 %v6464_v12  ;;  %v16979_v12 = vld [vmem:[%s17558_s21 + $0x288] sm:$0x7f]   ;;  %v18536_v1 = vpop.f32.mrb[162].mxu1 }
 0x408   : > { %5115 = vst [vmem:[#allocation2 + $0x950] sm:$0x3f] %v4911_v5  ;;  %v4915_v17 = vshll.u32 %v16979_v12, 16  ;;  %v4913_v25 = vshrl.u32 %v16979_v12, 16  ;;  %6317 = vst [vmem:[#allocation2 + $0x9a8] sm:$0x3f] %v6119_v36 }
 0x409   : > { %v16980_v5 = vld [vmem:[%s17558_s21 + $0x108] sm:$0x7f]   ;;  %20483 = vst [vmem:[#allocation49_spill] sm:$0xff] %v18536_v1  ;;  %v8238_v14 = vpop.f32.mrb[163].mxu1 }
 0x40a   : > { %v4917_v34 = vrot.slane %v4915_v17, 1  ;;  %v6123_v23 = vshll.u32 %v16980_v5, 16  ;;  %v6121_v31 = vshrl.u32 %v16980_v5, 16 }
 0x40c   : > { %v6125_v17 = vrot.slane %v6123_v23, 1 }
 0x40d   : > { %v18539_v36 = vpop.f32.mrb[164].mxu1 }
 0x40e   : > { %9259 = vmatmul.mubr.bf16.gmra.mrb[48].mxu0 %v6463_v0  ;;  %v4918_v0 = vor.u32 %v4917_v34, %v4913_v25  ;;  %v6126_v25 = vor.u32 %v6125_v17, %v6121_v31  ;;  %v6494_v34 = vld [vmem:[#allocation2 + $0x4f8] sm:$0xff]  ;;  %20484 = vst [vmem:[#allocation50_spill] sm:$0xff] %v18539_v36  ;;  %v8243_v51 = vpop.f32.mrb[165].mxu1  ;;  %v6493_v36 = vld [vmem:[#allocation2 + $0x4f0] sm:$0xff] }
 0x40f   : > { %9266 = vmatprep.mubr.bf16.mxu0 %v6474_v57  ;;  %v16981_v57 = vld [vmem:[%s17558_s21 + $0x290] sm:$0x7f]   ;;  %v18542_v1 = vpop.f32.mrb[166].mxu1 }
 0x410   : > { %5116 = vst [vmem:[#allocation2 + $0x9a0] sm:$0x3f] %v4918_v0  ;;  %v4922_v12 = vshll.u32 %v16981_v57, 16  ;;  %v4920_v42 = vshrl.u32 %v16981_v57, 16  ;;  %6318 = vst [vmem:[#allocation2 + $0x9f8] sm:$0x3f] %v6126_v25 }
 0x411   : > { %v16982_v0 = vld [vmem:[%s17558_s21 + $0x110] sm:$0x7f]   ;;  %20485 = vst [vmem:[#allocation51_spill] sm:$0xff] %v18542_v1  ;;  %v8246_v5 = vpop.f32.mrb[167].mxu1 }
 0x412   : > { %v4924_v24 = vrot.slane %v4922_v12, 1  ;;  %v6130_v14 = vshll.u32 %v16982_v0, 16  ;;  %v6128_v23 = vshrl.u32 %v16982_v0, 16 }
 0x414   : > { %v6132_v12 = vrot.slane %v6130_v14, 1 }
 0x415   : > { %v18545_v25 = vpop.f32.mrb[168].mxu1 }
 0x416   : > { %9267 = vmatmul.mubr.bf16.gmra.mrb[52].mxu0 %v6473_v54  ;;  %v4925_v54 = vor.u32 %v4924_v24, %v4920_v42  ;;  %v6133_v42 = vor.u32 %v6132_v12, %v6128_v23  ;;  %v6504_v24 = vld [vmem:[#allocation2 + $0x548] sm:$0xff]  ;;  %20486 = vst [vmem:[#allocation52_spill] sm:$0xff] %v18545_v25  ;;  %v8251_v51 = vpop.f32.mrb[169].mxu1  ;;  %v6503_v25 = vld [vmem:[#allocation2 + $0x540] sm:$0xff] }
 0x417   : > { %9274 = vmatprep.mubr.bf16.mxu0 %v6484_v45  ;;  %v16983_v45 = vld [vmem:[%s17558_s21 + $0x298] sm:$0x7f]   ;;  %v18548_v1 = vpop.f32.mrb[170].mxu1 }
 0x418   : > { %5117 = vst [vmem:[#allocation2 + $0x9f0] sm:$0x3f] %v4925_v54  ;;  %v4929_v57 = vshll.u32 %v16983_v45, 16  ;;  %v4927_v31 = vshrl.u32 %v16983_v45, 16  ;;  %6319 = vst [vmem:[#allocation2 + $0xa48] sm:$0x3f] %v6133_v42 }
 0x419   : > { %v16984_v54 = vld [vmem:[%s17558_s21 + $0x118] sm:$0x7f]   ;;  %20487 = vst [vmem:[#allocation53_spill] sm:$0xff] %v18548_v1  ;;  %v8254_v0 = vpop.f32.mrb[171].mxu1 }
 0x41a   : > { %v4931_v17 = vrot.slane %v4929_v57, 1  ;;  %v6137_v5 = vshll.u32 %v16984_v54, 16  ;;  %v6135_v14 = vshrl.u32 %v16984_v54, 16 }
 0x41c   : > { %v6139_v57 = vrot.slane %v6137_v5, 1 }
 0x41d   : > { %v18551_v42 = vpop.f32.mrb[172].mxu1 }
 0x41e   : > { %9275 = vmatmul.mubr.bf16.gmra.mrb[56].mxu0 %v6483_v50  ;;  %v4932_v50 = vor.u32 %v4931_v17, %v4927_v31  ;;  %v6140_v31 = vor.u32 %v6139_v57, %v6135_v14  ;;  %v6514_v17 = vld [vmem:[#allocation2 + $0x598] sm:$0xff]  ;;  %20488 = vst [vmem:[#allocation54_spill] sm:$0xff] %v18551_v42  ;;  %v8259_v51 = vpop.f32.mrb[173].mxu1  ;;  %v6513_v42 = vld [vmem:[#allocation2 + $0x590] sm:$0xff] }
 0x41f   : > { %9282 = vmatprep.mubr.bf16.mxu0 %v6494_v34  ;;  %v16985_v34 = vld [vmem:[%s17558_s21 + $0x2a0] sm:$0x7f]   ;;  %v18554_v1 = vpop.f32.mrb[174].mxu1 }
 0x420   : > { %5118 = vst [vmem:[#allocation2 + $0xa40] sm:$0x3f] %v4932_v50  ;;  %v4936_v45 = vshll.u32 %v16985_v34, 16  ;;  %v4934_v23 = vshrl.u32 %v16985_v34, 16  ;;  %6320 = vst [vmem:[#allocation2 + $0xa98] sm:$0x3f] %v6140_v31 }
 0x421   : > { %v16986_v50 = vld [vmem:[%s17558_s21 + $0x120] sm:$0x7f]   ;;  %20489 = vst [vmem:[#allocation55_spill] sm:$0xff] %v18554_v1  ;;  %v8262_v54 = vpop.f32.mrb[175].mxu1 }
 0x422   : > { %v4938_v12 = vrot.slane %v4936_v45, 1  ;;  %v6144_v0 = vshll.u32 %v16986_v50, 16  ;;  %v6142_v5 = vshrl.u32 %v16986_v50, 16 }
 0x424   : > { %v6146_v45 = vrot.slane %v6144_v0, 1 }
 0x426   : > { %9283 = vmatmul.mubr.bf16.gmra.mrb[60].mxu0 %v6493_v36  ;;  %v4939_v36 = vor.u32 %v4938_v12, %v4934_v23  ;;  %v6147_v23 = vor.u32 %v6146_v45, %v6142_v5  ;;  %v6524_v12 = vld [vmem:[#allocation2 + $0x5e8] sm:$0xff] }
 0x427   : > { %9290 = vmatprep.mubr.bf16.mxu0 %v6504_v24  ;;  %v16987_v24 = vld [vmem:[%s17558_s21 + $0x2a8] sm:$0x7f]  }
 0x428   : > { %5119 = vst [vmem:[#allocation2 + $0xa90] sm:$0x3f] %v4939_v36  ;;  %v4943_v34 = vshll.u32 %v16987_v24, 16  ;;  %v4941_v14 = vshrl.u32 %v16987_v24, 16  ;;  %6321 = vst [vmem:[#allocation2 + $0xae8] sm:$0x3f] %v6147_v23 }
 0x429   : > { %v16988_v36 = vld [vmem:[%s17558_s21 + $0x128] sm:$0x7f]  }
 0x42a   : > { %v4945_v57 = vrot.slane %v4943_v34, 1  ;;  %v6151_v54 = vshll.u32 %v16988_v36, 16  ;;  %v6149_v0 = vshrl.u32 %v16988_v36, 16 }
 0x42b   : > { %v18557_v31 = vpop.f32.mrb[176].mxu1 }
 0x42c   : > { %20490 = vst [vmem:[#allocation56_spill] sm:$0xff] %v18557_v31  ;;  %v8267_v51 = vpop.f32.mrb[177].mxu1  ;;  %v6153_v34 = vrot.slane %v6151_v54, 1  ;;  %v6523_v31 = vld [vmem:[#allocation2 + $0x5e0] sm:$0xff] }
 0x42d   : > { %v18560_v1 = vpop.f32.mrb[178].mxu1 }
 0x42e   : > { %9291 = vmatmul.mubr.bf16.gmra.mrb[64].mxu0 %v6503_v25  ;;  %v4946_v25 = vor.u32 %v4945_v57, %v4941_v14  ;;  %20491 = vst [vmem:[#allocation57_spill] sm:$0xff] %v18560_v1  ;;  %v8270_v50 = vpop.f32.mrb[179].mxu1  ;;  %v6154_v14 = vor.u32 %v6153_v34, %v6149_v0  ;;  %v6534_v57 = vld [vmem:[#allocation2 + $0x638] sm:$0xff] }
 0x42f   : > { %9298 = vmatprep.mubr.bf16.mxu0 %v6514_v17  ;;  %v16989_v17 = vld [vmem:[%s17558_s21 + $0x2b0] sm:$0x7f]  }
 0x430   : > { %5120 = vst [vmem:[#allocation2 + $0xae0] sm:$0x3f] %v4946_v25  ;;  %v4950_v24 = vshll.u32 %v16989_v17, 16  ;;  %v4948_v5 = vshrl.u32 %v16989_v17, 16  ;;  %6322 = vst [vmem:[#allocation2 + $0xb38] sm:$0x3f] %v6154_v14 }
 0x431   : > { %v16990_v25 = vld [vmem:[%s17558_s21 + $0x130] sm:$0x7f]  }
 0x432   : > { %v4952_v45 = vrot.slane %v4950_v24, 1  ;;  %v6158_v50 = vshll.u32 %v16990_v25, 16  ;;  %v6156_v54 = vshrl.u32 %v16990_v25, 16 }
 0x434   : > { %v18563_v23 = vpop.f32.mrb[180].mxu1  ;;  %v6160_v24 = vrot.slane %v6158_v50, 1 }
 0x435   : > { %20492 = vst [vmem:[#allocation58_spill] sm:$0xff] %v18563_v23  ;;  %v8275_v51 = vpop.f32.mrb[181].mxu1  ;;  %v6533_v23 = vld [vmem:[#allocation2 + $0x630] sm:$0xff] }
 0x436   : > { %9299 = vmatmul.mubr.bf16.gmra.mrb[68].mxu0 %v6513_v42  ;;  %v4953_v42 = vor.u32 %v4952_v45, %v4948_v5  ;;  %v18566_v1 = vpop.f32.mrb[182].mxu1  ;;  %v6161_v5 = vor.u32 %v6160_v24, %v6156_v54  ;;  %v6544_v45 = vld [vmem:[#allocation2 + $0x688] sm:$0xff] }
 0x437   : > { %9306 = vmatprep.mubr.bf16.mxu0 %v6524_v12  ;;  %20493 = vst [vmem:[#allocation59_spill] sm:$0xff] %v18566_v1  ;;  %v16991_v12 = vld [vmem:[%s17558_s21 + $0x2b8] sm:$0x7f]   ;;  %v8278_v36 = vpop.f32.mrb[183].mxu1 }
 0x438   : > { %5121 = vst [vmem:[#allocation2 + $0xb30] sm:$0x3f] %v4953_v42  ;;  %v4957_v17 = vshll.u32 %v16991_v12, 16  ;;  %v4955_v0 = vshrl.u32 %v16991_v12, 16  ;;  %6323 = vst [vmem:[#allocation2 + $0xb88] sm:$0x3f] %v6161_v5 }
 0x439   : > { %v16992_v42 = vld [vmem:[%s17558_s21 + $0x138] sm:$0x7f]  }
 0x43a   : > { %v4959_v34 = vrot.slane %v4957_v17, 1  ;;  %v6165_v36 = vshll.u32 %v16992_v42, 16  ;;  %v6163_v50 = vshrl.u32 %v16992_v42, 16 }
 0x43c   : > { %v18569_v14 = vpop.f32.mrb[184].mxu1  ;;  %v6167_v17 = vrot.slane %v6165_v36, 1 }
 0x43d   : > { %20494 = vst [vmem:[#allocation60_spill] sm:$0xff] %v18569_v14  ;;  %v8283_v51 = vpop.f32.mrb[185].mxu1  ;;  %v6543_v14 = vld [vmem:[#allocation2 + $0x680] sm:$0xff] }
 0x43e   : > { %9307 = vmatmul.mubr.bf16.gmra.mrb[72].mxu0 %v6523_v31  ;;  %v4960_v31 = vor.u32 %v4959_v34, %v4955_v0  ;;  %v18572_v1 = vpop.f32.mrb[186].mxu1  ;;  %v6168_v0 = vor.u32 %v6167_v17, %v6163_v50  ;;  %v6554_v34 = vld [vmem:[#allocation2 + $0x6d8] sm:$0xff] }
 0x43f   : > { %9314 = vmatprep.mubr.bf16.mxu0 %v6534_v57  ;;  %20495 = vst [vmem:[#allocation61_spill] sm:$0xff] %v18572_v1  ;;  %v16993_v57 = vld [vmem:[%s17558_s21 + $0x2c0] sm:$0x7f]   ;;  %v8286_v25 = vpop.f32.mrb[187].mxu1 }
 0x440   : > { %5122 = vst [vmem:[#allocation2 + $0xb80] sm:$0x3f] %v4960_v31  ;;  %v4964_v12 = vshll.u32 %v16993_v57, 16  ;;  %v4962_v54 = vshrl.u32 %v16993_v57, 16  ;;  %6324 = vst [vmem:[#allocation2 + $0xbd8] sm:$0x3f] %v6168_v0 }
 0x441   : > { %v16994_v31 = vld [vmem:[%s17558_s21 + $0x140] sm:$0x7f]  }
 0x442   : > { %v4966_v24 = vrot.slane %v4964_v12, 1  ;;  %v6172_v57 = vshll.u32 %v16994_v31, 16  ;;  %v6170_v36 = vshrl.u32 %v16994_v31, 16 }
 0x444   : > { %v18575_v5 = vpop.f32.mrb[188].mxu1  ;;  %v6174_v12 = vrot.slane %v6172_v57, 1 }
 0x445   : > { %20496 = vst [vmem:[#allocation62_spill] sm:$0xff] %v18575_v5  ;;  %v8291_v51 = vpop.f32.mrb[189].mxu1  ;;  %v6553_v5 = vld [vmem:[#allocation2 + $0x6d0] sm:$0xff] }
 0x446   : > { %9315 = vmatmul.mubr.bf16.gmra.mrb[76].mxu0 %v6533_v23  ;;  %v4967_v23 = vor.u32 %v4966_v24, %v4962_v54  ;;  %v18578_v1 = vpop.f32.mrb[190].mxu1  ;;  %v6175_v54 = vor.u32 %v6174_v12, %v6170_v36  ;;  %v6564_v24 = vld [vmem:[#allocation2 + $0x728] sm:$0xff]  ;;  %v16998_v12 = vld [vmem:[%s17558_s21 + $0x150] sm:$0x7f]  }
 0x447   : > { %9322 = vmatprep.mubr.bf16.mxu0 %v6544_v45  ;;  %20497 = vst [vmem:[#allocation63_spill] sm:$0xff] %v18578_v1  ;;  %v16995_v45 = vld [vmem:[%s17558_s21 + $0x2c8] sm:$0x7f]   ;;  %v8294_v42 = vpop.f32.mrb[191].mxu1 }
 0x448   : > { %5123 = vst [vmem:[#allocation2 + $0xbd0] sm:$0x3f] %v4967_v23  ;;  %v4971_v25 = vshll.u32 %v16995_v45, 16  ;;  %v4969_v50 = vshrl.u32 %v16995_v45, 16  ;;  %6325 = vst [vmem:[#allocation2 + $0xc28] sm:$0x3f] %v6175_v54 }
 0x449   : > { %v16997_v23 = vld [vmem:[%s17558_s21 + $0x2d0] sm:$0x7f]   ;;  %v6563_v45 = vld [vmem:[#allocation2 + $0x720] sm:$0xff]  ;;  %v6184_v54 = vshrl.u32 %v16998_v12, 16 }
 0x44a   : > { %v4973_v17 = vrot.slane %v4971_v25, 1  ;;  %v4978_v51 = vshll.u32 %v16997_v23, 16  ;;  %v4976_v31 = vshrl.u32 %v16997_v23, 16  ;;  %v6573_v23 = vld [vmem:[#allocation2 + $0x770] sm:$0xff] }
 0x44c   : > { %v4974_v0 = vor.u32 %v4973_v17, %v4969_v50  ;;  %v4980_v57 = vrot.slane %v4978_v51, 1  ;;  %v6186_v50 = vshll.u32 %v16998_v12, 16  ;;  %v6584_v51 = vld [vmem:[#allocation2 + $0x7c8] sm:$0xff] }
 0x44e   : > { %9323 = vmatmul.mubr.bf16.gmra.mrb[80].mxu0 %v6543_v14  ;;  %v16996_v14 = vld [vmem:[%s17558_s21 + $0x148] sm:$0x7f]   ;;  %5124 = vst [vmem:[#allocation2 + $0xc20] sm:$0x3f] %v4974_v0  ;;  %v4981_v36 = vor.u32 %v4980_v57, %v4976_v31  ;;  %v17001_v31 = vld [vmem:[%s17558_s21 + $0x2e0] sm:$0x7f]  }
 0x44f   : > { %9330 = vmatprep.mubr.bf16.mxu0 %v6554_v34  ;;  %v6179_v34 = vshll.u32 %v16996_v14, 16  ;;  %v6177_v42 = vshrl.u32 %v16996_v14, 16 }
 0x450   : > { %5125 = vst [vmem:[#allocation2 + $0xc70] sm:$0x3f] %v4981_v36  ;;  %v4990_v36 = vshrl.u32 %v17001_v31, 16 }
 0x451   : > { %v6181_v1 = vrot.slane %v6179_v34, 1 }
 0x453   : > { %v6182_v25 = vor.u32 %v6181_v1, %v6177_v42  ;;  %v17000_v42 = vld [vmem:[%s17558_s21 + $0x158] sm:$0x7f]  }
 0x454   : > { %v6193_v57 = vshll.u32 %v17000_v42, 16 }
 0x455   : > { %6326 = vst [vmem:[#allocation2 + $0xc78] sm:$0x3f] %v6182_v25 }
 0x456   : > { %9331 = vmatmul.mubr.bf16.gmra.mrb[84].mxu0 %v6553_v5  ;;  %v16999_v5 = vld [vmem:[%s17558_s21 + $0x2d8] sm:$0x7f]   ;;  %v6195_v25 = vrot.slane %v6193_v57, 1 }
 0x457   : > { %9338 = vmatprep.mubr.bf16.mxu0 %v6564_v24  ;;  %v4985_v17 = vshll.u32 %v16999_v5, 16  ;;  %v6188_v24 = vrot.slane %v6186_v50, 1  ;;  %v4983_v0 = vshrl.u32 %v16999_v5, 16  ;;  %v6583_v5 = vld [vmem:[#allocation2 + $0x7c0] sm:$0xff] }
 0x459   : > { %v4987_v14 = vrot.slane %v4985_v17, 1  ;;  %v6189_v34 = vor.u32 %v6188_v24, %v6184_v54  ;;  %v6594_v17 = vld [vmem:[#allocation2 + $0x818] sm:$0xff]  ;;  %v17002_v24 = vld [vmem:[%s17558_s21 + $0x160] sm:$0x7f]  }
 0x45b   : > { %v4988_v1 = vor.u32 %v4987_v14, %v4983_v0  ;;  %6327 = vst [vmem:[#allocation2 + $0xcc8] sm:$0x3f] %v6189_v34  ;;  %v17003_v0 = vld [vmem:[%s17558_s21 + $0x2e8] sm:$0x7f]   ;;  %v6200_v14 = vshll.u32 %v17002_v24, 16  ;;  %v6198_v34 = vshrl.u32 %v17002_v24, 16 }
 0x45d   : > { %5126 = vst [vmem:[#allocation2 + $0xcc0] sm:$0x3f] %v4988_v1  ;;  %v4997_v1 = vshrl.u32 %v17003_v0, 16 }
 0x45e   : > { %9339 = vmatmul.mubr.bf16.gmra.mrb[88].mxu0 %v6563_v45  ;;  %v6191_v45 = vshrl.u32 %v17000_v42, 16 }
 0x45f   : > { %9346 = vmatprep.mubr.bf16.mxu0 %v6574_v59  ;;  %v4992_v59 = vshll.u32 %v17001_v31, 16  ;;  %v6593_v31 = vld [vmem:[#allocation2 + $0x810] sm:$0xff] }
 0x460   : > { %v6196_v50 = vor.u32 %v6195_v25, %v6191_v45  ;;  %v17004_v25 = vld [vmem:[%s17558_s21 + $0x168] sm:$0x7f]  }
 0x461   : > { %v4994_v12 = vrot.slane %v4992_v59, 1  ;;  %v6604_v59 = vld [vmem:[#allocation2 + $0x868] sm:$0xff] }
 0x462   : > { %6328 = vst [vmem:[#allocation2 + $0xd18] sm:$0x3f] %v6196_v50  ;;  %v6205_v50 = vshrl.u32 %v17004_v25, 16 }
 0x463   : > { %v4995_v54 = vor.u32 %v4994_v12, %v4990_v36  ;;  %v17005_v36 = vld [vmem:[%s17558_s21 + $0x2f0] sm:$0x7f]   ;;  %v6207_v12 = vshll.u32 %v17004_v25, 16 }
 0x465   : > { %5127 = vst [vmem:[#allocation2 + $0xd10] sm:$0x3f] %v4995_v54  ;;  %v5004_v54 = vshrl.u32 %v17005_v36, 16 }
 0x466   : > { %9347 = vmatmul.mubr.bf16.gmra.mrb[92].mxu0 %v6573_v23  ;;  %v4999_v23 = vshll.u32 %v17003_v0, 16  ;;  %v6603_v0 = vld [vmem:[#allocation2 + $0x860] sm:$0xff] }
 0x467   : > { %9354 = vmatprep.mubr.bf16.mxu0 %v6584_v51  ;;  %v6202_v51 = vrot.slane %v6200_v14, 1 }
 0x468   : > { %v5001_v42 = vrot.slane %v4999_v23, 1  ;;  %v6614_v23 = vld [vmem:[#allocation2 + $0x8b8] sm:$0xff] }
 0x469   : > { %v6203_v57 = vor.u32 %v6202_v51, %v6198_v34  ;;  %v18594_v51 = vld [vmem:[%s20433_s2] ss:$0 sm:$0xff] }
 0x46a   : > { %v5002_v45 = vor.u32 %v5001_v42, %v4997_v1  ;;  %v17006_v1 = vld [vmem:[%s17558_s21 + $0x170] sm:$0x7f]   ;;  %v17007_v42 = vld [vmem:[%s17558_s21 + $0x2f8] sm:$0x7f]  }
 0x46b   : > { %6329 = vst [vmem:[#allocation2 + $0xd68] sm:$0x3f] %v6203_v57  ;;  %v7497_v57 = vadd.f32 %v18594_v51, %v18238_v3  ;;  %v6212_v25 = vshrl.u32 %v17006_v1, 16 }
 0x46c   : > { %5128 = vst [vmem:[#allocation2 + $0xd60] sm:$0x3f] %v5002_v45 }
 0x46e   : > { %9355 = vmatmul.mubr.bf16.gmra.mrb[96].mxu0 %v6583_v5  ;;  %v5006_v5 = vshll.u32 %v17005_v36, 16 }
 0x46f   : > { %9362 = vmatprep.mubr.bf16.mxu0 %v6594_v17  ;;  %v6209_v17 = vrot.slane %v6207_v12, 1 }
 0x470   : > { %v5008_v24 = vrot.slane %v5006_v5, 1 }
 0x471   : > { %v6210_v14 = vor.u32 %v6209_v17, %v6205_v50  ;;  %v7500_v50 = vadd.f32 %v18594_v51, %v18245_v21  ;;  %v5011_v17 = vshrl.u32 %v17007_v42, 16 }
 0x472   : > { %v5009_v34 = vor.u32 %v5008_v24, %v5004_v54 }
 0x473   : > { %6330 = vst [vmem:[#allocation2 + $0xdb8] sm:$0x3f] %v6210_v14 }
 0x474   : > { %5129 = vst [vmem:[#allocation2 + $0xdb0] sm:$0x3f] %v5009_v34 }
 0x476   : > { %9363 = vmatmul.mubr.bf16.gmra.mrb[100].mxu0 %v6593_v31  ;;  %v6214_v31 = vshll.u32 %v17006_v1, 16  ;;  %v17009_v1 = vld [vmem:[%s17558_s21 + $0x300] sm:$0x7f]  }
 0x477   : > { %9370 = vmatprep.mubr.bf16.mxu0 %v6604_v59  ;;  %v5013_v59 = vshll.u32 %v17007_v42, 16  ;;  %v5020_v21 = vshll.u32 %v17009_v1, 16 }
 0x478   : > { %v6216_v36 = vrot.slane %v6214_v31, 1  ;;  %v6221_v31 = vshll.u32 %v17008_v7, 16 }
 0x479   : > { %v5015_v54 = vrot.slane %v5013_v59, 1  ;;  %v6219_v59 = vshrl.u32 %v17008_v7, 16  ;;  %v17010_v7 = vld [vmem:[%s17558_s21 + $0x180] sm:$0x7f]  }
 0x47a   : > { %v6217_v14 = vor.u32 %v6216_v36, %v6212_v25 }
 0x47b   : > { %v5016_v3 = vor.u32 %v5015_v54, %v5011_v17  ;;  %v5022_v17 = vrot.slane %v5020_v21, 1 }
 0x47c   : > { %6331 = vst [vmem:[#allocation2 + $0xe08] sm:$0x3f] %v6217_v14 }
 0x47d   : > { %5130 = vst [vmem:[#allocation2 + $0xe00] sm:$0x3f] %v5016_v3  ;;  %v6634_v3 = vld [vmem:[#allocation2 + $0x958] sm:$0xff] }
 0x47e   : > { %9371 = vmatmul.mubr.bf16.gmra.mrb[104].mxu0 %v6603_v0  ;;  %v6613_v0 = vld [vmem:[#allocation2 + $0x8b0] sm:$0xff] }
 0x47f   : > { %9378 = vmatprep.mubr.bf16.mxu0 %v6614_v23 }
 0x481   : > { %v9164_v45 = vpop.f32.mrb[0].mxu0 }
 0x482   : > { %v15494_v12 = vadd.f32 %v9164_v45, %v7497_v57  ;;  %v9166_v5 = vpop.f32.mrb[1].mxu0  ;;  %v7505_v57 = vadd.f32 %v18594_v51, %v18250_v29  ;;  %v6223_v45 = vrot.slane %v6221_v31, 1 }
 0x483   : > { %v9167_v24 = vpop.f32.mrb[2].mxu0  ;;  %v7508_v5 = vadd.f32 %v18594_v51, %v18253_v41  ;;  %v17011_v41 = vld [vmem:[%s17558_s21 + $0x308] sm:$0x7f]  }
 0x484   : > { %v15496_v23 = vadd.f32 %v9167_v24, %v7500_v50  ;;  %v9169_v34 = vpop.f32.mrb[3].mxu0  ;;  %v5018_v50 = vshrl.u32 %v17009_v1, 16  ;;  %v6623_v24 = vld [vmem:[#allocation2 + $0x900] sm:$0xff]  ;;  %v6228_v1 = vshll.u32 %v17010_v7, 16 }
 0x486   : > { %9379 = vmatmul.mubr.bf16.gmra.mrb[108].mxu0 %v6613_v0  ;;  %v9547_v0 = vmax.f32 %v15494_v12, 0.0  ;;  %v5023_v58 = vor.u32 %v5022_v17, %v5018_v50  ;;  %v9548_v31 = vmax.f32 %v15496_v23, 0.0  ;;  %v7513_v12 = vadd.f32 %v18594_v51, %v18258_v49 }
 0x487   : > { %9386 = vmatprep.mubr.bf16.mxu0 %v6624_v48  ;;  %v6224_v48 = vor.u32 %v6223_v45, %v6219_v59  ;;  %v5027_v59 = vshll.u32 %v17011_v41, 16  ;;  %v6230_v23 = vrot.slane %v6228_v1, 1  ;;  %v5025_v17 = vshrl.u32 %v17011_v41, 16 }
 0x488   : > { %5131 = vst [vmem:[#allocation2 + $0xe50] sm:$0x3f] %v5023_v58 }
 0x489   : > { %v9172_v42 = vpop.f32.mrb[4].mxu0  ;;  %6332 = vst [vmem:[#allocation2 + $0xe58] sm:$0x3f] %v6224_v48  ;;  %v6633_v48 = vld [vmem:[#allocation2 + $0x950] sm:$0xff] }
 0x48a   : > { %v15498_v25 = vadd.f32 %v9172_v42, %v7505_v57  ;;  %v9174_v36 = vpop.f32.mrb[5].mxu0 }
 0x48b   : > { %v9175_v54 = vpop.f32.mrb[6].mxu0  ;;  %v6226_v36 = vshrl.u32 %v17010_v7, 16 }
 0x48c   : > { %v9549_v14 = vmax.f32 %v15498_v25, 0.0  ;;  %v15500_v34 = vadd.f32 %v9175_v54, %v7508_v5  ;;  %v9177_v29 = vpop.f32.mrb[7].mxu0  ;;  %v7516_v25 = vadd.f32 %v18594_v51, %v18261_v61  ;;  %v5029_v54 = vrot.slane %v5027_v59, 1  ;;  %v6644_v61 = vld [vmem:[#allocation2 + $0x9a8] sm:$0xff] }
 0x48d   : > { %v17012_v29 = vld [vmem:[%s17558_s21 + $0x188] sm:$0x7f]  }
 0x48e   : > { %v18609_v57 = vmax.f32 %v9547_v0, %v9549_v14  ;;  %v9550_v42 = vmax.f32 %v15500_v34, 0.0  ;;  %9387 = vmatmul.mubr.bf16.gmra.mrb[112].mxu0 %v6623_v24  ;;  %v6231_v0 = vor.u32 %v6230_v23, %v6226_v36  ;;  %v5030_v34 = vor.u32 %v5029_v54, %v5025_v17 }
 0x48f   : > { %9394 = vmatprep.mubr.bf16.mxu0 %v6634_v3  ;;  %v17013_v3 = vld [vmem:[%s17558_s21 + $0x310] sm:$0x7f]   ;;  %v6235_v7 = vshll.u32 %v17012_v29, 16  ;;  %v6233_v1 = vshrl.u32 %v17012_v29, 16  ;;  %s20389_s21 = scalar_lea.hbm %s20440_s9, %s15293_s29 }
 0x490   : > { %v18612_v21 = vmax.f32 %v9548_v31, %v9550_v42  ;;  %6333 = vst [vmem:[#allocation2 + $0xea8] sm:$0x3f] %v6231_v0  ;;  %5132 = vst [vmem:[#allocation2 + $0xea0] sm:$0x3f] %v5030_v34  ;;  %v7521_v31 = vadd.f32 %v18594_v51, %v18269_v8  ;;  %v5034_v42 = vshll.u32 %v17013_v3, 16  ;;  %v5032_v36 = vshrl.u32 %v17013_v3, 16 }
 0x491   : > { %v9180_v45 = vpop.f32.mrb[8].mxu0  ;;  %v7529_v3 = vadd.f32 %v18594_v51, %v18278_v30  ;;  %v7537_v30 = vadd.f32 %v18594_v51, %v18286_v52 }
 0x492   : > { %v15502_v5 = vadd.f32 %v9180_v45, %v7513_v12  ;;  %v9182_v50 = vpop.f32.mrb[9].mxu0  ;;  %v16344_v58 = vpack.i.bf16 %v18612_v21, %v18609_v57  ;;  %v6237_v12 = vrot.slane %v6235_v7, 1  ;;  %v5036_v23 = vrot.slane %v5034_v42, 1 }
 0x493   : > { %v9183_v24 = vpop.f32.mrb[10].mxu0  ;;  %v7532_v42 = vadd.f32 %v18594_v51, %v18281_v43  ;;  %v7540_v43 = vadd.f32 %v18594_v51, %v18289_v2 }
 0x494   : > { %v15504_v49 = vadd.f32 %v9183_v24, %v7516_v25  ;;  %v9185_v14 = vpop.f32.mrb[11].mxu0  ;;  %16345 = vrot.lane.b32.xlu1 %v16344_v58, %s17431_s17  ;;  %v7524_v25 = vadd.f32 %v18594_v51, %v18273_v20  ;;  %v6643_v58 = vld [vmem:[#allocation2 + $0x9a0] sm:$0xff]  ;;  %v6238_v17 = vor.u32 %v6237_v12, %v6233_v1  ;;  %v9551_v54 = vmax.f32 %v15502_v5, 0.0  ;;  %v6653_v1 = vld [vmem:[#allocation2 + $0x9f0] sm:$0xff] }
 0x495   : > { %v6654_v14 = vld [vmem:[#allocation2 + $0x9f8] sm:$0xff]  ;;  %v5037_v8 = vor.u32 %v5036_v23, %v5032_v36 }
 0x496   : > { %9395 = vmatmul.mubr.bf16.gmra.mrb[116].mxu0 %v6633_v48  ;;  %6334 = vst [vmem:[#allocation2 + $0xef8] sm:$0x3f] %v6238_v17 }
 0x497   : > { %9402 = vmatprep.mubr.bf16.mxu0 %v6644_v61  ;;  %v9552_v61 = vmax.f32 %v15504_v49, 0.0  ;;  %5133 = vst [vmem:[#allocation2 + $0xef0] sm:$0x3f] %v5037_v8 }
 0x499   : > { %v9188_v41 = vpop.f32.mrb[12].mxu0 }
 0x49a   : > { %v15506_v59 = vadd.f32 %v9188_v41, %v7521_v31  ;;  %v9190_v45 = vpop.f32.mrb[13].mxu0 }
 0x49b   : > { %v9191_v50 = vpop.f32.mrb[14].mxu0  ;;  %v6664_v45 = vld [vmem:[#allocation2 + $0xa48] sm:$0xff] }
 0x49c   : > { %v9553_v24 = vmax.f32 %v15506_v59, 0.0  ;;  %v15508_v48 = vadd.f32 %v9191_v50, %v7524_v25  ;;  %v9193_v0 = vpop.f32.mrb[15].mxu0 }
 0x49d   : > { %v6674_v0 = vld [vmem:[#allocation2 + $0xa98] sm:$0xff] }
 0x49e   : > { %v18627_v34 = vmax.f32 %v9551_v54, %v9553_v24  ;;  %v9554_v29 = vmax.f32 %v15508_v48, 0.0  ;;  %9403 = vmatmul.mubr.bf16.gmra.mrb[120].mxu0 %v6643_v58  ;;  %v6663_v58 = vld [vmem:[#allocation2 + $0xa40] sm:$0xff] }
 0x49f   : > { %9410 = vmatprep.mubr.bf16.mxu0 %v6654_v14 }
 0x4a0   : > { %v18629_v20 = vmax.f32 %v9552_v61, %v9554_v29  ;;  %v7545_v29 = vadd.f32 %v18594_v51, %v18297_v13  ;;  %v7556_v13 = vadd.f32 %v18594_v51, %v18309_v53  ;;  %v7564_v53 = vadd.f32 %v18594_v51, %v18317_v15 }
 0x4a1   : > { %v9196_v7 = vpop.f32.mrb[16].mxu0  ;;  %v7569_v15 = vadd.f32 %v18594_v51, %v18325_v26  ;;  %v7577_v26 = vadd.f32 %v18594_v51, %v18333_v55  ;;  %v15537_v55 = vadd.f32 %v18594_v51, %v18341_v33  ;;  %v15541_v33 = vadd.f32 %v18594_v51, %v18349_v63 }
 0x4a2   : > { %v15510_v5 = vadd.f32 %v9196_v7, %v7529_v3  ;;  %v9198_v31 = vpop.f32.mrb[17].mxu0  ;;  %v16334_v49 = vpack.i.bf16 %v18629_v20, %v18627_v34  ;;  %v15545_v63 = vadd.f32 %v18594_v51, %v18357_v32  ;;  %v15549_v32 = vadd.f32 %v18594_v51, %v18365_v4 }
 0x4a3   : > { %v9199_v41 = vpop.f32.mrb[18].mxu0  ;;  %v15553_v4 = vadd.f32 %v18594_v51, %v18373_v40  ;;  %v15557_v40 = vadd.f32 %v18594_v51, %v18381_v16 }
 0x4a4   : > { %v15512_v12 = vadd.f32 %v9199_v41, %v7532_v42  ;;  %v9201_v59 = vpop.f32.mrb[19].mxu0  ;;  %16335 = vrot.lane.b32.xlu0 %v16334_v49, %s17431_s17  ;;  %v9555_v17 = vmax.f32 %v15510_v5, 0.0  ;;  %v7548_v5 = vadd.f32 %v18594_v51, %v18301_v27  ;;  %v6673_v42 = vld [vmem:[#allocation2 + $0xa90] sm:$0xff] }
 0x4a6   : > { %9411 = vmatmul.mubr.bf16.gmra.mrb[124].mxu0 %v6653_v1  ;;  %v9556_v14 = vmax.f32 %v15512_v12, 0.0  ;;  %v6684_v1 = vld [vmem:[#allocation2 + $0xae8] sm:$0xff]  ;;  %v7553_v12 = vadd.f32 %v18594_v51, %v18306_v37  ;;  %v7561_v37 = vadd.f32 %v18594_v51, %v18314_v62 }
 0x4a7   : > { %9418 = vmatprep.mubr.bf16.mxu0 %v6664_v45 }
 0x4a9   : > { %v9204_v25 = vpop.f32.mrb[20].mxu0 }
 0x4aa   : > { %v15514_v36 = vadd.f32 %v9204_v25, %v7537_v30  ;;  %v9206_v23 = vpop.f32.mrb[21].mxu0 }
 0x4ab   : > { %v9207_v50 = vpop.f32.mrb[22].mxu0 }
 0x4ac   : > { %v9557_v54 = vmax.f32 %v15514_v36, 0.0  ;;  %v15516_v24 = vadd.f32 %v9207_v50, %v7540_v43  ;;  %v9209_v48 = vpop.f32.mrb[23].mxu0  ;;  %v6683_v36 = vld [vmem:[#allocation2 + $0xae0] sm:$0xff] }
 0x4ae   : > { %v18642_v8 = vmax.f32 %v9555_v17, %v9557_v54  ;;  %v9558_v61 = vmax.f32 %v15516_v24, 0.0  ;;  %9419 = vmatmul.mubr.bf16.gmra.mrb[128].mxu0 %v6663_v58  ;;  %v6694_v58 = vld [vmem:[#allocation2 + $0xb38] sm:$0xff] }
 0x4af   : > { %9426 = vmatprep.mubr.bf16.mxu0 %v6674_v0 }
 0x4b0   : > { %v18644_v52 = vmax.f32 %v9556_v14, %v9558_v61 }
 0x4b1   : > { %v9212_v3 = vpop.f32.mrb[24].mxu0 }
 0x4b2   : > { %v15518_v2 = vadd.f32 %v9212_v3, %v7545_v29  ;;  %v9214_v7 = vpop.f32.mrb[25].mxu0  ;;  %v16349_v62 = vpack.i.bf16 %v18644_v52, %v18642_v8 }
 0x4b3   : > { %v9215_v31 = vpop.f32.mrb[26].mxu0 }
 0x4b4   : > { %v15520_v49 = vadd.f32 %v9215_v31, %v7548_v5  ;;  %v9217_v41 = vpop.f32.mrb[27].mxu0  ;;  %v9559_v23 = vmax.f32 %v15518_v2, 0.0  ;;  %v6693_v2 = vld [vmem:[#allocation2 + $0xb30] sm:$0xff]  ;;  %v6704_v31 = vld [vmem:[#allocation2 + $0xb88] sm:$0xff] }
 0x4b6   : > { %9427 = vmatmul.mubr.bf16.gmra.mrb[132].mxu0 %v6673_v42  ;;  %v9560_v17 = vmax.f32 %v15520_v49, 0.0  ;;  %v7572_v49 = vadd.f32 %v18594_v51, %v18328_v44 }
 0x4b7   : > { %9434 = vmatprep.mubr.bf16.mxu0 %v6684_v1 }
 0x4b9   : > { %v9220_v59 = vpop.f32.mrb[28].mxu0 }
 0x4ba   : > { %v15522_v45 = vadd.f32 %v9220_v59, %v7553_v12  ;;  %v9222_v30 = vpop.f32.mrb[29].mxu0  ;;  %v6703_v59 = vld [vmem:[#allocation2 + $0xb80] sm:$0xff] }
 0x4bb   : > { %v9223_v25 = vpop.f32.mrb[30].mxu0 }
 0x4bc   : > { %v9561_v27 = vmax.f32 %v15522_v45, 0.0  ;;  %v15524_v43 = vadd.f32 %v9223_v25, %v7556_v13  ;;  %v9225_v50 = vpop.f32.mrb[31].mxu0 }
 0x4be   : > { %v18654_v54 = vmax.f32 %v9559_v23, %v9561_v27  ;;  %v9562_v24 = vmax.f32 %v15524_v43, 0.0  ;;  %9435 = vmatmul.mubr.bf16.gmra.mrb[136].mxu0 %v6683_v36  ;;  %v6714_v36 = vld [vmem:[#allocation2 + $0xbd8] sm:$0xff] }
 0x4bf   : > { %9442 = vmatprep.mubr.bf16.mxu0 %v6694_v58  ;;  %v7580_v58 = vadd.f32 %v18594_v51, %v18336_v9  ;;  %v15539_v9 = vadd.f32 %v18594_v51, %v18344_v38 }
 0x4c0   : > { %v18658_v48 = vmax.f32 %v9560_v17, %v9562_v24 }
 0x4c1   : > { %v9228_v0 = vpop.f32.mrb[32].mxu0 }
 0x4c2   : > { %v15526_v14 = vadd.f32 %v9228_v0, %v7561_v37  ;;  %v9230_v61 = vpop.f32.mrb[33].mxu0  ;;  %v16339_v29 = vpack.i.bf16 %v18658_v48, %v18654_v54 }
 0x4c3   : > { %v9231_v3 = vpop.f32.mrb[34].mxu0 }
 0x4c4   : > { %v15528_v7 = vadd.f32 %v9231_v3, %v7564_v53  ;;  %v9233_v5 = vpop.f32.mrb[35].mxu0  ;;  %16340 = vrot.lane.b32.xlu0 %v16339_v29, %s17431_s17  ;;  %v9563_v45 = vmax.f32 %v15526_v14, 0.0  ;;  %v6713_v53 = vld [vmem:[#allocation2 + $0xbd0] sm:$0xff]  ;;  %v6724_v29 = vld [vmem:[#allocation2 + $0xc28] sm:$0xff] }
 0x4c6   : > { %9443 = vmatmul.mubr.bf16.gmra.mrb[140].mxu0 %v6693_v2  ;;  %v9564_v23 = vmax.f32 %v15528_v7, 0.0 }
 0x4c7   : > { %9450 = vmatprep.mubr.bf16.mxu0 %v6704_v31  ;;  %v6723_v31 = vld [vmem:[#allocation2 + $0xc20] sm:$0xff] }
 0x4c8   : > { %16350 = vrot.lane.b32.xlu0 %v16349_v62, %s17431_s17 }
 0x4c9   : > { %v9236_v42 = vpop.f32.mrb[36].mxu0 }
 0x4ca   : > { %v15530_v41 = vadd.f32 %v9236_v42, %v7569_v15  ;;  %v9238_v1 = vpop.f32.mrb[37].mxu0 }
 0x4cb   : > { %v9239_v12 = vpop.f32.mrb[38].mxu0 }
 0x4cc   : > { %v9565_v30 = vmax.f32 %v15530_v41, 0.0  ;;  %v15532_v13 = vadd.f32 %v9239_v12, %v7572_v49  ;;  %v9241_v25 = vpop.f32.mrb[39].mxu0  ;;  %v6734_v41 = vld [vmem:[#allocation2 + $0xc78] sm:$0xff] }
 0x4ce   : > { %v18672_v27 = vmax.f32 %v9563_v45, %v9565_v30  ;;  %v9566_v43 = vmax.f32 %v15532_v13, 0.0  ;;  %9451 = vmatmul.mubr.bf16.gmra.mrb[144].mxu0 %v6703_v59  ;;  %v15543_v30 = vadd.f32 %v18594_v51, %v18352_v6  ;;  %v15547_v6 = vadd.f32 %v18594_v51, %v18360_v39 }
 0x4cf   : > { %9458 = vmatprep.mubr.bf16.mxu0 %v6714_v36 }
 0x4d0   : > { %v18676_v50 = vmax.f32 %v9564_v23, %v9566_v43  ;;  %v6733_v43 = vld [vmem:[#allocation2 + $0xc70] sm:$0xff] }
 0x4d1   : > { %v9244_v44 = vpop.f32.mrb[40].mxu0 }
 0x4d2   : > { %v15534_v17 = vadd.f32 %v9244_v44, %v7577_v26  ;;  %v9246_v24 = vpop.f32.mrb[41].mxu0  ;;  %v16354_v37 = vpack.i.bf16 %v18676_v50, %v18672_v27 }
 0x4d3   : > { %v9247_v0 = vpop.f32.mrb[42].mxu0 }
 0x4d4   : > { %v15536_v14 = vadd.f32 %v9247_v0, %v7580_v58  ;;  %v9249_v61 = vpop.f32.mrb[43].mxu0  ;;  %16355 = vrot.lane.b32.xlu0 %v16354_v37, %s17431_s17  ;;  %v9567_v62 = vmax.f32 %v15534_v17, 0.0  ;;  %v6744_v58 = vld [vmem:[#allocation2 + $0xcc8] sm:$0xff] }
 0x4d6   : > { %9459 = vmatmul.mubr.bf16.gmra.mrb[148].mxu0 %v6713_v53  ;;  %v9568_v1 = vmax.f32 %v15536_v14, 0.0  ;;  %v6743_v53 = vld [vmem:[#allocation2 + $0xcc0] sm:$0xff] }
 0x4d7   : > { %9466 = vmatprep.mubr.bf16.mxu0 %v6724_v29 }
 0x4d9   : > { %v9252_v3 = vpop.f32.mrb[44].mxu0 }
 0x4da   : > { %v15538_v2 = vadd.f32 %v15537_v55, %v9252_v3  ;;  %v9254_v7 = vpop.f32.mrb[45].mxu0  ;;  %v6754_v3 = vld [vmem:[#allocation2 + $0xd18] sm:$0xff] }
 0x4db   : > { %v9255_v5 = vpop.f32.mrb[46].mxu0 }
 0x4dc   : > { %v9569_v15 = vmax.f32 %v15538_v2, 0.0  ;;  %v15540_v42 = vadd.f32 %v15539_v9, %v9255_v5  ;;  %v9257_v49 = vpop.f32.mrb[47].mxu0 }
 0x4de   : > { %v18687_v12 = vmax.f32 %v9567_v62, %v9569_v15  ;;  %v9570_v59 = vmax.f32 %v15540_v42, 0.0  ;;  %9467 = vmatmul.mubr.bf16.gmra.mrb[152].mxu0 %v6723_v31  ;;  %v15551_v31 = vadd.f32 %v18594_v51, %v18368_v11  ;;  %v15555_v11 = vadd.f32 %v18594_v51, %v18376_v47 }
 0x4df   : > { %9474 = vmatprep.mubr.bf16.mxu0 %v6734_v41  ;;  %v6753_v41 = vld [vmem:[#allocation2 + $0xd10] sm:$0xff] }
 0x4e0   : > { %v18691_v45 = vmax.f32 %v9568_v1, %v9570_v59 }
 0x4e1   : > { %v9260_v38 = vpop.f32.mrb[48].mxu0 }
 0x4e2   : > { %v15542_v13 = vadd.f32 %v15541_v33, %v9260_v38  ;;  %v9262_v25 = vpop.f32.mrb[49].mxu0  ;;  %v16359_v36 = vpack.i.bf16 %v18691_v45, %v18687_v12  ;;  %v6764_v33 = vld [vmem:[#allocation2 + $0xd68] sm:$0xff] }
 0x4e3   : > { %v9263_v23 = vpop.f32.mrb[50].mxu0 }
 0x4e4   : > { %v15544_v26 = vadd.f32 %v15543_v30, %v9263_v23  ;;  %v9265_v44 = vpop.f32.mrb[51].mxu0  ;;  %16360 = vrot.lane.b32.xlu1 %v16359_v36, %s17431_s17  ;;  %v9571_v14 = vmax.f32 %v15542_v13, 0.0  ;;  %v6763_v36 = vld [vmem:[#allocation2 + $0xd60] sm:$0xff] }
 0x4e6   : > { %9475 = vmatmul.mubr.bf16.gmra.mrb[156].mxu0 %v6733_v43  ;;  %v9572_v9 = vmax.f32 %v15544_v26, 0.0 }
 0x4e7   : > { %9482 = vmatprep.mubr.bf16.mxu0 %v6744_v58  ;;  %v6774_v58 = vld [vmem:[#allocation2 + $0xdb8] sm:$0xff] }
 0x4e9   : > { %v9268_v17 = vpop.f32.mrb[52].mxu0 }
 0x4ea   : > { %v15546_v24 = vadd.f32 %v15545_v63, %v9268_v17  ;;  %v9270_v37 = vpop.f32.mrb[53].mxu0 }
 0x4eb   : > { %v9271_v0 = vpop.f32.mrb[54].mxu0  ;;  %v15559_v37 = vadd.f32 %v18594_v51, %v18384_v22  ;;  %v15561_v22 = vadd.f32 %v18594_v51, %v18389_v56 }
 0x4ec   : > { %v9573_v61 = vmax.f32 %v15546_v24, 0.0  ;;  %v15548_v29 = vadd.f32 %v15547_v6, %v9271_v0  ;;  %v9273_v55 = vpop.f32.mrb[55].mxu0 }
 0x4ee   : > { %v18702_v2 = vmax.f32 %v9571_v14, %v9573_v61  ;;  %v9574_v7 = vmax.f32 %v15548_v29, 0.0  ;;  %9483 = vmatmul.mubr.bf16.gmra.mrb[160].mxu0 %v6743_v53  ;;  %v6773_v29 = vld [vmem:[#allocation2 + $0xdb0] sm:$0xff] }
 0x4ef   : > { %9490 = vmatprep.mubr.bf16.mxu0 %v6754_v3 }
 0x4f0   : > { %v18706_v5 = vmax.f32 %v9572_v9, %v9574_v7  ;;  %v6784_v9 = vld [vmem:[#allocation2 + $0xe08] sm:$0xff] }
 0x4f1   : > { %v9276_v39 = vpop.f32.mrb[56].mxu0 }
 0x4f2   : > { %v15550_v62 = vadd.f32 %v15549_v32, %v9276_v39  ;;  %v9278_v15 = vpop.f32.mrb[57].mxu0  ;;  %v16364_v42 = vpack.i.bf16 %v18706_v5, %v18702_v2 }
 0x4f3   : > { %v9279_v49 = vpop.f32.mrb[58].mxu0  ;;  %v15563_v15 = vadd.f32 %v18594_v51, %v18392_v60  ;;  %v15565_v60 = vadd.f32 %v18594_v51, %v18397_v35 }
 0x4f4   : > { %v15552_v1 = vadd.f32 %v15551_v31, %v9279_v49  ;;  %v9281_v59 = vpop.f32.mrb[59].mxu0  ;;  %16365 = vrot.lane.b32.xlu0 %v16364_v42, %s17431_s17  ;;  %v9575_v23 = vmax.f32 %v15550_v62, 0.0 }
 0x4f5   : > { %v6783_v59 = vld [vmem:[#allocation2 + $0xe00] sm:$0xff] }
 0x4f6   : > { %9491 = vmatmul.mubr.bf16.gmra.mrb[164].mxu0 %v6753_v41  ;;  %v9576_v63 = vmax.f32 %v15552_v1, 0.0 }
 0x4f7   : > { %9498 = vmatprep.mubr.bf16.mxu0 %v6764_v33 }
 0x4f9   : > { %v9284_v38 = vpop.f32.mrb[60].mxu0 }
 0x4fa   : > { %v15554_v30 = vadd.f32 %v15553_v4, %v9284_v38  ;;  %v9286_v13 = vpop.f32.mrb[61].mxu0 }
 0x4fb   : > { %v9287_v25 = vpop.f32.mrb[62].mxu0 }
 0x4fc   : > { %v9577_v43 = vmax.f32 %v15554_v30, 0.0  ;;  %v15556_v26 = vadd.f32 %v15555_v11, %v9287_v25  ;;  %v9289_v44 = vpop.f32.mrb[63].mxu0  ;;  %v6794_v30 = vld [vmem:[#allocation2 + $0xe58] sm:$0xff] }
 0x4fe   : > { %v18717_v17 = vmax.f32 %v9575_v23, %v9577_v43  ;;  %v9578_v6 = vmax.f32 %v15556_v26, 0.0  ;;  %9499 = vmatmul.mubr.bf16.gmra.mrb[168].mxu0 %v6763_v36  ;;  %v15567_v36 = vadd.f32 %v18594_v51, %v18400_v46  ;;  %v15569_v46 = vadd.f32 %v18594_v51, %v18405_v19 }
 0x4ff   : > { %9506 = vmatprep.mubr.bf16.mxu0 %v6774_v58  ;;  %v6793_v58 = vld [vmem:[#allocation2 + $0xe50] sm:$0xff] }
 0x500   : > { %v18721_v24 = vmax.f32 %v9576_v63, %v9578_v6 }
 0x501   : > { %v9292_v47 = vpop.f32.mrb[64].mxu0 }
 0x502   : > { %v15558_v0 = vadd.f32 %v15557_v40, %v9292_v47  ;;  %v9294_v53 = vpop.f32.mrb[65].mxu0  ;;  %v16369_v14 = vpack.i.bf16 %v18721_v24, %v18717_v17  ;;  %v6804_v40 = vld [vmem:[#allocation2 + $0xea8] sm:$0xff] }
 0x503   : > { %v9295_v61 = vpop.f32.mrb[66].mxu0 }
 0x504   : > { %v15560_v55 = vadd.f32 %v15559_v37, %v9295_v61  ;;  %v9297_v3 = vpop.f32.mrb[67].mxu0  ;;  %16370 = vrot.lane.b32.xlu1 %v16369_v14, %s17431_s17  ;;  %v9579_v33 = vmax.f32 %v15558_v0, 0.0  ;;  %v15571_v61 = vadd.f32 %v18594_v51, %v18408_v28  ;;  %v15573_v28 = vadd.f32 %v18594_v51, %v18413_v10 }
 0x506   : > { %9507 = vmatmul.mubr.bf16.gmra.mrb[172].mxu0 %v6773_v29  ;;  %v16346_v16 = vpop.permute.xlu1 %16345  ;;  %v9580_v56 = vmax.f32 %v15560_v55, 0.0 }
 0x507   : > { %v16348_v7 = vunpack.i.h.bf16 %v16346_v16  ;;  %v16347_v32 = vunpack.i.l.bf16 %v16346_v16  ;;  %9514 = vmatprep.mubr.bf16.mxu0 %v6784_v9  ;;  %v6803_v16 = vld [vmem:[#allocation2 + $0xea0] sm:$0xff] }
 0x509   : > { %v9788_v39 = vmax.f32 %v18612_v21, %v16348_v7  ;;  %v9787_v31 = vmax.f32 %v18609_v57, %v16347_v32  ;;  %v9300_v62 = vpop.f32.mrb[68].mxu0 }
 0x50a   : > { %v15562_v42 = vadd.f32 %v15561_v22, %v9300_v62  ;;  %v9302_v49 = vpop.f32.mrb[69].mxu0 }
 0x50b   : > { %v9303_v41 = vpop.f32.mrb[70].mxu0  ;;  %v9811_v1 = vpack.c.bf16 %v9788_v39, %v9787_v31  ;;  %v6814_v31 = vld [vmem:[#allocation2 + $0xef8] sm:$0xff] }
 0x50c   : > { %v9581_v4 = vmax.f32 %v15562_v42, 0.0  ;;  %v15564_v38 = vadd.f32 %v15563_v15, %v9303_v41  ;;  %v9305_v11 = vpop.f32.mrb[71].mxu0  ;;  %v15575_v42 = vadd.f32 %v18594_v51, %v18416_v18 }
 0x50d   : > { %9848 = vrot.lane.b32.xlu1 %v9811_v1, %s17431_s17  ;;  %9824 = vst.msk [vmem:[#allocation3] sm:$0xff] %vm9823_vm0, %v9811_v1  ;;  %v20498_v11 = vld [vmem:[#allocation10_spill] sm:$0xff] }
 0x50e   : > { %v18736_v57 = vmax.f32 %v9579_v33, %v9581_v4  ;;  %v9582_v21 = vmax.f32 %v15564_v38, 0.0  ;;  %9515 = vmatmul.mubr.bf16.gmra.mrb[176].mxu0 %v6783_v59  ;;  %v6813_v33 = vld [vmem:[#allocation2 + $0xef0] sm:$0xff]  ;;  %v15577_v10 = vadd.f32 %v18594_v51, %v20498_v11 }
 0x50f   : > { %9522 = vmatprep.mubr.bf16.mxu0 %v6794_v30 }
 0x510   : > { %v18740_v13 = vmax.f32 %v9580_v56, %v9582_v21  ;;  %v20499_v56 = vld [vmem:[#allocation11_spill] sm:$0xff] }
 0x511   : > { %v9308_v25 = vpop.f32.mrb[72].mxu0  ;;  %v15579_v21 = vadd.f32 %v18594_v51, %v20499_v56 }
 0x512   : > { %v15566_v23 = vadd.f32 %v15565_v60, %v9308_v25  ;;  %v9310_v43 = vpop.f32.mrb[73].mxu0  ;;  %v16374_v26 = vpack.i.bf16 %v18740_v13, %v18736_v57 }
 0x513   : > { %v9311_v44 = vpop.f32.mrb[74].mxu0 }
 0x514   : > { %v15568_v63 = vadd.f32 %v15567_v36, %v9311_v44  ;;  %v9313_v6 = vpop.f32.mrb[75].mxu0  ;;  %16375 = vrot.lane.b32.xlu0 %v16374_v26, %s17431_s17  ;;  %v9583_v7 = vmax.f32 %v15566_v23, 0.0 }
 0x515   : > { %v20500_v6 = vld [vmem:[#allocation12_spill] sm:$0xff] }
 0x516   : > { %9523 = vmatmul.mubr.bf16.gmra.mrb[180].mxu0 %v6793_v58  ;;  %v16336_v35 = vpop.permute.xlu0 %16335  ;;  %v9584_v19 = vmax.f32 %v15568_v63, 0.0 }
 0x517   : > { %v16338_v47 = vunpack.i.h.bf16 %v16336_v35  ;;  %v16337_v37 = vunpack.i.l.bf16 %v16336_v35  ;;  %9530 = vmatprep.mubr.bf16.mxu0 %v6804_v40  ;;  %v15581_v40 = vadd.f32 %v18594_v51, %v20500_v6 }
 0x519   : > { %v9994_v0 = vmax.f32 %v18629_v20, %v16338_v47  ;;  %v9993_v53 = vmax.f32 %v18627_v34, %v16337_v37  ;;  %v9316_v14 = vpop.f32.mrb[76].mxu0  ;;  %v20501_v37 = vld [vmem:[#allocation13_spill] sm:$0xff] }
 0x51a   : > { %v15570_v29 = vadd.f32 %v15569_v46, %v9316_v14  ;;  %v9318_v55 = vpop.f32.mrb[77].mxu0  ;;  %v15583_v46 = vadd.f32 %v18594_v51, %v20501_v37 }
 0x51b   : > { %v9319_v3 = vpop.f32.mrb[78].mxu0  ;;  %v10017_v9 = vpack.c.bf16 %v9994_v0, %v9993_v53 }
 0x51c   : > { %v9585_v32 = vmax.f32 %v15570_v29, 0.0  ;;  %v15572_v22 = vadd.f32 %v15571_v61, %v9319_v3  ;;  %v9321_v39 = vpop.f32.mrb[79].mxu0 }
 0x51d   : > { %10054 = vrot.lane.b32.xlu1 %v10017_v9, %s17431_s17  ;;  %10030 = vst.msk [vmem:[#allocation3 + $0x60] sm:$0xff] %vm9823_vm0, %v10017_v9 }
 0x51e   : > { %v18755_v34 = vmax.f32 %v9583_v7, %v9585_v32  ;;  %v9586_v20 = vmax.f32 %v15572_v22, 0.0  ;;  %9531 = vmatmul.mubr.bf16.gmra.mrb[184].mxu0 %v6803_v16  ;;  %v20502_v7 = vld [vmem:[#allocation14_spill] sm:$0xff] }
 0x51f   : > { %9538 = vmatprep.mubr.bf16.mxu0 %v6814_v31  ;;  %v15585_v32 = vadd.f32 %v18594_v51, %v20502_v7 }
 0x520   : > { %v18759_v62 = vmax.f32 %v9584_v19, %v9586_v20  ;;  %v20503_v19 = vld [vmem:[#allocation15_spill] sm:$0xff] }
 0x521   : > { %v9324_v15 = vpop.f32.mrb[80].mxu0  ;;  %v15587_v20 = vadd.f32 %v18594_v51, %v20503_v19 }
 0x522   : > { %v15574_v49 = vadd.f32 %v15573_v28, %v9324_v15  ;;  %v9326_v41 = vpop.f32.mrb[81].mxu0  ;;  %v16379_v1 = vpack.i.bf16 %v18759_v62, %v18755_v34 }
 0x523   : > { %v9327_v59 = vpop.f32.mrb[82].mxu0 }
 0x524   : > { %v15576_v4 = vadd.f32 %v15575_v42, %v9327_v59  ;;  %v9329_v38 = vpop.f32.mrb[83].mxu0  ;;  %16380 = vrot.lane.b32.xlu1 %v16379_v1, %s17431_s17  ;;  %v9587_v36 = vmax.f32 %v15574_v49, 0.0 }
 0x526   : > { %9539 = vmatmul.mubr.bf16.gmra.mrb[188].mxu0 %v6813_v33  ;;  %v9588_v44 = vmax.f32 %v15576_v4, 0.0 }
 0x529   : > { %v9332_v30 = vpop.f32.mrb[84].mxu0 }
 0x52a   : > { %v15578_v18 = vadd.f32 %v15577_v10, %v9332_v30  ;;  %v9334_v60 = vpop.f32.mrb[85].mxu0 }
 0x52b   : > { %v9335_v25 = vpop.f32.mrb[86].mxu0 }
 0x52c   : > { %v9589_v23 = vmax.f32 %v15578_v18, 0.0  ;;  %v15580_v43 = vadd.f32 %v15579_v21, %v9335_v25  ;;  %v9337_v26 = vpop.f32.mrb[87].mxu0  ;;  %v20504_v18 = vld [vmem:[#allocation16_spill] sm:$0xff] }
 0x52d   : > { %v15589_v60 = vadd.f32 %v18594_v51, %v20504_v18 }
 0x52e   : > { %v18770_v58 = vmax.f32 %v9587_v36, %v9589_v23  ;;  %v9590_v63 = vmax.f32 %v15580_v43, 0.0 }
 0x530   : > { %v18774_v35 = vmax.f32 %v9588_v44, %v9590_v63 }
 0x531   : > { %v9340_v47 = vpop.f32.mrb[88].mxu0 }
 0x532   : > { %v15582_v0 = vadd.f32 %v15581_v40, %v9340_v47  ;;  %v9342_v53 = vpop.f32.mrb[89].mxu0  ;;  %v16384_v14 = vpack.i.bf16 %v18774_v35, %v18770_v58 }
 0x533   : > { %v9343_v61 = vpop.f32.mrb[90].mxu0 }
 0x534   : > { %v15584_v29 = vadd.f32 %v15583_v46, %v9343_v61  ;;  %v9345_v55 = vpop.f32.mrb[91].mxu0  ;;  %16385 = vrot.lane.b32.xlu0 %v16384_v14, %s17431_s17  ;;  %v9591_v33 = vmax.f32 %v15582_v0, 0.0  ;;  %v20506_v46 = vld [vmem:[#allocation18_spill] sm:$0xff] }
 0x535   : > { %v15593_v0 = vadd.f32 %v18594_v51, %v20506_v46  ;;  %v20512_v46 = vld [vmem:[#allocation24_spill] sm:$0xff] }
 0x536   : > { %v16341_v3 = vpop.permute.xlu0 %16340 }
 0x537   : > { %v16343_v9 = vunpack.i.h.bf16 %v16341_v3  ;;  %v16342_v16 = vunpack.i.l.bf16 %v16341_v3 }
 0x539   : > { %v9996_v22 = vmax.f32 %v18658_v48, %v16343_v9  ;;  %v9995_v39 = vmax.f32 %v18654_v54, %v16342_v16  ;;  %v9348_v31 = vpop.f32.mrb[92].mxu0  ;;  %v9592_v54 = vmax.f32 %v15584_v29, 0.0  ;;  %v20507_v29 = vld [vmem:[#allocation19_spill] sm:$0xff] }
 0x53a   : > { %v15586_v28 = vadd.f32 %v15585_v32, %v9348_v31  ;;  %v9350_v15 = vpop.f32.mrb[93].mxu0  ;;  %v16351_v42 = vpop.permute.xlu0 %16350  ;;  %v15595_v55 = vadd.f32 %v18594_v51, %v20507_v29 }
 0x53b   : > { %v16353_v49 = vunpack.i.h.bf16 %v16351_v42  ;;  %v16352_v41 = vunpack.i.l.bf16 %v16351_v42  ;;  %v9351_v1 = vpop.f32.mrb[94].mxu0  ;;  %v10018_v59 = vpack.c.bf16 %v9996_v22, %v9995_v39 }
 0x53c   : > { %v9593_v4 = vmax.f32 %v15586_v28, 0.0  ;;  %v15588_v38 = vadd.f32 %v15587_v20, %v9351_v1  ;;  %v9353_v11 = vpop.f32.mrb[95].mxu0  ;;  %v20508_v20 = vld [vmem:[#allocation20_spill] sm:$0xff] }
 0x53d   : > { %v9790_v10 = vmax.f32 %v18644_v52, %v16353_v49  ;;  %v9789_v48 = vmax.f32 %v18642_v8, %v16352_v41  ;;  %10056 = vrot.lane.b32.xlu0 %v10018_v59, %s17431_s17  ;;  %10031 = vst.msk [vmem:[#allocation3 + $0x68] sm:$0xff] %vm9823_vm0, %v10018_v59  ;;  %v20505_v8 = vld [vmem:[#allocation17_spill] sm:$0xff]  ;;  %v15597_v28 = vadd.f32 %v18594_v51, %v20508_v20 }
 0x53e   : > { %v18791_v30 = vmax.f32 %v9591_v33, %v9593_v4  ;;  %v9594_v56 = vmax.f32 %v15588_v38, 0.0  ;;  %v15591_v52 = vadd.f32 %v18594_v51, %v20505_v8  ;;  %v20509_v49 = vld [vmem:[#allocation21_spill] sm:$0xff]  ;;  %v20511_v8 = vld [vmem:[#allocation23_spill] sm:$0xff] }
 0x53f   : > { %v9812_v21 = vpack.c.bf16 %v9790_v10, %v9789_v48  ;;  %v15599_v41 = vadd.f32 %v18594_v51, %v20509_v49  ;;  %v20515_v49 = vld [vmem:[#allocation27_spill] sm:$0xff] }
 0x540   : > { %v18795_v25 = vmax.f32 %v9592_v54, %v9594_v56  ;;  %v20510_v56 = vld [vmem:[#allocation22_spill] sm:$0xff] }
 0x541   : > { %v9356_v36 = vpop.f32.mrb[96].mxu0  ;;  %9850 = vrot.lane.b32.xlu1 %v9812_v21, %s17431_s17  ;;  %9825 = vst.msk [vmem:[#allocation3 + $0x8] sm:$0xff] %vm9823_vm0, %v9812_v21  ;;  %v15601_v21 = vadd.f32 %v18594_v51, %v20510_v56  ;;  %v20516_v56 = vld [vmem:[#allocation28_spill] sm:$0xff] }
 0x542   : > { %v15590_v23 = vadd.f32 %v15589_v60, %v9356_v36  ;;  %v9358_v43 = vpop.f32.mrb[97].mxu0  ;;  %v16389_v26 = vpack.i.bf16 %v18795_v25, %v18791_v30 }
 0x543   : > { %v9359_v44 = vpop.f32.mrb[98].mxu0 }
 0x544   : > { %v15592_v63 = vadd.f32 %v15591_v52, %v9359_v44  ;;  %v9361_v6 = vpop.f32.mrb[99].mxu0  ;;  %v9595_v32 = vmax.f32 %v15590_v23, 0.0  ;;  %v15603_v52 = vadd.f32 %v18594_v51, %v20511_v8  ;;  %v18836_v51 = vld [vmem:[%s20433_s2] ss:$0 sm:$0xff] }
 0x545   : > { %16390 = vrot.lane.b32.xlu1 %v16389_v26, %s17431_s17 }
 0x546   : > { %v16356_v40 = vpop.permute.xlu0 %16355  ;;  %v9596_v19 = vmax.f32 %v15592_v63, 0.0 }
 0x547   : > { %v16358_v47 = vunpack.i.h.bf16 %v16356_v40  ;;  %v16357_v37 = vunpack.i.l.bf16 %v16356_v40 }
 0x549   : > { %v9792_v53 = vmax.f32 %v18676_v50, %v16358_v47  ;;  %v9791_v14 = vmax.f32 %v18672_v27, %v16357_v37  ;;  %v9364_v61 = vpop.f32.mrb[100].mxu0 }
 0x54a   : > { %v15594_v3 = vadd.f32 %v15593_v0, %v9364_v61  ;;  %v9366_v9 = vpop.f32.mrb[101].mxu0  ;;  %v15605_v0 = vadd.f32 %v18836_v51, %v20512_v46  ;;  %v20513_v61 = vld [vmem:[#allocation25_spill] sm:$0xff] }
 0x54b   : > { %v9367_v16 = vpop.f32.mrb[102].mxu0  ;;  %v9813_v7 = vpack.c.bf16 %v9792_v53, %v9791_v14  ;;  %v15607_v29 = vadd.f32 %v18836_v51, %v20513_v61  ;;  %v20519_v61 = vld [vmem:[#allocation31_spill] sm:$0xff] }
 0x54c   : > { %v9597_v22 = vmax.f32 %v15594_v3, 0.0  ;;  %v15596_v39 = vadd.f32 %v15595_v55, %v9367_v16  ;;  %v9369_v31 = vpop.f32.mrb[103].mxu0 }
 0x54d   : > { %9852 = vrot.lane.b32.xlu1 %v9813_v7, %s17431_s17  ;;  %9826 = vst.msk [vmem:[#allocation3 + $0x10] sm:$0xff] %vm9823_vm0, %v9813_v7 }
 0x54e   : > { %v18812_v50 = vmax.f32 %v9595_v32, %v9597_v22  ;;  %v9598_v27 = vmax.f32 %v15596_v39, 0.0 }
 0x550   : > { %v18816_v15 = vmax.f32 %v9596_v19, %v9598_v27  ;;  %v20514_v19 = vld [vmem:[#allocation26_spill] sm:$0xff] }
 0x551   : > { %v9372_v42 = vpop.f32.mrb[104].mxu0  ;;  %v15609_v27 = vadd.f32 %v18836_v51, %v20514_v19  ;;  %v17014_v19 = vld [vmem:[%s20434_s3 + $0x40] sm:$0xff]  }
 0x552   : > { %v15598_v1 = vadd.f32 %v15597_v28, %v9372_v42  ;;  %v9374_v59 = vpop.f32.mrb[105].mxu0  ;;  %v16394_v33 = vpack.i.bf16 %v18816_v15, %v18812_v50  ;;  %15296 = vmatprep.subr.bf16.mxu1 %v17014_v19 }
 0x553   : > { %v9375_v4 = vpop.f32.mrb[106].mxu0 }
 0x554   : > { %v15600_v38 = vadd.f32 %v15599_v41, %v9375_v4  ;;  %v9377_v11 = vpop.f32.mrb[107].mxu0  ;;  %16395 = vrot.lane.b32.xlu0 %v16394_v33, %s17431_s17  ;;  %v9599_v63 = vmax.f32 %v15598_v1, 0.0  ;;  %v15611_v41 = vadd.f32 %v18836_v51, %v20515_v49 }
 0x556   : > { %v16361_v10 = vpop.permute.xlu1 %16360  ;;  %v9600_v37 = vmax.f32 %v15600_v38, 0.0 }
 0x557   : > { %v16363_v48 = vunpack.i.h.bf16 %v16361_v10  ;;  %v16362_v54 = vunpack.i.l.bf16 %v16361_v10 }
 0x559   : > { %v9998_v18 = vmax.f32 %v18691_v45, %v16363_v48  ;;  %v9997_v60 = vmax.f32 %v18687_v12, %v16362_v54  ;;  %v9380_v36 = vpop.f32.mrb[108].mxu0 }
 0x55a   : > { %v15602_v23 = vadd.f32 %v15601_v21, %v9380_v36  ;;  %v9382_v43 = vpop.f32.mrb[109].mxu0  ;;  %v15613_v21 = vadd.f32 %v18836_v51, %v20516_v56  ;;  %v20517_v36 = vld [vmem:[#allocation29_spill] sm:$0xff] }
 0x55b   : > { %v9383_v26 = vpop.f32.mrb[110].mxu0  ;;  %v10019_v44 = vpack.c.bf16 %v9998_v18, %v9997_v60  ;;  %v15615_v8 = vadd.f32 %v18836_v51, %v20517_v36 }
 0x55c   : > { %v9601_v6 = vmax.f32 %v15602_v23, 0.0  ;;  %v15604_v40 = vadd.f32 %v15603_v52, %v9383_v26  ;;  %v9385_v47 = vpop.f32.mrb[111].mxu0 }
 0x55d   : > { %10058 = vrot.lane.b32.xlu0 %v10019_v44, %s17431_s17  ;;  %10032 = vst.msk [vmem:[#allocation3 + $0x70] sm:$0xff] %vm9823_vm0, %v10019_v44 }
 0x55e   : > { %v18831_v45 = vmax.f32 %v9599_v63, %v9601_v6  ;;  %v9602_v12 = vmax.f32 %v15604_v40, 0.0 }
 0x560   : > { %v18840_v53 = vmax.f32 %v9600_v37, %v9602_v12  ;;  %v20518_v37 = vld [vmem:[#allocation30_spill] sm:$0xff] }
 0x561   : > { %v9388_v14 = vpop.f32.mrb[112].mxu0  ;;  %v15617_v12 = vadd.f32 %v18836_v51, %v20518_v37 }
 0x562   : > { %v15606_v55 = vadd.f32 %v15605_v0, %v9388_v14  ;;  %v9390_v3 = vpop.f32.mrb[113].mxu0  ;;  %v16399_v9 = vpack.i.bf16 %v18840_v53, %v18831_v45 }
 0x563   : > { %v9391_v16 = vpop.f32.mrb[114].mxu0 }
 0x564   : > { %v15608_v7 = vadd.f32 %v15607_v29, %v9391_v16  ;;  %v9393_v32 = vpop.f32.mrb[115].mxu0  ;;  %16400 = vrot.lane.b32.xlu1 %v16399_v9, %s17431_s17  ;;  %v9603_v38 = vmax.f32 %v15606_v55, 0.0  ;;  %v15619_v29 = vadd.f32 %v18836_v51, %v20519_v61 }
 0x566   : > { %v16366_v22 = vpop.permute.xlu0 %16365  ;;  %v9604_v54 = vmax.f32 %v15608_v7, 0.0 }
 0x567   : > { %v16368_v39 = vunpack.i.h.bf16 %v16366_v22  ;;  %v16367_v31 = vunpack.i.l.bf16 %v16366_v22 }
 0x569   : > { %v9794_v20 = vmax.f32 %v18706_v5, %v16368_v39  ;;  %v9793_v28 = vmax.f32 %v18702_v2, %v16367_v31  ;;  %v9396_v42 = vpop.f32.mrb[116].mxu0 }
 0x56a   : > { %v15610_v1 = vadd.f32 %v15609_v27, %v9396_v42  ;;  %v9398_v59 = vpop.f32.mrb[117].mxu0  ;;  %v17015_v27 = vld [vmem:[%s20434_s3] sm:$0xff]  }
 0x56b   : > { %v9399_v33 = vpop.f32.mrb[118].mxu0  ;;  %v9814_v4 = vpack.c.bf16 %v9794_v20, %v9793_v28  ;;  %v20520_v28 = vld [vmem:[#allocation32_spill] sm:$0xff]  ;;  %15297 = vmatpush3.bf16.msra.mxu1 %v17015_v27 }
 0x56c   : > { %v9605_v11 = vmax.f32 %v15610_v1, 0.0  ;;  %v15612_v10 = vadd.f32 %v15611_v41, %v9399_v33  ;;  %v9401_v48 = vpop.f32.mrb[119].mxu0  ;;  %v15621_v42 = vadd.f32 %v18836_v51, %v20520_v28  ;;  %v20521_v41 = vld [vmem:[#allocation33_spill] sm:$0xff] }
 0x56d   : > { %9854 = vrot.lane.b32.xlu0 %v9814_v4, %s17431_s17  ;;  %9827 = vst.msk [vmem:[#allocation3 + $0x18] sm:$0xff] %vm9823_vm0, %v9814_v4  ;;  %v15623_v1 = vadd.f32 %v18836_v51, %v20521_v41 }
 0x56e   : > { %v18855_v5 = vmax.f32 %v9603_v38, %v9605_v11  ;;  %v9606_v2 = vmax.f32 %v15612_v10, 0.0 }
 0x570   : > { %v18859_v18 = vmax.f32 %v9604_v54, %v9606_v2  ;;  %v10116_v2 = vld [vmem:[#allocation4] sm:$0x3f] }
 0x571   : > { %v9404_v60 = vpop.f32.mrb[120].mxu0 }
 0x572   : > { %v15614_v52 = vadd.f32 %v15613_v21, %v9404_v60  ;;  %v9406_v23 = vpop.f32.mrb[121].mxu0  ;;  %v16404_v43 = vpack.i.bf16 %v18859_v18, %v18855_v5 }
 0x573   : > { %v9407_v26 = vpop.f32.mrb[122].mxu0 }
 0x574   : > { %v15616_v44 = vadd.f32 %v15615_v8, %v9407_v26  ;;  %v9409_v63 = vpop.f32.mrb[123].mxu0  ;;  %16405 = vrot.lane.b32.xlu1 %v16404_v43, %s17431_s17  ;;  %v9607_v7 = vmax.f32 %v15614_v52, 0.0  ;;  %v20524_v8 = vld [vmem:[#allocation34_spill] sm:$0xff] }
 0x575   : > { %v15625_v52 = vadd.f32 %v18836_v51, %v20524_v8  ;;  %v20525_v63 = vld [vmem:[#allocation35_spill] sm:$0xff] }
 0x576   : > { %v16371_v6 = vpop.permute.xlu1 %16370 }
 0x577   : > { %v16373_v40 = vunpack.i.h.bf16 %v16371_v6  ;;  %v16372_v47 = vunpack.i.l.bf16 %v16371_v6  ;;  %v15627_v6 = vadd.f32 %v18836_v51, %v20525_v63 }
 0x579   : > { %v10000_v46 = vmax.f32 %v18721_v24, %v16373_v40  ;;  %v9999_v0 = vmax.f32 %v18717_v17, %v16372_v47  ;;  %v9412_v14 = vpop.f32.mrb[124].mxu0  ;;  %v9608_v24 = vmax.f32 %v15616_v44, 0.0 }
 0x57a   : > { %v15618_v55 = vadd.f32 %v15617_v12, %v9412_v14  ;;  %v9414_v3 = vpop.f32.mrb[125].mxu0 }
 0x57b   : > { %v9415_v9 = vpop.f32.mrb[126].mxu0  ;;  %v10020_v16 = vpack.c.bf16 %v10000_v46, %v9999_v0 }
 0x57c   : > { %v9609_v32 = vmax.f32 %v15618_v55, 0.0  ;;  %v15620_v22 = vadd.f32 %v15619_v29, %v9415_v9  ;;  %v9417_v39 = vpop.f32.mrb[127].mxu0  ;;  %v20528_v9 = vld [vmem:[#allocation36_spill] sm:$0xff] }
 0x57d   : > { %10060 = vrot.lane.b32.xlu0 %v10020_v16, %s17431_s17  ;;  %10033 = vst.msk [vmem:[#allocation3 + $0x78] sm:$0xff] %vm9823_vm0, %v10020_v16  ;;  %v15629_v16 = vadd.f32 %v18836_v51, %v20528_v9 }
 0x57e   : > { %v18874_v31 = vmax.f32 %v9607_v7, %v9609_v32  ;;  %v9610_v17 = vmax.f32 %v15620_v22, 0.0 }
 0x57f   : > { %v9849_v20 = vpop.permute.xlu1 %9848 }
 0x580   : > { %v18884_v49 = vmax.f32 %v9608_v24, %v9610_v17  ;;  %9885 = vst.msk [vmem:[#allocation3] sm:$0xff] %vm9884_vm1, %v9849_v20  ;;  %v20529_v17 = vld [vmem:[#allocation37_spill] sm:$0xff] }
 0x581   : > { %v9420_v59 = vpop.f32.mrb[128].mxu0  ;;  %v15631_v19 = vadd.f32 %v18836_v51, %v20529_v17 }
 0x582   : > { %v15622_v33 = vadd.f32 %v15621_v42, %v9420_v59  ;;  %v9422_v4 = vpop.f32.mrb[129].mxu0  ;;  %v16409_v38 = vpack.i.bf16 %v18884_v49, %v18874_v31 }
 0x583   : > { %v9423_v11 = vpop.f32.mrb[130].mxu0 }
 0x584   : > { %v15624_v10 = vadd.f32 %v15623_v1, %v9423_v11  ;;  %v9425_v48 = vpop.f32.mrb[131].mxu0  ;;  %16410 = vrot.lane.b32.xlu1 %v16409_v38, %s17431_s17  ;;  %v9611_v46 = vmax.f32 %v15622_v33, 0.0  ;;  %v20530_v38 = vld [vmem:[#allocation38_spill] sm:$0xff] }
 0x585   : > { %v15633_v11 = vadd.f32 %v18836_v51, %v20530_v38 }
 0x586   : > { %v16376_v56 = vpop.permute.xlu0 %16375 }
 0x587   : > { %v16378_v21 = vunpack.i.h.bf16 %v16376_v56  ;;  %v16377_v60 = vunpack.i.l.bf16 %v16376_v56  ;;  %v10102_v36 = vld [vmem:[#allocation3] sm:$0x3f]  ;;  %v20531_v56 = vld [vmem:[#allocation39_spill] sm:$0xff] }
 0x588   : > { %v10117_v23 = vsel %vm18893_vm4, %v10102_v36, %v10116_v2  ;;  %v10149_v32 = vld [vmem:[#allocation3] sm:$0x3f] }
 0x589   : > { %v9796_v43 = vmax.f32 %v18740_v13, %v16378_v21  ;;  %v9795_v26 = vmax.f32 %v18736_v57, %v16377_v60  ;;  %v9428_v44 = vpop.f32.mrb[132].mxu0  ;;  %10118 = vst [vmem:[#allocation4] sm:$0x3f] %v10117_v23  ;;  %v9612_v13 = vmax.f32 %v15624_v10, 0.0  ;;  %v15635_v21 = vadd.f32 %v18836_v51, %v20531_v56  ;;  %v20536_v56 = vld [vmem:[#allocation44_spill] sm:$0xff] }
 0x58a   : > { %v15626_v40 = vadd.f32 %v15625_v52, %v9428_v44  ;;  %v9430_v47 = vpop.f32.mrb[133].mxu0 }
 0x58b   : > { %v9431_v37 = vpop.f32.mrb[134].mxu0  ;;  %v9815_v12 = vpack.c.bf16 %v9796_v43, %v9795_v26  ;;  %v20532_v47 = vld [vmem:[#allocation40_spill] sm:$0xff] }
 0x58c   : > { %v9613_v0 = vmax.f32 %v15626_v40, 0.0  ;;  %v15628_v14 = vadd.f32 %v15627_v6, %v9431_v37  ;;  %v9433_v61 = vpop.f32.mrb[135].mxu0  ;;  %v15637_v37 = vadd.f32 %v18836_v51, %v20532_v47  ;;  %v20538_v47 = vld [vmem:[#allocation46_spill] sm:$0xff] }
 0x58d   : > { %9856 = vrot.lane.b32.xlu1 %v9815_v12, %s17431_s17  ;;  %9828 = vst.msk [vmem:[#allocation3 + $0x20] sm:$0xff] %vm9823_vm0, %v9815_v12 }
 0x58e   : > { %v18907_v57 = vmax.f32 %v9611_v46, %v9613_v0  ;;  %v9614_v29 = vmax.f32 %v15628_v14, 0.0  ;;  %v20533_v0 = vld [vmem:[#allocation41_spill] sm:$0xff] }
 0x58f   : > { %v10055_v3 = vpop.permute.xlu1 %10054  ;;  %v15639_v14 = vadd.f32 %v18836_v51, %v20533_v0 }
 0x590   : > { %v18916_v7 = vmax.f32 %v9612_v13, %v9614_v29  ;;  %10090 = vst.msk [vmem:[#allocation3 + $0x60] sm:$0xff] %vm9884_vm1, %v10055_v3  ;;  %v10162_v22 = vld [vmem:[#allocation4] sm:$0x3f] }
 0x591   : > { %v9436_v39 = vpop.f32.mrb[136].mxu0  ;;  %v10163_v24 = vsel %vm18910_vm6, %v10149_v32, %v10162_v22 }
 0x592   : > { %v15630_v27 = vadd.f32 %v15629_v16, %v9436_v39  ;;  %v9438_v20 = vpop.f32.mrb[137].mxu0  ;;  %v16414_v28 = vpack.i.bf16 %v18916_v7, %v18907_v57  ;;  %10164 = vst [vmem:[#allocation4] sm:$0x3f] %v10163_v24  ;;  %v20534_v24 = vld [vmem:[#allocation42_spill] sm:$0xff] }
 0x593   : > { %v9439_v42 = vpop.f32.mrb[138].mxu0  ;;  %v15641_v17 = vadd.f32 %v18836_v51, %v20534_v24 }
 0x594   : > { %v15632_v41 = vadd.f32 %v15631_v19, %v9439_v42  ;;  %v9441_v1 = vpop.f32.mrb[139].mxu0  ;;  %16415 = vrot.lane.b32.xlu0 %v16414_v28, %s17431_s17  ;;  %v9615_v23 = vmax.f32 %v15630_v27, 0.0  ;;  %v20535_v28 = vld [vmem:[#allocation43_spill] sm:$0xff] }
 0x595   : > { %v15643_v42 = vadd.f32 %v18836_v51, %v20535_v28 }
 0x596   : > { %v16381_v59 = vpop.permute.xlu1 %16380  ;;  %v9616_v63 = vmax.f32 %v15632_v41, 0.0 }
 0x597   : > { %v16383_v33 = vunpack.i.h.bf16 %v16381_v59  ;;  %v16382_v4 = vunpack.i.l.bf16 %v16381_v59 }
 0x599   : > { %v10002_v10 = vmax.f32 %v18759_v62, %v16383_v33  ;;  %v10001_v48 = vmax.f32 %v18755_v34, %v16382_v4  ;;  %v9444_v2 = vpop.f32.mrb[140].mxu0  ;;  %v17016_v34 = vld [vmem:[%s20434_s3 + $0x48] sm:$0xff]  }
 0x59a   : > { %v15634_v60 = vadd.f32 %v15633_v11, %v9444_v2  ;;  %v9446_v36 = vpop.f32.mrb[141].mxu0  ;;  %v17017_v62 = vld [vmem:[%s20434_s3 + $0x8] sm:$0xff]   ;;  %15298 = vmatprep.subr.bf16.mxu1 %v17016_v34 }
 0x59b   : > { %v9447_v8 = vpop.f32.mrb[142].mxu0  ;;  %v10021_v52 = vpack.c.bf16 %v10002_v10, %v10001_v48  ;;  %15299 = vmatpush3.bf16.msra.mxu1 %v17017_v62 }
 0x59c   : > { %v9617_v43 = vmax.f32 %v15634_v60, 0.0  ;;  %v15636_v26 = vadd.f32 %v15635_v21, %v9447_v8  ;;  %v9449_v44 = vpop.f32.mrb[143].mxu0  ;;  %v15645_v21 = vadd.f32 %v18836_v51, %v20536_v56  ;;  %v20537_v8 = vld [vmem:[#allocation45_spill] sm:$0xff] }
 0x59d   : > { %10062 = vrot.lane.b32.xlu1 %v10021_v52, %s17431_s17  ;;  %10034 = vst.msk [vmem:[#allocation3 + $0x80] sm:$0xff] %vm9823_vm0, %v10021_v52  ;;  %v15647_v52 = vadd.f32 %v18836_v51, %v20537_v8 }
 0x59e   : > { %v18940_v6 = vmax.f32 %v9615_v23, %v9617_v43  ;;  %v9618_v40 = vmax.f32 %v15636_v26, 0.0 }
 0x5a0   : > { %v18944_v12 = vmax.f32 %v9616_v63, %v9618_v40 }
 0x5a1   : > { %v9452_v46 = vpop.f32.mrb[144].mxu0 }
 0x5a2   : > { %v15638_v61 = vadd.f32 %v15637_v37, %v9452_v46  ;;  %v9454_v13 = vpop.f32.mrb[145].mxu0  ;;  %v16419_v29 = vpack.i.bf16 %v18944_v12, %v18940_v6  ;;  %v15649_v37 = vadd.f32 %v18836_v51, %v20538_v47 }
 0x5a3   : > { %v9455_v3 = vpop.f32.mrb[146].mxu0 }
 0x5a4   : > { %v15640_v9 = vadd.f32 %v15639_v14, %v9455_v3  ;;  %v9457_v16 = vpop.f32.mrb[147].mxu0  ;;  %16420 = vrot.lane.b32.xlu0 %v16419_v29, %s17431_s17  ;;  %v9619_v4 = vmax.f32 %v15638_v61, 0.0  ;;  %v20539_v61 = vld [vmem:[#allocation47_spill] sm:$0xff] }
 0x5a5   : > { %v15651_v13 = vadd.f32 %v18836_v51, %v20539_v61  ;;  %v20543_v61 = vld [vmem:[#allocation51_spill] sm:$0xff] }
 0x5a6   : > { %v16386_v32 = vpop.permute.xlu0 %16385  ;;  %v9620_v48 = vmax.f32 %v15640_v9, 0.0 }
 0x5a7   : > { %v16388_v22 = vunpack.i.h.bf16 %v16386_v32  ;;  %v16387_v39 = vunpack.i.l.bf16 %v16386_v32 }
 0x5a9   : > { %v9798_v19 = vmax.f32 %v18774_v35, %v16388_v22  ;;  %v9797_v27 = vmax.f32 %v18770_v58, %v16387_v39  ;;  %v9460_v20 = vpop.f32.mrb[148].mxu0 }
 0x5aa   : > { %v15642_v41 = vadd.f32 %v15641_v17, %v9460_v20  ;;  %v9462_v1 = vpop.f32.mrb[149].mxu0  ;;  %v10119_v20 = vld [vmem:[#allocation4 + $0x18] sm:$0x3f] }
 0x5ab   : > { %v9463_v59 = vpop.f32.mrb[150].mxu0  ;;  %v18957_v33 = vpack.c.bf16 %v9798_v19, %v9797_v27 }
 0x5ac   : > { %v9621_v38 = vmax.f32 %v15642_v41, 0.0  ;;  %v15644_v11 = vadd.f32 %v15643_v42, %v9463_v59  ;;  %v9465_v10 = vpop.f32.mrb[151].mxu0 }
 0x5ad   : > { %9829 = vst.msk [vmem:[#allocation3 + $0x28] sm:$0xff] %vm9823_vm0, %v18957_v33  ;;  %v20540_v10 = vld [vmem:[#allocation48_spill] sm:$0xff] }
 0x5ae   : > { %v18961_v35 = vmax.f32 %v9619_v4, %v9621_v38  ;;  %v9622_v58 = vmax.f32 %v15644_v11, 0.0  ;;  %v10959_v38 = vld [vmem:[#allocation4 + $0x10] sm:$0x3f] }
 0x5af   : > { %v10057_v2 = vpop.permute.xlu0 %10056 }
 0x5b0   : > { %v18965_v60 = vmax.f32 %v9620_v48, %v9622_v58  ;;  %10091 = vst.msk [vmem:[#allocation3 + $0x68] sm:$0xff] %vm9884_vm1, %v10057_v2  ;;  %v15653_v48 = vadd.f32 %v18836_v51, %v20540_v10 }
 0x5b1   : > { %v9468_v36 = vpop.f32.mrb[152].mxu0 }
 0x5b2   : > { %v15646_v23 = vadd.f32 %v15645_v21, %v9468_v36  ;;  %v9470_v43 = vpop.f32.mrb[153].mxu0  ;;  %v16424_v26 = vpack.i.bf16 %v18965_v60, %v18961_v35  ;;  %v20541_v21 = vld [vmem:[#allocation49_spill] sm:$0xff] }
 0x5b3   : > { %v9471_v44 = vpop.f32.mrb[154].mxu0  ;;  %v9851_v34 = vpop.permute.xlu1 %9850  ;;  %v15655_v36 = vadd.f32 %v18836_v51, %v20541_v21 }
 0x5b4   : > { %v15648_v62 = vadd.f32 %v15647_v52, %v9471_v44  ;;  %9886 = vst.msk [vmem:[#allocation3 + $0x8] sm:$0xff] %vm9884_vm1, %v9851_v34  ;;  %v9473_v63 = vpop.f32.mrb[155].mxu0  ;;  %16425 = vrot.lane.b32.xlu1 %v16424_v26, %s17431_s17  ;;  %v9623_v39 = vmax.f32 %v15646_v23, 0.0 }
 0x5b6   : > { %v9624_v28 = vmax.f32 %v15648_v62, 0.0 }
 0x5b7   : > { %v16391_v40 = vpop.permute.xlu1 %16390 }
 0x5b8   : > { %v16393_v46 = vunpack.i.h.bf16 %v16391_v40  ;;  %v16392_v0 = vunpack.i.l.bf16 %v16391_v40 }
 0x5b9   : > { %v9476_v14 = vpop.f32.mrb[156].mxu0 }
 0x5ba   : > { %v10004_v29 = vmax.f32 %v18795_v25, %v16393_v46  ;;  %v10003_v3 = vmax.f32 %v18791_v30, %v16392_v0  ;;  %v15650_v9 = vadd.f32 %v15649_v37, %v9476_v14  ;;  %v9478_v16 = vpop.f32.mrb[157].mxu0  ;;  %v20542_v37 = vld [vmem:[#allocation50_spill] sm:$0xff]  ;;  %v10122_v14 = vld [vmem:[#allocation4 + $0x30] sm:$0x3f] }
 0x5bb   : > { %v10860_v32 = vld [vmem:[#allocation3 + $0x8] sm:$0x3f]  ;;  %v9479_v22 = vpop.f32.mrb[158].mxu0  ;;  %v15657_v46 = vadd.f32 %v18836_v51, %v20542_v37 }
 0x5bc   : > { %v10874_v24 = vshll.u32 %v10860_v32, 16  ;;  %v9625_v17 = vmax.f32 %v15650_v9, 0.0  ;;  %v15652_v19 = vadd.f32 %v15651_v13, %v9479_v22  ;;  %v9481_v27 = vpop.f32.mrb[159].mxu0  ;;  %v10022_v42 = vpack.c.bf16 %v10004_v29, %v10003_v3  ;;  %v10103_v41 = vld [vmem:[#allocation3 + $0x8] sm:$0x3f] }
 0x5bd   : > { %v10872_v1 = vshrl.u32 %v10860_v32, 16  ;;  %v10120_v11 = vsel %vm18893_vm4, %v10103_v41, %v10119_v20  ;;  %v15659_v13 = vadd.f32 %v18836_v51, %v20543_v61  ;;  %v10150_v16 = vld [vmem:[#allocation3 + $0x8] sm:$0x3f] }
 0x5be   : > { %v10876_v59 = vrot.slane %v10874_v24, 1  ;;  %v18980_v4 = vmax.f32 %v9623_v39, %v9625_v17  ;;  %v9626_v25 = vmax.f32 %v15652_v19, 0.0  ;;  %10064 = vrot.lane.b32.xlu0 %v10022_v42, %s17431_s17  ;;  %10035 = vst.msk [vmem:[#allocation3 + $0x88] sm:$0xff] %vm9823_vm0, %v10022_v42  ;;  %10121 = vst [vmem:[#allocation4 + $0x18] sm:$0x3f] %v10120_v11 }
 0x5bf   : > { %v9853_v30 = vpop.permute.xlu1 %9852 }
 0x5c0   : > { %v10877_v58 = vor.u32 %v10876_v59, %v10872_v1  ;;  %v18988_v2 = vmax.f32 %v9624_v28, %v9626_v25  ;;  %9887 = vst.msk [vmem:[#allocation3 + $0x10] sm:$0xff] %vm9884_vm1, %v9853_v30 }
 0x5c1   : > { %v9484_v56 = vpop.f32.mrb[160].mxu0 }
 0x5c2   : > { %v10960_v8 = vsel %vm18893_vm4, %v10877_v58, %v10959_v38  ;;  %v15654_v52 = vadd.f32 %v15653_v48, %v9484_v56  ;;  %v9486_v23 = vpop.f32.mrb[161].mxu0  ;;  %v16429_v43 = vpack.i.bf16 %v18988_v2, %v18980_v4  ;;  %v17018_v48 = vld [vmem:[%s20434_s3 + $0x50] sm:$0xff]  }
 0x5c3   : > { %10961 = vst [vmem:[#allocation4 + $0x10] sm:$0x3f] %v10960_v8  ;;  %v9487_v26 = vpop.f32.mrb[162].mxu0  ;;  %v17019_v58 = vld [vmem:[%s20434_s3 + $0x10] sm:$0xff]   ;;  %v10442_v8 = vld [vmem:[#allocation3 + $0x68] sm:$0x3f]  ;;  %15300 = vmatprep.subr.bf16.mxu1 %v17018_v48 }
 0x5c4   : > { %v15656_v44 = vadd.f32 %v15655_v36, %v9487_v26  ;;  %v9489_v34 = vpop.f32.mrb[163].mxu0  ;;  %16430 = vrot.lane.b32.xlu1 %v16429_v43, %s17431_s17  ;;  %v20544_v56 = vld [vmem:[#allocation52_spill] sm:$0xff]  ;;  %v20545_v23 = vld [vmem:[#allocation53_spill] sm:$0xff]  ;;  %15301 = vmatpush3.bf16.msra.mxu1 %v17019_v58 }
 0x5c5   : > { %v10165_v32 = vld [vmem:[#allocation4 + $0x18] sm:$0x3f]  ;;  %v15661_v21 = vadd.f32 %v18836_v51, %v20544_v56  ;;  %v15663_v43 = vadd.f32 %v18836_v51, %v20545_v23 }
 0x5c6   : > { %v16396_v62 = vpop.permute.xlu0 %16395  ;;  %v10166_v19 = vsel %vm18910_vm6, %v10150_v16, %v10165_v32  ;;  %v9628_v25 = vmax.f32 %v15656_v44, 0.0 }
 0x5c7   : > { %v10861_v63 = vld [vmem:[#allocation3 + $0x10] sm:$0x3f]  ;;  %v16398_v40 = vunpack.i.h.bf16 %v16396_v62  ;;  %v16397_v47 = vunpack.i.l.bf16 %v16396_v62  ;;  %10167 = vst [vmem:[#allocation4 + $0x18] sm:$0x3f] %v10166_v19 }
 0x5c8   : > { %v10881_v0 = vshll.u32 %v10861_v63, 16  ;;  %9858 = vrot.lane.b32.xlu1 %v18957_v33, %s17431_s17  ;;  %v10879_v22 = vshrl.u32 %v10861_v63, 16  ;;  %v10104_v27 = vld [vmem:[#allocation3 + $0x10] sm:$0x3f] }
 0x5c9   : > { %v9800_v29 = vmax.f32 %v18816_v15, %v16398_v40  ;;  %v9799_v3 = vmax.f32 %v18812_v50, %v16397_v47  ;;  %v9492_v9 = vpop.f32.mrb[164].mxu0  ;;  %v10123_v28 = vsel %vm18893_vm4, %v10104_v27, %v10122_v14  ;;  %v10962_v15 = vld [vmem:[#allocation4 + $0x28] sm:$0x3f]  ;;  %v9627_v50 = vmax.f32 %v15654_v52, 0.0  ;;  %v10151_v63 = vld [vmem:[#allocation3 + $0x10] sm:$0x3f] }
 0x5ca   : > { %v10883_v39 = vrot.slane %v10881_v0, 1  ;;  %v15658_v24 = vadd.f32 %v15657_v46, %v9492_v9  ;;  %v9494_v17 = vpop.f32.mrb[165].mxu0  ;;  %10124 = vst [vmem:[#allocation4 + $0x30] sm:$0x3f] %v10123_v28 }
 0x5cb   : > { %v9495_v33 = vpop.f32.mrb[166].mxu0  ;;  %v9817_v20 = vpack.c.bf16 %v9800_v29, %v9799_v3  ;;  %v20546_v29 = vld [vmem:[#allocation54_spill] sm:$0xff] }
 0x5cc   : > { %v10884_v42 = vor.u32 %v10883_v39, %v10879_v22  ;;  %v9629_v41 = vmax.f32 %v15658_v24, 0.0  ;;  %v15660_v1 = vadd.f32 %v15659_v13, %v9495_v33  ;;  %v9497_v59 = vpop.f32.mrb[167].mxu0  ;;  %v15665_v3 = vadd.f32 %v18836_v51, %v20546_v29  ;;  %v20547_v22 = vld [vmem:[#allocation55_spill] sm:$0xff] }
 0x5cd   : > { %9860 = vrot.lane.b32.xlu1 %v9817_v20, %s17431_s17  ;;  %9830 = vst.msk [vmem:[#allocation3 + $0x30] sm:$0xff] %vm9823_vm0, %v9817_v20  ;;  %v15667_v39 = vadd.f32 %v18836_v51, %v20547_v22 }
 0x5ce   : > { %v19012_v38 = vmax.f32 %v9627_v50, %v9629_v41  ;;  %v9630_v30 = vmax.f32 %v15660_v1, 0.0  ;;  %v10963_v11 = vsel %vm18893_vm4, %v10884_v42, %v10962_v15  ;;  %v10529_v50 = vld [vmem:[#allocation3 + $0x60] sm:$0x3f]  ;;  %v20548_v1 = vld [vmem:[#allocation56_spill] sm:$0xff] }
 0x5cf   : > { %v10059_v10 = vpop.permute.xlu0 %10058  ;;  %10964 = vst [vmem:[#allocation4 + $0x28] sm:$0x3f] %v10963_v11  ;;  %v15669_v59 = vadd.f32 %v18836_v51, %v20548_v1  ;;  %v10543_v11 = vshll.u32 %v10529_v50, 16 }
 0x5d0   : > { %v19024_v36 = vmax.f32 %v9628_v25, %v9630_v30  ;;  %10092 = vst.msk [vmem:[#allocation3 + $0x70] sm:$0xff] %vm9884_vm1, %v10059_v10  ;;  %v20549_v10 = vld [vmem:[#allocation57_spill] sm:$0xff] }
 0x5d1   : > { %v9500_v52 = vpop.f32.mrb[168].mxu0  ;;  %10465 = vrot.lane.b32.xlu1 %v10442_v8, %s17431_s17  ;;  %v10168_v40 = vld [vmem:[#allocation4 + $0x30] sm:$0x3f]  ;;  %v15671_v48 = vadd.f32 %v18836_v51, %v20549_v10  ;;  %v10530_v8 = vld [vmem:[#allocation3 + $0x68] sm:$0x3f]  ;;  %v17020_v10 = vld [vmem:[%s20434_s3 + $0x58] sm:$0xff]  }
 0x5d2   : > { %v15662_v26 = vadd.f32 %v15661_v21, %v9500_v52  ;;  %v9502_v44 = vpop.f32.mrb[169].mxu0  ;;  %v16434_v34 = vpack.i.bf16 %v19024_v36, %v19012_v38  ;;  %v10169_v46 = vsel %vm18910_vm6, %v10151_v63, %v10168_v40  ;;  %v10125_v63 = vld [vmem:[#allocation4 + $0x48] sm:$0x3f]  ;;  %15302 = vmatprep.subr.bf16.mxu1 %v17020_v10 }
 0x5d3   : > { %v9503_v62 = vpop.f32.mrb[170].mxu0  ;;  %10170 = vst [vmem:[#allocation4 + $0x30] sm:$0x3f] %v10169_v46  ;;  %v10550_v44 = vshll.u32 %v10530_v8, 16  ;;  %v10441_v46 = vld [vmem:[#allocation3 + $0x60] sm:$0x3f] }
 0x5d4   : > { %v15664_v47 = vadd.f32 %v15663_v43, %v9503_v62  ;;  %v9505_v37 = vpop.f32.mrb[171].mxu0  ;;  %16435 = vrot.lane.b32.xlu0 %v16434_v34, %s17431_s17  ;;  %v9631_v33 = vmax.f32 %v15662_v26, 0.0  ;;  %v10545_v26 = vrot.slane %v10543_v11, 1  ;;  %v19056_v34 = vld [vmem:[#allocation3] sm:$0x3f] }
 0x5d6   : > { %v16401_v0 = vpop.permute.xlu1 %16400  ;;  %v9632_v42 = vmax.f32 %v15664_v47, 0.0 }
 0x5d7   : > { %v16403_v14 = vunpack.i.h.bf16 %v16401_v0  ;;  %v16402_v61 = vunpack.i.l.bf16 %v16401_v0  ;;  %v10443_v13 = vld [vmem:[#allocation3 + $0x70] sm:$0x3f]  ;;  %v10541_v0 = vshrl.u32 %v10529_v50, 16  ;;  %v10965_v50 = vld [vmem:[#allocation4 + $0x40] sm:$0x3f] }
 0x5d8   : > { %10467 = vrot.lane.b32.xlu1 %v10443_v13, %s17431_s17  ;;  %v20551_v13 = vld [vmem:[#allocation59_spill] sm:$0xff] }
 0x5d9   : > { %v10006_v9 = vmax.f32 %v18840_v53, %v16403_v14  ;;  %v10005_v16 = vmax.f32 %v18831_v45, %v16402_v61  ;;  %v9508_v32 = vpop.f32.mrb[172].mxu0  ;;  %v20550_v14 = vld [vmem:[#allocation58_spill] sm:$0xff]  ;;  %v15675_v29 = vadd.f32 %v18836_v51, %v20551_v13 }
 0x5da   : > { %v15666_v24 = vadd.f32 %v15665_v3, %v9508_v32  ;;  %v9510_v17 = vpop.f32.mrb[173].mxu0  ;;  %v15673_v61 = vadd.f32 %v18836_v51, %v20550_v14 }
 0x5db   : > { %v9511_v19 = vpop.f32.mrb[174].mxu0  ;;  %v10023_v27 = vpack.c.bf16 %v10006_v9, %v10005_v16  ;;  %v10209_v9 = vshll.u32 %v19056_v34, 16 }
 0x5dc   : > { %v9633_v20 = vmax.f32 %v15666_v24, 0.0  ;;  %v15668_v28 = vadd.f32 %v15667_v39, %v9511_v19  ;;  %v9513_v15 = vpop.f32.mrb[175].mxu0  ;;  %v10546_v39 = vor.u32 %v10545_v26, %v10541_v0  ;;  %v10552_v24 = vrot.slane %v10550_v44, 1  ;;  %v20552_v26 = vld [vmem:[#allocation60_spill] sm:$0xff] }
 0x5dd   : > { %10066 = vrot.lane.b32.xlu0 %v10023_v27, %s17431_s17  ;;  %10036 = vst.msk [vmem:[#allocation3 + $0x90] sm:$0xff] %vm9823_vm0, %v10023_v27  ;;  %v10211_v11 = vrot.slane %v10209_v9, 1  ;;  %v15677_v44 = vadd.f32 %v18836_v51, %v20552_v26 }
 0x5de   : > { %v19044_v53 = vmax.f32 %v9631_v33, %v9633_v20  ;;  %v9634_v45 = vmax.f32 %v15668_v28, 0.0 }
 0x5df   : > { %v9855_v41 = vpop.permute.xlu0 %9854 }
 0x5e0   : > { %v19048_v25 = vmax.f32 %v9632_v42, %v9634_v45  ;;  %9888 = vst.msk [vmem:[#allocation3 + $0x18] sm:$0xff] %vm9884_vm1, %v9855_v41  ;;  %v10548_v45 = vshrl.u32 %v10530_v8, 16  ;;  %v17021_v8 = vld [vmem:[%s20434_s3 + $0x18] sm:$0xff]  }
 0x5e1   : > { %v9516_v30 = vpop.f32.mrb[176].mxu0  ;;  %15303 = vmatpush3.bf16.msra.mxu1 %v17021_v8  ;;  %v10772_v8 = vld [vmem:[#allocation3 + $0x8] sm:$0x3f] }
 0x5e2   : > { %v15670_v58 = vadd.f32 %v15669_v59, %v9516_v30  ;;  %v9518_v56 = vpop.f32.mrb[177].mxu0  ;;  %v16439_v21 = vpack.i.bf16 %v19048_v25, %v19044_v53  ;;  %v10553_v30 = vor.u32 %v10552_v24, %v10548_v45 }
 0x5e3   : > { %v9519_v52 = vpop.f32.mrb[178].mxu0 }
 0x5e4   : > { %v15672_v23 = vadd.f32 %v15671_v48, %v9519_v52  ;;  %v9521_v43 = vpop.f32.mrb[179].mxu0  ;;  %16440 = vrot.lane.b32.xlu0 %v16439_v21, %s17431_s17  ;;  %v10531_v21 = vld [vmem:[#allocation3 + $0x70] sm:$0x3f] }
 0x5e5   : > { %v10555_v45 = vshrl.u32 %v10531_v21, 16 }
 0x5e6   : > { %v16406_v62 = vpop.permute.xlu1 %16405  ;;  %v9636_v48 = vmax.f32 %v15672_v23, 0.0  ;;  %v10207_v23 = vshrl.u32 %v19056_v34, 16  ;;  %v17023_v34 = vld [vmem:[%s20434_s3 + $0x20] sm:$0xff]  }
 0x5e7   : > { %v10862_v40 = vld [vmem:[#allocation3 + $0x18] sm:$0x3f]  ;;  %v16408_v47 = vunpack.i.h.bf16 %v16406_v62  ;;  %v16407_v37 = vunpack.i.l.bf16 %v16406_v62 }
 0x5e8   : > { %v10888_v3 = vshll.u32 %v10862_v40, 16  ;;  %10463 = vrot.lane.b32.xlu0 %v10441_v46, %s17431_s17  ;;  %v10105_v17 = vld [vmem:[#allocation3 + $0x18] sm:$0x3f]  ;;  %v10886_v19 = vshrl.u32 %v10862_v40, 16  ;;  %v10557_v40 = vshll.u32 %v10531_v21, 16  ;;  %v20553_v46 = vld [vmem:[#allocation61_spill] sm:$0xff] }
 0x5e9   : > { %v9802_v16 = vmax.f32 %v18859_v18, %v16408_v47  ;;  %v9801_v32 = vmax.f32 %v18855_v5, %v16407_v37  ;;  %v9524_v22 = vpop.f32.mrb[180].mxu0  ;;  %v10126_v28 = vsel %vm18893_vm4, %v10105_v17, %v10125_v63  ;;  %v9635_v18 = vmax.f32 %v15670_v58, 0.0  ;;  %v10196_v47 = vld [vmem:[#allocation3 + $0x8] sm:$0x3f]  ;;  %v17022_v37 = vld [vmem:[%s20434_s3 + $0x60] sm:$0xff]  }
 0x5ea   : > { %v10890_v27 = vrot.slane %v10888_v3, 1  ;;  %v15674_v33 = vadd.f32 %v15673_v61, %v9524_v22  ;;  %v9526_v20 = vpop.f32.mrb[181].mxu0  ;;  %10127 = vst [vmem:[#allocation4 + $0x48] sm:$0x3f] %v10126_v28  ;;  %v15679_v0 = vadd.f32 %v18836_v51, %v20553_v46  ;;  %v10152_v3 = vld [vmem:[#allocation3 + $0x18] sm:$0x3f]  ;;  %15304 = vmatprep.subr.bf16.mxu1 %v17022_v37 }
 0x5eb   : > { %v9527_v15 = vpop.f32.mrb[182].mxu0  ;;  %v9818_v42 = vpack.c.bf16 %v9802_v16, %v9801_v32  ;;  %v10216_v24 = vshll.u32 %v10196_v47, 16  ;;  %15305 = vmatpush3.bf16.msra.mxu1 %v17023_v34  ;;  %v10684_v20 = vld [vmem:[#allocation3 + $0x8] sm:$0x3f]  ;;  %v10685_v28 = vld [vmem:[#allocation3 + $0x10] sm:$0x3f] }
 0x5ec   : > { %v10891_v41 = vor.u32 %v10890_v27, %v10886_v19  ;;  %v9637_v1 = vmax.f32 %v15674_v33, 0.0  ;;  %v15676_v5 = vadd.f32 %v15675_v29, %v9527_v15  ;;  %v9529_v59 = vpop.f32.mrb[183].mxu0  ;;  %10617 = vrot.lane.b32.xlu0 %v10546_v39, %s17432_s24  ;;  %v10212_v29 = vor.u32 %v10211_v11, %v10207_v23  ;;  %v20554_v15 = vld [vmem:[#allocation62_spill] sm:$0xff]  ;;  %v20555_v11 = vld [vmem:[#allocation63_spill] sm:$0xff] }
 0x5ed   : > { %9862 = vrot.lane.b32.xlu1 %v9818_v42, %s17431_s17  ;;  %9831 = vst.msk [vmem:[#allocation3 + $0x38] sm:$0xff] %vm9823_vm0, %v9818_v42  ;;  %v10559_v19 = vrot.slane %v10557_v40, 1  ;;  %v15681_v42 = vadd.f32 %v18836_v51, %v20554_v15  ;;  %v10218_v59 = vrot.slane %v10216_v24, 1  ;;  %v15683_v10 = vadd.f32 %v18836_v51, %v20555_v11  ;;  %v10197_v11 = vld [vmem:[#allocation3 + $0x10] sm:$0x3f] }
 0x5ee   : > { %v19074_v56 = vmax.f32 %v9635_v18, %v9637_v1  ;;  %v9638_v58 = vmax.f32 %v15676_v5, 0.0  ;;  %v10966_v52 = vsel %vm18893_vm4, %v10891_v41, %v10965_v50  ;;  %v17024_v50 = vld [vmem:[%s20434_s3 + $0x68] sm:$0xff]  }
 0x5ef   : > { %v10061_v43 = vpop.permute.xlu0 %10060  ;;  %10967 = vst [vmem:[#allocation4 + $0x40] sm:$0x3f] %v10966_v52  ;;  %v17025_v41 = vld [vmem:[%s20434_s3 + $0x28] sm:$0xff]   ;;  %v10560_v21 = vor.u32 %v10559_v19, %v10555_v45  ;;  %15306 = vmatprep.subr.bf16.mxu1 %v17024_v50  ;;  %v10686_v19 = vld [vmem:[#allocation3 + $0x18] sm:$0x3f] }
 0x5f0   : > { %v19083_v62 = vmax.f32 %v9636_v48, %v9638_v58  ;;  %10093 = vst.msk [vmem:[#allocation3 + $0x78] sm:$0xff] %vm9884_vm1, %v10061_v43  ;;  %10619 = vrot.lane.b32.xlu0 %v10553_v30, %s17432_s24  ;;  %v17026_v30 = vld [vmem:[%s20434_s3 + $0x70] sm:$0xff]   ;;  %v10214_v43 = vshrl.u32 %v10196_v47, 16  ;;  %15307 = vmatpush3.bf16.msra.mxu1 %v17025_v41  ;;  %v17028_v47 = vld [vmem:[%s20434_s3 + $0x78] sm:$0xff]  }
 0x5f1   : > { %v9532_v63 = vpop.f32.mrb[184].mxu0  ;;  %v10171_v9 = vld [vmem:[#allocation4 + $0x48] sm:$0x3f]  ;;  %15308 = vmatprep.subr.bf16.mxu1 %v17026_v30 }
 0x5f2   : > { %v15678_v14 = vadd.f32 %v15677_v44, %v9532_v63  ;;  %v9534_v61 = vpop.f32.mrb[185].mxu0  ;;  %v16444_v13 = vpack.i.bf16 %v19083_v62, %v19074_v56  ;;  %v10172_v32 = vsel %vm18910_vm6, %v10152_v3, %v10171_v9  ;;  %v10219_v51 = vor.u32 %v10218_v59, %v10214_v43  ;;  %v10351_v9 = vld [vmem:[#allocation3 + $0x60] sm:$0x3f] }
 0x5f3   : > { %v9535_v16 = vpop.f32.mrb[186].mxu0  ;;  %10173 = vst [vmem:[#allocation4 + $0x48] sm:$0x3f] %v10172_v32 }
 0x5f4   : > { %v15680_v22 = vadd.f32 %v15679_v0, %v9535_v16  ;;  %v9537_v39 = vpop.f32.mrb[187].mxu0  ;;  %16445 = vrot.lane.b32.xlu1 %v16444_v13, %s17431_s17  ;;  %10283 = vrot.lane.b32.xlu0 %v10212_v29, %s17433_s22  ;;  %v9639_v44 = vmax.f32 %v15678_v14, 0.0  ;;  %v17029_v29 = vld [vmem:[%s20434_s3 + $0x38] sm:$0xff]  }
 0x5f6   : > { %v16411_v17 = vpop.permute.xlu1 %16410  ;;  %v9640_v37 = vmax.f32 %v15680_v22, 0.0 }
 0x5f7   : > { %v16413_v27 = vunpack.i.h.bf16 %v16411_v17  ;;  %v16412_v33 = vunpack.i.l.bf16 %v16411_v17  ;;  %v10444_v13 = vld [vmem:[#allocation3 + $0x78] sm:$0x3f] }
 0x5f8   : > { %10706 = vrot.lane.b32.xlu1 %v10684_v20, %s17433_s22  ;;  %10708 = vrot.lane.b32.xlu0 %v10685_v28, %s17433_s22 }
 0x5f9   : > { %v10008_v18 = vmax.f32 %v18884_v49, %v16413_v27  ;;  %v10007_v1 = vmax.f32 %v18874_v31, %v16412_v33  ;;  %v9540_v5 = vpop.f32.mrb[188].mxu0  ;;  %v10532_v49 = vld [vmem:[#allocation3 + $0x78] sm:$0x3f]  ;;  %v17027_v31 = vld [vmem:[%s20434_s3 + $0x30] sm:$0xff]   ;;  %v10128_v27 = vld [vmem:[#allocation4 + $0x60] sm:$0x3f] }
 0x5fa   : > { %v15682_v48 = vadd.f32 %v15681_v42, %v9540_v5  ;;  %v9542_v58 = vpop.f32.mrb[189].mxu0  ;;  %v10564_v14 = vshll.u32 %v10532_v49, 16  ;;  %15309 = vmatpush3.bf16.msra.mxu1 %v17027_v31  ;;  %v10562_v16 = vshrl.u32 %v10532_v49, 16 }
 0x5fb   : > { %v9543_v52 = vpop.f32.mrb[190].mxu0  ;;  %v10024_v26 = vpack.c.bf16 %v10008_v18, %v10007_v1  ;;  %15310 = vmatprep.subr.bf16.mxu1 %v17028_v47  ;;  %v10968_v18 = vld [vmem:[#allocation4 + $0x58] sm:$0x3f]  ;;  %v10352_v47 = vld [vmem:[#allocation3 + $0x68] sm:$0x3f] }
 0x5fc   : > { %v9641_v23 = vmax.f32 %v15682_v48, 0.0  ;;  %v15684_v63 = vadd.f32 %v15683_v10, %v9543_v52  ;;  %v9545_v40 = vpop.f32.mrb[191].mxu0  ;;  %10621 = vrot.lane.b32.xlu1 %v10560_v21, %s17432_s24  ;;  %10794 = vrot.lane.b32.xlu0 %v10772_v8, %s17433_s22  ;;  %v10566_v3 = vrot.slane %v10564_v14, 1  ;;  %v10223_v8 = vshll.u32 %v10197_v11, 16 }
 0x5fd   : > { %10037 = vst.msk [vmem:[#allocation3 + $0x98] sm:$0xff] %vm9823_vm0, %v10024_v26 }
 0x5fe   : > { %v19128_v46 = vmax.f32 %v9639_v44, %v9641_v23  ;;  %v9642_v0 = vmax.f32 %v15684_v63, 0.0  ;;  %15311 = vmatpush3.bf16.msra.mxu1 %v17029_v29  ;;  %v10567_v22 = vor.u32 %v10566_v3, %v10562_v16  ;;  %v10225_v31 = vrot.slane %v10223_v8, 1 }
 0x5ff   : > { %v9857_v61 = vpop.permute.xlu1 %9856  ;;  %v10221_v23 = vshrl.u32 %v10197_v11, 16 }
 0x600   : > { %v19133_v34 = vmax.f32 %v9640_v37, %v9642_v0  ;;  %9889 = vst.msk [vmem:[#allocation3 + $0x20] sm:$0xff] %vm9884_vm1, %v9857_v61  ;;  %10285 = vrot.lane.b32.xlu1 %v10219_v51, %s17433_s22  ;;  %10469 = vrot.lane.b32.xlu0 %v10444_v13, %s17431_s17 }
 0x601   : > { %v10226_v63 = vor.u32 %v10225_v31, %v10221_v23  ;;  %v10134_v23 = vld [vmem:[#allocation4 + $0x90] sm:$0x3f] }
 0x604   : > { %10373 = vrot.lane.b32.xlu1 %v10351_v9, %s17431_s17  ;;  %10068 = vrot.lane.b32.xlu0 %v10024_v26, %s17431_s17  ;;  %v10773_v26 = vld [vmem:[#allocation3 + $0x10] sm:$0x3f] }
 0x606   : > { %v16416_v32 = vpop.permute.xlu0 %16415 }
 0x607   : > { %v10863_v39 = vld [vmem:[#allocation3 + $0x20] sm:$0x3f]  ;;  %v16418_v24 = vunpack.i.h.bf16 %v16416_v32  ;;  %v16417_v17 = vunpack.i.l.bf16 %v16416_v32 }
 0x608   : > { %v10895_v33 = vshll.u32 %v10863_v39, 16  ;;  %10710 = vrot.lane.b32.xlu1 %v10686_v19, %s17433_s22  ;;  %10623 = vrot.lane.b32.xlu0 %v10567_v22, %s17432_s24  ;;  %v10106_v15 = vld [vmem:[#allocation3 + $0x20] sm:$0x3f]  ;;  %v10893_v42 = vshrl.u32 %v10863_v39, 16 }
 0x609   : > { %v9804_v20 = vmax.f32 %v18916_v7, %v16418_v24  ;;  %v9803_v28 = vmax.f32 %v18907_v57, %v16417_v17  ;;  %v10129_v50 = vsel %vm18893_vm4, %v10106_v15, %v10128_v27  ;;  %v10153_v57 = vld [vmem:[#allocation3 + $0x20] sm:$0x3f]  ;;  %v10353_v24 = vld [vmem:[#allocation3 + $0x70] sm:$0x3f] }
 0x60a   : > { %v10897_v45 = vrot.slane %v10895_v33, 1  ;;  %10130 = vst [vmem:[#allocation4 + $0x60] sm:$0x3f] %v10129_v50  ;;  %v10199_v19 = vld [vmem:[#allocation3 + $0x20] sm:$0x3f] }
 0x60b   : > { %v9819_v41 = vpack.c.bf16 %v9804_v20, %v9803_v28 }
 0x60c   : > { %v10898_v1 = vor.u32 %v10897_v45, %v10893_v42  ;;  %v10237_v45 = vshll.u32 %v10199_v19, 16 }
 0x60d   : > { %9864 = vrot.lane.b32.xlu0 %v9819_v41, %s17431_s17  ;;  %9832 = vst.msk [vmem:[#allocation3 + $0x40] sm:$0xff] %vm9823_vm0, %v9819_v41 }
 0x60e   : > { %v10969_v5 = vsel %vm18893_vm4, %v10898_v1, %v10968_v18 }
 0x60f   : > { %v10063_v7 = vpop.permute.xlu1 %10062  ;;  %10970 = vst [vmem:[#allocation4 + $0x58] sm:$0x3f] %v10969_v5 }
 0x610   : > { %10094 = vst.msk [vmem:[#allocation3 + $0x80] sm:$0xff] %vm9884_vm1, %v10063_v7  ;;  %v10499_v7 = vld [vmem:[#allocation4 + $0x20] sm:$0x3f] }
 0x611   : > { %v10174_v59 = vld [vmem:[#allocation4 + $0x60] sm:$0x3f] }
 0x612   : > { %v10175_v30 = vsel %vm18910_vm6, %v10153_v57, %v10174_v59  ;;  %v10131_v57 = vld [vmem:[#allocation4 + $0x78] sm:$0x3f] }
 0x613   : > { %10176 = vst [vmem:[#allocation4 + $0x60] sm:$0x3f] %v10175_v30 }
 0x616   : > { %v16421_v10 = vpop.permute.xlu0 %16420 }
 0x617   : > { %v16423_v48 = vunpack.i.h.bf16 %v16421_v10  ;;  %v16422_v58 = vunpack.i.l.bf16 %v16421_v10  ;;  %v10445_v21 = vld [vmem:[#allocation3 + $0x80] sm:$0x3f] }
 0x618   : > { %10471 = vrot.lane.b32.xlu1 %v10445_v21, %s17431_s17  ;;  %v10533_v44 = vld [vmem:[#allocation3 + $0x80] sm:$0x3f] }
 0x619   : > { %v10010_v52 = vmax.f32 %v18944_v12, %v16423_v48  ;;  %v10009_v43 = vmax.f32 %v18940_v6, %v16422_v58  ;;  %v10571_v40 = vshll.u32 %v10533_v44, 16  ;;  %v10198_v12 = vld [vmem:[#allocation3 + $0x18] sm:$0x3f]  ;;  %v10569_v6 = vshrl.u32 %v10533_v44, 16 }
 0x61a   : > { %v10230_v13 = vshll.u32 %v10198_v12, 16  ;;  %v10228_v32 = vshrl.u32 %v10198_v12, 16 }
 0x61b   : > { %v10025_v49 = vpack.c.bf16 %v10010_v52, %v10009_v43  ;;  %v10573_v51 = vrot.slane %v10571_v40, 1 }
 0x61c   : > { %10796 = vrot.lane.b32.xlu1 %v10773_v26, %s17433_s22  ;;  %v10232_v16 = vrot.slane %v10230_v13, 1 }
 0x61d   : > { %10070 = vrot.lane.b32.xlu0 %v10025_v49, %s17431_s17  ;;  %10038 = vst.msk [vmem:[#allocation3 + $0xa0] sm:$0xff] %vm9823_vm0, %v10025_v49  ;;  %v10574_v61 = vor.u32 %v10573_v51, %v10569_v6  ;;  %v10502_v51 = vld [vmem:[#allocation4 + $0x38] sm:$0x3f] }
 0x61e   : > { %v10233_v22 = vor.u32 %v10232_v16, %v10228_v32 }
 0x621   : > { %10287 = vrot.lane.b32.xlu0 %v10226_v63, %s17433_s22  ;;  %v10971_v63 = vld [vmem:[#allocation4 + $0x70] sm:$0x3f] }
 0x625   : > { %10375 = vrot.lane.b32.xlu0 %v10352_v47, %s17431_s17 }
 0x626   : > { %v16426_v37 = vpop.permute.xlu1 %16425 }
 0x627   : > { %v16428_v0 = vunpack.i.h.bf16 %v16426_v37  ;;  %v16427_v14 = vunpack.i.l.bf16 %v16426_v37 }
 0x629   : > { %v9806_v29 = vmax.f32 %v18965_v60, %v16428_v0  ;;  %v9805_v3 = vmax.f32 %v18961_v35, %v16427_v14  ;;  %10625 = vrot.lane.b32.xlu0 %v10574_v61, %s17432_s24 }
 0x62b   : > { %v9820_v9 = vpack.c.bf16 %v9806_v29, %v9805_v3  ;;  %v10974_v29 = vld [vmem:[#allocation4 + $0x88] sm:$0x3f] }
 0x62d   : > { %9866 = vrot.lane.b32.xlu0 %v9820_v9, %s17431_s17  ;;  %9833 = vst.msk [vmem:[#allocation3 + $0x48] sm:$0xff] %vm9823_vm0, %v9820_v9 }
 0x630   : > { %v10065_v39 = vpop.permute.xlu0 %10064 }
 0x631   : > { %10289 = vrot.lane.b32.xlu0 %v10233_v22, %s17433_s22  ;;  %10095 = vst.msk [vmem:[#allocation3 + $0x88] sm:$0xff] %vm9884_vm1, %v10065_v39 }
 0x635   : > { %10377 = vrot.lane.b32.xlu0 %v10353_v24, %s17431_s17 }
 0x636   : > { %v16431_v60 = vpop.permute.xlu1 %16430 }
 0x637   : > { %v16433_v35 = vunpack.i.h.bf16 %v16431_v60  ;;  %v16432_v17 = vunpack.i.l.bf16 %v16431_v60 }
 0x638   : > { %v10446_v20 = vld [vmem:[#allocation3 + $0x88] sm:$0x3f] }
 0x639   : > { %v10012_v27 = vmax.f32 %v18988_v2, %v16433_v35  ;;  %v10011_v33 = vmax.f32 %v18980_v4, %v16432_v17  ;;  %v10534_v28 = vld [vmem:[#allocation3 + $0x88] sm:$0x3f]  ;;  %10473 = vrot.lane.b32.xlu1 %v10446_v20, %s17431_s17  ;;  %v10239_v2 = vrot.slane %v10237_v45, 1  ;;  %v10235_v4 = vshrl.u32 %v10199_v19, 16 }
 0x63a   : > { %v9859_v15 = vpop.permute.xlu1 %9858  ;;  %v10578_v42 = vshll.u32 %v10534_v28, 16  ;;  %v10576_v41 = vshrl.u32 %v10534_v28, 16 }
 0x63b   : > { %9890 = vst.msk [vmem:[#allocation3 + $0x28] sm:$0xff] %vm9884_vm1, %v9859_v15  ;;  %v10026_v50 = vpack.c.bf16 %v10012_v27, %v10011_v33  ;;  %v10240_v30 = vor.u32 %v10239_v2, %v10235_v4  ;;  %v10496_v33 = vld [vmem:[#allocation4 + $0x8] sm:$0x3f]  ;;  %v10774_v4 = vld [vmem:[#allocation3 + $0x18] sm:$0x3f] }
 0x63c   : > { %v10580_v18 = vrot.slane %v10578_v42, 1 }
 0x63d   : > { %10039 = vst.msk [vmem:[#allocation3 + $0xa8] sm:$0xff] %vm9823_vm0, %v10026_v50  ;;  %10072 = vrot.lane.b32.xlu1 %v10026_v50, %s17431_s17 }
 0x63e   : > { %v10581_v1 = vor.u32 %v10580_v18, %v10576_v41  ;;  %v10687_v18 = vld [vmem:[#allocation3 + $0x20] sm:$0x3f] }
 0x63f   : > { %v9861_v5 = vpop.permute.xlu1 %9860 }
 0x640   : > { %9891 = vst.msk [vmem:[#allocation3 + $0x30] sm:$0xff] %vm9884_vm1, %v9861_v5  ;;  %10627 = vrot.lane.b32.xlu0 %v10581_v1, %s17432_s24 }
 0x642   : > { %v10864_v59 = vld [vmem:[#allocation3 + $0x28] sm:$0x3f] }
 0x643   : > { %v10902_v11 = vshll.u32 %v10864_v59, 16  ;;  %v10466_v10 = vpop.permute.xlu1 %10465  ;;  %v10107_v48 = vld [vmem:[#allocation3 + $0x28] sm:$0x3f]  ;;  %v10900_v8 = vshrl.u32 %v10864_v59, 16 }
 0x644   : > { %v10500_v58 = vsel %vm18893_vm4, %v10466_v10, %v10499_v7  ;;  %10291 = vrot.lane.b32.xlu0 %v10240_v30, %s17433_s22  ;;  %v10132_v21 = vsel %vm18893_vm4, %v10107_v48, %v10131_v57  ;;  %v10318_v30 = vld [vmem:[#allocation4] sm:$0x3f] }
 0x645   : > { %v10904_v52 = vrot.slane %v10902_v11, 1  ;;  %10501 = vst [vmem:[#allocation4 + $0x20] sm:$0x3f] %v10500_v58  ;;  %10133 = vst [vmem:[#allocation4 + $0x78] sm:$0x3f] %v10132_v21 }
 0x646   : > { %v16436_v43 = vpop.permute.xlu0 %16435 }
 0x647   : > { %v10905_v26 = vor.u32 %v10904_v52, %v10900_v8  ;;  %v10865_v49 = vld [vmem:[#allocation3 + $0x30] sm:$0x3f]  ;;  %v16438_v31 = vunpack.i.h.bf16 %v16436_v43  ;;  %v16437_v44 = vunpack.i.l.bf16 %v16436_v43  ;;  %v10137_v8 = vld [vmem:[#allocation4 + $0xa8] sm:$0x3f] }
 0x648   : > { %v10909_v40 = vshll.u32 %v10865_v49, 16  ;;  %v10108_v47 = vld [vmem:[#allocation3 + $0x30] sm:$0x3f]  ;;  %v10907_v37 = vshrl.u32 %v10865_v49, 16 }
 0x649   : > { %v9808_v12 = vmax.f32 %v19024_v36, %v16438_v31  ;;  %v9807_v6 = vmax.f32 %v19012_v38, %v16437_v44  ;;  %v10135_v61 = vsel %vm18893_vm4, %v10108_v47, %v10134_v23  ;;  %v10972_v13 = vsel %vm18893_vm4, %v10905_v26, %v10971_v63  ;;  %v10154_v36 = vld [vmem:[#allocation3 + $0x28] sm:$0x3f]  ;;  %v10155_v24 = vld [vmem:[#allocation3 + $0x30] sm:$0x3f]  ;;  %v10977_v44 = vld [vmem:[#allocation4 + $0xa0] sm:$0x3f] }
 0x64a   : > { %v10911_v0 = vrot.slane %v10909_v40, 1  ;;  %v10468_v14 = vpop.permute.xlu1 %10467  ;;  %10136 = vst [vmem:[#allocation4 + $0x90] sm:$0x3f] %v10135_v61  ;;  %10973 = vst [vmem:[#allocation4 + $0x70] sm:$0x3f] %v10972_v13 }
 0x64b   : > { %v10503_v3 = vsel %vm18893_vm4, %v10468_v14, %v10502_v51  ;;  %v9821_v9 = vpack.c.bf16 %v9808_v12, %v9807_v6 }
 0x64c   : > { %v10912_v16 = vor.u32 %v10911_v0, %v10907_v37  ;;  %10504 = vst [vmem:[#allocation4 + $0x38] sm:$0x3f] %v10503_v3  ;;  %v10177_v38 = vld [vmem:[#allocation4 + $0x78] sm:$0x3f]  ;;  %v10200_v0 = vld [vmem:[#allocation3 + $0x28] sm:$0x3f] }
 0x64d   : > { %9868 = vrot.lane.b32.xlu1 %v9821_v9, %s17431_s17  ;;  %9834 = vst.msk [vmem:[#allocation3 + $0x50] sm:$0xff] %vm9823_vm0, %v9821_v9  ;;  %v10178_v32 = vsel %vm18910_vm6, %v10154_v36, %v10177_v38  ;;  %v10244_v36 = vshll.u32 %v10200_v0, 16 }
 0x64e   : > { %v10975_v22 = vsel %vm18893_vm4, %v10912_v16, %v10974_v29  ;;  %10179 = vst [vmem:[#allocation4 + $0x78] sm:$0x3f] %v10178_v32 }
 0x64f   : > { %10976 = vst [vmem:[#allocation4 + $0x88] sm:$0x3f] %v10975_v22  ;;  %v10067_v39 = vpop.permute.xlu0 %10066  ;;  %v10775_v22 = vld [vmem:[#allocation3 + $0x20] sm:$0x3f] }
 0x650   : > { %10096 = vst.msk [vmem:[#allocation3 + $0x90] sm:$0xff] %vm9884_vm1, %v10067_v39  ;;  %v10354_v39 = vld [vmem:[#allocation3 + $0x78] sm:$0x3f] }
 0x651   : > { %v10180_v60 = vld [vmem:[#allocation4 + $0x90] sm:$0x3f] }
 0x652   : > { %v10181_v35 = vsel %vm18910_vm6, %v10155_v24, %v10180_v60  ;;  %v10505_v24 = vld [vmem:[#allocation4 + $0x50] sm:$0x3f]  ;;  %v10321_v60 = vld [vmem:[#allocation4 + $0x18] sm:$0x3f] }
 0x653   : > { %10182 = vst [vmem:[#allocation4 + $0x90] sm:$0x3f] %v10181_v35  ;;  %v10656_v3 = vld [vmem:[#allocation4 + $0x38] sm:$0x3f] }
 0x656   : > { %v16441_v17 = vpop.permute.xlu0 %16440 }
 0x657   : > { %v16443_v19 = vunpack.i.h.bf16 %v16441_v17  ;;  %v16442_v27 = vunpack.i.l.bf16 %v16441_v17  ;;  %v10447_v21 = vld [vmem:[#allocation3 + $0x90] sm:$0x3f] }
 0x658   : > { %v10535_v43 = vld [vmem:[#allocation3 + $0x90] sm:$0x3f] }
 0x659   : > { %v10014_v20 = vmax.f32 %v19048_v25, %v16443_v19  ;;  %v10013_v28 = vmax.f32 %v19044_v53, %v16442_v27  ;;  %v10653_v53 = vld [vmem:[#allocation4 + $0x20] sm:$0x3f]  ;;  %v10585_v37 = vshll.u32 %v10535_v43, 16  ;;  %v10583_v35 = vshrl.u32 %v10535_v43, 16 }
 0x65a   : > { %v10464_v15 = vpop.permute.xlu0 %10463  ;;  %v10246_v27 = vrot.slane %v10244_v36, 1  ;;  %v10508_v36 = vld [vmem:[#allocation4 + $0x68] sm:$0x3f] }
 0x65b   : > { %v10497_v42 = vsel %vm18893_vm4, %v10464_v15, %v10496_v33  ;;  %v10027_v45 = vpack.c.bf16 %v10014_v20, %v10013_v28  ;;  %v10587_v32 = vrot.slane %v10585_v37, 1 }
 0x65c   : > { %10498 = vst [vmem:[#allocation4 + $0x8] sm:$0x3f] %v10497_v42 }
 0x65d   : > { %10074 = vrot.lane.b32.xlu1 %v10027_v45, %s17431_s17  ;;  %10040 = vst.msk [vmem:[#allocation3 + $0xb0] sm:$0xff] %vm9823_vm0, %v10027_v45  ;;  %v10588_v45 = vor.u32 %v10587_v32, %v10583_v35  ;;  %v10980_v35 = vld [vmem:[#allocation4 + $0xb8] sm:$0x3f] }
 0x65e   : > { %v10618_v50 = vpop.permute.xlu0 %10617 }
 0x65f   : > { %v9863_v41 = vpop.permute.xlu1 %9862 }
 0x660   : > { %9892 = vst.msk [vmem:[#allocation3 + $0x38] sm:$0xff] %vm9884_vm1, %v9863_v41  ;;  %v10689_v41 = vld [vmem:[#allocation3 + $0x30] sm:$0x3f] }
 0x661   : > { %10712 = vrot.lane.b32.xlu1 %v10687_v18, %s17433_s22  ;;  %v10201_v18 = vld [vmem:[#allocation3 + $0x30] sm:$0x3f] }
 0x662   : > { %v10620_v25 = vpop.permute.xlu0 %10619 }
 0x663   : > { %v10650_v1 = vld [vmem:[#allocation4 + $0x8] sm:$0x3f]  ;;  %v10654_v2 = vsel %vm18910_vm6, %v10620_v25, %v10653_v53  ;;  %v10242_v53 = vshrl.u32 %v10200_v0, 16 }
 0x664   : > { %v10651_v5 = vsel %vm18910_vm6, %v10618_v50, %v10650_v1  ;;  %10655 = vst [vmem:[#allocation4 + $0x20] sm:$0x3f] %v10654_v2 }
 0x665   : > { %10652 = vst [vmem:[#allocation4 + $0x8] sm:$0x3f] %v10651_v5  ;;  %10798 = vrot.lane.b32.xlu1 %v10774_v4, %s17433_s22 }
 0x666   : > { %v16446_v57 = vpop.permute.xlu1 %16445  ;;  %v10284_v59 = vpop.permute.xlu0 %10283 }
 0x667   : > { %v10866_v11 = vld [vmem:[#allocation3 + $0x38] sm:$0x3f]  ;;  %v16448_v10 = vunpack.i.h.bf16 %v16446_v57  ;;  %v16447_v48 = vunpack.i.l.bf16 %v16446_v57  ;;  %v10319_v58 = vsel %vm19212_vm8, %v10284_v59, %v10318_v30  ;;  %v10247_v59 = vor.u32 %v10246_v27, %v10242_v53  ;;  %v10324_v53 = vld [vmem:[#allocation4 + $0x30] sm:$0x3f] }
 0x668   : > { %v10916_v52 = vshll.u32 %v10866_v11, 16  ;;  %10320 = vst [vmem:[#allocation4] sm:$0x3f] %v10319_v58  ;;  %v10109_v26 = vld [vmem:[#allocation3 + $0x38] sm:$0x3f]  ;;  %v10914_v23 = vshrl.u32 %v10866_v11, 16 }
 0x669   : > { %v9810_v49 = vmax.f32 %v19083_v62, %v16448_v10  ;;  %v9809_v31 = vmax.f32 %v19074_v56, %v16447_v48  ;;  %10475 = vrot.lane.b32.xlu1 %v10447_v21, %s17431_s17  ;;  %v10138_v47 = vsel %vm18893_vm4, %v10109_v26, %v10137_v8  ;;  %v10688_v62 = vld [vmem:[#allocation3 + $0x28] sm:$0x3f]  ;;  %v10156_v33 = vld [vmem:[#allocation3 + $0x38] sm:$0x3f]  ;;  %v10251_v30 = vshll.u32 %v10201_v18, 16 }
 0x66a   : > { %v10918_v63 = vrot.slane %v10916_v52, 1  ;;  %v10707_v40 = vpop.permute.xlu1 %10706  ;;  %v10709_v51 = vpop.permute.xlu0 %10708  ;;  %10139 = vst [vmem:[#allocation4 + $0xa8] sm:$0x3f] %v10138_v47  ;;  %v10776_v11 = vld [vmem:[#allocation3 + $0x28] sm:$0x3f] }
 0x66b   : > { %v10742_v12 = vld [vmem:[#allocation4 + $0x20] sm:$0x3f]  ;;  %v9822_v6 = vpack.c.bf16 %v9810_v49, %v9809_v31  ;;  %v10253_v52 = vrot.slane %v10251_v30, 1  ;;  %v10690_v26 = vld [vmem:[#allocation3 + $0x38] sm:$0x3f] }
 0x66c   : > { %v10919_v14 = vor.u32 %v10918_v63, %v10914_v23  ;;  %v10739_v61 = vld [vmem:[#allocation4 + $0x8] sm:$0x3f]  ;;  %v10743_v56 = vsel %vm19212_vm8, %v10709_v51, %v10742_v12  ;;  %v10355_v49 = vld [vmem:[#allocation3 + $0x80] sm:$0x3f]  ;;  %v10202_v31 = vld [vmem:[#allocation3 + $0x38] sm:$0x3f] }
 0x66d   : > { %v10740_v13 = vsel %vm19212_vm8, %v10707_v40, %v10739_v61  ;;  %10744 = vst [vmem:[#allocation4 + $0x20] sm:$0x3f] %v10743_v56  ;;  %10714 = vrot.lane.b32.xlu1 %v10688_v62, %s17433_s22  ;;  %9870 = vrot.lane.b32.xlu0 %v9822_v6, %s17431_s17  ;;  %9835 = vst.msk [vmem:[#allocation3 + $0x58] sm:$0xff] %vm9823_vm0, %v9822_v6  ;;  %v10258_v47 = vshll.u32 %v10202_v31, 16  ;;  %v10777_v12 = vld [vmem:[#allocation3 + $0x30] sm:$0x3f] }
 0x66e   : > { %v10978_v29 = vsel %vm18893_vm4, %v10919_v14, %v10977_v44  ;;  %10741 = vst [vmem:[#allocation4 + $0x8] sm:$0x3f] %v10740_v13  ;;  %v10622_v9 = vpop.permute.xlu1 %10621  ;;  %v10795_v16 = vpop.permute.xlu0 %10794  ;;  %v10249_v44 = vshrl.u32 %v10201_v18, 16  ;;  %v10778_v14 = vld [vmem:[#allocation3 + $0x38] sm:$0x3f]  ;;  %v10256_v56 = vshrl.u32 %v10202_v31, 16 }
 0x66f   : > { %10979 = vst [vmem:[#allocation4 + $0xa0] sm:$0x3f] %v10978_v29  ;;  %v10657_v38 = vsel %vm18910_vm6, %v10622_v9, %v10656_v3  ;;  %v10408_v5 = vld [vmem:[#allocation4] sm:$0x3f]  ;;  %v10260_v37 = vrot.slane %v10258_v47, 1 }
 0x670   : > { %10658 = vst [vmem:[#allocation4 + $0x38] sm:$0x3f] %v10657_v38  ;;  %v10254_v51 = vor.u32 %v10253_v52, %v10249_v44  ;;  %v10356_v61 = vld [vmem:[#allocation3 + $0x88] sm:$0x3f]  ;;  %v10140_v3 = vld [vmem:[#allocation4 + $0xc0] sm:$0x3f] }
 0x671   : > { %10800 = vrot.lane.b32.xlu1 %v10775_v22, %s17433_s22  ;;  %10379 = vrot.lane.b32.xlu0 %v10354_v39, %s17431_s17  ;;  %v10183_v20 = vld [vmem:[#allocation4 + $0xa8] sm:$0x3f]  ;;  %v10261_v13 = vor.u32 %v10260_v37, %v10256_v56 }
 0x672   : > { %v10286_v17 = vpop.permute.xlu1 %10285  ;;  %v10470_v19 = vpop.permute.xlu0 %10469  ;;  %v10184_v50 = vsel %vm18910_vm6, %v10156_v33, %v10183_v20 }
 0x673   : > { %v10322_v15 = vsel %vm19212_vm8, %v10286_v17, %v10321_v60  ;;  %v10506_v42 = vsel %vm18893_vm4, %v10470_v19, %v10505_v24  ;;  %10185 = vst [vmem:[#allocation4 + $0xa8] sm:$0x3f] %v10184_v50 }
 0x674   : > { %10323 = vst [vmem:[#allocation4 + $0x18] sm:$0x3f] %v10322_v15  ;;  %10507 = vst [vmem:[#allocation4 + $0x50] sm:$0x3f] %v10506_v42  ;;  %v10830_v42 = vld [vmem:[#allocation4 + $0x20] sm:$0x3f] }
 0x675   : > { %v10827_v25 = vld [vmem:[#allocation4 + $0x8] sm:$0x3f]  ;;  %10716 = vrot.lane.b32.xlu1 %v10689_v41, %s17433_s22  ;;  %10629 = vrot.lane.b32.xlu0 %v10588_v45, %s17432_s24  ;;  %v10357_v41 = vld [vmem:[#allocation3 + $0x90] sm:$0x3f] }
 0x676   : > { %v10828_v1 = vsel %vm19239_vm10, %v10795_v16, %v10827_v25  ;;  %v10374_v2 = vpop.permute.xlu1 %10373  ;;  %v10069_v4 = vpop.permute.xlu0 %10068 }
 0x677   : > { %10829 = vst [vmem:[#allocation4 + $0x8] sm:$0x3f] %v10828_v1  ;;  %v10409_v57 = vsel %vm19239_vm10, %v10374_v2, %v10408_v5  ;;  %10097 = vst.msk [vmem:[#allocation3 + $0x98] sm:$0xff] %vm9884_vm1, %v10069_v4  ;;  %v10745_v10 = vld [vmem:[#allocation4 + $0x38] sm:$0x3f] }
 0x678   : > { %10410 = vst [vmem:[#allocation4] sm:$0x3f] %v10409_v57 }
 0x679   : > { %10802 = vrot.lane.b32.xlu1 %v10776_v11, %s17433_s22  ;;  %10293 = vrot.lane.b32.xlu0 %v10247_v59, %s17433_s22 }
 0x67a   : > { %v10711_v48 = vpop.permute.xlu1 %10710  ;;  %v10624_v58 = vpop.permute.xlu0 %10623 }
 0x67b   : > { %v10746_v21 = vsel %vm19212_vm8, %v10711_v48, %v10745_v10  ;;  %v10659_v8 = vld [vmem:[#allocation4 + $0x50] sm:$0x3f]  ;;  %v10411_v57 = vld [vmem:[#allocation4 + $0x18] sm:$0x3f] }
 0x67c   : > { %10747 = vst [vmem:[#allocation4 + $0x38] sm:$0x3f] %v10746_v21  ;;  %v10660_v43 = vsel %vm18910_vm6, %v10624_v58, %v10659_v8 }
 0x67d   : > { %10661 = vst [vmem:[#allocation4 + $0x50] sm:$0x3f] %v10660_v43  ;;  %10718 = vrot.lane.b32.xlu1 %v10690_v26, %s17433_s22  ;;  %10381 = vrot.lane.b32.xlu0 %v10355_v49, %s17431_s17 }
 0x67e   : > { %v10993_v23 = vld [vmem:[#allocation4 + $0x8] sm:$0xff]  ;;  %v10536_v6 = vld [vmem:[#allocation3 + $0x98] sm:$0x3f] }
 0x67f   : > { %11241 = vmatprep.mubr.bf16.mxu1 %v10993_v23  ;;  %v9865_v63 = vpop.permute.xlu0 %9864  ;;  %v10992_v40 = vld [vmem:[#allocation4] sm:$0xff]  ;;  %v10592_v0 = vshll.u32 %v10536_v6, 16  ;;  %v10448_v16 = vld [vmem:[#allocation3 + $0x98] sm:$0x3f]  ;;  %v10590_v38 = vshrl.u32 %v10536_v6, 16 }
 0x680   : > { %9893 = vst.msk [vmem:[#allocation3 + $0x40] sm:$0xff] %vm9884_vm1, %v9865_v63  ;;  %11242 = vmatmul.mubr.bf16.vlgmr.msra.gmra.mrb[192].mxu1 %v10992_v40  ;;  %v17030_v63 = vld [vmem:[%s20434_s3 + $0x80] sm:$0xff]   ;;  %v10327_v6 = vld [vmem:[#allocation4 + $0x48] sm:$0x3f] }
 0x681   : > { %10804 = vrot.lane.b32.xlu1 %v10777_v12, %s17433_s22  ;;  %10295 = vrot.lane.b32.xlu0 %v10254_v51, %s17433_s22  ;;  %v10594_v29 = vrot.slane %v10592_v0, 1  ;;  %v17434_v51 = vmov 0.0  }
 0x682   : > { %15413 = vmatprep.subr.bf16.mxu1 %v17434_v51 }
 0x683   : > { %v10595_v19 = vor.u32 %v10594_v29, %v10590_v38  ;;  %15414 = vmatpush3.bf16.msra.mxu1 %v17030_v63  ;;  %v17031_v63 = vld [vmem:[%s20434_s3 + $0x88] sm:$0xff]  }
 0x684   : > { %15415 = vmatprep.subr.bf16.mxu1 %v17434_v51 }
 0x685   : > { %10806 = vrot.lane.b32.xlu1 %v10778_v14, %s17433_s22  ;;  %10383 = vrot.lane.b32.xlu0 %v10356_v61, %s17431_s17  ;;  %v10143_v14 = vld [vmem:[#allocation4 + $0xd8] sm:$0x3f] }
 0x687   : > { %v10867_v62 = vld [vmem:[#allocation3 + $0x40] sm:$0x3f]  ;;  %15416 = vmatpush3.bf16.msra.mxu1 %v17031_v63 }
 0x688   : > { %v10923_v9 = vshll.u32 %v10867_v62, 16  ;;  %v10110_v32 = vld [vmem:[#allocation3 + $0x40] sm:$0x3f]  ;;  %v10921_v22 = vshrl.u32 %v10867_v62, 16 }
 0x689   : > { %10297 = vrot.lane.b32.xlu0 %v10261_v13, %s17433_s22  ;;  %10477 = vrot.lane.b32.xlu1 %v10448_v16, %s17431_s17  ;;  %v10141_v60 = vsel %vm18893_vm4, %v10110_v32, %v10140_v3  ;;  %v10691_v33 = vld [vmem:[#allocation3 + $0x40] sm:$0x3f] }
 0x68a   : > { %v10925_v39 = vrot.slane %v10923_v9, 1  ;;  %v10472_v24 = vpop.permute.xlu1 %10471  ;;  %10142 = vst [vmem:[#allocation4 + $0xc0] sm:$0x3f] %v10141_v60  ;;  %v10157_v18 = vld [vmem:[#allocation3 + $0x40] sm:$0x3f] }
 0x68b   : > { %v10509_v17 = vsel %vm18893_vm4, %v10472_v24, %v10508_v36  ;;  %v10203_v4 = vld [vmem:[#allocation3 + $0x40] sm:$0x3f] }
 0x68c   : > { %v10926_v27 = vor.u32 %v10925_v39, %v10921_v22  ;;  %10510 = vst [vmem:[#allocation4 + $0x68] sm:$0x3f] %v10509_v17  ;;  %v10265_v21 = vshll.u32 %v10203_v4, 16  ;;  %v10263_v23 = vshrl.u32 %v10203_v4, 16  ;;  %v10511_v32 = vld [vmem:[#allocation4 + $0x80] sm:$0x3f] }
 0x68d   : > { %10631 = vrot.lane.b32.xlu0 %v10595_v19, %s17432_s24  ;;  %10720 = vrot.lane.b32.xlu1 %v10691_v33, %s17433_s22  ;;  %v10983_v22 = vld [vmem:[#allocation4 + $0xd0] sm:$0x3f] }
 0x68e   : > { %v10981_v20 = vsel %vm18893_vm4, %v10926_v27, %v10980_v35  ;;  %v10797_v15 = vpop.permute.xlu1 %10796  ;;  %v10267_v44 = vrot.slane %v10265_v21, 1 }
 0x68f   : > { %10982 = vst [vmem:[#allocation4 + $0xb8] sm:$0x3f] %v10981_v20  ;;  %v10831_v45 = vsel %vm19239_vm10, %v10797_v15, %v10830_v42  ;;  %v10071_v50 = vpop.permute.xlu0 %10070 }
 0x690   : > { %10832 = vst [vmem:[#allocation4 + $0x20] sm:$0x3f] %v10831_v45  ;;  %10098 = vst.msk [vmem:[#allocation3 + $0xa0] sm:$0xff] %vm9884_vm1, %v10071_v50  ;;  %v10268_v12 = vor.u32 %v10267_v44, %v10263_v23  ;;  %v10330_v45 = vld [vmem:[#allocation4 + $0x60] sm:$0x3f] }
 0x691   : > { %10385 = vrot.lane.b32.xlu0 %v10357_v41, %s17431_s17  ;;  %v10186_v25 = vld [vmem:[#allocation4 + $0xc0] sm:$0x3f] }
 0x692   : > { %v10187_v2 = vsel %vm18910_vm6, %v10157_v18, %v10186_v25 }
 0x693   : > { %v10288_v1 = vpop.permute.xlu0 %10287  ;;  %10188 = vst [vmem:[#allocation4 + $0xc0] sm:$0x3f] %v10187_v2  ;;  %v10662_v43 = vld [vmem:[#allocation4 + $0x68] sm:$0x3f] }
 0x694   : > { %v10325_v5 = vsel %vm19212_vm8, %v10288_v1, %v10324_v53 }
 0x695   : > { %10326 = vst [vmem:[#allocation4 + $0x30] sm:$0x3f] %v10325_v5  ;;  %v10779_v5 = vld [vmem:[#allocation3 + $0x40] sm:$0x3f] }
 0x697   : > { %v10376_v59 = vpop.permute.xlu0 %10375  ;;  %v10449_v30 = vld [vmem:[#allocation3 + $0xa0] sm:$0x3f] }
 0x698   : > { %v10996_v11 = vld [vmem:[#allocation4 + $0x20] sm:$0xff]  ;;  %v10412_v48 = vsel %vm19239_vm10, %v10376_v59, %v10411_v57  ;;  %10479 = vrot.lane.b32.xlu1 %v10449_v30, %s17431_s17  ;;  %v10358_v59 = vld [vmem:[#allocation3 + $0x98] sm:$0x3f] }
 0x699   : > { %v10537_v10 = vld [vmem:[#allocation3 + $0xa0] sm:$0x3f]  ;;  %11249 = vmatprep.mubr.bf16.mxu1 %v10996_v11  ;;  %10413 = vst [vmem:[#allocation4 + $0x18] sm:$0x3f] %v10412_v48 }
 0x69a   : > { %v10599_v58 = vshll.u32 %v10537_v10, 16  ;;  %v10597_v8 = vshrl.u32 %v10537_v10, 16  ;;  %v10146_v10 = vld [vmem:[#allocation4 + $0xf0] sm:$0x3f] }
 0x69b   : > { %v10626_v26 = vpop.permute.xlu0 %10625 }
 0x69c   : > { %v10601_v52 = vrot.slane %v10599_v58, 1  ;;  %v10663_v49 = vsel %vm18910_vm6, %v10626_v26, %v10662_v43  ;;  %v10414_v56 = vld [vmem:[#allocation4 + $0x30] sm:$0x3f]  ;;  %v10986_v43 = vld [vmem:[#allocation4 + $0xe8] sm:$0x3f] }
 0x69d   : > { %10664 = vst [vmem:[#allocation4 + $0x68] sm:$0x3f] %v10663_v49 }
 0x69e   : > { %v10602_v31 = vor.u32 %v10601_v52, %v10597_v8 }
 0x69f   : > { %v9867_v40 = vpop.permute.xlu0 %9866 }
 0x6a0   : > { %10633 = vrot.lane.b32.xlu0 %v10602_v31, %s17432_s24  ;;  %9894 = vst.msk [vmem:[#allocation3 + $0x48] sm:$0xff] %vm9884_vm1, %v9867_v40  ;;  %v10995_v47 = vld [vmem:[#allocation4 + $0x18] sm:$0xff] }
 0x6a1   : > { %11250 = vmatmul.mubr.bf16.gmra.mrb[196].mxu1 %v10995_v47 }
 0x6a3   : > { %v10290_v37 = vpop.permute.xlu0 %10289 }
 0x6a4   : > { %10299 = vrot.lane.b32.xlu0 %v10268_v12, %s17433_s22  ;;  %v10328_v0 = vsel %vm19212_vm8, %v10290_v37, %v10327_v6  ;;  %v10748_v37 = vld [vmem:[#allocation4 + $0x50] sm:$0x3f] }
 0x6a5   : > { %10329 = vst [vmem:[#allocation4 + $0x48] sm:$0x3f] %v10328_v0 }
 0x6a7   : > { %v10868_v61 = vld [vmem:[#allocation3 + $0x48] sm:$0x3f]  ;;  %v10378_v62 = vpop.permute.xlu0 %10377 }
 0x6a8   : > { %v10692_v13 = vld [vmem:[#allocation3 + $0x48] sm:$0x3f]  ;;  %v10930_v29 = vshll.u32 %v10868_v61, 16  ;;  %v10415_v3 = vsel %vm19239_vm10, %v10378_v62, %v10414_v56  ;;  %v10928_v36 = vshrl.u32 %v10868_v61, 16  ;;  %v10833_v56 = vld [vmem:[#allocation4 + $0x38] sm:$0x3f] }
 0x6a9   : > { %10722 = vrot.lane.b32.xlu1 %v10692_v13, %s17433_s22  ;;  %v10111_v9 = vld [vmem:[#allocation3 + $0x48] sm:$0x3f]  ;;  %10416 = vst [vmem:[#allocation4 + $0x30] sm:$0x3f] %v10415_v3 }
 0x6aa   : > { %v10144_v16 = vsel %vm18893_vm4, %v10111_v9, %v10143_v14  ;;  %v10932_v38 = vrot.slane %v10930_v29, 1  ;;  %v10158_v19 = vld [vmem:[#allocation3 + $0x48] sm:$0x3f] }
 0x6ab   : > { %10145 = vst [vmem:[#allocation4 + $0xd8] sm:$0x3f] %v10144_v16  ;;  %v10474_v24 = vpop.permute.xlu1 %10473  ;;  %v10780_v26 = vld [vmem:[#allocation3 + $0x48] sm:$0x3f] }
 0x6ac   : > { %v10933_v39 = vor.u32 %v10932_v38, %v10928_v36  ;;  %v10512_v60 = vsel %vm18893_vm4, %v10474_v24, %v10511_v32  ;;  %v10204_v23 = vld [vmem:[#allocation3 + $0x48] sm:$0x3f]  ;;  %v10514_v36 = vld [vmem:[#allocation4 + $0x98] sm:$0x3f] }
 0x6ad   : > { %10513 = vst [vmem:[#allocation4 + $0x80] sm:$0x3f] %v10512_v60  ;;  %v10272_v40 = vshll.u32 %v10204_v23, 16  ;;  %v10270_v9 = vshrl.u32 %v10204_v23, 16 }
 0x6ae   : > { %v10984_v35 = vsel %vm18893_vm4, %v10933_v39, %v10983_v22 }
 0x6af   : > { %10985 = vst [vmem:[#allocation4 + $0xd0] sm:$0x3f] %v10984_v35  ;;  %v10073_v17 = vpop.permute.xlu1 %10072  ;;  %v10274_v61 = vrot.slane %v10272_v40, 1 }
 0x6b0   : > { %10099 = vst.msk [vmem:[#allocation3 + $0xa8] sm:$0xff] %vm9884_vm1, %v10073_v17 }
 0x6b1   : > { %v10275_v38 = vor.u32 %v10274_v61, %v10270_v9 }
 0x6b2   : > { %v10189_v27 = vld [vmem:[#allocation4 + $0xd8] sm:$0x3f]  ;;  %v10628_v33 = vpop.permute.xlu0 %10627 }
 0x6b3   : > { %v10190_v20 = vsel %vm18910_vm6, %v10158_v19, %v10189_v27  ;;  %v10751_v27 = vld [vmem:[#allocation4 + $0x68] sm:$0x3f] }
 0x6b4   : > { %10191 = vst [vmem:[#allocation4 + $0xd8] sm:$0x3f] %v10190_v20  ;;  %v10665_v15 = vld [vmem:[#allocation4 + $0x80] sm:$0x3f] }
 0x6b5   : > { %v10666_v42 = vsel %vm18910_vm6, %v10628_v33, %v10665_v15 }
 0x6b6   : > { %v10292_v50 = vpop.permute.xlu0 %10291  ;;  %10667 = vst [vmem:[#allocation4 + $0x80] sm:$0x3f] %v10666_v42  ;;  %v10998_v42 = vld [vmem:[#allocation4 + $0x30] sm:$0xff] }
 0x6b7   : > { %v10331_v41 = vsel %vm19212_vm8, %v10292_v50, %v10330_v45  ;;  %v10450_v18 = vld [vmem:[#allocation3 + $0xa8] sm:$0x3f] }
 0x6b8   : > { %10332 = vst [vmem:[#allocation4 + $0x60] sm:$0x3f] %v10331_v41  ;;  %v10538_v25 = vld [vmem:[#allocation3 + $0xa8] sm:$0x3f]  ;;  %10481 = vrot.lane.b32.xlu1 %v10450_v18, %s17431_s17 }
 0x6b9   : > { %v10606_v53 = vshll.u32 %v10538_v25, 16  ;;  %v10604_v1 = vshrl.u32 %v10538_v25, 16  ;;  %v10417_v18 = vld [vmem:[#allocation4 + $0x48] sm:$0x3f] }
 0x6ba   : > { %v10360_v63 = vld [vmem:[#allocation3 + $0xa8] sm:$0x3f] }
 0x6bb   : > { %v10608_v2 = vrot.slane %v10606_v53, 1  ;;  %v10359_v53 = vld [vmem:[#allocation3 + $0xa0] sm:$0x3f] }
 0x6bc   : > { %10808 = vrot.lane.b32.xlu1 %v10779_v5, %s17433_s22 }
 0x6bd   : > { %v10609_v4 = vor.u32 %v10608_v2, %v10604_v1 }
 0x6bf   : > { %10635 = vrot.lane.b32.xlu0 %v10609_v4, %s17432_s24  ;;  %v9869_v57 = vpop.permute.xlu1 %9868  ;;  %v10754_v4 = vld [vmem:[#allocation4 + $0x80] sm:$0x3f] }
 0x6c0   : > { %9895 = vst.msk [vmem:[#allocation3 + $0x50] sm:$0xff] %vm9884_vm1, %v9869_v57 }
 0x6c3   : > { %10387 = vrot.lane.b32.xlu0 %v10358_v59, %s17431_s17 }
 0x6c7   : > { %v10869_v30 = vld [vmem:[#allocation3 + $0x50] sm:$0x3f] }
 0x6c8   : > { %v10693_v11 = vld [vmem:[#allocation3 + $0x50] sm:$0x3f]  ;;  %v10937_v48 = vshll.u32 %v10869_v30, 16  ;;  %v10935_v21 = vshrl.u32 %v10869_v30, 16 }
 0x6c9   : > { %10724 = vrot.lane.b32.xlu0 %v10693_v11, %s17433_s22  ;;  %v10112_v58 = vld [vmem:[#allocation3 + $0x50] sm:$0x3f] }
 0x6ca   : > { %v10939_v8 = vrot.slane %v10937_v48, 1  ;;  %v10147_v52 = vsel %vm18893_vm4, %v10112_v58, %v10146_v10  ;;  %v10159_v47 = vld [vmem:[#allocation3 + $0x50] sm:$0x3f] }
 0x6cb   : > { %10148 = vst [vmem:[#allocation4 + $0xf0] sm:$0x3f] %v10147_v52  ;;  %v10205_v39 = vld [vmem:[#allocation3 + $0x50] sm:$0x3f]  ;;  %v10989_v52 = vld [vmem:[#allocation4 + $0x100] sm:$0x3f] }
 0x6cc   : > { %v10940_v49 = vor.u32 %v10939_v8, %v10935_v21  ;;  %v10279_v17 = vshll.u32 %v10205_v39, 16  ;;  %v10277_v5 = vshrl.u32 %v10205_v39, 16  ;;  %v10781_v40 = vld [vmem:[#allocation3 + $0x50] sm:$0x3f] }
 0x6cd   : > { %10810 = vrot.lane.b32.xlu0 %v10780_v26, %s17433_s22 }
 0x6ce   : > { %v10987_v31 = vsel %vm18893_vm4, %v10940_v49, %v10986_v43  ;;  %v10281_v45 = vrot.slane %v10279_v17, 1  ;;  %v10333_v49 = vld [vmem:[#allocation4 + $0x78] sm:$0x3f] }
 0x6cf   : > { %10988 = vst [vmem:[#allocation4 + $0xe8] sm:$0x3f] %v10987_v31  ;;  %v10075_v44 = vpop.permute.xlu1 %10074 }
 0x6d0   : > { %10100 = vst.msk [vmem:[#allocation3 + $0xb0] sm:$0xff] %vm9884_vm1, %v10075_v44  ;;  %v10282_v57 = vor.u32 %v10281_v45, %v10277_v5 }
 0x6d2   : > { %v10192_v12 = vld [vmem:[#allocation4 + $0xf0] sm:$0x3f] }
 0x6d3   : > { %v10713_v6 = vpop.permute.xlu1 %10712  ;;  %v10193_v0 = vsel %vm18910_vm6, %v10159_v47, %v10192_v12 }
 0x6d4   : > { %v10749_v14 = vsel %vm19212_vm8, %v10713_v6, %v10748_v37  ;;  %10194 = vst [vmem:[#allocation4 + $0xf0] sm:$0x3f] %v10193_v0 }
 0x6d5   : > { %10750 = vst [vmem:[#allocation4 + $0x50] sm:$0x3f] %v10749_v14 }
 0x6d7   : > { %v10799_v62 = vpop.permute.xlu1 %10798  ;;  %v10451_v13 = vld [vmem:[#allocation3 + $0xb0] sm:$0x3f] }
 0x6d8   : > { %v10539_v29 = vld [vmem:[#allocation3 + $0xb0] sm:$0x3f]  ;;  %v10834_v3 = vsel %vm19239_vm10, %v10799_v62, %v10833_v56  ;;  %10483 = vrot.lane.b32.xlu1 %v10451_v13, %s17431_s17  ;;  %v10420_v56 = vld [vmem:[#allocation4 + $0x60] sm:$0x3f] }
 0x6d9   : > { %v10613_v16 = vshll.u32 %v10539_v29, 16  ;;  %10835 = vst [vmem:[#allocation4 + $0x38] sm:$0x3f] %v10834_v3  ;;  %v10611_v60 = vshrl.u32 %v10539_v29, 16  ;;  %v10361_v13 = vld [vmem:[#allocation3 + $0xb0] sm:$0x3f] }
 0x6db   : > { %v10615_v32 = vrot.slane %v10613_v16, 1  ;;  %v10476_v22 = vpop.permute.xlu1 %10475 }
 0x6dc   : > { %v10515_v24 = vsel %vm18893_vm4, %v10476_v22, %v10514_v36  ;;  %10301 = vrot.lane.b32.xlu1 %v10275_v38, %s17433_s22  ;;  %v10836_v41 = vld [vmem:[#allocation4 + $0x50] sm:$0x3f] }
 0x6dd   : > { %10516 = vst [vmem:[#allocation4 + $0x98] sm:$0x3f] %v10515_v24  ;;  %v10616_v35 = vor.u32 %v10615_v32, %v10611_v60  ;;  %v10336_v32 = vld [vmem:[#allocation4 + $0x90] sm:$0x3f] }
 0x6df   : > { %v10715_v19 = vpop.permute.xlu1 %10714  ;;  %v9871_v33 = vpop.permute.xlu0 %9870 }
 0x6e0   : > { %v10752_v20 = vsel %vm19212_vm8, %v10715_v19, %v10751_v27  ;;  %9896 = vst.msk [vmem:[#allocation3 + $0x58] sm:$0xff] %vm9884_vm1, %v9871_v33  ;;  %10637 = vrot.lane.b32.xlu1 %v10616_v35, %s17432_s24  ;;  %v10999_v15 = vld [vmem:[#allocation4 + $0x38] sm:$0xff] }
 0x6e1   : > { %10753 = vst [vmem:[#allocation4 + $0x68] sm:$0x3f] %v10752_v20  ;;  %11257 = vmatprep.mubr.bf16.mxu1 %v10999_v15  ;;  %v10517_v15 = vld [vmem:[#allocation4 + $0xb0] sm:$0x3f] }
 0x6e2   : > { %11258 = vmatmul.mubr.bf16.gmra.mrb[200].mxu1 %v10998_v42 }
 0x6e3   : > { %v10801_v50 = vpop.permute.xlu1 %10800  ;;  %v10380_v25 = vpop.permute.xlu0 %10379 }
 0x6e4   : > { %v10837_v1 = vsel %vm19239_vm10, %v10801_v50, %v10836_v41  ;;  %v10418_v2 = vsel %vm19239_vm10, %v10380_v25, %v10417_v18  ;;  %10389 = vrot.lane.b32.xlu1 %v10359_v53, %s17431_s17  ;;  %v10668_v11 = vld [vmem:[#allocation4 + $0x98] sm:$0x3f]  ;;  %v10339_v50 = vld [vmem:[#allocation4 + $0xa8] sm:$0x3f] }
 0x6e5   : > { %10838 = vst [vmem:[#allocation4 + $0x50] sm:$0x3f] %v10837_v1  ;;  %10419 = vst [vmem:[#allocation4 + $0x48] sm:$0x3f] %v10418_v2 }
 0x6e7   : > { %v10870_v59 = vld [vmem:[#allocation3 + $0x58] sm:$0x3f]  ;;  %v10717_v30 = vpop.permute.xlu1 %10716  ;;  %v10630_v10 = vpop.permute.xlu0 %10629 }
 0x6e8   : > { %v10694_v48 = vld [vmem:[#allocation3 + $0x58] sm:$0x3f]  ;;  %v10944_v58 = vshll.u32 %v10870_v59, 16  ;;  %v10755_v21 = vsel %vm19212_vm8, %v10717_v30, %v10754_v4  ;;  %v10669_v8 = vsel %vm18910_vm6, %v10630_v10, %v10668_v11  ;;  %10303 = vrot.lane.b32.xlu1 %v10282_v57, %s17433_s22  ;;  %v10942_v43 = vshrl.u32 %v10870_v59, 16  ;;  %v10839_v44 = vld [vmem:[#allocation4 + $0x68] sm:$0x3f] }
 0x6e9   : > { %10726 = vrot.lane.b32.xlu0 %v10694_v48, %s17433_s22  ;;  %10756 = vst [vmem:[#allocation4 + $0x80] sm:$0x3f] %v10755_v21  ;;  %10670 = vst [vmem:[#allocation4 + $0x98] sm:$0x3f] %v10669_v8  ;;  %v10782_v29 = vld [vmem:[#allocation3 + $0x58] sm:$0x3f] }
 0x6ea   : > { %v10946_v26 = vrot.slane %v10944_v58, 1  ;;  %v10520_v48 = vld [vmem:[#allocation4 + $0xc8] sm:$0x3f] }
 0x6eb   : > { %v10803_v31 = vpop.permute.xlu1 %10802  ;;  %v10294_v23 = vpop.permute.xlu0 %10293 }
 0x6ec   : > { %v10947_v47 = vor.u32 %v10946_v26, %v10942_v43  ;;  %v10840_v12 = vsel %vm19239_vm10, %v10803_v31, %v10839_v44  ;;  %v10334_v6 = vsel %vm19212_vm8, %v10294_v23, %v10333_v49  ;;  %10391 = vrot.lane.b32.xlu1 %v10360_v63, %s17431_s17  ;;  %v11002_v37 = vld [vmem:[#allocation4 + $0x50] sm:$0xff]  ;;  %v11001_v0 = vld [vmem:[#allocation4 + $0x48] sm:$0xff]  ;;  %v10342_v44 = vld [vmem:[#allocation4 + $0xc0] sm:$0x3f] }
 0x6ed   : > { %10812 = vrot.lane.b32.xlu0 %v10781_v40, %s17433_s22  ;;  %10841 = vst [vmem:[#allocation4 + $0x68] sm:$0x3f] %v10840_v12  ;;  %10335 = vst [vmem:[#allocation4 + $0x78] sm:$0x3f] %v10334_v6  ;;  %11265 = vmatprep.mubr.bf16.mxu1 %v11002_v37  ;;  %v10523_v6 = vld [vmem:[#allocation4 + $0xe0] sm:$0x3f] }
 0x6ee   : > { %v10990_v14 = vsel %vm18893_vm4, %v10947_v47, %v10989_v52  ;;  %11266 = vmatmul.mubr.bf16.gmra.mrb[204].mxu1 %v11001_v0 }
 0x6ef   : > { %10991 = vst [vmem:[#allocation4 + $0x100] sm:$0x3f] %v10990_v14  ;;  %v10719_v61 = vpop.permute.xlu1 %10718  ;;  %v10382_v62 = vpop.permute.xlu0 %10381 }
 0x6f0   : > { %v10757_v3 = vld [vmem:[#allocation4 + $0x98] sm:$0x3f]  ;;  %v10421_v9 = vsel %vm19239_vm10, %v10382_v62, %v10420_v56  ;;  %10393 = vrot.lane.b32.xlu1 %v10361_v13, %s17431_s17  ;;  %v10842_v38 = vld [vmem:[#allocation4 + $0x80] sm:$0x3f] }
 0x6f1   : > { %10814 = vrot.lane.b32.xlu0 %v10782_v29, %s17433_s22  ;;  %v10758_v16 = vsel %vm19212_vm8, %v10719_v61, %v10757_v3  ;;  %10422 = vst [vmem:[#allocation4 + $0x60] sm:$0x3f] %v10421_v9 }
 0x6f2   : > { %10759 = vst [vmem:[#allocation4 + $0x98] sm:$0x3f] %v10758_v16 }
 0x6f3   : > { %v10805_v36 = vpop.permute.xlu1 %10804  ;;  %v10296_v22 = vpop.permute.xlu0 %10295 }
 0x6f4   : > { %v10843_v39 = vsel %vm19239_vm10, %v10805_v36, %v10842_v38  ;;  %v10337_v24 = vsel %vm19212_vm8, %v10296_v22, %v10336_v32  ;;  %v11005_v60 = vld [vmem:[#allocation4 + $0x68] sm:$0xff]  ;;  %v10423_v17 = vld [vmem:[#allocation4 + $0x78] sm:$0x3f] }
 0x6f5   : > { %10844 = vst [vmem:[#allocation4 + $0x80] sm:$0x3f] %v10843_v39  ;;  %10338 = vst [vmem:[#allocation4 + $0x90] sm:$0x3f] %v10337_v24  ;;  %11273 = vmatprep.mubr.bf16.mxu1 %v11005_v60 }
 0x6f7   : > { %v10807_v35 = vpop.permute.xlu1 %10806  ;;  %v10384_v19 = vpop.permute.xlu0 %10383 }
 0x6f8   : > { %v10424_v27 = vsel %vm19239_vm10, %v10384_v19, %v10423_v17  ;;  %v11004_v33 = vld [vmem:[#allocation4 + $0x60] sm:$0xff]  ;;  %v10526_v19 = vld [vmem:[#allocation4 + $0xf8] sm:$0x3f] }
 0x6f9   : > { %v10845_v20 = vld [vmem:[#allocation4 + $0x98] sm:$0x3f]  ;;  %10425 = vst [vmem:[#allocation4 + $0x78] sm:$0x3f] %v10424_v27  ;;  %11274 = vmatmul.mubr.bf16.gmra.mrb[208].mxu1 %v11004_v33 }
 0x6fa   : > { %v10846_v42 = vsel %vm19239_vm10, %v10807_v35, %v10845_v20 }
 0x6fb   : > { %10847 = vst [vmem:[#allocation4 + $0x98] sm:$0x3f] %v10846_v42  ;;  %v10478_v45 = vpop.permute.xlu1 %10477  ;;  %v10298_v41 = vpop.permute.xlu0 %10297 }
 0x6fc   : > { %v10518_v18 = vsel %vm18893_vm4, %v10478_v45, %v10517_v15  ;;  %v10340_v25 = vsel %vm19212_vm8, %v10298_v41, %v10339_v50  ;;  %v11008_v53 = vld [vmem:[#allocation4 + $0x80] sm:$0xff]  ;;  %v10426_v4 = vld [vmem:[#allocation4 + $0x90] sm:$0x3f]  ;;  %v10345_v15 = vld [vmem:[#allocation4 + $0xd8] sm:$0x3f] }
 0x6fd   : > { %10519 = vst [vmem:[#allocation4 + $0xb0] sm:$0x3f] %v10518_v18  ;;  %10341 = vst [vmem:[#allocation4 + $0xa8] sm:$0x3f] %v10340_v25  ;;  %11281 = vmatprep.mubr.bf16.mxu1 %v11008_v53 }
 0x6ff   : > { %v10632_v1 = vpop.permute.xlu0 %10631  ;;  %v10721_v10 = vpop.permute.xlu1 %10720 }
 0x700   : > { %v11007_v2 = vld [vmem:[#allocation4 + $0x78] sm:$0xff] }
 0x701   : > { %11282 = vmatmul.mubr.bf16.gmra.mrb[212].mxu1 %v11007_v2 }
 0x702   : > { %v11011_v5 = vld [vmem:[#allocation4 + $0x98] sm:$0xff] }
 0x703   : > { %v10386_v57 = vpop.permute.xlu0 %10385  ;;  %11289 = vmatprep.mubr.bf16.mxu1 %v11011_v5 }
 0x704   : > { %v10671_v59 = vld [vmem:[#allocation4 + $0xb0] sm:$0x3f]  ;;  %v10427_v30 = vsel %vm19239_vm10, %v10386_v57, %v10426_v4  ;;  %v10429_v3 = vld [vmem:[#allocation4 + $0xa8] sm:$0x3f] }
 0x705   : > { %v10672_v11 = vsel %vm18910_vm6, %v10632_v1, %v10671_v59  ;;  %10428 = vst [vmem:[#allocation4 + $0x90] sm:$0x3f] %v10427_v30  ;;  %v10348_v59 = vld [vmem:[#allocation4 + $0xf0] sm:$0x3f] }
 0x706   : > { %10673 = vst [vmem:[#allocation4 + $0xb0] sm:$0x3f] %v10672_v11 }
 0x70a   : > { %v10480_v58 = vpop.permute.xlu1 %10479 }
 0x70b   : > { %v10521_v21 = vsel %vm18893_vm4, %v10480_v58, %v10520_v48 }
 0x70c   : > { %10522 = vst [vmem:[#allocation4 + $0xc8] sm:$0x3f] %v10521_v21  ;;  %v11010_v8 = vld [vmem:[#allocation4 + $0x90] sm:$0xff] }
 0x70d   : > { %v10760_v52 = vld [vmem:[#allocation4 + $0xb0] sm:$0x3f]  ;;  %11290 = vmatmul.mubr.bf16.gmra.mrb[216].mxu1 %v11010_v8 }
 0x70e   : > { %v10761_v43 = vsel %vm19212_vm8, %v10721_v10, %v10760_v52 }
 0x70f   : > { %10762 = vst [vmem:[#allocation4 + $0xb0] sm:$0x3f] %v10761_v43 }
 0x712   : > { %v10634_v26 = vpop.permute.xlu0 %10633 }
 0x713   : > { %v10674_v49 = vld [vmem:[#allocation4 + $0xc8] sm:$0x3f] }
 0x714   : > { %v10675_v31 = vsel %vm18910_vm6, %v10634_v26, %v10674_v49 }
 0x715   : > { %10676 = vst [vmem:[#allocation4 + $0xc8] sm:$0x3f] %v10675_v31 }
 0x716   : > { %v10300_v23 = vpop.permute.xlu0 %10299  ;;  %v10848_v61 = vld [vmem:[#allocation4 + $0xb0] sm:$0x3f] }
 0x717   : > { %v10343_v63 = vsel %vm19212_vm8, %v10300_v23, %v10342_v44 }
 0x718   : > { %10344 = vst [vmem:[#allocation4 + $0xc0] sm:$0x3f] %v10343_v63 }
 0x71b   : > { %v10723_v40 = vpop.permute.xlu1 %10722 }
 0x71c   : > { %v10763_v47 = vld [vmem:[#allocation4 + $0xc8] sm:$0x3f] }
 0x71d   : > { %v10764_v12 = vsel %vm19212_vm8, %v10723_v40, %v10763_v47 }
 0x71e   : > { %10765 = vst [vmem:[#allocation4 + $0xc8] sm:$0x3f] %v10764_v12 }
 0x71f   : > { %v10432_v2 = vld [vmem:[#allocation4 + $0xc0] sm:$0x3f] }
 0x725   : > { %v10851_v39 = vld [vmem:[#allocation4 + $0xc8] sm:$0x3f] }
 0x72a   : > { %v10482_v37 = vpop.permute.xlu1 %10481 }
 0x72b   : > { %v10524_v0 = vsel %vm18893_vm4, %v10482_v37, %v10523_v6 }
 0x72c   : > { %10525 = vst [vmem:[#allocation4 + $0xe0] sm:$0x3f] %v10524_v0 }
 0x72e   : > { %v10809_v14 = vpop.permute.xlu1 %10808 }
 0x72f   : > { %v10849_v56 = vsel %vm19239_vm10, %v10809_v14, %v10848_v61 }
 0x730   : > { %10850 = vst [vmem:[#allocation4 + $0xb0] sm:$0x3f] %v10849_v56 }
 0x731   : > { %v10636_v62 = vpop.permute.xlu0 %10635 }
 0x733   : > { %v10677_v13 = vld [vmem:[#allocation4 + $0xe0] sm:$0x3f] }
 0x734   : > { %v10678_v29 = vsel %vm18910_vm6, %v10636_v62, %v10677_v13  ;;  %v10994_v13 = vld [vmem:[#allocation4 + $0x10] sm:$0xff] }
 0x735   : > { %v10388_v9 = vpop.permute.xlu0 %10387  ;;  %10679 = vst [vmem:[#allocation4 + $0xe0] sm:$0x3f] %v10678_v29  ;;  %v10997_v29 = vld [vmem:[#allocation4 + $0x28] sm:$0xff] }
 0x736   : > { %v10430_v16 = vsel %vm19239_vm10, %v10388_v9, %v10429_v3  ;;  %v11000_v3 = vld [vmem:[#allocation4 + $0x40] sm:$0xff]  ;;  %v11003_v9 = vld [vmem:[#allocation4 + $0x58] sm:$0xff] }
 0x737   : > { %10431 = vst [vmem:[#allocation4 + $0xa8] sm:$0x3f] %v10430_v16  ;;  %v11014_v36 = vld [vmem:[#allocation4 + $0xb0] sm:$0xff] }
 0x738   : > { %11297 = vmatprep.mubr.bf16.mxu1 %v11014_v36  ;;  %v11006_v16 = vld [vmem:[#allocation4 + $0x70] sm:$0xff]  ;;  %v11009_v36 = vld [vmem:[#allocation4 + $0x88] sm:$0xff] }
 0x73b   : > { %v10725_v38 = vpop.permute.xlu0 %10724 }
 0x73c   : > { %v10766_v32 = vld [vmem:[#allocation4 + $0xe0] sm:$0x3f] }
 0x73d   : > { %v10767_v22 = vsel %vm19212_vm8, %v10725_v38, %v10766_v32  ;;  %v11012_v38 = vld [vmem:[#allocation4 + $0xa0] sm:$0xff]  ;;  %v11015_v32 = vld [vmem:[#allocation4 + $0xb8] sm:$0xff] }
 0x73e   : > { %v11013_v60 = vld [vmem:[#allocation4 + $0xa8] sm:$0xff]  ;;  %10768 = vst [vmem:[#allocation4 + $0xe0] sm:$0x3f] %v10767_v22 }
 0x73f   : > { %v10811_v24 = vpop.permute.xlu0 %10810  ;;  %11298 = vmatmul.mubr.bf16.gmra.mrb[220].mxu1 %v11013_v60 }
 0x740   : > { %v10852_v35 = vsel %vm19239_vm10, %v10811_v24, %v10851_v39 }
 0x741   : > { %10853 = vst [vmem:[#allocation4 + $0xc8] sm:$0x3f] %v10852_v35 }
 0x745   : > { %v10854_v8 = vld [vmem:[#allocation4 + $0xe0] sm:$0x3f] }
 0x748   : > { %v11017_v17 = vld [vmem:[#allocation4 + $0xc8] sm:$0xff] }
 0x749   : > { %11305 = vmatprep.mubr.bf16.mxu1 %v11017_v17  ;;  %v11018_v17 = vld [vmem:[#allocation4 + $0xd0] sm:$0xff] }
 0x74a   : > { %v10484_v27 = vpop.permute.xlu1 %10483 }
 0x74b   : > { %v10527_v33 = vsel %vm18893_vm4, %v10484_v27, %v10526_v19  ;;  %v11021_v27 = vld [vmem:[#allocation4 + $0xe8] sm:$0xff] }
 0x74c   : > { %10528 = vst [vmem:[#allocation4 + $0xf8] sm:$0x3f] %v10527_v33 }
 0x74e   : > { %v10302_v20 = vpop.permute.xlu1 %10301 }
 0x74f   : > { %v10346_v42 = vsel %vm19212_vm8, %v10302_v20, %v10345_v15 }
 0x750   : > { %10347 = vst [vmem:[#allocation4 + $0xd8] sm:$0x3f] %v10346_v42 }
 0x752   : > { %v10638_v45 = vpop.permute.xlu1 %10637 }
 0x753   : > { %v10680_v50 = vld [vmem:[#allocation4 + $0xf8] sm:$0x3f]  ;;  %v15312_v41 = vpop.f32.mrb[192].mxu1 }
 0x754   : > { %v10681_v18 = vsel %vm18910_vm6, %v10638_v45, %v10680_v50  ;;  %v15313_v25 = vpop.f32.mrb[193].mxu1 }
 0x755   : > { %10682 = vst [vmem:[#allocation4 + $0xf8] sm:$0x3f] %v10681_v18  ;;  %v19416_v53 = vadd.f32 %v15313_v25, %v15312_v41  ;;  %v15315_v1 = vpop.f32.mrb[194].mxu1  ;;  %v11024_v41 = vld [vmem:[#allocation4 + $0x100] sm:$0xff] }
 0x756   : > { %v10390_v54 = vpop.permute.xlu1 %10389  ;;  %v15316_v5 = vpop.f32.mrb[195].mxu1 }
 0x757   : > { %v10433_v4 = vsel %vm19239_vm10, %v10390_v54, %v10432_v2  ;;  %v19420_v57 = vadd.f32 %v15316_v5, %v15315_v1  ;;  %v10435_v21 = vld [vmem:[#allocation4 + $0xd8] sm:$0x3f] }
 0x758   : > { %10434 = vst [vmem:[#allocation4 + $0xc0] sm:$0x3f] %v10433_v4 }
 0x75a   : > { %v10304_v30 = vpop.permute.xlu1 %10303 }
 0x75b   : > { %v10727_v11 = vpop.permute.xlu0 %10726  ;;  %v10349_v55 = vsel %vm19212_vm8, %v10304_v30, %v10348_v59 }
 0x75c   : > { %10350 = vst [vmem:[#allocation4 + $0xf0] sm:$0x3f] %v10349_v55  ;;  %v10769_v10 = vld [vmem:[#allocation4 + $0xf8] sm:$0x3f] }
 0x75d   : > { %v10770_v48 = vsel %vm19212_vm8, %v10727_v11, %v10769_v10 }
 0x75e   : > { %10771 = vst [vmem:[#allocation4 + $0xf8] sm:$0x3f] %v10770_v48  ;;  %v10392_v58 = vpop.permute.xlu1 %10391 }
 0x75f   : > { %v10813_v52 = vpop.permute.xlu0 %10812  ;;  %v10436_v43 = vsel %vm19239_vm10, %v10392_v58, %v10435_v21  ;;  %v11016_v49 = vld [vmem:[#allocation4 + $0xc0] sm:$0xff] }
 0x760   : > { %v10855_v26 = vsel %vm19239_vm10, %v10813_v52, %v10854_v8  ;;  %10437 = vst [vmem:[#allocation4 + $0xd8] sm:$0x3f] %v10436_v43  ;;  %11306 = vmatmul.mubr.bf16.gmra.mrb[224].mxu1 %v11016_v49 }
 0x761   : > { %10856 = vst [vmem:[#allocation4 + $0xe0] sm:$0x3f] %v10855_v26 }
 0x762   : > { %v10394_v31 = vpop.permute.xlu1 %10393 }
 0x763   : > { %v10438_v44 = vld [vmem:[#allocation4 + $0xf0] sm:$0x3f]  ;;  %v10815_v63 = vpop.permute.xlu0 %10814 }
 0x764   : > { %v10439_v7 = vsel %vm19239_vm10, %v10394_v31, %v10438_v44 }
 0x765   : > { %10440 = vst [vmem:[#allocation4 + $0xf0] sm:$0x3f] %v10439_v7  ;;  %v10857_v23 = vld [vmem:[#allocation4 + $0xf8] sm:$0x3f] }
 0x766   : > { %v10858_v40 = vsel %vm19239_vm10, %v10815_v63, %v10857_v23  ;;  %v17032_v63 = vld [vmem:[%s20436_s5] ss:$8 sps:$4 sm:$0xff]  }
 0x767   : > { %10859 = vst [vmem:[#allocation4 + $0xf8] sm:$0x3f] %v10858_v40  ;;  %v11019_v12 = vld [vmem:[#allocation4 + $0xd8] sm:$0xff]  ;;  %v17034_v40 = vld [vmem:[%s20436_s5 + $0x4] ss:$8 sps:$4 sm:$0xff]  }
 0x768   : > { %v11020_v47 = vld [vmem:[#allocation4 + $0xe0] sm:$0xff]  ;;  %13182 = vmatprep.subr.bf16.mxu1 %v17034_v40 }
 0x769   : > { %11313 = vmatprep.mubr.bf16.mxu1 %v11020_v47 }
 0x76a   : > { %11314 = vmatmul.mubr.bf16.gmra.mrb[228].mxu1 %v11019_v12  ;;  %v17037_v12 = vld [vmem:[%s20436_s5 + $0x14] ss:$8 sps:$4 sm:$0xff]  }
 0x76c   : > { %v11022_v37 = vld [vmem:[#allocation4 + $0xf0] sm:$0xff] }
 0x76e   : > { %v11023_v6 = vld [vmem:[#allocation4 + $0xf8] sm:$0xff] }
 0x76f   : > { %11321 = vmatprep.mubr.bf16.mxu1 %v11023_v6 }
 0x772   : > { %11322 = vmatmul.mubr.bf16.gmra.mrb[232].mxu1 %v11022_v37 }
 0x773   : > { %15417 = vmatprep.mubr.msk.bf16.mxu1 %vm17435_vm11, %v17434_v51 }
 0x774   : > { %v15318_v0 = vpop.f32.mrb[196].mxu1 }
 0x775   : > { %v15319_v14 = vpop.f32.mrb[197].mxu1 }
 0x776   : > { %v19436_v61 = vadd.f32 %v15319_v14, %v15318_v0  ;;  %v15321_v56 = vpop.f32.mrb[198].mxu1  ;;  %v17035_v14 = vld [vmem:[%s20436_s5 + $0x10] ss:$8 sps:$4 sm:$0xff]  }
 0x777   : > { %v15322_v28 = vpop.f32.mrb[199].mxu1 }
 0x778   : > { %v19438_v62 = vadd.f32 %v15322_v28, %v15321_v56  ;;  %v17040_v28 = vld [vmem:[%s20436_s5 + $0x24] ss:$8 sps:$4 sm:$0xff]  }
 0x77a   : > { %15418 = vmatmul.mubr.msk.bf16.vlgmr.msra.gmra.mrb[236].mxu1 %vm9823_vm0, %v10994_v13  ;;  %v17038_v13 = vld [vmem:[%s20436_s5 + $0x20] ss:$8 sps:$4 sm:$0xff]  }
 0x77b   : > { %15421 = vmatprep.mubr.msk.bf16.mxu1 %vm17435_vm11, %v17434_v51  ;;  %13183 = vmatpush1.bf16.msra.mxu1 %v17032_v63 }
 0x77c   : > { %13184 = vmatprep.subr.bf16.mxu1 %v17037_v12  ;;  %v11518_v12 = vlaneseq }
 0x77f   : > { %13185 = vmatpush1.bf16.msra.mxu1 %v17035_v14 }
 0x780   : > { %13186 = vmatprep.subr.bf16.mxu1 %v17040_v28 }
 0x782   : > { %15422 = vmatmul.mubr.msk.bf16.gmra.mrb[240].mxu1 %vm9823_vm0, %v10997_v29  ;;  %v17043_v29 = vld [vmem:[%s20436_s5 + $0x34] ss:$8 sps:$4 sm:$0xff]  }
 0x783   : > { %15425 = vmatprep.mubr.msk.bf16.mxu1 %vm17435_vm11, %v17434_v51  ;;  %13187 = vmatpush1.bf16.msra.mxu1 %v17038_v13 }
 0x784   : > { %13188 = vmatprep.subr.bf16.mxu1 %v17043_v29 }
 0x78a   : > { %15426 = vmatmul.mubr.msk.bf16.gmra.mrb[244].mxu1 %vm9823_vm0, %v11000_v3 }
 0x78b   : > { %15429 = vmatprep.mubr.msk.bf16.mxu1 %vm17435_vm11, %v17434_v51 }
 0x792   : > { %15430 = vmatmul.mubr.msk.bf16.gmra.mrb[248].mxu1 %vm9823_vm0, %v11003_v9 }
 0x793   : > { %15433 = vmatprep.mubr.msk.bf16.mxu1 %vm17435_vm11, %v17434_v51 }
 0x79a   : > { %15434 = vmatmul.mubr.msk.bf16.gmra.mrb[252].mxu1 %vm9823_vm0, %v11006_v16 }
 0x79b   : > { %15437 = vmatprep.mubr.msk.bf16.mxu1 %vm17435_vm11, %v17434_v51 }
 0x7a2   : > { %15438 = vmatmul.mubr.msk.bf16.gmra.mrb[0].mxu1 %vm9823_vm0, %v11009_v36 }
 0x7a3   : > { %15441 = vmatprep.mubr.msk.bf16.mxu1 %vm17435_vm11, %v17434_v51 }
 0x7aa   : > { %15442 = vmatmul.mubr.msk.bf16.gmra.mrb[4].mxu1 %vm9823_vm0, %v11012_v38  ;;  %v17041_v38 = vld [vmem:[%s20436_s5 + $0x30] ss:$8 sps:$4 sm:$0xff]  }
 0x7ab   : > { %15445 = vmatprep.mubr.msk.bf16.mxu1 %vm17435_vm11, %v17434_v51  ;;  %13189 = vmatpush1.bf16.msra.mxu1 %v17041_v38 }
 0x7b2   : > { %15446 = vmatmul.mubr.msk.bf16.gmra.mrb[8].mxu1 %vm9823_vm0, %v11015_v32 }
 0x7b3   : > { %15449 = vmatprep.mubr.msk.bf16.mxu1 %vm17435_vm11, %v17434_v51 }
 0x7b5   : > { %v15324_v22 = vpop.f32.mrb[200].mxu1 }
 0x7b6   : > { %v15325_v39 = vpop.f32.mrb[201].mxu1 }
 0x7b7   : > { %v19464_v24 = vadd.f32 %v15325_v39, %v15324_v22  ;;  %v15327_v60 = vpop.f32.mrb[202].mxu1  ;;  %v17046_v22 = vld [vmem:[%s20436_s5 + $0x44] ss:$8 sps:$4 sm:$0xff]  }
 0x7b8   : > { %v15328_v35 = vpop.f32.mrb[203].mxu1  ;;  %13190 = vmatprep.subr.bf16.mxu1 %v17046_v22 }
 0x7b9   : > { %v19466_v19 = vadd.f32 %v15328_v35, %v15327_v60  ;;  %v17044_v60 = vld [vmem:[%s20436_s5 + $0x40] ss:$8 sps:$4 sm:$0xff]  }
 0x7ba   : > { %15450 = vmatmul.mubr.msk.bf16.gmra.mrb[12].mxu1 %vm9823_vm0, %v11018_v17 }
 0x7bb   : > { %15453 = vmatprep.mubr.msk.bf16.mxu1 %vm17435_vm11, %v17434_v51  ;;  %13191 = vmatpush1.bf16.msra.mxu1 %v17044_v60 }
 0x7c1   : > { %v15330_v33 = vpop.f32.mrb[204].mxu1 }
 0x7c2   : > { %15454 = vmatmul.mubr.msk.bf16.gmra.mrb[16].mxu1 %vm9823_vm0, %v11021_v27  ;;  %v15331_v20 = vpop.f32.mrb[205].mxu1 }
 0x7c3   : > { %15457 = vmatprep.mubr.msk.bf16.mxu1 %vm17435_vm11, %v17434_v51  ;;  %v19474_v15 = vadd.f32 %v15331_v20, %v15330_v33  ;;  %v15333_v42 = vpop.f32.mrb[206].mxu1  ;;  %v19536_v20 = vld [vmem:[%s20435_s4] ss:$0 sm:$0xff] }
 0x7c4   : > { %v15334_v45 = vpop.f32.mrb[207].mxu1  ;;  %v11263_v40 = vadd.f32 %v19466_v19, %v19536_v20 }
 0x7c5   : > { %v19476_v50 = vadd.f32 %v15334_v45, %v15333_v42  ;;  %v11244_v42 = vadd.f32 %v19416_v53, %v19536_v20  ;;  %v11268_v38 = vadd.f32 %v19474_v15, %v19536_v20  ;;  %v17047_v15 = vld [vmem:[%s20436_s5 + $0x50] ss:$8 sps:$4 sm:$0xff]  }
 0x7ca   : > { %15458 = vmatmul.mubr.msk.bf16.gmra.mrb[20].mxu1 %vm9823_vm0, %v11024_v41  ;;  %vm11540_vm0 = vcmask 1040896  }
 0x7cb   : > { %vm19738_vm1 = vmand %vm11540_vm0, %vm11509_vm14 }
 0x7cc   : > { %v15336_v18 = vpop.f32.mrb[208].mxu1 }
 0x7cd   : > { %v15337_v25 = vpop.f32.mrb[209].mxu1 }
 0x7ce   : > { %v19479_v1 = vadd.f32 %v15337_v25, %v15336_v18  ;;  %v15339_v54 = vpop.f32.mrb[210].mxu1  ;;  %v11247_v25 = vadd.f32 %v19420_v57, %v19536_v20 }
 0x7cf   : > { %v15340_v2 = vpop.f32.mrb[211].mxu1 }
 0x7d0   : > { %v19481_v5 = vadd.f32 %v15340_v2, %v15339_v54 }
 0x7d4   : > { %v15342_v4 = vpop.f32.mrb[212].mxu1 }
 0x7d5   : > { %v15343_v59 = vpop.f32.mrb[213].mxu1 }
 0x7d6   : > { %v19483_v51 = vadd.f32 %v15343_v59, %v15342_v4  ;;  %v15345_v30 = vpop.f32.mrb[214].mxu1 }
 0x7d7   : > { %v15346_v11 = vpop.f32.mrb[215].mxu1 }
 0x7d8   : > { %v19485_v55 = vadd.f32 %v15346_v11, %v15345_v30  ;;  %v11252_v11 = vadd.f32 %v19436_v61, %v19536_v20 }
 0x7e0   : > { %v15348_v10 = vpop.f32.mrb[216].mxu1 }
 0x7e1   : > { %v15349_v48 = vpop.f32.mrb[217].mxu1 }
 0x7e2   : > { %v19487_v58 = vadd.f32 %v15349_v48, %v15348_v10  ;;  %v15351_v21 = vpop.f32.mrb[218].mxu1 }
 0x7e3   : > { %v15352_v8 = vpop.f32.mrb[219].mxu1 }
 0x7e4   : > { %v19489_v52 = vadd.f32 %v15352_v8, %v15351_v21  ;;  %v11255_v21 = vadd.f32 %v19438_v62, %v19536_v20 }
 0x812   : > { %v15354_v43 = vpop.f32.mrb[220].mxu1 }
 0x813   : > { %v15355_v26 = vpop.f32.mrb[221].mxu1 }
 0x814   : > { %v19491_v49 = vadd.f32 %v15355_v26, %v15354_v43  ;;  %v15357_v31 = vpop.f32.mrb[222].mxu1 }
 0x815   : > { %v15358_v44 = vpop.f32.mrb[223].mxu1 }
 0x816   : > { %v19493_v7 = vadd.f32 %v15358_v44, %v15357_v31  ;;  %v11260_v44 = vadd.f32 %v19464_v24, %v19536_v20 }
 0x833   : > { %v15360_v23 = vpop.f32.mrb[224].mxu1 }
 0x834   : > { %v15361_v47 = vpop.f32.mrb[225].mxu1 }
 0x835   : > { %v19504_v6 = vadd.f32 %v15361_v47, %v15360_v23  ;;  %v15363_v37 = vpop.f32.mrb[226].mxu1  ;;  %v17436_v47 = vmov 1966171168  }
 0x836   : > { %v15364_v0 = vpop.f32.mrb[227].mxu1  ;;  %v11516_v62 = vunpack.c.l.s4 %v17436_v47  ;;  %v17053_v47 = vld [vmem:[%s20436_s5 + $0x70] ss:$8 sps:$4 sm:$0xff]  }
 0x837   : > { %v19509_v56 = vadd.f32 %v15364_v0, %v15363_v37 }
 0x838   : > { %v11517_v24 = vunpack.c.0.s8 %v11516_v62 }
 0x83d   : > { %v15366_v3 = vpop.f32.mrb[228].mxu1 }
 0x83e   : > { %v15367_v9 = vpop.f32.mrb[229].mxu1 }
 0x83f   : > { %v19520_v16 = vadd.f32 %v15367_v9, %v15366_v3  ;;  %v15369_v36 = vpop.f32.mrb[230].mxu1 }
 0x840   : > { %v15370_v32 = vpop.f32.mrb[231].mxu1 }
 0x841   : > { %v19528_v39 = vadd.f32 %v15370_v32, %v15369_v36  ;;  %v19555_v36 = vshrl.u32 %v11518_v12, 7 }
 0x845   : > { %v15372_v35 = vpop.f32.mrb[232].mxu1 }
 0x846   : > { %v15373_v17 = vpop.f32.mrb[233].mxu1 }
 0x847   : > { %v15375_v27 = vpop.f32.mrb[234].mxu1  ;;  %v11271_v17 = vadd.f32 %v19476_v50, %v19536_v20  ;;  %v11511_v50 = vld [vmem:[#allocation6] sm:$0x1] }
 0x848   : > { %v15376_v33 = vpop.f32.mrb[235].mxu1 }
 0x84d   : > { %v11364_v45 = vpop.f32.mrb[236].mxu1 }
 0x84e   : > { %v11365_v41 = vadd.f32 %v11364_v45, %v11244_v42  ;;  %v15419_v18 = vpop.f32.mrb[237].mxu1  ;;  %v19563_v45 = vsub.s32 %v11517_v24, %v19555_v36 }
 0x84f   : > { %v11367_v54 = vpop.f32.mrb[238].mxu1 }
 0x850   : > { %v11451_v2 = vmax.f32 %v11365_v41, 0.0  ;;  %v11368_v4 = vadd.f32 %v11367_v54, %v11247_v25  ;;  %v15420_v59 = vpop.f32.mrb[239].mxu1  ;;  %v17049_v41 = vld [vmem:[%s20436_s5 + $0x54] ss:$8 sps:$4 sm:$0xff]  }
 0x851   : > { %13192 = vmatprep.subr.bf16.mxu1 %v17049_v41 }
 0x852   : > { %11474 = vst.msk [vmem:[#allocation5] sm:$0xff] %vm11473_vm12, %v11451_v2  ;;  %v11452_v30 = vmax.f32 %v11368_v4, 0.0  ;;  %v17052_v2 = vld [vmem:[%s20436_s5 + $0x64] ss:$8 sps:$4 sm:$0xff]   ;;  %13193 = vmatpush1.bf16.msra.mxu1 %v17047_v15  ;;  %v11287_v15 = vadd.f32 %v19485_v55, %v19536_v20 }
 0x853   : > { %13194 = vmatprep.subr.bf16.mxu1 %v17052_v2 }
 0x854   : > { %11475 = vst.msk [vmem:[#allocation5 + $0x8] sm:$0xff] %vm11473_vm12, %v11452_v30 }
 0x855   : > { %v11372_v53 = vpop.f32.mrb[240].mxu1 }
 0x856   : > { %v11373_v10 = vadd.f32 %v11372_v53, %v11252_v11  ;;  %v15423_v48 = vpop.f32.mrb[241].mxu1 }
 0x857   : > { %v11375_v57 = vpop.f32.mrb[242].mxu1  ;;  %v11562_v48 = vld [vmem:[#allocation6 + $0x2] sm:$0x1] }
 0x858   : > { %v11453_v8 = vmax.f32 %v11373_v10, 0.0  ;;  %v11376_v43 = vadd.f32 %v11375_v57, %v11255_v21  ;;  %v15424_v26 = vpop.f32.mrb[243].mxu1  ;;  %v17050_v10 = vld [vmem:[%s20436_s5 + $0x60] ss:$8 sps:$4 sm:$0xff]  }
 0x859   : > { %v11496_v13 = vld [vmem:[#allocation5] sm:$0xff]  ;;  %13195 = vmatpush1.bf16.msra.mxu1 %v17050_v10 }
 0x85a   : > { %11476 = vst.msk [vmem:[#allocation5 + $0x10] sm:$0xff] %vm11473_vm12, %v11453_v8  ;;  %v11454_v31 = vmax.f32 %v11376_v43, 0.0  ;;  %v17055_v43 = vld [vmem:[%s20436_s5 + $0x74] ss:$8 sps:$4 sm:$0xff]  }
 0x85b   : > { %v11497_v19 = vld [vmem:[#allocation5 + $0x8] sm:$0xff]  ;;  %13196 = vmatprep.subr.bf16.mxu1 %v17055_v43 }
 0x85c   : > { %11477 = vst.msk [vmem:[#allocation5 + $0x18] sm:$0xff] %vm11473_vm12, %v11454_v31  ;;  %v11276_v31 = vadd.f32 %v19479_v1, %v19536_v20 }
 0x85d   : > { %v11380_v23 = vpop.f32.mrb[244].mxu1  ;;  %13197 = vmatpush1.bf16.msra.mxu1 %v17053_v47 }
 0x85e   : > { %v11381_v61 = vadd.f32 %v11380_v23, %v11260_v44  ;;  %v15427_v63 = vpop.f32.mrb[245].mxu1 }
 0x85f   : > { %v11383_v37 = vpop.f32.mrb[246].mxu1 }
 0x860   : > { %v11455_v0 = vmax.f32 %v11381_v61, 0.0  ;;  %v11384_v14 = vadd.f32 %v11383_v37, %v11263_v40  ;;  %v15428_v28 = vpop.f32.mrb[247].mxu1  ;;  %v11547_v40 = vld [vmem:[#allocation6 + $0x1] sm:$0x1]  ;;  %v11279_v37 = vadd.f32 %v19481_v5, %v19536_v20 }
 0x861   : > { %v11499_v29 = vld [vmem:[#allocation5 + $0x10] sm:$0xff] }
 0x862   : > { %11478 = vst.msk [vmem:[#allocation5 + $0x20] sm:$0xff] %vm11473_vm12, %v11455_v0  ;;  %v11456_v3 = vmax.f32 %v11384_v14, 0.0  ;;  %v11501_v9 = vmax.f32 %v11496_v13, %v11499_v29 }
 0x863   : > { %v11500_v32 = vld [vmem:[#allocation5 + $0x18] sm:$0xff] }
 0x864   : > { %11479 = vst.msk [vmem:[#allocation5 + $0x28] sm:$0xff] %vm11473_vm12, %v11456_v3  ;;  %v11504_v22 = vrot.slane %v11501_v9, 1  ;;  %v11502_v60 = vmax.f32 %v11497_v19, %v11500_v32 }
 0x865   : > { %v11388_v35 = vpop.f32.mrb[248].mxu1 }
 0x866   : > { %v11389_v27 = vadd.f32 %v11388_v35, %v11268_v38  ;;  %v15431_v33 = vpop.f32.mrb[249].mxu1  ;;  %v11506_v42 = vmax.f32 %v11501_v9, %v11504_v22  ;;  %v11558_v18 = vrot.slane %v11502_v60, 1 }
 0x867   : > { %v11391_v25 = vpop.f32.mrb[250].mxu1 }
 0x868   : > { %v11457_v4 = vmax.f32 %v11389_v27, 0.0  ;;  %v11392_v59 = vadd.f32 %v11391_v25, %v11271_v17  ;;  %v15432_v30 = vpop.f32.mrb[251].mxu1  ;;  %v11507_v11 = vpack.c.bf16 %v11506_v42, %v11506_v42  ;;  %v11560_v53 = vmax.f32 %v11502_v60, %v11558_v18  ;;  %v17056_v25 = vld [vmem:[%s20436_s5 + $0x80] ss:$8 sps:$4 sm:$0xff]  }
 0x869   : > { %v11566_v24 = vld [vmem:[#allocation5 + $0x20] sm:$0xff]  ;;  %v11284_v60 = vadd.f32 %v19483_v51, %v19536_v20  ;;  %v17061_v51 = vld [vmem:[%s20436_s5 + $0x94] ss:$8 sps:$4 sm:$0xff]  }
 0x86a   : > { %11480 = vst.msk [vmem:[#allocation5 + $0x30] sm:$0xff] %vm11473_vm12, %v11457_v4  ;;  %v11458_v21 = vmax.f32 %v11392_v59, 0.0  ;;  %v11521_v57 = vrot.slane %v11507_v11, %v19563_v45  ;;  %v11512_v8 = vsel %vm19572_vm15, %v11507_v11, %v11511_v50  ;;  %v11561_v26 = vpack.c.bf16 %v11560_v53, %v11560_v53  ;;  %v17058_v50 = vld [vmem:[%s20436_s5 + $0x84] ss:$8 sps:$4 sm:$0xff]   ;;  %v17059_v53 = vld [vmem:[%s20436_s5 + $0x90] ss:$8 sps:$4 sm:$0xff]  }
 0x86b   : > { %11513 = vst [vmem:[#allocation6] sm:$0x1] %v11512_v8  ;;  %v11567_v32 = vld [vmem:[#allocation5 + $0x28] sm:$0xff]  ;;  %13198 = vmatprep.subr.bf16.mxu1 %v17058_v50  ;;  %v11292_v8 = vadd.f32 %v19487_v58, %v19536_v20  ;;  %v11295_v58 = vadd.f32 %v19489_v52, %v19536_v20  ;;  %v17070_v50 = vld [vmem:[%s20436_s5 + $0xc4] ss:$8 sps:$4 sm:$0xff]  }
 0x86c   : > { %11481 = vst.msk [vmem:[#allocation5 + $0x38] sm:$0xff] %vm11473_vm12, %v11458_v21  ;;  %v11522_v44 = vcombine.high %v11521_v57, %v11521_v57  ;;  %v11529_v23 = vrot.slane %v11521_v57, %v19563_v45  ;;  %v11563_v61 = vsel %vm19572_vm15, %v11561_v26, %v11562_v48  ;;  %13199 = vmatpush1.bf16.msra.mxu1 %v17056_v25  ;;  %v17064_v57 = vld [vmem:[%s20436_s5 + $0xa4] ss:$8 sps:$4 sm:$0xff]  }
 0x86d   : > { %v11396_v63 = vpop.f32.mrb[252].mxu1  ;;  %11564 = vst [vmem:[#allocation6 + $0x2] sm:$0x1] %v11563_v61  ;;  %13200 = vmatprep.subr.bf16.mxu1 %v17061_v51  ;;  %v17062_v61 = vld [vmem:[%s20436_s5 + $0xa0] ss:$8 sps:$4 sm:$0xff]  }
 0x86e   : > { %v11397_v62 = vadd.f32 %v11396_v63, %v11276_v31  ;;  %v15435_v12 = vpop.f32.mrb[253].mxu1  ;;  %v11536_v1 = vrot.slane %v11522_v44, %v19563_v45  ;;  %v11545_v0 = vcombine.high %v11529_v23, %v11529_v23  ;;  %v11608_v23 = vld [vmem:[#allocation6 + $0x3] sm:$0x1] }
 0x86f   : > { %v11399_v14 = vpop.f32.mrb[254].mxu1 }
 0x870   : > { %v11459_v28 = vmax.f32 %v11397_v62, 0.0  ;;  %v11400_v13 = vadd.f32 %v11399_v14, %v11279_v37  ;;  %v15436_v29 = vpop.f32.mrb[255].mxu1  ;;  %11537 = vrot.lane.b32.xlu0 %v11536_v1, %s17433_s22  ;;  %v11550_v3 = vcombine.high %v11536_v1, %v11536_v1  ;;  %v11548_v9 = vsel %vm19572_vm15, %v11545_v0, %v11547_v40  ;;  %13201 = vmatpush1.bf16.msra.mxu1 %v17059_v53  ;;  %v11620_v1 = vld [vmem:[#allocation6 + $0x4] sm:$0x1] }
 0x871   : > { %v11569_v38 = vld [vmem:[#allocation5 + $0x30] sm:$0xff]  ;;  %11549 = vst [vmem:[#allocation6 + $0x1] sm:$0x1] %v11548_v9  ;;  %13202 = vmatprep.subr.bf16.mxu1 %v17064_v57 }
 0x872   : > { %11482 = vst.msk [vmem:[#allocation5 + $0x40] sm:$0xff] %vm11473_vm12, %v11459_v28  ;;  %v11460_v5 = vmax.f32 %v11400_v13, 0.0  ;;  %11551 = vrot.lane.b32.xlu1 %v11550_v3, %s17433_s22  ;;  %v11571_v19 = vmax.f32 %v11566_v24, %v11569_v38 }
 0x873   : > { %v11570_v22 = vld [vmem:[#allocation5 + $0x38] sm:$0xff] }
 0x874   : > { %11483 = vst.msk [vmem:[#allocation5 + $0x48] sm:$0xff] %vm11473_vm12, %v11460_v5  ;;  %v11574_v35 = vrot.slane %v11571_v19, 1  ;;  %v11572_v17 = vmax.f32 %v11567_v32, %v11570_v22  ;;  %13203 = vmatpush1.bf16.msra.mxu1 %v17062_v61  ;;  %v11300_v32 = vadd.f32 %v19491_v49, %v19536_v20  ;;  %v11662_v49 = vld [vmem:[#allocation6 + $0x5] sm:$0x1]  ;;  %v11311_v61 = vadd.f32 %v19509_v56, %v19536_v20 }
 0x875   : > { %v11404_v27 = vpop.f32.mrb[0].mxu1 }
 0x876   : > { %v11405_v33 = vadd.f32 %v11404_v27, %v11284_v60  ;;  %v15439_v42 = vpop.f32.mrb[1].mxu1  ;;  %v11576_v41 = vmax.f32 %v11571_v19, %v11574_v35  ;;  %v11624_v18 = vrot.slane %v11572_v17, 1 }
 0x877   : > { %v11407_v2 = vpop.f32.mrb[2].mxu1 }
 0x878   : > { %v11461_v4 = vmax.f32 %v11405_v33, 0.0  ;;  %v11408_v59 = vadd.f32 %v11407_v2, %v11287_v15  ;;  %v15440_v30 = vpop.f32.mrb[3].mxu1  ;;  %v11577_v11 = vpack.c.bf16 %v11576_v41, %v11576_v41  ;;  %v11626_v55 = vmax.f32 %v11572_v17, %v11624_v18  ;;  %v17065_v15 = vld [vmem:[%s20436_s5 + $0xb0] ss:$8 sps:$4 sm:$0xff]   ;;  %v17067_v41 = vld [vmem:[%s20436_s5 + $0xb4] ss:$8 sps:$4 sm:$0xff]  }
 0x879   : > { %v11650_v3 = vld [vmem:[#allocation5 + $0x40] sm:$0xff]  ;;  %v11303_v33 = vadd.f32 %v19493_v7, %v19536_v20  ;;  %13204 = vmatprep.subr.bf16.mxu1 %v17067_v41 }
 0x87a   : > { %11484 = vst.msk [vmem:[#allocation5 + $0x50] sm:$0xff] %vm11473_vm12, %v11461_v4  ;;  %v11462_v10 = vmax.f32 %v11408_v59, 0.0  ;;  %v11585_v48 = vrot.slane %v11577_v11, %v19563_v45  ;;  %v11627_v21 = vpack.c.bf16 %v11626_v55, %v11626_v55  ;;  %13205 = vmatpush1.bf16.msra.mxu1 %v17065_v15  ;;  %v17068_v30 = vld [vmem:[%s20436_s5 + $0xc0] ss:$8 sps:$4 sm:$0xff]   ;;  %v11711_v11 = vld [vmem:[#allocation6 + $0x7] sm:$0x1] }
 0x87b   : > { %v11651_v5 = vld [vmem:[#allocation5 + $0x48] sm:$0xff]  ;;  %13206 = vmatprep.subr.bf16.mxu1 %v17070_v50 }
 0x87c   : > { %11485 = vst.msk [vmem:[#allocation5 + $0x58] sm:$0xff] %vm11473_vm12, %v11462_v10  ;;  %v11592_v43 = vrot.slane %v11585_v48, %v19563_v45  ;;  %v11599_v26 = vcombine.high %v11585_v48, %v11585_v48  ;;  %v11635_v31 = vrot.slane %v11627_v21, %v19563_v45  ;;  %v11308_v21 = vadd.f32 %v19504_v6, %v19536_v20 }
 0x87d   : > { %v11412_v44 = vpop.f32.mrb[4].mxu1 }
 0x87e   : > { %v11413_v63 = vadd.f32 %v11412_v44, %v11292_v8  ;;  %v15443_v40 = vpop.f32.mrb[5].mxu1  ;;  %v11606_v47 = vrot.slane %v11599_v26, %v19563_v45  ;;  %11593 = vrot.lane.b32.xlu0 %v11592_v43, %s17433_s22  ;;  %v11611_v62 = vcombine.high %v11592_v43, %v11592_v43  ;;  %v11642_v37 = vrot.slane %v11635_v31, %v19563_v45  ;;  %v11696_v31 = vld [vmem:[#allocation6 + $0x6] sm:$0x1] }
 0x87f   : > { %v11415_v12 = vpop.f32.mrb[6].mxu1  ;;  %13207 = vmatpush1.bf16.msra.mxu1 %v17068_v30 }
 0x880   : > { %v11463_v0 = vmax.f32 %v11413_v63, 0.0  ;;  %v11416_v14 = vadd.f32 %v11415_v12, %v11295_v58  ;;  %v15444_v28 = vpop.f32.mrb[7].mxu1  ;;  %11612 = vrot.lane.b32.xlu1 %v11611_v62, %s17433_s22  ;;  %v11609_v13 = vsel %vm19572_vm15, %v11606_v47, %v11608_v23  ;;  %v11618_v29 = vcombine.high %v11606_v47, %v11606_v47 }
 0x881   : > { %v11653_v9 = vld [vmem:[#allocation5 + $0x50] sm:$0xff]  ;;  %11610 = vst [vmem:[#allocation6 + $0x3] sm:$0x1] %v11609_v13 }
 0x882   : > { %11486 = vst.msk [vmem:[#allocation5 + $0x60] sm:$0xff] %vm11473_vm12, %v11463_v0  ;;  %v11464_v52 = vmax.f32 %v11416_v14, 0.0  ;;  %11643 = vrot.lane.b32.xlu0 %v11642_v37, %s17433_s22  ;;  %v11655_v24 = vmax.f32 %v11650_v3, %v11653_v9  ;;  %v11621_v38 = vsel %vm19572_vm15, %v11618_v29, %v11620_v1  ;;  %v17071_v28 = vld [vmem:[%s20436_s5 + $0xd0] ss:$8 sps:$4 sm:$0xff]   ;;  %v17073_v3 = vld [vmem:[%s20436_s5 + $0xd4] ss:$8 sps:$4 sm:$0xff]   ;;  %v11316_v9 = vadd.f32 %v19520_v16, %v19536_v20 }
 0x883   : > { %11622 = vst [vmem:[#allocation6 + $0x4] sm:$0x1] %v11621_v38  ;;  %v11654_v19 = vld [vmem:[#allocation5 + $0x58] sm:$0xff]  ;;  %13208 = vmatprep.subr.bf16.mxu1 %v17073_v3 }
 0x884   : > { %11487 = vst.msk [vmem:[#allocation5 + $0x68] sm:$0xff] %vm11473_vm12, %v11464_v52  ;;  %v11658_v22 = vrot.slane %v11655_v24, 1  ;;  %v11656_v60 = vmax.f32 %v11651_v5, %v11654_v19  ;;  %13209 = vmatpush1.bf16.msra.mxu1 %v17071_v28  ;;  %v17076_v16 = vld [vmem:[%s20436_s5 + $0xe4] ss:$8 sps:$4 sm:$0xff]  }
 0x885   : > { %v11420_v35 = vpop.f32.mrb[8].mxu1  ;;  %13210 = vmatprep.subr.bf16.mxu1 %v17076_v16  ;;  %v11596_v16 = vld [vmem:[#allocation6 + $0x2] sm:$0x1] }
 0x886   : > { %v11421_v17 = vadd.f32 %v11420_v35, %v11300_v32  ;;  %v15447_v27 = vpop.f32.mrb[9].mxu1  ;;  %v11660_v42 = vmax.f32 %v11655_v24, %v11658_v22  ;;  %v11707_v18 = vrot.slane %v11656_v60, 1  ;;  %v11319_v32 = vadd.f32 %v19528_v39, %v19536_v20  ;;  %v17074_v35 = vld [vmem:[%s20436_s5 + $0xe0] ss:$8 sps:$4 sm:$0xff]  }
 0x887   : > { %v11423_v25 = vpop.f32.mrb[10].mxu1  ;;  %v17079_v27 = vld [vmem:[%s20436_s5 + $0xf4] ss:$8 sps:$4 sm:$0xff]  }
 0x888   : > { %v11465_v2 = vmax.f32 %v11421_v17, 0.0  ;;  %v11424_v51 = vadd.f32 %v11423_v25, %v11303_v33  ;;  %v15448_v4 = vpop.f32.mrb[11].mxu1  ;;  %v11661_v7 = vpack.c.bf16 %v11660_v42, %v11660_v42  ;;  %v11709_v59 = vmax.f32 %v11656_v60, %v11707_v18  ;;  %13211 = vmatpush1.bf16.msra.mxu1 %v17074_v35 }
 0x889   : > { %v11715_v1 = vld [vmem:[#allocation5 + $0x60] sm:$0xff]  ;;  %13212 = vmatprep.subr.bf16.mxu1 %v17079_v27 }
 0x88a   : > { %11488 = vst.msk [vmem:[#allocation5 + $0x70] sm:$0xff] %vm11473_vm12, %v11465_v2  ;;  %v11466_v55 = vmax.f32 %v11424_v51, 0.0  ;;  %v11672_v53 = vrot.slane %v11661_v7, %v19563_v45  ;;  %v11663_v10 = vsel %vm19572_vm15, %v11661_v7, %v11662_v49  ;;  %v11710_v48 = vpack.c.bf16 %v11709_v59, %v11709_v59  ;;  %v17077_v49 = vld [vmem:[%s20436_s5 + $0xf0] ss:$8 sps:$4 sm:$0xff]   ;;  %v11757_v7 = vld [vmem:[#allocation6 + $0x8] sm:$0x1] }
 0x88b   : > { %11664 = vst [vmem:[#allocation6 + $0x5] sm:$0x1] %v11663_v10  ;;  %v11716_v13 = vld [vmem:[#allocation5 + $0x68] sm:$0xff]  ;;  %v11769_v10 = vld [vmem:[#allocation6 + $0x9] sm:$0x1] }
 0x88c   : > { %11489 = vst.msk [vmem:[#allocation5 + $0x78] sm:$0xff] %vm11473_vm12, %v11466_v55  ;;  %v11673_v57 = vcombine.high %v11672_v53, %v11672_v53  ;;  %v11680_v8 = vrot.slane %v11672_v53, %v19563_v45  ;;  %v11712_v43 = vsel %vm19572_vm15, %v11710_v48, %v11711_v11  ;;  %13213 = vmatpush1.bf16.msra.mxu1 %v17077_v49 }
 0x88d   : > { %v11428_v26 = vpop.f32.mrb[12].mxu1  ;;  %11713 = vst [vmem:[#allocation6 + $0x7] sm:$0x1] %v11712_v43 }
 0x88e   : > { %v11429_v44 = vadd.f32 %v11428_v26, %v11308_v21  ;;  %v15451_v23 = vpop.f32.mrb[13].mxu1  ;;  %v11687_v63 = vrot.slane %v11673_v57, %v19563_v45  ;;  %v11694_v40 = vcombine.high %v11680_v8, %v11680_v8  ;;  %v17082_v8 = vld [vmem:[%s20436_s5 + $0x104] ss:$8 sps:$4 sm:$0xff]  }
 0x88f   : > { %v11431_v47 = vpop.f32.mrb[14].mxu1  ;;  %13223 = vmatprep.subr.bf16.mxu1 %v17082_v8 }
 0x890   : > { %v11467_v6 = vmax.f32 %v11429_v44, 0.0  ;;  %v11432_v58 = vadd.f32 %v11431_v47, %v11311_v61  ;;  %v15452_v62 = vpop.f32.mrb[15].mxu1  ;;  %11688 = vrot.lane.b32.xlu1 %v11687_v63, %s17433_s22  ;;  %v11699_v12 = vcombine.high %v11687_v63, %v11687_v63  ;;  %v11697_v37 = vsel %vm19572_vm15, %v11694_v40, %v11696_v31 }
 0x891   : > { %v11718_v0 = vld [vmem:[#allocation5 + $0x70] sm:$0xff]  ;;  %11698 = vst [vmem:[#allocation6 + $0x6] sm:$0x1] %v11697_v37  ;;  %v11860_v37 = vld [vmem:[#allocation6 + $0xc] sm:$0x1] }
 0x892   : > { %11490 = vst.msk [vmem:[#allocation5 + $0x80] sm:$0xff] %vm11473_vm12, %v11467_v6  ;;  %v11468_v14 = vmax.f32 %v11432_v58, 0.0  ;;  %11700 = vrot.lane.b32.xlu0 %v11699_v12, %s17433_s22  ;;  %v11720_v56 = vmax.f32 %v11715_v1, %v11718_v0  ;;  %v11811_v58 = vld [vmem:[#allocation6 + $0xa] sm:$0x1] }
 0x893   : > { %v11719_v29 = vld [vmem:[#allocation5 + $0x78] sm:$0xff] }
 0x894   : > { %11491 = vst.msk [vmem:[#allocation5 + $0x88] sm:$0xff] %vm11473_vm12, %v11468_v14  ;;  %v11723_v52 = vrot.slane %v11720_v56, 1  ;;  %v11721_v24 = vmax.f32 %v11716_v13, %v11719_v29  ;;  %v11845_v29 = vld [vmem:[#allocation6 + $0xb] sm:$0x1] }
 0x895   : > { %v11436_v38 = vpop.f32.mrb[16].mxu1 }
 0x896   : > { %v11437_v5 = vadd.f32 %v11436_v38, %v11316_v9  ;;  %v15455_v19 = vpop.f32.mrb[17].mxu1  ;;  %v11725_v22 = vmax.f32 %v11720_v56, %v11723_v52  ;;  %v11773_v60 = vrot.slane %v11721_v24, 1  ;;  %v16449_v38 = vpack.i.bf16 %v19133_v34, %v19128_v46 }
 0x897   : > { %v11439_v17 = vpop.f32.mrb[18].mxu1 }
 0x898   : > { %v11469_v33 = vmax.f32 %v11437_v5, 0.0  ;;  %v11440_v42 = vadd.f32 %v11439_v17, %v11319_v32  ;;  %v15456_v15 = vpop.f32.mrb[19].mxu1  ;;  %v11726_v39 = vpack.c.bf16 %v11725_v22, %v11725_v22  ;;  %v11775_v20 = vmax.f32 %v11721_v24, %v11773_v60  ;;  %v11542_v32 = vld [vmem:[#allocation6] sm:$0x1]  ;;  %v11554_v22 = vld [vmem:[#allocation6 + $0x1] sm:$0x1] }
 0x899   : > { %v11799_v43 = vld [vmem:[#allocation5 + $0x80] sm:$0xff]  ;;  %v17103_v5 = vld [vmem:[%s20436_s5 + $0x174] ss:$8 sps:$4 sm:$0xff]  }
 0x89a   : > { %11492 = vst.msk [vmem:[#allocation5 + $0x90] sm:$0xff] %vm11473_vm12, %v11469_v33  ;;  %v11470_v41 = vmax.f32 %v11440_v42, 0.0  ;;  %v11734_v18 = vrot.slane %v11726_v39, %v19563_v45  ;;  %v11776_v25 = vpack.c.bf16 %v11775_v20, %v11775_v20  ;;  %v11615_v33 = vld [vmem:[#allocation6 + $0x3] sm:$0x1]  ;;  %v11646_v39 = vld [vmem:[#allocation6 + $0x4] sm:$0x1] }
 0x89b   : > { %v11800_v23 = vld [vmem:[#allocation5 + $0x88] sm:$0xff] }
 0x89c   : > { %11493 = vst.msk [vmem:[#allocation5 + $0x98] sm:$0xff] %vm11473_vm12, %v11470_v41  ;;  %v11741_v50 = vrot.slane %v11734_v18, %v19563_v45  ;;  %v11748_v2 = vcombine.high %v11734_v18, %v11734_v18  ;;  %v11784_v51 = vrot.slane %v11776_v25, %v19563_v45  ;;  %v11691_v18 = vld [vmem:[#allocation6 + $0x5] sm:$0x1] }
 0x89d   : > { %v11444_v4 = vpop.f32.mrb[20].mxu1 }
 0x89e   : > { %v15459_v59 = vpop.f32.mrb[21].mxu1  ;;  %v11755_v30 = vrot.slane %v11748_v2, %v19563_v45  ;;  %11742 = vrot.lane.b32.xlu1 %v11741_v50, %s17433_s22  ;;  %v11760_v11 = vcombine.high %v11741_v50, %v11741_v50  ;;  %v11791_v53 = vrot.slane %v11784_v51, %v19563_v45  ;;  %v11703_v50 = vld [vmem:[#allocation6 + $0x6] sm:$0x1]  ;;  %v11745_v4 = vld [vmem:[#allocation6 + $0x7] sm:$0x1] }
 0x89f   : > { %v11447_v55 = vpop.f32.mrb[22].mxu1 }
 0x8a0   : > { %v15460_v48 = vpop.f32.mrb[23].mxu1  ;;  %11761 = vrot.lane.b32.xlu0 %v11760_v11, %s17433_s22  ;;  %v11758_v21 = vsel %vm19572_vm15, %v11755_v30, %v11757_v7  ;;  %v11767_v57 = vcombine.high %v11755_v30, %v11755_v30 }
 0x8a1   : > { %v11802_v26 = vld [vmem:[#allocation5 + $0x90] sm:$0xff]  ;;  %11759 = vst [vmem:[#allocation6 + $0x8] sm:$0x1] %v11758_v21 }
 0x8a2   : > { %11792 = vrot.lane.b32.xlu1 %v11791_v53, %s17433_s22  ;;  %v11804_v31 = vmax.f32 %v11799_v43, %v11802_v26  ;;  %v11770_v44 = vsel %vm19572_vm15, %v11767_v57, %v11769_v10  ;;  %v17080_v26 = vld [vmem:[%s20436_s5 + $0x100] ss:$8 sps:$4 sm:$0xff]  }
 0x8a3   : > { %v11803_v61 = vld [vmem:[#allocation5 + $0x98] sm:$0xff]  ;;  %11771 = vst [vmem:[#allocation6 + $0x9] sm:$0x1] %v11770_v44  ;;  %v17085_v44 = vld [vmem:[%s20436_s5 + $0x114] ss:$8 sps:$4 sm:$0xff]  }
 0x8a4   : > { %v11805_v63 = vmax.f32 %v11800_v23, %v11803_v61  ;;  %v11807_v40 = vrot.slane %v11804_v31, 1 }
 0x8a6   : > { %v11856_v47 = vrot.slane %v11805_v63, 1  ;;  %v11809_v6 = vmax.f32 %v11804_v31, %v11807_v40  ;;  %v17083_v40 = vld [vmem:[%s20436_s5 + $0x110] ss:$8 sps:$4 sm:$0xff]  }
 0x8a8   : > { %v11858_v62 = vmax.f32 %v11805_v63, %v11856_v47  ;;  %v11810_v12 = vpack.c.bf16 %v11809_v6, %v11809_v6  ;;  %v11764_v30 = vld [vmem:[#allocation6 + $0x8] sm:$0x1]  ;;  %v17088_v6 = vld [vmem:[%s20436_s5 + $0x124] ss:$8 sps:$4 sm:$0xff]  }
 0x8aa   : > { %v11859_v1 = vpack.c.bf16 %v11858_v62, %v11858_v62  ;;  %v11821_v0 = vrot.slane %v11810_v12, %v19563_v45  ;;  %v11812_v14 = vsel %vm19572_vm15, %v11810_v12, %v11811_v58  ;;  %v11795_v53 = vld [vmem:[#allocation6 + $0x9] sm:$0x1] }
 0x8ab   : > { %11813 = vst [vmem:[#allocation6 + $0xa] sm:$0x1] %v11812_v14 }
 0x8ac   : > { %v11822_v56 = vcombine.high %v11821_v0, %v11821_v0  ;;  %v11829_v28 = vrot.slane %v11821_v0, %v19563_v45  ;;  %v11861_v13 = vsel %vm19572_vm15, %v11859_v1, %v11860_v37  ;;  %v17086_v1 = vld [vmem:[%s20436_s5 + $0x120] ss:$8 sps:$4 sm:$0xff]  }
 0x8ad   : > { %11862 = vst [vmem:[#allocation6 + $0xc] sm:$0x1] %v11861_v13 }
 0x8ae   : > { %v11836_v3 = vrot.slane %v11822_v56, %v19563_v45  ;;  %v11843_v9 = vcombine.high %v11829_v28, %v11829_v28  ;;  %v17091_v56 = vld [vmem:[%s20436_s5 + $0x134] ss:$8 sps:$4 sm:$0xff]  }
 0x8b0   : > { %11837 = vrot.lane.b32.xlu0 %v11836_v3, %s17433_s22  ;;  %v11848_v52 = vcombine.high %v11836_v3, %v11836_v3  ;;  %v11846_v24 = vsel %vm19572_vm15, %v11843_v9, %v11845_v29  ;;  %v17089_v29 = vld [vmem:[%s20436_s5 + $0x130] ss:$8 sps:$4 sm:$0xff]   ;;  %v17094_v9 = vld [vmem:[%s20436_s5 + $0x144] ss:$8 sps:$4 sm:$0xff]  }
 0x8b1   : > { %11847 = vst [vmem:[#allocation6 + $0xb] sm:$0x1] %v11846_v24  ;;  %v17100_v24 = vld [vmem:[%s20436_s5 + $0x164] ss:$8 sps:$4 sm:$0xff]  }
 0x8b2   : > { %11849 = vrot.lane.b32.xlu1 %v11848_v52, %s17433_s22  ;;  %v11840_v61 = vld [vmem:[#allocation6 + $0xa] sm:$0x1]  ;;  %v17095_v52 = vld [vmem:[%s20436_s5 + $0x150] ss:$8 sps:$4 sm:$0xff]  }
 0x8b4   : > { %16450 = vrot.lane.b32.xlu0 %v16449_v38, %s17431_s17  ;;  %v17098_v38 = vld [vmem:[%s20436_s5 + $0x160] ss:$8 sps:$4 sm:$0xff]  }
 0x8b8   : > { %v11852_v58 = vld [vmem:[#allocation6 + $0xb] sm:$0x1] }
 0x8e2   : > { %v11538_v19 = vpop.permute.xlu0 %11537 }
 0x8e3   : > { %v11543_v54 = vsel %vm19738_vm1, %v11538_v19, %v11542_v32  ;;  %v17101_v19 = vld [vmem:[%s20436_s5 + $0x170] ss:$8 sps:$4 sm:$0xff]   ;;  %v17106_v32 = vld [vmem:[%s20436_s5 + $0x184] ss:$8 sps:$4 sm:$0xff]  }
 0x8e4   : > { %11544 = vst [vmem:[#allocation6] sm:$0x1] %v11543_v54  ;;  %v11552_v60 = vpop.permute.xlu1 %11551  ;;  %v17104_v54 = vld [vmem:[%s20436_s5 + $0x180] ss:$8 sps:$4 sm:$0xff]  }
 0x8e5   : > { %v11555_v35 = vsel %vm19738_vm1, %v11552_v60, %v11554_v22  ;;  %v17109_v22 = vld [vmem:[%s20436_s5 + $0x194] ss:$8 sps:$4 sm:$0xff]   ;;  %v17107_v60 = vld [vmem:[%s20436_s5 + $0x190] ss:$8 sps:$4 sm:$0xff]  }
 0x8e6   : > { %11556 = vst [vmem:[#allocation6 + $0x1] sm:$0x1] %v11555_v35  ;;  %v17112_v35 = vld [vmem:[%s20436_s5 + $0x1a4] ss:$8 sps:$4 sm:$0xff]  }
 0x8f0   : > { %v11594_v17 = vpop.permute.xlu0 %11593 }
 0x8f1   : > { %v11597_v27 = vsel %vm19738_vm1, %v11594_v17, %v11596_v16  ;;  %v17110_v16 = vld [vmem:[%s20436_s5 + $0x1a0] ss:$8 sps:$4 sm:$0xff]   ;;  %v17115_v17 = vld [vmem:[%s20436_s5 + $0x1b4] ss:$8 sps:$4 sm:$0xff]  }
 0x8f2   : > { %11598 = vst [vmem:[#allocation6 + $0x2] sm:$0x1] %v11597_v27  ;;  %v11613_v42 = vpop.permute.xlu1 %11612  ;;  %v17113_v27 = vld [vmem:[%s20436_s5 + $0x1b0] ss:$8 sps:$4 sm:$0xff]  }
 0x8f3   : > { %v11616_v15 = vsel %vm19738_vm1, %v11613_v42, %v11615_v33  ;;  %v17118_v33 = vld [vmem:[%s20436_s5 + $0x1c4] ss:$8 sps:$4 sm:$0xff]   ;;  %v17116_v42 = vld [vmem:[%s20436_s5 + $0x1c0] ss:$8 sps:$4 sm:$0xff]  }
 0x8f4   : > { %11617 = vst [vmem:[#allocation6 + $0x3] sm:$0x1] %v11616_v15  ;;  %v11644_v20 = vpop.permute.xlu0 %11643  ;;  %v17121_v15 = vld [vmem:[%s20436_s5 + $0x1d4] ss:$8 sps:$4 sm:$0xff]  }
 0x8f5   : > { %v11647_v41 = vsel %vm19738_vm1, %v11644_v20, %v11646_v39  ;;  %v17119_v39 = vld [vmem:[%s20436_s5 + $0x1d0] ss:$8 sps:$4 sm:$0xff]   ;;  %v17124_v20 = vld [vmem:[%s20436_s5 + $0x1e4] ss:$8 sps:$4 sm:$0xff]  }
 0x8f6   : > { %11648 = vst [vmem:[#allocation6 + $0x4] sm:$0x1] %v11647_v41 }
 0x902   : > { %v11689_v25 = vpop.permute.xlu1 %11688 }
 0x903   : > { %v11692_v49 = vsel %vm19738_vm1, %v11689_v25, %v11691_v18  ;;  %v17122_v18 = vld [vmem:[%s20436_s5 + $0x1e0] ss:$8 sps:$4 sm:$0xff]   ;;  %v17127_v25 = vld [vmem:[%s20436_s5 + $0x1f4] ss:$8 sps:$4 sm:$0xff]  }
 0x904   : > { %11693 = vst [vmem:[#allocation6 + $0x5] sm:$0x1] %v11692_v49  ;;  %v11701_v2 = vpop.permute.xlu0 %11700 }
 0x905   : > { %v11704_v51 = vsel %vm19738_vm1, %v11701_v2, %v11703_v50  ;;  %v17125_v50 = vld [vmem:[%s20436_s5 + $0x1f0] ss:$8 sps:$4 sm:$0xff]   ;;  %v17130_v2 = vld [vmem:[%s20436_s5 + $0x204] ss:$8 sps:$4 sm:$0xff]  }
 0x906   : > { %11705 = vst [vmem:[#allocation6 + $0x6] sm:$0x1] %v11704_v51 }
 0x910   : > { %v11743_v7 = vpop.permute.xlu1 %11742 }
 0x911   : > { %v11746_v59 = vsel %vm19738_vm1, %v11743_v7, %v11745_v4  ;;  %v17128_v4 = vld [vmem:[%s20436_s5 + $0x200] ss:$8 sps:$4 sm:$0xff]  }
 0x912   : > { %11747 = vst [vmem:[#allocation6 + $0x7] sm:$0x1] %v11746_v59  ;;  %v11762_v11 = vpop.permute.xlu0 %11761  ;;  %v17133_v59 = vld [vmem:[%s20436_s5 + $0x214] ss:$8 sps:$4 sm:$0xff]  }
 0x913   : > { %v11765_v55 = vsel %vm19738_vm1, %v11762_v11, %v11764_v30  ;;  %v17131_v11 = vld [vmem:[%s20436_s5 + $0x210] ss:$8 sps:$4 sm:$0xff]  }
 0x914   : > { %11766 = vst [vmem:[#allocation6 + $0x8] sm:$0x1] %v11765_v55  ;;  %v11793_v10 = vpop.permute.xlu1 %11792  ;;  %v17136_v55 = vld [vmem:[%s20436_s5 + $0x224] ss:$8 sps:$4 sm:$0xff]  }
 0x915   : > { %v11796_v48 = vsel %vm19738_vm1, %v11793_v10, %v11795_v53  ;;  %v17134_v53 = vld [vmem:[%s20436_s5 + $0x220] ss:$8 sps:$4 sm:$0xff]   ;;  %v17139_v10 = vld [vmem:[%s20436_s5 + $0x234] ss:$8 sps:$4 sm:$0xff]  }
 0x916   : > { %11797 = vst [vmem:[#allocation6 + $0x9] sm:$0x1] %v11796_v48  ;;  %v17137_v48 = vld [vmem:[%s20436_s5 + $0x230] ss:$8 sps:$4 sm:$0xff]  }
 0x919   : > { %v19762_v21 = vld [vmem:[#allocation6] sm:$0xff] }
 0x91a   : > { %v12075_v57 = vrot.slane %v19762_v21, %v19563_v45  ;;  %v12068_v41 = vcombine.high %v19762_v21, %v19762_v21  ;;  %v17142_v21 = vld [vmem:[%s20436_s5 + $0x244] ss:$8 sps:$4 sm:$0xff]  }
 0x91c   : > { %v12083_v8 = vcombine.high %v12075_v57, %v12075_v57  ;;  %v19771_v31 = vrot.slane %v12075_v57, %v19563_v45  ;;  %v19871_v49 = vrot.slane %v12068_v41, %v19563_v45  ;;  %v17140_v57 = vld [vmem:[%s20436_s5 + $0x240] ss:$8 sps:$4 sm:$0xff]   ;;  %v17203_v41 = vld [vmem:[%s20436_s5 + $0x390] ss:$8 sps:$4 sm:$0xff]  }
 0x91e   : > { %v12105_v43 = vrot.slane %v12083_v8, %v19563_v45  ;;  %v12084_v51 = vcombine.high %v19871_v49, %v19871_v49  ;;  %v12113_v7 = vcombine.high %v19771_v31, %v19771_v31  ;;  %v17145_v8 = vld [vmem:[%s20436_s5 + $0x254] ss:$8 sps:$4 sm:$0xff]  }
 0x920   : > { %13214 = vmatprep.mubr.bf16.mxu1 %v12105_v43  ;;  %v12115_v23 = vcombine.high %v12105_v43, %v12105_v43  ;;  %v19890_v30 = vrot.slane %v12084_v51, %v19563_v45  ;;  %v17143_v43 = vld [vmem:[%s20436_s5 + $0x250] ss:$8 sps:$4 sm:$0xff]   ;;  %v17212_v51 = vld [vmem:[%s20436_s5 + $0x3c0] ss:$8 sps:$4 sm:$0xff]  }
 0x921   : > { %13215 = vmatmul.mubr.bf16.vlgmr.msra.gmra.mrb[24].mxu1 %v19771_v31  ;;  %v17146_v31 = vld [vmem:[%s20436_s5 + $0x260] ss:$8 sps:$4 sm:$0xff]  }
 0x922   : > { %13224 = vmatpush1.bf16.msra.mxu1 %v17080_v26  ;;  %v11838_v63 = vpop.permute.xlu0 %11837  ;;  %13255 = vmatprep.mubr.bf16.mxu1 %v12115_v23  ;;  %v17148_v26 = vld [vmem:[%s20436_s5 + $0x264] ss:$8 sps:$4 sm:$0xff]   ;;  %v17149_v23 = vld [vmem:[%s20436_s5 + $0x270] ss:$8 sps:$4 sm:$0xff]  }
 0x923   : > { %v11841_v47 = vsel %vm19738_vm1, %v11838_v63, %v11840_v61  ;;  %13225 = vmatprep.subr.bf16.mxu1 %v17085_v44  ;;  %v17151_v44 = vld [vmem:[%s20436_s5 + $0x274] ss:$8 sps:$4 sm:$0xff]   ;;  %v17154_v61 = vld [vmem:[%s20436_s5 + $0x284] ss:$8 sps:$4 sm:$0xff]   ;;  %v17152_v63 = vld [vmem:[%s20436_s5 + $0x280] ss:$8 sps:$4 sm:$0xff]  }
 0x924   : > { %11842 = vst [vmem:[#allocation6 + $0xa] sm:$0x1] %v11841_v47  ;;  %v11850_v62 = vpop.permute.xlu1 %11849  ;;  %v17155_v47 = vld [vmem:[%s20436_s5 + $0x290] ss:$8 sps:$4 sm:$0xff]  }
 0x925   : > { %v11853_v12 = vsel %vm19738_vm1, %v11850_v62, %v11852_v58  ;;  %v17158_v58 = vld [vmem:[%s20436_s5 + $0x2a0] ss:$8 sps:$4 sm:$0xff]   ;;  %v17163_v62 = vld [vmem:[%s20436_s5 + $0x2b4] ss:$8 sps:$4 sm:$0xff]  }
 0x926   : > { %11854 = vst [vmem:[#allocation6 + $0xb] sm:$0x1] %v11853_v12  ;;  %13226 = vmatpush1.bf16.msra.mxu1 %v17083_v40  ;;  %v16451_v37 = vpop.permute.xlu0 %16450  ;;  %v17157_v40 = vld [vmem:[%s20436_s5 + $0x294] ss:$8 sps:$4 sm:$0xff]   ;;  %v17161_v12 = vld [vmem:[%s20436_s5 + $0x2b0] ss:$8 sps:$4 sm:$0xff]  }
 0x927   : > { %v16453_v0 = vunpack.i.h.bf16 %v16451_v37  ;;  %v16452_v14 = vunpack.i.l.bf16 %v16451_v37  ;;  %13227 = vmatprep.subr.bf16.mxu1 %v17088_v6  ;;  %v17160_v6 = vld [vmem:[%s20436_s5 + $0x2a4] ss:$8 sps:$4 sm:$0xff]  }
 0x928   : > { %v17166_v37 = vld [vmem:[%s20436_s5 + $0x2c4] ss:$8 sps:$4 sm:$0xff]  }
 0x929   : > { %v10016_v28 = vmax.f32 %v19133_v34, %v16453_v0  ;;  %v10015_v13 = vmax.f32 %v19128_v46, %v16452_v14  ;;  %v17092_v34 = vld [vmem:[%s20436_s5 + $0x140] ss:$8 sps:$4 sm:$0xff]   ;;  %v17097_v46 = vld [vmem:[%s20436_s5 + $0x154] ss:$8 sps:$4 sm:$0xff]   ;;  %v17167_v14 = vld [vmem:[%s20436_s5 + $0x2d0] ss:$8 sps:$4 sm:$0xff]  }
 0x92a   : > { %13228 = vmatpush1.bf16.msra.mxu1 %v17086_v1  ;;  %v17164_v1 = vld [vmem:[%s20436_s5 + $0x2c0] ss:$8 sps:$4 sm:$0xff]   ;;  %v17169_v0 = vld [vmem:[%s20436_s5 + $0x2d4] ss:$8 sps:$4 sm:$0xff]  }
 0x92b   : > { %v10028_v3 = vpack.c.bf16 %v10016_v28, %v10015_v13  ;;  %13229 = vmatprep.subr.bf16.mxu1 %v17091_v56  ;;  %v17172_v56 = vld [vmem:[%s20436_s5 + $0x2e4] ss:$8 sps:$4 sm:$0xff]   ;;  %v17170_v28 = vld [vmem:[%s20436_s5 + $0x2e0] ss:$8 sps:$4 sm:$0xff]   ;;  %v17175_v13 = vld [vmem:[%s20436_s5 + $0x2f4] ss:$8 sps:$4 sm:$0xff]  }
 0x92d   : > { %10076 = vrot.lane.b32.xlu1 %v10028_v3, %s17431_s17  ;;  %v17178_v3 = vld [vmem:[%s20436_s5 + $0x304] ss:$8 sps:$4 sm:$0xff]   ;;  %s324_s17 = scalar_lea.vmem [#allocation7], %s323_s27 }
 0x92e   : > { %13230 = vmatpush1.bf16.msra.mxu1 %v17089_v29  ;;  %v17173_v29 = vld [vmem:[%s20436_s5 + $0x2f0] ss:$8 sps:$4 sm:$0xff]   ;;  %s13657_s14 = sshll.u32 %s324_s17, 4  ;;  %s20391_s14 = int_to_ptr.vmem [resolvable:$true] %s13657_s14 }
 0x92f   : > { %13231 = vmatprep.subr.bf16.mxu1 %v17094_v9  ;;  %v17176_v9 = vld [vmem:[%s20436_s5 + $0x300] ss:$8 sps:$4 sm:$0xff]   ;;  %s17366_s13 = scalar_lea.vmem %s20391_s14, 16  ;;  %p17373_p0 = scmp.lt.s32.totalorder %s20391_s14, %s17371_s26 }
 0x930   : > { %p17367_p11 = scmp.ne.s32.totalorder %s20391_s14, %s17366_s13  ;;  %p17374_p1 = scmp.lt.s32.totalorder %s17372_s28, %s17366_s13 }
 0x932   : > { %13232 = vmatpush1.bf16.msra.mxu1 %v17092_v34  ;;  %v19988_v34 = vrot.slane %v19871_v49, %v19563_v45  ;;  %v17211_v49 = vld [vmem:[%s20436_s5 + $0x3b4] ss:$8 sps:$4 sm:$0xff]   ;;  %p17368_p12 = pnand %p17367_p11, %p17526_p5  ;;  %p17375_p2 = por %p17374_p1, %p17373_p0 }
 0x933   : > { %13233 = vmatprep.subr.bf16.mxu1 %v17097_v46 }
 0x934   : > { %p17369_p13 = pneg %p17368_p12 }
 0x936   : > { %13234 = vmatpush1.bf16.msra.mxu1 %v17095_v52  ;;  %v17181_v52 = vld [vmem:[%s20436_s5 + $0x314] ss:$8 sps:$4 sm:$0xff]   ;;  %p17376_p3 = pnand %p17375_p2, %p17369_p13 }
 0x937   : > { %13235 = vmatprep.subr.bf16.mxu1 %v17100_v24  ;;  %v12116_v24 = vcombine.high %v19890_v30, %v19890_v30 }
 0x93a   : > { %13236 = vmatpush1.bf16.msra.mxu1 %v17098_v38  ;;  %v17179_v38 = vld [vmem:[%s20436_s5 + $0x310] ss:$8 sps:$4 sm:$0xff]  }
 0x93b   : > { %13237 = vmatprep.subr.bf16.mxu1 %v17103_v5  ;;  %v17184_v5 = vld [vmem:[%s20436_s5 + $0x324] ss:$8 sps:$4 sm:$0xff]  }
 0x93e   : > { %13238 = vmatpush1.bf16.msra.mxu1 %v17101_v19  ;;  %v17182_v19 = vld [vmem:[%s20436_s5 + $0x320] ss:$8 sps:$4 sm:$0xff]  }
 0x93f   : > { %13239 = vmatprep.subr.bf16.mxu1 %v17106_v32  ;;  %v17187_v32 = vld [vmem:[%s20436_s5 + $0x334] ss:$8 sps:$4 sm:$0xff]  }
 0x942   : > { %13240 = vmatpush1.bf16.msra.mxu1 %v17104_v54  ;;  %v17185_v54 = vld [vmem:[%s20436_s5 + $0x330] ss:$8 sps:$4 sm:$0xff]  }
 0x943   : > { %13241 = vmatprep.subr.bf16.mxu1 %v17109_v22  ;;  %v17190_v22 = vld [vmem:[%s20436_s5 + $0x344] ss:$8 sps:$4 sm:$0xff]  }
 0x946   : > { %13242 = vmatpush1.bf16.msra.mxu1 %v17107_v60  ;;  %v17188_v60 = vld [vmem:[%s20436_s5 + $0x340] ss:$8 sps:$4 sm:$0xff]  }
 0x947   : > { %13243 = vmatprep.subr.bf16.mxu1 %v17112_v35  ;;  %v17193_v35 = vld [vmem:[%s20436_s5 + $0x354] ss:$8 sps:$4 sm:$0xff]  }
 0x94a   : > { %13244 = vmatpush1.bf16.msra.mxu1 %v17110_v16  ;;  %v17191_v16 = vld [vmem:[%s20436_s5 + $0x350] ss:$8 sps:$4 sm:$0xff]  }
 0x94b   : > { %13245 = vmatprep.subr.bf16.mxu1 %v17115_v17  ;;  %v17196_v17 = vld [vmem:[%s20436_s5 + $0x364] ss:$8 sps:$4 sm:$0xff]  }
 0x94e   : > { %13246 = vmatpush1.bf16.msra.mxu1 %v17113_v27  ;;  %v17194_v27 = vld [vmem:[%s20436_s5 + $0x360] ss:$8 sps:$4 sm:$0xff]  }
 0x94f   : > { %13247 = vmatprep.subr.bf16.mxu1 %v17118_v33  ;;  %v17199_v33 = vld [vmem:[%s20436_s5 + $0x374] ss:$8 sps:$4 sm:$0xff]  }
 0x952   : > { %13248 = vmatpush1.bf16.msra.mxu1 %v17116_v42  ;;  %v17197_v42 = vld [vmem:[%s20436_s5 + $0x370] ss:$8 sps:$4 sm:$0xff]  }
 0x953   : > { %13249 = vmatprep.subr.bf16.mxu1 %v17121_v15  ;;  %v17202_v15 = vld [vmem:[%s20436_s5 + $0x384] ss:$8 sps:$4 sm:$0xff]  }
 0x956   : > { %13250 = vmatpush1.bf16.msra.mxu1 %v17119_v39  ;;  %v17200_v39 = vld [vmem:[%s20436_s5 + $0x380] ss:$8 sps:$4 sm:$0xff]  }
 0x957   : > { %13251 = vmatprep.subr.bf16.mxu1 %v17124_v20  ;;  %v17205_v20 = vld [vmem:[%s20436_s5 + $0x394] ss:$8 sps:$4 sm:$0xff]  }
 0x95a   : > { %13252 = vmatpush1.bf16.msra.mxu1 %v17122_v18  ;;  %v17208_v18 = vld [vmem:[%s20436_s5 + $0x3a4] ss:$8 sps:$4 sm:$0xff]  }
 0x95b   : > { %13253 = vmatprep.subr.bf16.mxu1 %v17127_v25  ;;  %v17206_v25 = vld [vmem:[%s20436_s5 + $0x3a0] ss:$8 sps:$4 sm:$0xff]  }
 0x95e   : > { %13254 = vmatpush1.bf16.msra.mxu1 %v17125_v50  ;;  %v17209_v50 = vld [vmem:[%s20436_s5 + $0x3b0] ss:$8 sps:$4 sm:$0xff]  }
 0x95f   : > { %13264 = vmatprep.subr.bf16.mxu1 %v17130_v2  ;;  %v17214_v2 = vld [vmem:[%s20436_s5 + $0x3c4] ss:$8 sps:$4 sm:$0xff]  }
 0x961   : > { %13256 = vmatmul.mubr.bf16.vlgmr.msra.gmra.mrb[24].mxu1 %v12113_v7  ;;  %v17215_v7 = vld [vmem:[%s20436_s5 + $0x3d0] ss:$8 sps:$4 sm:$0xff]  }
 0x962   : > { %13265 = vmatpush1.bf16.msra.mxu1 %v17128_v4  ;;  %13296 = vmatprep.mubr.bf16.mxu1 %v19890_v30  ;;  %v17217_v4 = vld [vmem:[%s20436_s5 + $0x3d4] ss:$8 sps:$4 sm:$0xff]   ;;  %v20074_v30 = vld [vmem:[#allocation6 + $0x8] sm:$0x1f] }
 0x963   : > { %13266 = vmatprep.subr.bf16.mxu1 %v17133_v59  ;;  %v17220_v59 = vld [vmem:[%s20436_s5 + $0x3e4] ss:$8 sps:$4 sm:$0xff]  }
 0x966   : > { %13267 = vmatpush1.bf16.msra.mxu1 %v17131_v11  ;;  %v17218_v11 = vld [vmem:[%s20436_s5 + $0x3e0] ss:$8 sps:$4 sm:$0xff]  }
 0x967   : > { %13268 = vmatprep.subr.bf16.mxu1 %v17136_v55  ;;  %v17223_v55 = vld [vmem:[%s20436_s5 + $0x3f4] ss:$8 sps:$4 sm:$0xff]  }
 0x96a   : > { %13269 = vmatpush1.bf16.msra.mxu1 %v17134_v53  ;;  %v20084_v53 = vrot.slane %v20074_v30, %v19563_v45 }
 0x96b   : > { %13270 = vmatprep.subr.bf16.mxu1 %v17139_v10  ;;  %v17221_v10 = vld [vmem:[%s20436_s5 + $0x3f0] ss:$8 sps:$4 sm:$0xff]  }
 0x96e   : > { %13271 = vmatpush1.bf16.msra.mxu1 %v17137_v48  ;;  %v17226_v48 = vld [vmem:[%s20436_s5 + $0x404] ss:$8 sps:$4 sm:$0xff]  }
 0x96f   : > { %13272 = vmatprep.subr.bf16.mxu1 %v17142_v21  ;;  %v12132_v21 = vcombine.high %v20084_v53, %v20084_v53 }
 0x972   : > { %13273 = vmatpush1.bf16.msra.mxu1 %v17140_v57  ;;  %v17224_v57 = vld [vmem:[%s20436_s5 + $0x400] ss:$8 sps:$4 sm:$0xff]  }
 0x973   : > { %13274 = vmatprep.subr.bf16.mxu1 %v17145_v8  ;;  %v12114_v8 = vcombine.high %v19988_v34, %v19988_v34 }
 0x976   : > { %13275 = vmatpush1.bf16.msra.mxu1 %v17143_v43  ;;  %v17230_v43 = vld [vmem:[%s20436_s5 + $0x414] ss:$8 sps:$4 sm:$0xff]  }
 0x977   : > { %13276 = vmatprep.subr.bf16.mxu1 %v17148_v26  ;;  %v20103_v26 = vrot.slane %v12132_v21, %v19563_v45  ;;  %v17309_v21 = vld [vmem:[%s20436_s5 + $0x5c0] ss:$8 sps:$4 sm:$0xff]  }
 0x97a   : > { %13277 = vmatpush1.bf16.msra.mxu1 %v17146_v31  ;;  %v17228_v31 = vld [vmem:[%s20436_s5 + $0x410] ss:$8 sps:$4 sm:$0xff]  }
 0x97b   : > { %13278 = vmatprep.subr.bf16.mxu1 %v17151_v44  ;;  %v17233_v44 = vld [vmem:[%s20436_s5 + $0x424] ss:$8 sps:$4 sm:$0xff]  }
 0x97e   : > { %13279 = vmatpush1.bf16.msra.mxu1 %v17149_v23  ;;  %v17231_v23 = vld [vmem:[%s20436_s5 + $0x420] ss:$8 sps:$4 sm:$0xff]  }
 0x97f   : > { %13280 = vmatprep.subr.bf16.mxu1 %v17154_v61  ;;  %v17236_v61 = vld [vmem:[%s20436_s5 + $0x434] ss:$8 sps:$4 sm:$0xff]  }
 0x982   : > { %13281 = vmatpush1.bf16.msra.mxu1 %v17152_v63  ;;  %v17234_v63 = vld [vmem:[%s20436_s5 + $0x430] ss:$8 sps:$4 sm:$0xff]  }
 0x983   : > { %13282 = vmatprep.subr.bf16.mxu1 %v17157_v40  ;;  %v17239_v40 = vld [vmem:[%s20436_s5 + $0x444] ss:$8 sps:$4 sm:$0xff]  }
 0x986   : > { %13283 = vmatpush1.bf16.msra.mxu1 %v17155_v47  ;;  %v17237_v47 = vld [vmem:[%s20436_s5 + $0x440] ss:$8 sps:$4 sm:$0xff]  }
 0x987   : > { %13284 = vmatprep.subr.bf16.mxu1 %v17160_v6  ;;  %v17242_v6 = vld [vmem:[%s20436_s5 + $0x454] ss:$8 sps:$4 sm:$0xff]  }
 0x98a   : > { %13285 = vmatpush1.bf16.msra.mxu1 %v17158_v58  ;;  %v17240_v58 = vld [vmem:[%s20436_s5 + $0x450] ss:$8 sps:$4 sm:$0xff]  }
 0x98b   : > { %13286 = vmatprep.subr.bf16.mxu1 %v17163_v62  ;;  %v17245_v62 = vld [vmem:[%s20436_s5 + $0x464] ss:$8 sps:$4 sm:$0xff]  }
 0x98e   : > { %13287 = vmatpush1.bf16.msra.mxu1 %v17161_v12  ;;  %v17243_v12 = vld [vmem:[%s20436_s5 + $0x460] ss:$8 sps:$4 sm:$0xff]  }
 0x98f   : > { %13288 = vmatprep.subr.bf16.mxu1 %v17166_v37  ;;  %v17248_v37 = vld [vmem:[%s20436_s5 + $0x474] ss:$8 sps:$4 sm:$0xff]  }
 0x992   : > { %13289 = vmatpush1.bf16.msra.mxu1 %v17164_v1  ;;  %v17246_v1 = vld [vmem:[%s20436_s5 + $0x470] ss:$8 sps:$4 sm:$0xff]  }
 0x993   : > { %13290 = vmatprep.subr.bf16.mxu1 %v17169_v0  ;;  %v17251_v0 = vld [vmem:[%s20436_s5 + $0x484] ss:$8 sps:$4 sm:$0xff]  }
 0x996   : > { %13291 = vmatpush1.bf16.msra.mxu1 %v17167_v14  ;;  %v17249_v14 = vld [vmem:[%s20436_s5 + $0x480] ss:$8 sps:$4 sm:$0xff]  }
 0x997   : > { %13292 = vmatprep.subr.bf16.mxu1 %v17172_v56  ;;  %v17254_v56 = vld [vmem:[%s20436_s5 + $0x494] ss:$8 sps:$4 sm:$0xff]  }
 0x99a   : > { %13293 = vmatpush1.bf16.msra.mxu1 %v17170_v28  ;;  %v17252_v28 = vld [vmem:[%s20436_s5 + $0x490] ss:$8 sps:$4 sm:$0xff]  }
 0x99b   : > { %13294 = vmatprep.subr.bf16.mxu1 %v17175_v13  ;;  %v17257_v13 = vld [vmem:[%s20436_s5 + $0x4a4] ss:$8 sps:$4 sm:$0xff]  }
 0x99e   : > { %13295 = vmatpush1.bf16.msra.mxu1 %v17173_v29  ;;  %v17255_v29 = vld [vmem:[%s20436_s5 + $0x4a0] ss:$8 sps:$4 sm:$0xff]  }
 0x99f   : > { %v10077_v46 = vpop.permute.xlu1 %10076  ;;  %13305 = vmatprep.subr.bf16.mxu1 %v17178_v3  ;;  %v17260_v3 = vld [vmem:[%s20436_s5 + $0x4b4] ss:$8 sps:$4 sm:$0xff]  }
 0x9a0   : > { %v17261_v46 = vld [vmem:[%s20436_s5 + $0x4c0] ss:$8 sps:$4 sm:$0xff]  }
 0x9a1   : > { %13297 = vmatmul.mubr.bf16.vlgmr.msra.gmra.mrb[24].mxu1 %v19988_v34  ;;  %v17263_v34 = vld [vmem:[%s20436_s5 + $0x4c4] ss:$8 sps:$4 sm:$0xff]  }
 0x9a2   : > { %13306 = vmatpush1.bf16.msra.mxu1 %v17176_v9  ;;  %13337 = vmatprep.mubr.bf16.mxu1 %v12116_v24  ;;  %v17258_v9 = vld [vmem:[%s20436_s5 + $0x4b0] ss:$8 sps:$4 sm:$0xff]  }
 0x9a3   : > { %13307 = vmatprep.subr.bf16.mxu1 %v17181_v52  ;;  %v17266_v52 = vld [vmem:[%s20436_s5 + $0x4d4] ss:$8 sps:$4 sm:$0xff]   ;;  %v17264_v24 = vld [vmem:[%s20436_s5 + $0x4d0] ss:$8 sps:$4 sm:$0xff]  }
 0x9a6   : > { %13308 = vmatpush1.bf16.msra.mxu1 %v17179_v38  ;;  %v17269_v38 = vld [vmem:[%s20436_s5 + $0x4e4] ss:$8 sps:$4 sm:$0xff]  }
 0x9a7   : > { %13309 = vmatprep.subr.bf16.mxu1 %v17184_v5  ;;  %v17267_v5 = vld [vmem:[%s20436_s5 + $0x4e0] ss:$8 sps:$4 sm:$0xff]  }
 0x9aa   : > { %13310 = vmatpush1.bf16.msra.mxu1 %v17182_v19  ;;  %v17272_v19 = vld [vmem:[%s20436_s5 + $0x4f4] ss:$8 sps:$4 sm:$0xff]  }
 0x9ab   : > { %13311 = vmatprep.subr.bf16.mxu1 %v17187_v32  ;;  %v17270_v32 = vld [vmem:[%s20436_s5 + $0x4f0] ss:$8 sps:$4 sm:$0xff]  }
 0x9ae   : > { %13312 = vmatpush1.bf16.msra.mxu1 %v17185_v54  ;;  %v17275_v54 = vld [vmem:[%s20436_s5 + $0x504] ss:$8 sps:$4 sm:$0xff]  }
 0x9af   : > { %13313 = vmatprep.subr.bf16.mxu1 %v17190_v22  ;;  %v17273_v22 = vld [vmem:[%s20436_s5 + $0x500] ss:$8 sps:$4 sm:$0xff]  }
 0x9b2   : > { %13314 = vmatpush1.bf16.msra.mxu1 %v17188_v60  ;;  %v20201_v60 = vrot.slane %v20084_v53, %v19563_v45  ;;  %v17308_v53 = vld [vmem:[%s20436_s5 + $0x5b4] ss:$8 sps:$4 sm:$0xff]  }
 0x9b3   : > { %13315 = vmatprep.subr.bf16.mxu1 %v17193_v35  ;;  %v17278_v35 = vld [vmem:[%s20436_s5 + $0x514] ss:$8 sps:$4 sm:$0xff]  }
 0x9b6   : > { %13316 = vmatpush1.bf16.msra.mxu1 %v17191_v16  ;;  %v12155_v16 = vcombine.high %v20103_v26, %v20103_v26 }
 0x9b7   : > { %13317 = vmatprep.subr.bf16.mxu1 %v17196_v17  ;;  %v17276_v17 = vld [vmem:[%s20436_s5 + $0x510] ss:$8 sps:$4 sm:$0xff]  }
 0x9ba   : > { %13318 = vmatpush1.bf16.msra.mxu1 %v17194_v27  ;;  %v17281_v27 = vld [vmem:[%s20436_s5 + $0x524] ss:$8 sps:$4 sm:$0xff]  }
 0x9bb   : > { %13319 = vmatprep.subr.bf16.mxu1 %v17199_v33  ;;  %v17279_v33 = vld [vmem:[%s20436_s5 + $0x520] ss:$8 sps:$4 sm:$0xff]  }
 0x9be   : > { %13320 = vmatpush1.bf16.msra.mxu1 %v17197_v42  ;;  %v17284_v42 = vld [vmem:[%s20436_s5 + $0x534] ss:$8 sps:$4 sm:$0xff]  }
 0x9bf   : > { %13321 = vmatprep.subr.bf16.mxu1 %v17202_v15  ;;  %v17282_v15 = vld [vmem:[%s20436_s5 + $0x530] ss:$8 sps:$4 sm:$0xff]  }
 0x9c2   : > { %13322 = vmatpush1.bf16.msra.mxu1 %v17200_v39  ;;  %v17287_v39 = vld [vmem:[%s20436_s5 + $0x544] ss:$8 sps:$4 sm:$0xff]  }
 0x9c3   : > { %13323 = vmatprep.subr.bf16.mxu1 %v17205_v20  ;;  %v17285_v20 = vld [vmem:[%s20436_s5 + $0x540] ss:$8 sps:$4 sm:$0xff]  }
 0x9c6   : > { %13324 = vmatpush1.bf16.msra.mxu1 %v17203_v41  ;;  %v17290_v41 = vld [vmem:[%s20436_s5 + $0x554] ss:$8 sps:$4 sm:$0xff]  }
 0x9c7   : > { %13325 = vmatprep.subr.bf16.mxu1 %v17208_v18  ;;  %v17288_v18 = vld [vmem:[%s20436_s5 + $0x550] ss:$8 sps:$4 sm:$0xff]  }
 0x9ca   : > { %13326 = vmatpush1.bf16.msra.mxu1 %v17206_v25  ;;  %v17293_v25 = vld [vmem:[%s20436_s5 + $0x564] ss:$8 sps:$4 sm:$0xff]  }
 0x9cb   : > { %13327 = vmatprep.subr.bf16.mxu1 %v17211_v49  ;;  %v17291_v49 = vld [vmem:[%s20436_s5 + $0x560] ss:$8 sps:$4 sm:$0xff]  }
 0x9ce   : > { %13328 = vmatpush1.bf16.msra.mxu1 %v17209_v50  ;;  %v17296_v50 = vld [vmem:[%s20436_s5 + $0x574] ss:$8 sps:$4 sm:$0xff]  }
 0x9cf   : > { %13329 = vmatprep.subr.bf16.mxu1 %v17214_v2  ;;  %v17294_v2 = vld [vmem:[%s20436_s5 + $0x570] ss:$8 sps:$4 sm:$0xff]  }
 0x9d2   : > { %13330 = vmatpush1.bf16.msra.mxu1 %v17212_v51  ;;  %v17299_v51 = vld [vmem:[%s20436_s5 + $0x584] ss:$8 sps:$4 sm:$0xff]  }
 0x9d3   : > { %13331 = vmatprep.subr.bf16.mxu1 %v17217_v4  ;;  %v17297_v4 = vld [vmem:[%s20436_s5 + $0x580] ss:$8 sps:$4 sm:$0xff]  }
 0x9d6   : > { %13332 = vmatpush1.bf16.msra.mxu1 %v17215_v7  ;;  %v17302_v7 = vld [vmem:[%s20436_s5 + $0x594] ss:$8 sps:$4 sm:$0xff]  }
 0x9d7   : > { %13333 = vmatprep.subr.bf16.mxu1 %v17220_v59  ;;  %v17300_v59 = vld [vmem:[%s20436_s5 + $0x590] ss:$8 sps:$4 sm:$0xff]  }
 0x9da   : > { %13334 = vmatpush1.bf16.msra.mxu1 %v17218_v11  ;;  %v17305_v11 = vld [vmem:[%s20436_s5 + $0x5a4] ss:$8 sps:$4 sm:$0xff]  }
 0x9db   : > { %13335 = vmatprep.subr.bf16.mxu1 %v17223_v55  ;;  %v17303_v55 = vld [vmem:[%s20436_s5 + $0x5a0] ss:$8 sps:$4 sm:$0xff]  }
 0x9de   : > { %13336 = vmatpush1.bf16.msra.mxu1 %v17221_v10  ;;  %v17306_v10 = vld [vmem:[%s20436_s5 + $0x5b0] ss:$8 sps:$4 sm:$0xff]  }
 0x9df   : > { %13346 = vmatprep.subr.bf16.mxu1 %v17226_v48  ;;  %v17311_v48 = vld [vmem:[%s20436_s5 + $0x5c4] ss:$8 sps:$4 sm:$0xff]  }
 0x9e1   : > { %13338 = vmatmul.mubr.bf16.vlgmr.msra.gmra.mrb[24].mxu1 %v12114_v8  ;;  %v17312_v8 = vld [vmem:[%s20436_s5 + $0x5d0] ss:$8 sps:$4 sm:$0xff]  }
 0x9e2   : > { %13347 = vmatpush1.bf16.msra.mxu1 %v17224_v57  ;;  %13378 = vmatprep.mubr.bf16.mxu1 %v20103_v26  ;;  %v17314_v57 = vld [vmem:[%s20436_s5 + $0x5d4] ss:$8 sps:$4 sm:$0xff]   ;;  %v17315_v26 = vld [vmem:[%s20436_s5 + $0x5e0] ss:$8 sps:$4 sm:$0xff]  }
 0x9e3   : > { %13348 = vmatprep.subr.bf16.mxu1 %v17230_v43  ;;  %v17317_v43 = vld [vmem:[%s20436_s5 + $0x5e4] ss:$8 sps:$4 sm:$0xff]  }
 0x9e6   : > { %13349 = vmatpush1.bf16.msra.mxu1 %v17228_v31  ;;  %v17320_v31 = vld [vmem:[%s20436_s5 + $0x5f4] ss:$8 sps:$4 sm:$0xff]  }
 0x9e7   : > { %13350 = vmatprep.subr.bf16.mxu1 %v17233_v44  ;;  %v17318_v44 = vld [vmem:[%s20436_s5 + $0x5f0] ss:$8 sps:$4 sm:$0xff]  }
 0x9ea   : > { %13351 = vmatpush1.bf16.msra.mxu1 %v17231_v23  ;;  %v17323_v23 = vld [vmem:[%s20436_s5 + $0x604] ss:$8 sps:$4 sm:$0xff]  }
 0x9eb   : > { %13352 = vmatprep.subr.bf16.mxu1 %v17236_v61  ;;  %v17321_v61 = vld [vmem:[%s20436_s5 + $0x600] ss:$8 sps:$4 sm:$0xff]  }
 0x9ee   : > { %13353 = vmatpush1.bf16.msra.mxu1 %v17234_v63  ;;  %v12154_v63 = vcombine.high %v20201_v60, %v20201_v60 }
 0x9ef   : > { %13354 = vmatprep.subr.bf16.mxu1 %v17239_v40  ;;  %v17326_v40 = vld [vmem:[%s20436_s5 + $0x614] ss:$8 sps:$4 sm:$0xff]  }
 0x9f2   : > { %13355 = vmatpush1.bf16.msra.mxu1 %v17237_v47  ;;  %v17324_v47 = vld [vmem:[%s20436_s5 + $0x610] ss:$8 sps:$4 sm:$0xff]  }
 0x9f3   : > { %13356 = vmatprep.subr.bf16.mxu1 %v17242_v6  ;;  %v20564_v6 = vmov 0  }
 0x9f6   : > { %13357 = vmatpush1.bf16.msra.mxu1 %v17240_v58  ;;  %v17329_v58 = vld [vmem:[%s20436_s5 + $0x624] ss:$8 sps:$4 sm:$0xff]  }
 0x9f7   : > { %13358 = vmatprep.subr.bf16.mxu1 %v17245_v62  ;;  %v17327_v62 = vld [vmem:[%s20436_s5 + $0x620] ss:$8 sps:$4 sm:$0xff]  }
 0x9fa   : > { %13359 = vmatpush1.bf16.msra.mxu1 %v17243_v12  ;;  %v12117_v12 = vcombine.high %v20074_v30, %v20074_v30  ;;  %v17334_v30 = vld [vmem:[%s20438_s7] sm:$0xff]  }
 0x9fb   : > { %13360 = vmatprep.subr.bf16.mxu1 %v17248_v37  ;;  %v17332_v37 = vld [vmem:[%s20436_s5 + $0x634] ss:$8 sps:$4 sm:$0xff]  }
 0x9fe   : > { %13361 = vmatpush1.bf16.msra.mxu1 %v17246_v1  ;;  %v17330_v1 = vld [vmem:[%s20436_s5 + $0x630] ss:$8 sps:$4 sm:$0xff]  }
 0x9ff   : > { %13362 = vmatprep.subr.bf16.mxu1 %v17251_v0  ;;  %v12131_v0 = vrot.slane %v12117_v12, %v19563_v45 }
 0xa02   : > { %13363 = vmatpush1.bf16.msra.mxu1 %v17249_v14  ;;  %v17333_v14 = vld [vmem:[%s20438_s7 + $0x40] sm:$0xff]  }
 0xa03   : > { %13364 = vmatprep.subr.bf16.mxu1 %v17254_v56  ;;  %v12146_v56 = vrot.slane %v12131_v0, %v19563_v45  ;;  %v17338_v45 = vld [vmem:[%s20438_s7 + $0x10] sm:$0xff]  }
 0xa06   : > { %13365 = vmatpush1.bf16.msra.mxu1 %v17252_v28  ;;  %v17335_v28 = vld [vmem:[%s20438_s7 + $0x48] sm:$0xff]  }
 0xa07   : > { %13366 = vmatprep.subr.bf16.mxu1 %v17257_v13  ;;  %v17336_v13 = vld [vmem:[%s20438_s7 + $0x8] sm:$0xff]  }
 0xa0a   : > { %13367 = vmatpush1.bf16.msra.mxu1 %v17255_v29  ;;  %v17337_v29 = vld [vmem:[%s20438_s7 + $0x50] sm:$0xff]  }
 0xa0b   : > { %13368 = vmatprep.subr.bf16.mxu1 %v17260_v3  ;;  %v17339_v3 = vld [vmem:[%s20438_s7 + $0x58] sm:$0xff]  }
 0xa0e   : > { %13369 = vmatpush1.bf16.msra.mxu1 %v17258_v9  ;;  %v17340_v9 = vld [vmem:[%s20438_s7 + $0x18] sm:$0xff]  }
 0xa0f   : > { %13370 = vmatprep.subr.bf16.mxu1 %v17263_v34  ;;  %v17341_v34 = vld [vmem:[%s20438_s7 + $0x60] sm:$0xff]  }
 0xa12   : > { %13371 = vmatpush1.bf16.msra.mxu1 %v17261_v46  ;;  %v17342_v46 = vld [vmem:[%s20438_s7 + $0x20] sm:$0xff]  }
 0xa13   : > { %13372 = vmatprep.subr.bf16.mxu1 %v17266_v52  ;;  %v17343_v52 = vld [vmem:[%s20438_s7 + $0x68] sm:$0xff]  }
 0xa16   : > { %13373 = vmatpush1.bf16.msra.mxu1 %v17264_v24  ;;  %v17344_v24 = vld [vmem:[%s20438_s7 + $0x28] sm:$0xff]  }
 0xa17   : > { %13374 = vmatprep.subr.bf16.mxu1 %v17269_v38  ;;  %v17345_v38 = vld [vmem:[%s20438_s7 + $0x70] sm:$0xff]  }
 0xa1a   : > { %13375 = vmatpush1.bf16.msra.mxu1 %v17267_v5  ;;  %v17346_v5 = vld [vmem:[%s20438_s7 + $0x30] sm:$0xff]  }
 0xa1b   : > { %13376 = vmatprep.subr.bf16.mxu1 %v17272_v19  ;;  %v17347_v19 = vld [vmem:[%s20438_s7 + $0x78] sm:$0xff]  }
 0xa1e   : > { %13377 = vmatpush1.bf16.msra.mxu1 %v17270_v32  ;;  %v17348_v32 = vld [vmem:[%s20438_s7 + $0x38] sm:$0xff]  }
 0xa1f   : > { %13387 = vmatprep.subr.bf16.mxu1 %v17275_v54  ;;  %v13171_v54 = vsub.s32 0, %v19555_v36 }
 0xa21   : > { %13379 = vmatmul.mubr.bf16.vlgmr.msra.gmra.mrb[24].mxu1 %v20201_v60  ;;  %v13175_v60 = vsub.s32 1, %v19555_v36  ;;  %v13505_v36 = vld [vmem:[%s20439_s8] sm:$0x1] }
 0xa22   : > { %13388 = vmatpush1.bf16.msra.mxu1 %v17273_v22  ;;  %13419 = vmatprep.mubr.bf16.mxu1 %v12155_v16  ;;  %v12065_v22 = vld [vmem:[%s20437_s6] sm:$0x3] }
 0xa23   : > { %13389 = vmatprep.subr.bf16.mxu1 %v17278_v35  ;;  %v13172_v35 = vrot.slane %v12065_v22, %v13171_v54  ;;  %v13176_v16 = vrot.slane %v12065_v22, %v13175_v60 }
 0xa26   : > { %13390 = vmatpush1.bf16.msra.mxu1 %v17276_v17 }
 0xa27   : > { %13391 = vmatprep.subr.bf16.mxu1 %v17281_v27 }
 0xa2a   : > { %13392 = vmatpush1.bf16.msra.mxu1 %v17279_v33 }
 0xa2b   : > { %13393 = vmatprep.subr.bf16.mxu1 %v17284_v42 }
 0xa2e   : > { %13394 = vmatpush1.bf16.msra.mxu1 %v17282_v15 }
 0xa2f   : > { %13395 = vmatprep.subr.bf16.mxu1 %v17287_v39 }
 0xa32   : > { %13396 = vmatpush1.bf16.msra.mxu1 %v17285_v20 }
 0xa33   : > { %13397 = vmatprep.subr.bf16.mxu1 %v17290_v41 }
 0xa36   : > { %13398 = vmatpush1.bf16.msra.mxu1 %v17288_v18 }
 0xa37   : > { %13399 = vmatprep.subr.bf16.mxu1 %v17293_v25 }
 0xa3a   : > { %13400 = vmatpush1.bf16.msra.mxu1 %v17291_v49 }
 0xa3b   : > { %13401 = vmatprep.subr.bf16.mxu1 %v17296_v50 }
 0xa3e   : > { %13402 = vmatpush1.bf16.msra.mxu1 %v17294_v2 }
 0xa3f   : > { %13403 = vmatprep.subr.bf16.mxu1 %v17299_v51 }
 0xa42   : > { %13404 = vmatpush1.bf16.msra.mxu1 %v17297_v4 }
 0xa43   : > { %13405 = vmatprep.subr.bf16.mxu1 %v17302_v7 }
 0xa46   : > { %13406 = vmatpush1.bf16.msra.mxu1 %v17300_v59 }
 0xa47   : > { %13407 = vmatprep.subr.bf16.mxu1 %v17305_v11 }
 0xa4a   : > { %13408 = vmatpush1.bf16.msra.mxu1 %v17303_v55 }
 0xa4b   : > { %13409 = vmatprep.subr.bf16.mxu1 %v17308_v53 }
 0xa4e   : > { %13410 = vmatpush1.bf16.msra.mxu1 %v17306_v10 }
 0xa4f   : > { %13411 = vmatprep.subr.bf16.mxu1 %v17311_v48 }
 0xa52   : > { %13412 = vmatpush1.bf16.msra.mxu1 %v17309_v21 }
 0xa53   : > { %13413 = vmatprep.subr.bf16.mxu1 %v17314_v57 }
 0xa56   : > { %13414 = vmatpush1.bf16.msra.mxu1 %v17312_v8 }
 0xa57   : > { %13415 = vmatprep.subr.bf16.mxu1 %v17317_v43 }
 0xa5a   : > { %13416 = vmatpush1.bf16.msra.mxu1 %v17315_v26 }
 0xa5b   : > { %13417 = vmatprep.subr.bf16.mxu1 %v17320_v31 }
 0xa5e   : > { %13418 = vmatpush1.bf16.msra.mxu1 %v17318_v44 }
 0xa5f   : > { %13428 = vmatprep.subr.bf16.mxu1 %v17323_v23 }
 0xa61   : > { %13420 = vmatmul.mubr.bf16.vlgmr.msra.gmra.mrb[24].mxu1 %v12154_v63 }
 0xa62   : > { %13429 = vmatpush1.bf16.msra.mxu1 %v17321_v61  ;;  %13460 = vmatprep.mubr.bf16.mxu1 %v20564_v6 }
 0xa63   : > { %13430 = vmatprep.subr.bf16.mxu1 %v17326_v40 }
 0xa66   : > { %13431 = vmatpush1.bf16.msra.mxu1 %v17324_v47 }
 0xa67   : > { %13432 = vmatprep.subr.bf16.mxu1 %v17329_v58 }
 0xa6a   : > { %13433 = vmatpush1.bf16.msra.mxu1 %v17327_v62 }
 0xa6b   : > { %13434 = vmatprep.subr.bf16.mxu1 %v17332_v37 }
 0xa6e   : > { %13435 = vmatpush1.bf16.msra.mxu1 %v17330_v1 }
 0xa6f   : > { %15391 = vmatprep.subr.bf16.mxu1 %v17333_v14 }
 0xa71   : > { %15276 = vmatmul.mubr.msk.bf16.vlgmr.msra.gmra.mrb[24].mxu1 %vm11473_vm12, %v12146_v56 }
 0xa72   : > { %15392 = vmatpush3.bf16.msra.mxu1 %v17334_v30 }
 0xa73   : > { %15393 = vmatprep.subr.bf16.mxu1 %v17335_v28 }
 0xa76   : > { %15394 = vmatpush3.bf16.msra.mxu1 %v17336_v13 }
 0xa77   : > { %15395 = vmatprep.subr.bf16.mxu1 %v17337_v29 }
 0xa7a   : > { %15396 = vmatpush3.bf16.msra.mxu1 %v17338_v45 }
 0xa7b   : > { %15397 = vmatprep.subr.bf16.mxu1 %v17339_v3 }
 0xa7e   : > { %15398 = vmatpush3.bf16.msra.mxu1 %v17340_v9 }
 0xa7f   : > { %15399 = vmatprep.subr.bf16.mxu1 %v17341_v34 }
 0xa82   : > { %15400 = vmatpush3.bf16.msra.mxu1 %v17342_v46 }
 0xa83   : > { %15401 = vmatprep.subr.bf16.mxu1 %v17343_v52 }
 0xa86   : > { %15402 = vmatpush3.bf16.msra.mxu1 %v17344_v24 }
 0xa87   : > { %15403 = vmatprep.subr.bf16.mxu1 %v17345_v38 }
 0xa8a   : > { %15404 = vmatpush3.bf16.msra.mxu1 %v17346_v5 }
 0xa8b   : > { %15405 = vmatprep.subr.bf16.mxu1 %v17347_v19 }
 0xa8e   : > { %15406 = vmatpush3.bf16.msra.mxu1 %v17348_v32 }
 0xb44   : > { %v13462_v17 = vpop.f32.mrb[24].mxu1 }
 0xb45   : > { %v15685_v27 = vadd.f32 %v13462_v17, %v13172_v35  ;;  %v13464_v33 = vpop.f32.mrb[25].mxu1 }
 0xb46   : > { %v15686_v42 = vadd.f32 %v13464_v33, %v13176_v16  ;;  %v13466_v15 = vpop.f32.mrb[26].mxu1 }
 0xb47   : > { %v13469_v39 = vmax.f32 %v15685_v27, 0.0  ;;  %v13467_v20 = vpop.f32.mrb[27].mxu1 }
 0xb48   : > { %v13470_v41 = vmax.f32 %v15686_v42, 0.0 }
 0xb49   : > { %v13471_v25 = vpack.c.bf16 %v13469_v39, %v13469_v39 }
 0xb4a   : > { %v13472_v18 = vpack.c.bf16 %v13470_v41, %v13470_v41 }
 0xb4c   : > { %13634 = vmatprep.mubr.bf16.mxu1 %v13472_v18 }
 0xb4d   : > { %13635 = vmatmul.mubr.bf16.vlgmr.msra.gmra.mrb[28].mxu1 %v13471_v25 }
 0xc20   : > { %v15407_v49 = vpop.f32.mrb[28].mxu1 }
 0xc21   : > { %v15408_v50 = vpop.f32.mrb[29].mxu1 }
 0xc22   : > { %v15409_v2 = vadd.f32 %v15408_v50, %v15407_v49  ;;  %v15410_v51 = vpop.f32.mrb[30].mxu1 }
 0xc23   : > { %v15411_v4 = vpop.f32.mrb[31].mxu1 }
 0xc24   : > { %v13637_v7 = vadd.f32 %v15409_v2, %v13505_v36 }
 0xc26   : > { %13643 = vst.msk [vmem:[%s324_s17] sm:$0x1] %vm13642_vm2, %v13637_v7 }
 0xc27   : > { %17379 = shalt.err (!%p17376_p3)
}
 0xc28   : > { %s17380_s27 = scalar_lea.hbm %s20389_s21, 16  ;;  %s17384_s17 = scalar_lea.hbm %s20440_s9, 32 }
 0xc29   : > { %p17381_p4 = scmp.ne.s32.totalorder %s20389_s21, %s17380_s27  ;;  %p17385_p9 = scmp.lt.u32.totalorder %s20389_s21, %s20440_s9 }
 0xc2a   : > { %p17386_p10 = scmp.lt.u32.totalorder %s17384_s17, %s17380_s27  ;;  %p17388_p12 = scmp.lt.u32.totalorder %s17380_s27, %s20389_s21 }
 0xc2b   : > { %p17382_p7 = pnand %p17381_p4, %p17526_p5 }
 0xc2c   : > { %p17387_p11 = por %p17386_p10, %p17385_p9 }
 0xc2d   : > { %p17383_p8 = pneg %p17382_p7 }
 0xc2e   : > { %p17389_p13 = por %p17388_p12, %p17387_p11 }
 0xc30   : > { %p17390_p0 = pnand %p17389_p13, %p17383_p8 }
 0xc32   : > { %17393 = shalt.err (!%p17390_p0)
}
 0xc33   : > { %16288 = dma.vmem_to_hbm [thread:$0]  (%p17526_p5), %s20391_s14, 16, %s20389_s21, %s13645_s23  }
 0xc34 PF: > { %p16294_p1 = scmp.ge.s32.totalorder %s17428_s12, 2  ;;  %s13669_s13 = sand.u32 1, %s17416_s30  }
 0xc35   : > { %s13670_s25 = scalar_lea.sflag [#allocation8], %s13669_s13 }
 0xc36   : > { %p16291_p2 = pnand %p16294_p1, %p17530_p6 }
 0xc38   : > { %17411 = dma.done.wait (!%p16291_p2), %s13670_s25, 16  }
 0xc39   : > { %17413 = vsyncadd (!%p16291_p2), %s13670_s25, 4294967280  ;;  %p19_p3 = scmp.ge.s32.totalorder %s17513_s15, 4   ;;  %s20565_s30 = smov %s17420_s10 }
 0xc3a   : > { %s20566_s10 = smov %s17424_s11  ;;  %s20567_s11 = smov %s17524_s18 }
 0xc3b   : > { %s20568_s12 = smov %s17513_s15  ;;  %21 = sbr.rel (!%p19_p3) target bundleno = 3 (0x3), region = 106 }
 0xc42   :  { %13674 = vsyncpa [#allocation8], 1 }
 0xc43   :  { %13676 = vsyncpa [#allocation8 + $0x1], 1 }

</bundles_post_ra>
